<compile_context>
chip_gen: v7x
topology: tpu7x:2x2x1
jax: 0.10.0
libtpu: 0.0.40
codegen_flags: <defaults>
</compile_context>

<pallas_src>
import numpy as np
import jax
import jax.numpy as jnp
from jax.experimental import pallas as pl
from jax.experimental.pallas import tpu as pltpu


# ----------------------------------------------------------------------------
# Fused ConvBlock forward
# ----------------------------------------------------------------------------
def conv_block_forward(params, x, *, drop_prob=0.0, eps=1e-5):
    """x: (N, Cin, H, W) f32 -> (intout, output), each (N, Cout, H, W) f32."""
    del drop_prob  # Dropout2d == identity at inference (see TODO above).

    N, Cin, H, W = x.shape
    Cout = params["w1"].shape[-1]
    Hp, Wp = H + 2, W + 2          # zero-padded spatial grid
    R = Hp * Wp                    # rows of the flattened padded grid
    EXT = Wp + 1                   # extra zero rows so every tap is a contiguous slice
    Rext = R + 2 * EXT

    # ---- layout plumbing in XLA (cheap, no data blow-up) -------------------
    x_nhwc = jnp.transpose(x, (0, 2, 3, 1))                       # (N,H,W,Cin)
    xp = jnp.pad(x_nhwc, ((0, 0), (1, 1), (1, 1), (0, 0)))        # (N,Hp,Wp,Cin)
    xe = jnp.pad(xp.reshape(N, R, Cin), ((0, 0), (EXT, EXT), (0, 0)))  # (N,Rext,Cin)

    # Validity mask of the padded grid (1 on the HxW interior, 0 on the ring).
    aa, bb = np.divmod(np.arange(R), Wp)
    valid = (aa >= 1) & (aa <= H) & (bb >= 1) & (bb <= W)
    mask = jnp.asarray(valid.astype(np.float32).reshape(R, 1))

    w1 = params["w1"].reshape(9, Cin, Cout)     # tap-major (kh*3 + kw)
    w2 = params["w2"].reshape(9, Cout, Cout)
    b1 = params["b1"].reshape(1, Cout)
    b2 = params["b2"].reshape(1, Cout)

    inv_hw = 1.0 / float(H * W)

    def kernel(xe_ref, m_ref, w1_ref, b1_ref, w2_ref, b2_ref,
               int_ref, out_ref, mid_ref):
        m = m_ref[...]                                            # (R, 1)

        def conv_in_relu(read_win, w_ref, b_ref):
            cout = w_ref.shape[-1]
            # 3x3 conv = 9 shift-accumulated dots (f32 accumulate on the MXU).
            acc = jnp.zeros((R, cout), jnp.float32)
            for kh in range(3):
                for kw in range(3):
                    acc = acc + jnp.dot(read_win(kh * Wp + kw),
                                        w_ref[kh * 3 + kw],
                                        preferred_element_type=jnp.float32)
            acc = acc + b_ref[...]
            # InstanceNorm2d (affine=False, biased variance) over the valid HxW.
            mu = jnp.sum(acc * m, axis=0, keepdims=True) * inv_hw
            ex2 = jnp.sum(acc * acc * m, axis=0, keepdims=True) * inv_hw
            y = (acc - mu) * jax.lax.rsqrt(ex2 - mu * mu + eps)
            # ReLU; Dropout2d identity.  Mask zeroes the padding ring so this
            # tensor doubles as the zero-padded input of the next conv.
            return jnp.maximum(y, 0.0) * m

        # ---- stage 1: conv1 + IN + ReLU -----------------------------------
        y1 = conv_in_relu(lambda d: xe_ref[0, d:d + R, :], w1_ref, b1_ref)
        int_ref[0] = y1.astype(int_ref.dtype)

        # Keep the intermediate on-chip: place it into the zero-extended VMEM
        # scratch that stage 2 reads (no HBM round trip for the conv2 input).
        mid_ref[...] = jnp.zeros_like(mid_ref)
        mid_ref[EXT:EXT + R, :] = y1

        # ---- stage 2: conv2 + IN + ReLU -----------------------------------
        y2 = conv_in_relu(lambda d: mid_ref[d:d + R, :], w2_ref, b2_ref)
        out_ref[0] = y2.astype(out_ref.dtype)

    intout_flat, output_flat = pl.pallas_call(
        kernel,
        out_shape=(jax.ShapeDtypeStruct((N, R, Cout), jnp.float32),
                   jax.ShapeDtypeStruct((N, R, Cout), jnp.float32)),
        grid=(N,),
        in_specs=[
            pl.BlockSpec((1, Rext, Cin), lambda n: (n, 0, 0)),     # image rows
            pl.BlockSpec((R, 1), lambda n: (0, 0)),                # validity mask
            pl.BlockSpec((9, Cin, Cout), lambda n: (0, 0, 0)),     # w1 (resident)
            pl.BlockSpec((1, Cout), lambda n: (0, 0)),             # b1
            pl.BlockSpec((9, Cout, Cout), lambda n: (0, 0, 0)),    # w2 (resident)
            pl.BlockSpec((1, Cout), lambda n: (0, 0)),             # b2
        ],
        out_specs=[
            pl.BlockSpec((1, R, Cout), lambda n: (n, 0, 0)),       # intout
            pl.BlockSpec((1, R, Cout), lambda n: (n, 0, 0)),       # output
        ],
        scratch_shapes=[pltpu.VMEM((Rext, Cout), jnp.float32)],    # zero-extended mid
        compiler_params=pltpu.CompilerParams(
            dimension_semantics=("parallel",)),                    # batch across TCs
    )(xe, mask, w1, b1, w2, b2)

    def unflatten(o):  # (N, R, Cout) padded-grid rows -> (N, Cout, H, W)
        o = o.reshape(N, Hp, Wp, Cout)[:, 1:H + 1, 1:W + 1, :]
        return jnp.transpose(o, (0, 3, 1, 2))

    return unflatten(intout_flat), unflatten(output_flat)


# ----------------------------------------------------------------------------
# Pure-JAX reference (for in-script verification)
# ----------------------------------------------------------------------------
def conv_block_reference(params, x, eps=1e-5):
    def conv(h, w, b):
        y = jax.lax.conv_general_dilated(
            h, w, window_strides=(1, 1), padding="SAME",
            dimension_numbers=("NCHW", "HWIO", "NCHW"),
            precision=jax.lax.Precision.HIGHEST)
        return y + b[None, :, None, None]

    def in_relu(y):
        mu = jnp.mean(y, axis=(2, 3), keepdims=True)
        var = jnp.mean((y - mu) ** 2, axis=(2, 3), keepdims=True)
        return jnp.maximum((y - mu) / jnp.sqrt(var + eps), 0.0)

    intout = in_relu(conv(x, params["w1"], params["b1"]))
    output = in_relu(conv(intout, params["w2"], params["b2"]))
    return intout, output


# ----------------------------------------------------------------------------
# Deterministic parameter construction
# ----------------------------------------------------------------------------
def init_params(key, in_chans, out_chans):
    k1, k2, k3, k4 = jax.random.split(key, 4)
    s1 = 1.0 / np.sqrt(9 * in_chans)
    s2 = 1.0 / np.sqrt(9 * out_chans)
    return {
        "w1": jax.random.normal(k1, (3, 3, in_chans, out_chans), jnp.float32) * s1,
        "b1": jax.random.normal(k2, (out_chans,), jnp.float32) * 0.01,
        "w2": jax.random.normal(k3, (3, 3, out_chans, out_chans), jnp.float32) * s2,
        "b2": jax.random.normal(k4, (out_chans,), jnp.float32) * 0.01,
    }


# ----------------------------------------------------------------------------
if __name__ == "__main__":
    key = jax.random.PRNGKey(0)
    kx, kp = jax.random.split(key)

    N, Cin, Cout, H, W = 2, 4, 32, 16, 16
    x = jax.random.normal(kx, (N, Cin, H, W), jnp.float32)
    params = init_params(kp, Cin, Cout)

    fwd = jax.jit(conv_block_forward)
    intout, output = fwd(params, x)
    jax.block_until_ready((intout, output))

    assert intout.shape == (N, Cout, H, W), intout.shape
    assert output.shape == (N, Cout, H, W), output.shape
    assert intout.dtype == jnp.float32 and output.dtype == jnp.float32
    assert bool(jnp.all(jnp.isfinite(intout)))
    assert bool(jnp.all(jnp.isfinite(output)))

    ref_int, ref_out = conv_block_reference(params, x)
    assert bool(jnp.allclose(intout, ref_int, atol=2e-3, rtol=2e-3))
    assert bool(jnp.allclose(output, ref_out, atol=2e-3, rtol=2e-3))

    print("KERNEL_OK")
</pallas_src>

<mosaic_0001>
module attributes {stable_mosaic.version = 11 : i64} {
  func.func @kernel(%arg0: i32, %arg1: memref<1x362x4xf32, #tpu.memory_space<vmem>>, %arg2: memref<324x1xf32, #tpu.memory_space<vmem>>, %arg3: memref<9x4x32xf32, #tpu.memory_space<vmem>>, %arg4: memref<1x32xf32, #tpu.memory_space<vmem>>, %arg5: memref<9x32x32xf32, #tpu.memory_space<vmem>>, %arg6: memref<1x32xf32, #tpu.memory_space<vmem>>, %arg7: memref<1x324x32xf32, #tpu.memory_space<vmem>>, %arg8: memref<1x324x32xf32, #tpu.memory_space<vmem>>, %arg9: memref<362x32xf32, #tpu.memory_space<vmem>>) attributes {dimension_semantics = [#tpu.dimension_semantics<parallel>], iteration_bounds = array<i64: 2>, scalar_prefetch = 0 : i64, scratch_operands = 1 : i64, tpu.core_type = #tpu.core_type<tc>, window_params = [{transform_indices = @transform_0, window_bounds = array<i64: 1, 362, 4>}, {pipeline_mode = #tpu.pipeline_mode<synchronous>, transform_indices = @transform_1, window_bounds = array<i64: 324, 1>}, {pipeline_mode = #tpu.pipeline_mode<synchronous>, transform_indices = @transform_2, window_bounds = array<i64: 9, 4, 32>}, {pipeline_mode = #tpu.pipeline_mode<synchronous>, transform_indices = @transform_3, window_bounds = array<i64: 1, 32>}, {pipeline_mode = #tpu.pipeline_mode<synchronous>, transform_indices = @transform_4, window_bounds = array<i64: 9, 32, 32>}, {pipeline_mode = #tpu.pipeline_mode<synchronous>, transform_indices = @transform_5, window_bounds = array<i64: 1, 32>}, {transform_indices = @transform_6, window_bounds = array<i64: 1, 324, 32>}, {transform_indices = @transform_7, window_bounds = array<i64: 1, 324, 32>}]} {
    %c0 = arith.constant 0 : index
    %c0_0 = arith.constant 0 : index
    %0 = vector.load %arg2[%c0, %c0_0] : memref<324x1xf32, #tpu.memory_space<vmem>>, vector<324x1xf32>
    %cst = arith.constant 0.000000e+00 : f32
    %1 = vector.broadcast %cst : f32 to vector<324x32xf32>
    %c0_1 = arith.constant 0 : index
    %c0_2 = arith.constant 0 : index
    %c0_3 = arith.constant 0 : index
    %2 = vector.load %arg1[%c0_1, %c0_2, %c0_3] : memref<1x362x4xf32, #tpu.memory_space<vmem>>, vector<1x324x4xf32>
    %3 = vector.shape_cast %2 : vector<1x324x4xf32> to vector<324x4xf32>
    %c0_4 = arith.constant 0 : index
    %c0_5 = arith.constant 0 : index
    %c0_6 = arith.constant 0 : index
    %4 = vector.load %arg3[%c0_4, %c0_5, %c0_6] : memref<9x4x32xf32, #tpu.memory_space<vmem>>, vector<1x4x32xf32>
    %5 = vector.shape_cast %4 : vector<1x4x32xf32> to vector<4x32xf32>
    %cst_7 = arith.constant dense<0.000000e+00> : vector<324x32xf32>
    %6 = tpu.matmul %3, %5, %cst_7 {dimension_numbers = #tpu.dot_dimension_numbers<[1], [0], [0], [1], [0, 0, 1, 1], [], []>} : vector<324x4xf32>, vector<4x32xf32>, vector<324x32xf32> -> vector<324x32xf32>
    %7 = arith.addf %1, %6 : vector<324x32xf32>
    %c0_8 = arith.constant 0 : index
    %c1 = arith.constant 1 : index
    %c0_9 = arith.constant 0 : index
    %8 = vector.load %arg1[%c0_8, %c1, %c0_9] : memref<1x362x4xf32, #tpu.memory_space<vmem>>, vector<1x324x4xf32>
    %9 = vector.shape_cast %8 : vector<1x324x4xf32> to vector<324x4xf32>
    %c1_10 = arith.constant 1 : index
    %c0_11 = arith.constant 0 : index
    %c0_12 = arith.constant 0 : index
    %10 = vector.load %arg3[%c1_10, %c0_11, %c0_12] : memref<9x4x32xf32, #tpu.memory_space<vmem>>, vector<1x4x32xf32>
    %11 = vector.shape_cast %10 : vector<1x4x32xf32> to vector<4x32xf32>
    %cst_13 = arith.constant dense<0.000000e+00> : vector<324x32xf32>
    %12 = tpu.matmul %9, %11, %cst_13 {dimension_numbers = #tpu.dot_dimension_numbers<[1], [0], [0], [1], [0, 0, 1, 1], [], []>} : vector<324x4xf32>, vector<4x32xf32>, vector<324x32xf32> -> vector<324x32xf32>
    %13 = arith.addf %7, %12 : vector<324x32xf32>
    %c0_14 = arith.constant 0 : index
    %c2 = arith.constant 2 : index
    %c0_15 = arith.constant 0 : index
    %14 = vector.load %arg1[%c0_14, %c2, %c0_15] : memref<1x362x4xf32, #tpu.memory_space<vmem>>, vector<1x324x4xf32>
    %15 = vector.shape_cast %14 : vector<1x324x4xf32> to vector<324x4xf32>
    %c2_16 = arith.constant 2 : index
    %c0_17 = arith.constant 0 : index
    %c0_18 = arith.constant 0 : index
    %16 = vector.load %arg3[%c2_16, %c0_17, %c0_18] : memref<9x4x32xf32, #tpu.memory_space<vmem>>, vector<1x4x32xf32>
    %17 = vector.shape_cast %16 : vector<1x4x32xf32> to vector<4x32xf32>
    %cst_19 = arith.constant dense<0.000000e+00> : vector<324x32xf32>
    %18 = tpu.matmul %15, %17, %cst_19 {dimension_numbers = #tpu.dot_dimension_numbers<[1], [0], [0], [1], [0, 0, 1, 1], [], []>} : vector<324x4xf32>, vector<4x32xf32>, vector<324x32xf32> -> vector<324x32xf32>
    %19 = arith.addf %13, %18 : vector<324x32xf32>
    %c0_20 = arith.constant 0 : index
    %c18 = arith.constant 18 : index
    %c0_21 = arith.constant 0 : index
    %20 = vector.load %arg1[%c0_20, %c18, %c0_21] : memref<1x362x4xf32, #tpu.memory_space<vmem>>, vector<1x324x4xf32>
    %21 = vector.shape_cast %20 : vector<1x324x4xf32> to vector<324x4xf32>
    %c3 = arith.constant 3 : index
    %c0_22 = arith.constant 0 : index
    %c0_23 = arith.constant 0 : index
    %22 = vector.load %arg3[%c3, %c0_22, %c0_23] : memref<9x4x32xf32, #tpu.memory_space<vmem>>, vector<1x4x32xf32>
    %23 = vector.shape_cast %22 : vector<1x4x32xf32> to vector<4x32xf32>
    %cst_24 = arith.constant dense<0.000000e+00> : vector<324x32xf32>
    %24 = tpu.matmul %21, %23, %cst_24 {dimension_numbers = #tpu.dot_dimension_numbers<[1], [0], [0], [1], [0, 0, 1, 1], [], []>} : vector<324x4xf32>, vector<4x32xf32>, vector<324x32xf32> -> vector<324x32xf32>
    %25 = arith.addf %19, %24 : vector<324x32xf32>
    %c0_25 = arith.constant 0 : index
    %c19 = arith.constant 19 : index
    %c0_26 = arith.constant 0 : index
    %26 = vector.load %arg1[%c0_25, %c19, %c0_26] : memref<1x362x4xf32, #tpu.memory_space<vmem>>, vector<1x324x4xf32>
    %27 = vector.shape_cast %26 : vector<1x324x4xf32> to vector<324x4xf32>
    %c4 = arith.constant 4 : index
    %c0_27 = arith.constant 0 : index
    %c0_28 = arith.constant 0 : index
    %28 = vector.load %arg3[%c4, %c0_27, %c0_28] : memref<9x4x32xf32, #tpu.memory_space<vmem>>, vector<1x4x32xf32>
    %29 = vector.shape_cast %28 : vector<1x4x32xf32> to vector<4x32xf32>
    %cst_29 = arith.constant dense<0.000000e+00> : vector<324x32xf32>
    %30 = tpu.matmul %27, %29, %cst_29 {dimension_numbers = #tpu.dot_dimension_numbers<[1], [0], [0], [1], [0, 0, 1, 1], [], []>} : vector<324x4xf32>, vector<4x32xf32>, vector<324x32xf32> -> vector<324x32xf32>
    %31 = arith.addf %25, %30 : vector<324x32xf32>
    %c0_30 = arith.constant 0 : index
    %c20 = arith.constant 20 : index
    %c0_31 = arith.constant 0 : index
    %32 = vector.load %arg1[%c0_30, %c20, %c0_31] : memref<1x362x4xf32, #tpu.memory_space<vmem>>, vector<1x324x4xf32>
    %33 = vector.shape_cast %32 : vector<1x324x4xf32> to vector<324x4xf32>
    %c5 = arith.constant 5 : index
    %c0_32 = arith.constant 0 : index
    %c0_33 = arith.constant 0 : index
    %34 = vector.load %arg3[%c5, %c0_32, %c0_33] : memref<9x4x32xf32, #tpu.memory_space<vmem>>, vector<1x4x32xf32>
    %35 = vector.shape_cast %34 : vector<1x4x32xf32> to vector<4x32xf32>
    %cst_34 = arith.constant dense<0.000000e+00> : vector<324x32xf32>
    %36 = tpu.matmul %33, %35, %cst_34 {dimension_numbers = #tpu.dot_dimension_numbers<[1], [0], [0], [1], [0, 0, 1, 1], [], []>} : vector<324x4xf32>, vector<4x32xf32>, vector<324x32xf32> -> vector<324x32xf32>
    %37 = arith.addf %31, %36 : vector<324x32xf32>
    %c0_35 = arith.constant 0 : index
    %c36 = arith.constant 36 : index
    %c0_36 = arith.constant 0 : index
    %38 = vector.load %arg1[%c0_35, %c36, %c0_36] : memref<1x362x4xf32, #tpu.memory_space<vmem>>, vector<1x324x4xf32>
    %39 = vector.shape_cast %38 : vector<1x324x4xf32> to vector<324x4xf32>
    %c6 = arith.constant 6 : index
    %c0_37 = arith.constant 0 : index
    %c0_38 = arith.constant 0 : index
    %40 = vector.load %arg3[%c6, %c0_37, %c0_38] : memref<9x4x32xf32, #tpu.memory_space<vmem>>, vector<1x4x32xf32>
    %41 = vector.shape_cast %40 : vector<1x4x32xf32> to vector<4x32xf32>
    %cst_39 = arith.constant dense<0.000000e+00> : vector<324x32xf32>
    %42 = tpu.matmul %39, %41, %cst_39 {dimension_numbers = #tpu.dot_dimension_numbers<[1], [0], [0], [1], [0, 0, 1, 1], [], []>} : vector<324x4xf32>, vector<4x32xf32>, vector<324x32xf32> -> vector<324x32xf32>
    %43 = arith.addf %37, %42 : vector<324x32xf32>
    %c0_40 = arith.constant 0 : index
    %c37 = arith.constant 37 : index
    %c0_41 = arith.constant 0 : index
    %44 = vector.load %arg1[%c0_40, %c37, %c0_41] : memref<1x362x4xf32, #tpu.memory_space<vmem>>, vector<1x324x4xf32>
    %45 = vector.shape_cast %44 : vector<1x324x4xf32> to vector<324x4xf32>
    %c7 = arith.constant 7 : index
    %c0_42 = arith.constant 0 : index
    %c0_43 = arith.constant 0 : index
    %46 = vector.load %arg3[%c7, %c0_42, %c0_43] : memref<9x4x32xf32, #tpu.memory_space<vmem>>, vector<1x4x32xf32>
    %47 = vector.shape_cast %46 : vector<1x4x32xf32> to vector<4x32xf32>
    %cst_44 = arith.constant dense<0.000000e+00> : vector<324x32xf32>
    %48 = tpu.matmul %45, %47, %cst_44 {dimension_numbers = #tpu.dot_dimension_numbers<[1], [0], [0], [1], [0, 0, 1, 1], [], []>} : vector<324x4xf32>, vector<4x32xf32>, vector<324x32xf32> -> vector<324x32xf32>
    %49 = arith.addf %43, %48 : vector<324x32xf32>
    %c0_45 = arith.constant 0 : index
    %c38 = arith.constant 38 : index
    %c0_46 = arith.constant 0 : index
    %50 = vector.load %arg1[%c0_45, %c38, %c0_46] : memref<1x362x4xf32, #tpu.memory_space<vmem>>, vector<1x324x4xf32>
    %51 = vector.shape_cast %50 : vector<1x324x4xf32> to vector<324x4xf32>
    %c8 = arith.constant 8 : index
    %c0_47 = arith.constant 0 : index
    %c0_48 = arith.constant 0 : index
    %52 = vector.load %arg3[%c8, %c0_47, %c0_48] : memref<9x4x32xf32, #tpu.memory_space<vmem>>, vector<1x4x32xf32>
    %53 = vector.shape_cast %52 : vector<1x4x32xf32> to vector<4x32xf32>
    %cst_49 = arith.constant dense<0.000000e+00> : vector<324x32xf32>
    %54 = tpu.matmul %51, %53, %cst_49 {dimension_numbers = #tpu.dot_dimension_numbers<[1], [0], [0], [1], [0, 0, 1, 1], [], []>} : vector<324x4xf32>, vector<4x32xf32>, vector<324x32xf32> -> vector<324x32xf32>
    %55 = arith.addf %49, %54 : vector<324x32xf32>
    %c0_50 = arith.constant 0 : index
    %c0_51 = arith.constant 0 : index
    %56 = vector.load %arg4[%c0_50, %c0_51] : memref<1x32xf32, #tpu.memory_space<vmem>>, vector<1x32xf32>
    %57 = vector.broadcast %56 : vector<1x32xf32> to vector<324x32xf32>
    %58 = arith.addf %55, %57 : vector<324x32xf32>
    %59 = vector.broadcast %0 : vector<324x1xf32> to vector<324x32xf32>
    %60 = arith.mulf %58, %59 : vector<324x32xf32>
    %cst_52 = arith.constant dense<0.000000e+00> : vector<32xf32>
    %61 = vector.multi_reduction <add>, %60, %cst_52 [0] : vector<324x32xf32> to vector<32xf32>
    %62 = vector.shape_cast %61 : vector<32xf32> to vector<1x32xf32>
    %cst_53 = arith.constant 3.906250e-03 : f32
    %63 = vector.broadcast %cst_53 : f32 to vector<1x32xf32>
    %64 = arith.mulf %62, %63 : vector<1x32xf32>
    %65 = arith.mulf %58, %58 : vector<324x32xf32>
    %66 = vector.broadcast %0 : vector<324x1xf32> to vector<324x32xf32>
    %67 = arith.mulf %65, %66 : vector<324x32xf32>
    %cst_54 = arith.constant dense<0.000000e+00> : vector<32xf32>
    %68 = vector.multi_reduction <add>, %67, %cst_54 [0] : vector<324x32xf32> to vector<32xf32>
    %69 = vector.shape_cast %68 : vector<32xf32> to vector<1x32xf32>
    %cst_55 = arith.constant 3.906250e-03 : f32
    %70 = vector.broadcast %cst_55 : f32 to vector<1x32xf32>
    %71 = arith.mulf %69, %70 : vector<1x32xf32>
    %72 = vector.broadcast %64 : vector<1x32xf32> to vector<324x32xf32>
    %73 = arith.subf %58, %72 : vector<324x32xf32>
    %74 = arith.mulf %64, %64 : vector<1x32xf32>
    %75 = arith.subf %71, %74 : vector<1x32xf32>
    %cst_56 = arith.constant 9.99999974E-6 : f32
    %76 = vector.broadcast %cst_56 : f32 to vector<1x32xf32>
    %77 = arith.addf %75, %76 : vector<1x32xf32>
    %78 = math.rsqrt %77 : vector<1x32xf32>
    %79 = vector.broadcast %78 : vector<1x32xf32> to vector<324x32xf32>
    %80 = arith.mulf %73, %79 : vector<324x32xf32>
    %cst_57 = arith.constant 0.000000e+00 : f32
    %81 = vector.broadcast %cst_57 : f32 to vector<324x32xf32>
    %82 = arith.maximumf %80, %81 : vector<324x32xf32>
    %83 = vector.broadcast %0 : vector<324x1xf32> to vector<324x32xf32>
    %84 = arith.mulf %82, %83 : vector<324x32xf32>
    %c0_58 = arith.constant 0 : index
    %c0_59 = arith.constant 0 : index
    %c0_60 = arith.constant 0 : index
    %85 = vector.load %arg7[%c0_58, %c0_59, %c0_60] : memref<1x324x32xf32, #tpu.memory_space<vmem>>, vector<1x324x32xf32>
    %86 = vector.shape_cast %85 : vector<1x324x32xf32> to vector<324x32xf32>
    %87 = vector.shape_cast %84 : vector<324x32xf32> to vector<1x324x32xf32>
    tpu.vector_store %arg7[%c0_58, %c0_59, %c0_60], %87 {strides = array<i32>} : memref<1x324x32xf32, #tpu.memory_space<vmem>>, vector<1x324x32xf32>,
    %cst_61 = arith.constant 0.000000e+00 : f32
    %88 = vector.broadcast %cst_61 : f32 to vector<362x32xf32>
    %c0_62 = arith.constant 0 : index
    %c0_63 = arith.constant 0 : index
    %89 = vector.load %arg9[%c0_62, %c0_63] : memref<362x32xf32, #tpu.memory_space<vmem>>, vector<362x32xf32>
    tpu.vector_store %arg9[%c0_62, %c0_63], %88 {strides = array<i32>} : memref<362x32xf32, #tpu.memory_space<vmem>>, vector<362x32xf32>,
    %c19_64 = arith.constant 19 : index
    %c0_65 = arith.constant 0 : index
    %90 = vector.load %arg9[%c19_64, %c0_65] : memref<362x32xf32, #tpu.memory_space<vmem>>, vector<324x32xf32>
    tpu.vector_store %arg9[%c19_64, %c0_65], %84 {strides = array<i32>} : memref<362x32xf32, #tpu.memory_space<vmem>>, vector<324x32xf32>,
    %cst_66 = arith.constant 0.000000e+00 : f32
    %91 = vector.broadcast %cst_66 : f32 to vector<324x32xf32>
    %c0_67 = arith.constant 0 : index
    %c0_68 = arith.constant 0 : index
    %92 = vector.load %arg9[%c0_67, %c0_68] : memref<362x32xf32, #tpu.memory_space<vmem>>, vector<324x32xf32>
    %c0_69 = arith.constant 0 : index
    %c0_70 = arith.constant 0 : index
    %c0_71 = arith.constant 0 : index
    %93 = vector.load %arg5[%c0_69, %c0_70, %c0_71] : memref<9x32x32xf32, #tpu.memory_space<vmem>>, vector<1x32x32xf32>
    %94 = vector.shape_cast %93 : vector<1x32x32xf32> to vector<32x32xf32>
    %cst_72 = arith.constant dense<0.000000e+00> : vector<324x32xf32>
    %95 = tpu.matmul %92, %94, %cst_72 {dimension_numbers = #tpu.dot_dimension_numbers<[1], [0], [0], [1], [0, 0, 1, 1], [], []>} : vector<324x32xf32>, vector<32x32xf32>, vector<324x32xf32> -> vector<324x32xf32>
    %96 = arith.addf %91, %95 : vector<324x32xf32>
    %c1_73 = arith.constant 1 : index
    %c0_74 = arith.constant 0 : index
    %97 = vector.load %arg9[%c1_73, %c0_74] : memref<362x32xf32, #tpu.memory_space<vmem>>, vector<324x32xf32>
    %c1_75 = arith.constant 1 : index
    %c0_76 = arith.constant 0 : index
    %c0_77 = arith.constant 0 : index
    %98 = vector.load %arg5[%c1_75, %c0_76, %c0_77] : memref<9x32x32xf32, #tpu.memory_space<vmem>>, vector<1x32x32xf32>
    %99 = vector.shape_cast %98 : vector<1x32x32xf32> to vector<32x32xf32>
    %cst_78 = arith.constant dense<0.000000e+00> : vector<324x32xf32>
    %100 = tpu.matmul %97, %99, %cst_78 {dimension_numbers = #tpu.dot_dimension_numbers<[1], [0], [0], [1], [0, 0, 1, 1], [], []>} : vector<324x32xf32>, vector<32x32xf32>, vector<324x32xf32> -> vector<324x32xf32>
    %101 = arith.addf %96, %100 : vector<324x32xf32>
    %c2_79 = arith.constant 2 : index
    %c0_80 = arith.constant 0 : index
    %102 = vector.load %arg9[%c2_79, %c0_80] : memref<362x32xf32, #tpu.memory_space<vmem>>, vector<324x32xf32>
    %c2_81 = arith.constant 2 : index
    %c0_82 = arith.constant 0 : index
    %c0_83 = arith.constant 0 : index
    %103 = vector.load %arg5[%c2_81, %c0_82, %c0_83] : memref<9x32x32xf32, #tpu.memory_space<vmem>>, vector<1x32x32xf32>
    %104 = vector.shape_cast %103 : vector<1x32x32xf32> to vector<32x32xf32>
    %cst_84 = arith.constant dense<0.000000e+00> : vector<324x32xf32>
    %105 = tpu.matmul %102, %104, %cst_84 {dimension_numbers = #tpu.dot_dimension_numbers<[1], [0], [0], [1], [0, 0, 1, 1], [], []>} : vector<324x32xf32>, vector<32x32xf32>, vector<324x32xf32> -> vector<324x32xf32>
    %106 = arith.addf %101, %105 : vector<324x32xf32>
    %c18_85 = arith.constant 18 : index
    %c0_86 = arith.constant 0 : index
    %107 = vector.load %arg9[%c18_85, %c0_86] : memref<362x32xf32, #tpu.memory_space<vmem>>, vector<324x32xf32>
    %c3_87 = arith.constant 3 : index
    %c0_88 = arith.constant 0 : index
    %c0_89 = arith.constant 0 : index
    %108 = vector.load %arg5[%c3_87, %c0_88, %c0_89] : memref<9x32x32xf32, #tpu.memory_space<vmem>>, vector<1x32x32xf32>
    %109 = vector.shape_cast %108 : vector<1x32x32xf32> to vector<32x32xf32>
    %cst_90 = arith.constant dense<0.000000e+00> : vector<324x32xf32>
    %110 = tpu.matmul %107, %109, %cst_90 {dimension_numbers = #tpu.dot_dimension_numbers<[1], [0], [0], [1], [0, 0, 1, 1], [], []>} : vector<324x32xf32>, vector<32x32xf32>, vector<324x32xf32> -> vector<324x32xf32>
    %111 = arith.addf %106, %110 : vector<324x32xf32>
    %c19_91 = arith.constant 19 : index
    %c0_92 = arith.constant 0 : index
    %112 = vector.load %arg9[%c19_91, %c0_92] : memref<362x32xf32, #tpu.memory_space<vmem>>, vector<324x32xf32>
    %c4_93 = arith.constant 4 : index
    %c0_94 = arith.constant 0 : index
    %c0_95 = arith.constant 0 : index
    %113 = vector.load %arg5[%c4_93, %c0_94, %c0_95] : memref<9x32x32xf32, #tpu.memory_space<vmem>>, vector<1x32x32xf32>
    %114 = vector.shape_cast %113 : vector<1x32x32xf32> to vector<32x32xf32>
    %cst_96 = arith.constant dense<0.000000e+00> : vector<324x32xf32>
    %115 = tpu.matmul %112, %114, %cst_96 {dimension_numbers = #tpu.dot_dimension_numbers<[1], [0], [0], [1], [0, 0, 1, 1], [], []>} : vector<324x32xf32>, vector<32x32xf32>, vector<324x32xf32> -> vector<324x32xf32>
    %116 = arith.addf %111, %115 : vector<324x32xf32>
    %c20_97 = arith.constant 20 : index
    %c0_98 = arith.constant 0 : index
    %117 = vector.load %arg9[%c20_97, %c0_98] : memref<362x32xf32, #tpu.memory_space<vmem>>, vector<324x32xf32>
    %c5_99 = arith.constant 5 : index
    %c0_100 = arith.constant 0 : index
    %c0_101 = arith.constant 0 : index
    %118 = vector.load %arg5[%c5_99, %c0_100, %c0_101] : memref<9x32x32xf32, #tpu.memory_space<vmem>>, vector<1x32x32xf32>
    %119 = vector.shape_cast %118 : vector<1x32x32xf32> to vector<32x32xf32>
    %cst_102 = arith.constant dense<0.000000e+00> : vector<324x32xf32>
    %120 = tpu.matmul %117, %119, %cst_102 {dimension_numbers = #tpu.dot_dimension_numbers<[1], [0], [0], [1], [0, 0, 1, 1], [], []>} : vector<324x32xf32>, vector<32x32xf32>, vector<324x32xf32> -> vector<324x32xf32>
    %121 = arith.addf %116, %120 : vector<324x32xf32>
    %c36_103 = arith.constant 36 : index
    %c0_104 = arith.constant 0 : index
    %122 = vector.load %arg9[%c36_103, %c0_104] : memref<362x32xf32, #tpu.memory_space<vmem>>, vector<324x32xf32>
    %c6_105 = arith.constant 6 : index
    %c0_106 = arith.constant 0 : index
    %c0_107 = arith.constant 0 : index
    %123 = vector.load %arg5[%c6_105, %c0_106, %c0_107] : memref<9x32x32xf32, #tpu.memory_space<vmem>>, vector<1x32x32xf32>
    %124 = vector.shape_cast %123 : vector<1x32x32xf32> to vector<32x32xf32>
    %cst_108 = arith.constant dense<0.000000e+00> : vector<324x32xf32>
    %125 = tpu.matmul %122, %124, %cst_108 {dimension_numbers = #tpu.dot_dimension_numbers<[1], [0], [0], [1], [0, 0, 1, 1], [], []>} : vector<324x32xf32>, vector<32x32xf32>, vector<324x32xf32> -> vector<324x32xf32>
    %126 = arith.addf %121, %125 : vector<324x32xf32>
    %c37_109 = arith.constant 37 : index
    %c0_110 = arith.constant 0 : index
    %127 = vector.load %arg9[%c37_109, %c0_110] : memref<362x32xf32, #tpu.memory_space<vmem>>, vector<324x32xf32>
    %c7_111 = arith.constant 7 : index
    %c0_112 = arith.constant 0 : index
    %c0_113 = arith.constant 0 : index
    %128 = vector.load %arg5[%c7_111, %c0_112, %c0_113] : memref<9x32x32xf32, #tpu.memory_space<vmem>>, vector<1x32x32xf32>
    %129 = vector.shape_cast %128 : vector<1x32x32xf32> to vector<32x32xf32>
    %cst_114 = arith.constant dense<0.000000e+00> : vector<324x32xf32>
    %130 = tpu.matmul %127, %129, %cst_114 {dimension_numbers = #tpu.dot_dimension_numbers<[1], [0], [0], [1], [0, 0, 1, 1], [], []>} : vector<324x32xf32>, vector<32x32xf32>, vector<324x32xf32> -> vector<324x32xf32>
    %131 = arith.addf %126, %130 : vector<324x32xf32>
    %c38_115 = arith.constant 38 : index
    %c0_116 = arith.constant 0 : index
    %132 = vector.load %arg9[%c38_115, %c0_116] : memref<362x32xf32, #tpu.memory_space<vmem>>, vector<324x32xf32>
    %c8_117 = arith.constant 8 : index
    %c0_118 = arith.constant 0 : index
    %c0_119 = arith.constant 0 : index
    %133 = vector.load %arg5[%c8_117, %c0_118, %c0_119] : memref<9x32x32xf32, #tpu.memory_space<vmem>>, vector<1x32x32xf32>
    %134 = vector.shape_cast %133 : vector<1x32x32xf32> to vector<32x32xf32>
    %cst_120 = arith.constant dense<0.000000e+00> : vector<324x32xf32>
    %135 = tpu.matmul %132, %134, %cst_120 {dimension_numbers = #tpu.dot_dimension_numbers<[1], [0], [0], [1], [0, 0, 1, 1], [], []>} : vector<324x32xf32>, vector<32x32xf32>, vector<324x32xf32> -> vector<324x32xf32>
    %136 = arith.addf %131, %135 : vector<324x32xf32>
    %c0_121 = arith.constant 0 : index
    %c0_122 = arith.constant 0 : index
    %137 = vector.load %arg6[%c0_121, %c0_122] : memref<1x32xf32, #tpu.memory_space<vmem>>, vector<1x32xf32>
    %138 = vector.broadcast %137 : vector<1x32xf32> to vector<324x32xf32>
    %139 = arith.addf %136, %138 : vector<324x32xf32>
    %140 = vector.broadcast %0 : vector<324x1xf32> to vector<324x32xf32>
    %141 = arith.mulf %139, %140 : vector<324x32xf32>
    %cst_123 = arith.constant dense<0.000000e+00> : vector<32xf32>
    %142 = vector.multi_reduction <add>, %141, %cst_123 [0] : vector<324x32xf32> to vector<32xf32>
    %143 = vector.shape_cast %142 : vector<32xf32> to vector<1x32xf32>
    %cst_124 = arith.constant 3.906250e-03 : f32
    %144 = vector.broadcast %cst_124 : f32 to vector<1x32xf32>
    %145 = arith.mulf %143, %144 : vector<1x32xf32>
    %146 = arith.mulf %139, %139 : vector<324x32xf32>
    %147 = vector.broadcast %0 : vector<324x1xf32> to vector<324x32xf32>
    %148 = arith.mulf %146, %147 : vector<324x32xf32>
    %cst_125 = arith.constant dense<0.000000e+00> : vector<32xf32>
    %149 = vector.multi_reduction <add>, %148, %cst_125 [0] : vector<324x32xf32> to vector<32xf32>
    %150 = vector.shape_cast %149 : vector<32xf32> to vector<1x32xf32>
    %cst_126 = arith.constant 3.906250e-03 : f32
    %151 = vector.broadcast %cst_126 : f32 to vector<1x32xf32>
    %152 = arith.mulf %150, %151 : vector<1x32xf32>
    %153 = vector.broadcast %145 : vector<1x32xf32> to vector<324x32xf32>
    %154 = arith.subf %139, %153 : vector<324x32xf32>
    %155 = arith.mulf %145, %145 : vector<1x32xf32>
    %156 = arith.subf %152, %155 : vector<1x32xf32>
    %cst_127 = arith.constant 9.99999974E-6 : f32
    %157 = vector.broadcast %cst_127 : f32 to vector<1x32xf32>
    %158 = arith.addf %156, %157 : vector<1x32xf32>
    %159 = math.rsqrt %158 : vector<1x32xf32>
    %160 = vector.broadcast %159 : vector<1x32xf32> to vector<324x32xf32>
    %161 = arith.mulf %154, %160 : vector<324x32xf32>
    %cst_128 = arith.constant 0.000000e+00 : f32
    %162 = vector.broadcast %cst_128 : f32 to vector<324x32xf32>
    %163 = arith.maximumf %161, %162 : vector<324x32xf32>
    %164 = vector.broadcast %0 : vector<324x1xf32> to vector<324x32xf32>
    %165 = arith.mulf %163, %164 : vector<324x32xf32>
    %c0_129 = arith.constant 0 : index
    %c0_130 = arith.constant 0 : index
    %c0_131 = arith.constant 0 : index
    %166 = vector.load %arg8[%c0_129, %c0_130, %c0_131] : memref<1x324x32xf32, #tpu.memory_space<vmem>>, vector<1x324x32xf32>
    %167 = vector.shape_cast %166 : vector<1x324x32xf32> to vector<324x32xf32>
    %168 = vector.shape_cast %165 : vector<324x32xf32> to vector<1x324x32xf32>
    tpu.vector_store %arg8[%c0_129, %c0_130, %c0_131], %168 {strides = array<i32>} : memref<1x324x32xf32, #tpu.memory_space<vmem>>, vector<1x324x32xf32>,
    return
  }
  func.func @transform_0(%arg0: i32) -> (i32, i32, i32) {
    %c0_i32 = arith.constant 0 : i32
    %c0_i32_0 = arith.constant 0 : i32
    %c0_i32_1 = arith.constant 0 : i32
    return %arg0, %c0_i32, %c0_i32_0 : i32, i32, i32
  }
  func.func @transform_1(%arg0: i32) -> (i32, i32) {
    %c0_i32 = arith.constant 0 : i32
    %c0_i32_0 = arith.constant 0 : i32
    %c0_i32_1 = arith.constant 0 : i32
    return %c0_i32, %c0_i32_0 : i32, i32
  }
  func.func @transform_2(%arg0: i32) -> (i32, i32, i32) {
    %c0_i32 = arith.constant 0 : i32
    %c0_i32_0 = arith.constant 0 : i32
    %c0_i32_1 = arith.constant 0 : i32
    %c0_i32_2 = arith.constant 0 : i32
    return %c0_i32, %c0_i32_0, %c0_i32_1 : i32, i32, i32
  }
  func.func @transform_3(%arg0: i32) -> (i32, i32) {
    %c0_i32 = arith.constant 0 : i32
    %c0_i32_0 = arith.constant 0 : i32
    %c0_i32_1 = arith.constant 0 : i32
    return %c0_i32, %c0_i32_0 : i32, i32
  }
  func.func @transform_4(%arg0: i32) -> (i32, i32, i32) {
    %c0_i32 = arith.constant 0 : i32
    %c0_i32_0 = arith.constant 0 : i32
    %c0_i32_1 = arith.constant 0 : i32
    %c0_i32_2 = arith.constant 0 : i32
    return %c0_i32, %c0_i32_0, %c0_i32_1 : i32, i32, i32
  }
  func.func @transform_5(%arg0: i32) -> (i32, i32) {
    %c0_i32 = arith.constant 0 : i32
    %c0_i32_0 = arith.constant 0 : i32
    %c0_i32_1 = arith.constant 0 : i32
    return %c0_i32, %c0_i32_0 : i32, i32
  }
  func.func @transform_6(%arg0: i32) -> (i32, i32, i32) {
    %c0_i32 = arith.constant 0 : i32
    %c0_i32_0 = arith.constant 0 : i32
    %c0_i32_1 = arith.constant 0 : i32
    return %arg0, %c0_i32, %c0_i32_0 : i32, i32, i32
  }
  func.func @transform_7(%arg0: i32) -> (i32, i32, i32) {
    %c0_i32 = arith.constant 0 : i32
    %c0_i32_0 = arith.constant 0 : i32
    %c0_i32_1 = arith.constant 0 : i32
    return %arg0, %c0_i32, %c0_i32_0 : i32, i32, i32
  }
}

</mosaic_0001>

<bundles_post_ra>
// kernel: conv_block_forward.1
= control target key start
LH: loop header
LB: loop body
LE: loop exit
PB: predicated region body
PF: predicated region fallthrough
CT: control target
= control target key end

     0   :  { %s14316_s24 = smov 0   ;;  %s20354_s0 = inlined_call_operand.vmem [shape: f32[2,362,4], index: 0, kind: input, shape index: {}]   ;;  %s20355_s1 = inlined_call_operand.vmem [shape: f32[324,1], index: 1, kind: input, shape index: {}]   ;;  %s20356_s2 = inlined_call_operand.vmem [shape: f32[9,4,32], index: 2, kind: input, shape index: {}]   ;;  %s20357_s3 = inlined_call_operand.vmem [shape: f32[1,32], index: 3, kind: input, shape index: {}]   ;;  %s20358_s4 = inlined_call_operand.vmem [shape: f32[9,32,32], index: 4, kind: input, shape index: {}]   ;;  %s20359_s5 = inlined_call_operand.vmem [shape: f32[1,32], index: 5, kind: input, shape index: {}]   ;;  %s20360_s6 = inlined_call_operand.vmem [shape: f32[2,324,32], index: 6, kind: output, shape index: {0}]   ;;  %s20361_s7 = inlined_call_operand.vmem [shape: f32[2,324,32], index: 7, kind: output, shape index: {1}]  }
   0x1 LB: > { %s10304_s25 = sadd.s32 4294967295, %s14270_s24   ;;  %p10308_p0 = scmp.ge.s32.totalorder %s14270_s24, 1  ;;  %s14270_s24 = sphi %s14316_s24, %s18_s24  }
   0x2   : > { %p240_p1 = scmp.lt.s32.totalorder %s14270_s24, 3 }
   0x4   : > { %p241_p2 = pnand %p10308_p0, %p240_p1 }
   0x6   : > { %244 = sbr.rel (%p241_p2) target bundleno = 2236 (0x8bc), region = 44 }
   0xd   : > { %v10312_v0 = vld [vmem:[%s20356_s2 + $0x4] sm:$0xf]  ;;  %vm542_vm0 = vcmask 1043456   ;;  %p277_p3 = scmp.lt.s32.totalorder %s10304_s25, 1  ;;  %v20362_v1 = vmov 0.0   ;;  %vm14273_vm1 = vmmov 0  }
   0xe   : > { %11886 = vmatprep.subr.mxu0 %v20362_v1  ;;  %12011 = vmatprep.subr.mxu1 %v20362_v1  ;;  %v374_v2 = vld [vmem:[%s20356_s2] sm:$0xf]  ;;  %vm418_vm2 = vcmask 31744   ;;  %v10397_v3 = vld [vmem:[%s20356_s2 + $0x8] sm:$0xf]  ;;  %vm4866_vm3 = vcmask 261120  }
   0xf   : > { %11887 = vmatpush3.msk.msra.mxu0 %vm542_vm0, %v10312_v0  ;;  %11888 = vmatprep.mubr.msk.f32.mxu0 %vm14273_vm1, %v20362_v1  ;;  %s20844_s25 = smov (!%p277_p3, %s10304_s25), 1  ;;  %v10440_v22 = vld [vmem:[%s20356_s2 + $0xc] sm:$0xf]  ;;  %5337 = vst.msk [vmem:[#allocation2 + $0x10] sm:$0xff] %vm4866_vm3, %v20362_v1  ;;  %5338 = vst.msk [vmem:[#allocation2 + $0x18] sm:$0xff] %vm4866_vm3, %v20362_v1  ;;  %vm4946_vm4 = vcmask 257024  }
  0x10   : > { %12012 = vmatpush3.msk.msra.mxu1 %vm542_vm0, %v374_v2  ;;  %12013 = vmatprep.mubr.msk.f32.mxu1 %vm14273_vm1, %v20362_v1  ;;  %s14244_s30 = smul.u32 368, %s20844_s25  ;;  %5335 = vst.msk [vmem:[#allocation2] sm:$0xff] %vm4866_vm3, %v20362_v1  ;;  %5336 = vst.msk [vmem:[#allocation2 + $0x8] sm:$0xff] %vm4866_vm3, %v20362_v1  ;;  %vm5380_vm5 = vcmask 254976  }
  0x11   : > { %12136 = vmatprep.subr.mxu0 %v20362_v1  ;;  %12261 = vmatprep.subr.mxu1 %v20362_v1  ;;  %5339 = vst.msk [vmem:[#allocation2 + $0x20] sm:$0xff] %vm4866_vm3, %v20362_v1  ;;  %5340 = vst.msk [vmem:[#allocation2 + $0x28] sm:$0xff] %vm4866_vm3, %v20362_v1  ;;  %s14245_s11 = smul.u32 328, %s20844_s25 }
  0x12   : > { %s14346_s10 = scalar_lea.vmem %s20354_s0, %s14244_s30  ;;  %5341 = vst.msk [vmem:[#allocation2 + $0x30] sm:$0xff] %vm4866_vm3, %v20362_v1  ;;  %5342 = vst.msk [vmem:[#allocation2 + $0x38] sm:$0xff] %vm4866_vm3, %v20362_v1 }
  0x13   : > { %v375_v4 = vld [vmem:[%s14346_s10 + $0x1] sm:$0xff]  ;;  %v376_v6 = vld [vmem:[%s14346_s10 + $0x9] sm:$0xff]  ;;  %v377_v8 = vld [vmem:[%s14346_s10 + $0x11] sm:$0xff]  ;;  %5343 = vst.msk [vmem:[#allocation2 + $0x40] sm:$0xff] %vm4866_vm3, %v20362_v1  ;;  %s17351_s14 = scalar_lea.vmem %s20360_s6, %s14245_s11  ;;  %s20198_s29 = scalar_lea.vmem %s20361_s7, %s14245_s11 }
  0x14   : > { %v333_v5 = vld [vmem:[%s14346_s10] sm:$0xff]  ;;  %11889 = vmatmul.mubr.msk.f32.vlgmr.msra.gmra.mrb[0].mxu0 %vm418_vm2, %v375_v4  ;;  %v334_v7 = vld [vmem:[%s14346_s10 + $0x8] sm:$0xff]  ;;  %v335_v9 = vld [vmem:[%s14346_s10 + $0x10] sm:$0xff]  ;;  %5344 = vst.msk [vmem:[#allocation2 + $0x48] sm:$0xff] %vm4866_vm3, %v20362_v1 }
  0x15   : > { %12014 = vmatmul.mubr.msk.f32.vlgmr.msra.gmra.mrb[0].mxu1 %vm418_vm2, %v333_v5  ;;  %12137 = vmatpush3.msk.msra.mxu0 %vm542_vm0, %v10397_v3  ;;  %v378_v10 = vld [vmem:[%s14346_s10 + $0x19] sm:$0xff]  ;;  %v379_v12 = vld [vmem:[%s14346_s10 + $0x21] sm:$0xff]  ;;  %v380_v14 = vld [vmem:[%s14346_s10 + $0x29] sm:$0xff]  ;;  %5345 = vst.msk [vmem:[#allocation2 + $0x50] sm:$0xff] %vm4866_vm3, %v20362_v1 }
  0x16   : > { %11891 = vmatprep.mubr.msk.f32.mxu0 %vm14273_vm1, %v20362_v1  ;;  %12016 = vmatprep.mubr.msk.f32.mxu1 %vm14273_vm1, %v20362_v1  ;;  %v336_v11 = vld [vmem:[%s14346_s10 + $0x18] sm:$0xff]  ;;  %v337_v13 = vld [vmem:[%s14346_s10 + $0x20] sm:$0xff]  ;;  %v338_v15 = vld [vmem:[%s14346_s10 + $0x28] sm:$0xff]  ;;  %5346 = vst.msk [vmem:[#allocation2 + $0x58] sm:$0xff] %vm4866_vm3, %v20362_v1 }
  0x17   : > { %12386 = vmatprep.subr.mxu0 %v20362_v1  ;;  %v381_v16 = vld [vmem:[%s14346_s10 + $0x31] sm:$0xff]  ;;  %v382_v18 = vld [vmem:[%s14346_s10 + $0x39] sm:$0xff]  ;;  %v383_v20 = vld [vmem:[%s14346_s10 + $0x41] sm:$0xff]  ;;  %12262 = vmatpush3.msk.msra.mxu1 %vm542_vm0, %v10440_v22  ;;  %5347 = vst.msk [vmem:[#allocation2 + $0x60] sm:$0xff] %vm4866_vm3, %v20362_v1 }
  0x18   : > { %11892 = vmatmul.mubr.msk.f32.gmra.mrb[2].mxu0 %vm418_vm2, %v376_v6  ;;  %v339_v17 = vld [vmem:[%s14346_s10 + $0x30] sm:$0xff]  ;;  %v340_v19 = vld [vmem:[%s14346_s10 + $0x38] sm:$0xff]  ;;  %v341_v21 = vld [vmem:[%s14346_s10 + $0x40] sm:$0xff]  ;;  %12511 = vmatprep.subr.mxu1 %v20362_v1  ;;  %5348 = vst.msk [vmem:[#allocation2 + $0x68] sm:$0xff] %vm4866_vm3, %v20362_v1 }
  0x19   : > { %12017 = vmatmul.mubr.msk.f32.gmra.mrb[2].mxu1 %vm418_vm2, %v334_v7  ;;  %11894 = vmatprep.mubr.msk.f32.mxu0 %vm14273_vm1, %v20362_v1  ;;  %v384_v23 = vld [vmem:[%s14346_s10 + $0x49] sm:$0xff]  ;;  %v385_v25 = vld [vmem:[%s14346_s10 + $0x51] sm:$0xff]  ;;  %v386_v27 = vld [vmem:[%s14346_s10 + $0x59] sm:$0xff]  ;;  %5349 = vst.msk [vmem:[#allocation2 + $0x70] sm:$0xff] %vm4866_vm3, %v20362_v1 }
  0x1a   : > { %12019 = vmatprep.mubr.msk.f32.mxu1 %vm14273_vm1, %v20362_v1  ;;  %v342_v24 = vld [vmem:[%s14346_s10 + $0x48] sm:$0xff]  ;;  %v343_v26 = vld [vmem:[%s14346_s10 + $0x50] sm:$0xff]  ;;  %v344_v28 = vld [vmem:[%s14346_s10 + $0x58] sm:$0xff]  ;;  %5350 = vst.msk [vmem:[#allocation2 + $0x78] sm:$0xff] %vm4866_vm3, %v20362_v1 }
  0x1b   : > { %v387_v29 = vld [vmem:[%s14346_s10 + $0x61] sm:$0xff]  ;;  %v388_v31 = vld [vmem:[%s14346_s10 + $0x69] sm:$0xff]  ;;  %v389_v33 = vld [vmem:[%s14346_s10 + $0x71] sm:$0xff]  ;;  %5351 = vst.msk [vmem:[#allocation2 + $0x80] sm:$0xff] %vm4866_vm3, %v20362_v1 }
  0x1c   : > { %11895 = vmatmul.mubr.msk.f32.gmra.mrb[4].mxu0 %vm418_vm2, %v377_v8  ;;  %v345_v30 = vld [vmem:[%s14346_s10 + $0x60] sm:$0xff]  ;;  %v346_v32 = vld [vmem:[%s14346_s10 + $0x68] sm:$0xff]  ;;  %v347_v34 = vld [vmem:[%s14346_s10 + $0x70] sm:$0xff]  ;;  %5352 = vst.msk [vmem:[#allocation2 + $0x88] sm:$0xff] %vm4866_vm3, %v20362_v1 }
  0x1d   : > { %12020 = vmatmul.mubr.msk.f32.gmra.mrb[4].mxu1 %vm418_vm2, %v335_v9  ;;  %11897 = vmatprep.mubr.msk.f32.mxu0 %vm14273_vm1, %v20362_v1  ;;  %v390_v35 = vld [vmem:[%s14346_s10 + $0x79] sm:$0xff]  ;;  %v391_v37 = vld [vmem:[%s14346_s10 + $0x81] sm:$0xff]  ;;  %v392_v39 = vld [vmem:[%s14346_s10 + $0x89] sm:$0xff]  ;;  %5353 = vst.msk [vmem:[#allocation2 + $0x90] sm:$0xff] %vm4866_vm3, %v20362_v1 }
  0x1e   : > { %12022 = vmatprep.mubr.msk.f32.mxu1 %vm14273_vm1, %v20362_v1  ;;  %v348_v36 = vld [vmem:[%s14346_s10 + $0x78] sm:$0xff]  ;;  %v349_v38 = vld [vmem:[%s14346_s10 + $0x80] sm:$0xff]  ;;  %v350_v40 = vld [vmem:[%s14346_s10 + $0x88] sm:$0xff]  ;;  %5354 = vst.msk [vmem:[#allocation2 + $0x98] sm:$0xff] %vm4866_vm3, %v20362_v1 }
  0x1f   : > { %v393_v41 = vld [vmem:[%s14346_s10 + $0x91] sm:$0xff]  ;;  %v394_v43 = vld [vmem:[%s14346_s10 + $0x99] sm:$0xff]  ;;  %v395_v45 = vld [vmem:[%s14346_s10 + $0xa1] sm:$0xff]  ;;  %5355 = vst.msk [vmem:[#allocation2 + $0xa0] sm:$0xff] %vm4866_vm3, %v20362_v1 }
  0x20   : > { %11898 = vmatmul.mubr.msk.f32.gmra.mrb[6].mxu0 %vm418_vm2, %v378_v10  ;;  %v351_v42 = vld [vmem:[%s14346_s10 + $0x90] sm:$0xff]  ;;  %v352_v44 = vld [vmem:[%s14346_s10 + $0x98] sm:$0xff]  ;;  %v353_v46 = vld [vmem:[%s14346_s10 + $0xa0] sm:$0xff]  ;;  %5356 = vst.msk [vmem:[#allocation2 + $0xa8] sm:$0xff] %vm4866_vm3, %v20362_v1 }
  0x21   : > { %12023 = vmatmul.mubr.msk.f32.gmra.mrb[6].mxu1 %vm418_vm2, %v336_v11  ;;  %11900 = vmatprep.mubr.msk.f32.mxu0 %vm14273_vm1, %v20362_v1  ;;  %v396_v47 = vld [vmem:[%s14346_s10 + $0xa9] sm:$0xff]  ;;  %v397_v49 = vld [vmem:[%s14346_s10 + $0xb1] sm:$0xff]  ;;  %v398_v51 = vld [vmem:[%s14346_s10 + $0xb9] sm:$0xff]  ;;  %5357 = vst.msk [vmem:[#allocation2 + $0xb0] sm:$0xff] %vm4866_vm3, %v20362_v1 }
  0x22   : > { %12025 = vmatprep.mubr.msk.f32.mxu1 %vm14273_vm1, %v20362_v1  ;;  %v354_v48 = vld [vmem:[%s14346_s10 + $0xa8] sm:$0xff]  ;;  %v355_v50 = vld [vmem:[%s14346_s10 + $0xb0] sm:$0xff]  ;;  %v356_v52 = vld [vmem:[%s14346_s10 + $0xb8] sm:$0xff]  ;;  %5358 = vst.msk [vmem:[#allocation2 + $0xb8] sm:$0xff] %vm4866_vm3, %v20362_v1 }
  0x23   : > { %v399_v53 = vld [vmem:[%s14346_s10 + $0xc1] sm:$0xff]  ;;  %v400_v55 = vld [vmem:[%s14346_s10 + $0xc9] sm:$0xff]  ;;  %v401_v57 = vld [vmem:[%s14346_s10 + $0xd1] sm:$0xff]  ;;  %5359 = vst.msk [vmem:[#allocation2 + $0xc0] sm:$0xff] %vm4866_vm3, %v20362_v1 }
  0x24   : > { %11901 = vmatmul.mubr.msk.f32.gmra.mrb[8].mxu0 %vm418_vm2, %v379_v12  ;;  %v357_v54 = vld [vmem:[%s14346_s10 + $0xc0] sm:$0xff]  ;;  %v358_v56 = vld [vmem:[%s14346_s10 + $0xc8] sm:$0xff]  ;;  %v359_v58 = vld [vmem:[%s14346_s10 + $0xd0] sm:$0xff]  ;;  %5360 = vst.msk [vmem:[#allocation2 + $0xc8] sm:$0xff] %vm4866_vm3, %v20362_v1 }
  0x25   : > { %12026 = vmatmul.mubr.msk.f32.gmra.mrb[8].mxu1 %vm418_vm2, %v337_v13  ;;  %11903 = vmatprep.mubr.msk.f32.mxu0 %vm14273_vm1, %v20362_v1  ;;  %v402_v59 = vld [vmem:[%s14346_s10 + $0xd9] sm:$0xff]  ;;  %v403_v61 = vld [vmem:[%s14346_s10 + $0xe1] sm:$0xff]  ;;  %v404_v63 = vld [vmem:[%s14346_s10 + $0xe9] sm:$0xff]  ;;  %5361 = vst.msk [vmem:[#allocation2 + $0xd0] sm:$0xff] %vm4866_vm3, %v20362_v1 }
  0x26   : > { %12028 = vmatprep.mubr.msk.f32.mxu1 %vm14273_vm1, %v20362_v1  ;;  %v360_v60 = vld [vmem:[%s14346_s10 + $0xd8] sm:$0xff]  ;;  %v361_v62 = vld [vmem:[%s14346_s10 + $0xe0] sm:$0xff]  ;;  %v362_v0 = vld [vmem:[%s14346_s10 + $0xe8] sm:$0xff]  ;;  %5362 = vst.msk [vmem:[#allocation2 + $0xd8] sm:$0xff] %vm4866_vm3, %v20362_v1 }
  0x27   : > { %v405_v2 = vld [vmem:[%s14346_s10 + $0xf1] sm:$0xff]  ;;  %v406_v4 = vld [vmem:[%s14346_s10 + $0xf9] sm:$0xff]  ;;  %v407_v6 = vld [vmem:[%s14346_s10 + $0x101] sm:$0xff]  ;;  %5363 = vst.msk [vmem:[#allocation2 + $0xe0] sm:$0xff] %vm4866_vm3, %v20362_v1 }
  0x28   : > { %11904 = vmatmul.mubr.msk.f32.gmra.mrb[10].mxu0 %vm418_vm2, %v380_v14  ;;  %v363_v3 = vld [vmem:[%s14346_s10 + $0xf0] sm:$0xff]  ;;  %v364_v5 = vld [vmem:[%s14346_s10 + $0xf8] sm:$0xff]  ;;  %v365_v7 = vld [vmem:[%s14346_s10 + $0x100] sm:$0xff]  ;;  %5364 = vst.msk [vmem:[#allocation2 + $0xe8] sm:$0xff] %vm4866_vm3, %v20362_v1 }
  0x29   : > { %12029 = vmatmul.mubr.msk.f32.gmra.mrb[10].mxu1 %vm418_vm2, %v338_v15  ;;  %11906 = vmatprep.mubr.msk.f32.mxu0 %vm14273_vm1, %v20362_v1  ;;  %v408_v8 = vld [vmem:[%s14346_s10 + $0x109] sm:$0xff]  ;;  %v409_v10 = vld [vmem:[%s14346_s10 + $0x111] sm:$0xff]  ;;  %v410_v12 = vld [vmem:[%s14346_s10 + $0x119] sm:$0xff]  ;;  %5365 = vst.msk [vmem:[#allocation2 + $0xf0] sm:$0xff] %vm4866_vm3, %v20362_v1 }
  0x2a   : > { %12031 = vmatprep.mubr.msk.f32.mxu1 %vm14273_vm1, %v20362_v1  ;;  %v366_v9 = vld [vmem:[%s14346_s10 + $0x108] sm:$0xff]  ;;  %v367_v11 = vld [vmem:[%s14346_s10 + $0x110] sm:$0xff]  ;;  %v368_v13 = vld [vmem:[%s14346_s10 + $0x118] sm:$0xff]  ;;  %5366 = vst.msk [vmem:[#allocation2 + $0xf8] sm:$0xff] %vm4866_vm3, %v20362_v1 }
  0x2b   : > { %v411_v14 = vld [vmem:[%s14346_s10 + $0x121] sm:$0xff]  ;;  %5367 = vst.msk [vmem:[#allocation2 + $0x100] sm:$0xff] %vm4866_vm3, %v20362_v1  ;;  %5368 = vst.msk [vmem:[#allocation2 + $0x108] sm:$0xff] %vm4866_vm3, %v20362_v1 }
  0x2c   : > { %11907 = vmatmul.mubr.msk.f32.gmra.mrb[12].mxu0 %vm418_vm2, %v381_v16  ;;  %v369_v15 = vld [vmem:[%s14346_s10 + $0x120] sm:$0xff]  ;;  %v412_v16 = vld [vmem:[%s14346_s10 + $0x129] sm:$0xff]  ;;  %5369 = vst.msk [vmem:[#allocation2 + $0x110] sm:$0xff] %vm4866_vm3, %v20362_v1  ;;  %5370 = vst.msk [vmem:[#allocation2 + $0x118] sm:$0xff] %vm4866_vm3, %v20362_v1 }
  0x2d   : > { %12032 = vmatmul.mubr.msk.f32.gmra.mrb[12].mxu1 %vm418_vm2, %v339_v17  ;;  %11909 = vmatprep.mubr.msk.f32.mxu0 %vm14273_vm1, %v20362_v1  ;;  %v370_v17 = vld [vmem:[%s14346_s10 + $0x128] sm:$0xff]  ;;  %v415_v22 = vld [vmem:[%s14346_s10 + $0x141] sm:$0xf]  ;;  %5371 = vst.msk [vmem:[#allocation2 + $0x120] sm:$0xff] %vm4866_vm3, %v20362_v1  ;;  %5372 = vst.msk [vmem:[#allocation2 + $0x128] sm:$0xff] %vm4866_vm3, %v20362_v1 }
  0x2e   : > { %12034 = vmatprep.mubr.msk.f32.mxu1 %vm14273_vm1, %v20362_v1  ;;  %5373 = vst.msk [vmem:[#allocation2 + $0x130] sm:$0xff] %vm4866_vm3, %v20362_v1  ;;  %5374 = vst.msk [vmem:[#allocation2 + $0x138] sm:$0xff] %vm4866_vm3, %v20362_v1 }
  0x2f   : > { %5375 = vst.msk [vmem:[#allocation2 + $0x140] sm:$0xff] %vm4866_vm3, %v20362_v1  ;;  %5376 = vst.msk [vmem:[#allocation2 + $0x148] sm:$0xff] %vm4866_vm3, %v20362_v1 }
  0x30   : > { %11910 = vmatmul.mubr.msk.f32.gmra.mrb[14].mxu0 %vm418_vm2, %v382_v18  ;;  %v413_v18 = vld [vmem:[%s14346_s10 + $0x131] sm:$0xff]  ;;  %5377 = vst.msk [vmem:[#allocation2 + $0x150] sm:$0xff] %vm4866_vm3, %v20362_v1  ;;  %5378 = vst.msk [vmem:[#allocation2 + $0x158] sm:$0xff] %vm4866_vm3, %v20362_v1 }
  0x31   : > { %12035 = vmatmul.mubr.msk.f32.gmra.mrb[14].mxu1 %vm418_vm2, %v340_v19  ;;  %11912 = vmatprep.mubr.msk.f32.mxu0 %vm14273_vm1, %v20362_v1  ;;  %v371_v19 = vld [vmem:[%s14346_s10 + $0x130] sm:$0xff]  ;;  %5379 = vst.msk [vmem:[#allocation2 + $0x160] sm:$0xff] %vm4866_vm3, %v20362_v1 }
  0x32   : > { %12037 = vmatprep.mubr.msk.f32.mxu1 %vm14273_vm1, %v20362_v1 }
  0x34   : > { %11913 = vmatmul.mubr.msk.f32.gmra.mrb[16].mxu0 %vm418_vm2, %v383_v20  ;;  %v414_v20 = vld [vmem:[%s14346_s10 + $0x139] sm:$0xff] }
  0x35   : > { %12038 = vmatmul.mubr.msk.f32.gmra.mrb[16].mxu1 %vm418_vm2, %v341_v21  ;;  %11915 = vmatprep.mubr.msk.f32.mxu0 %vm14273_vm1, %v20362_v1  ;;  %v372_v21 = vld [vmem:[%s14346_s10 + $0x138] sm:$0xff] }
  0x36   : > { %12040 = vmatprep.mubr.msk.f32.mxu1 %vm14273_vm1, %v20362_v1 }
  0x38   : > { %11916 = vmatmul.mubr.msk.f32.gmra.mrb[18].mxu0 %vm418_vm2, %v384_v23  ;;  %v373_v23 = vld [vmem:[%s14346_s10 + $0x140] sm:$0xf] }
  0x39   : > { %12041 = vmatmul.mubr.msk.f32.gmra.mrb[18].mxu1 %vm418_vm2, %v342_v24  ;;  %11918 = vmatprep.mubr.msk.f32.mxu0 %vm14273_vm1, %v20362_v1  ;;  %v1212_v24 = vld [vmem:[%s14346_s10 + $0x2] sm:$0xff] }
  0x3a   : > { %12043 = vmatprep.mubr.msk.f32.mxu1 %vm14273_vm1, %v20362_v1 }
  0x3c   : > { %11919 = vmatmul.mubr.msk.f32.gmra.mrb[20].mxu0 %vm418_vm2, %v385_v25  ;;  %v1692_v25 = vld [vmem:[%s14346_s10 + $0x12] sm:$0xff] }
  0x3d   : > { %12044 = vmatmul.mubr.msk.f32.gmra.mrb[20].mxu1 %vm418_vm2, %v343_v26  ;;  %11921 = vmatprep.mubr.msk.f32.mxu0 %vm14273_vm1, %v20362_v1  ;;  %v10483_v26 = vld [vmem:[%s20356_s2 + $0x10] sm:$0xf] }
  0x3e   : > { %12046 = vmatprep.mubr.msk.f32.mxu1 %vm14273_vm1, %v20362_v1 }
  0x40   : > { %11922 = vmatmul.mubr.msk.f32.gmra.mrb[22].mxu0 %vm418_vm2, %v386_v27  ;;  %v1213_v27 = vld [vmem:[%s14346_s10 + $0xa] sm:$0xff] }
  0x41   : > { %12047 = vmatmul.mubr.msk.f32.gmra.mrb[22].mxu1 %vm418_vm2, %v344_v28  ;;  %11924 = vmatprep.mubr.msk.f32.mxu0 %vm14273_vm1, %v20362_v1  ;;  %v1693_v28 = vld [vmem:[%s14346_s10 + $0x1a] sm:$0xff] }
  0x42   : > { %12049 = vmatprep.mubr.msk.f32.mxu1 %vm14273_vm1, %v20362_v1 }
  0x44   : > { %11925 = vmatmul.mubr.msk.f32.gmra.mrb[24].mxu0 %vm418_vm2, %v387_v29  ;;  %v1694_v29 = vld [vmem:[%s14346_s10 + $0x22] sm:$0xff] }
  0x45   : > { %12050 = vmatmul.mubr.msk.f32.gmra.mrb[24].mxu1 %vm418_vm2, %v345_v30  ;;  %11927 = vmatprep.mubr.msk.f32.mxu0 %vm14273_vm1, %v20362_v1  ;;  %v1695_v30 = vld [vmem:[%s14346_s10 + $0x2a] sm:$0xff] }
  0x46   : > { %12052 = vmatprep.mubr.msk.f32.mxu1 %vm14273_vm1, %v20362_v1 }
  0x48   : > { %11928 = vmatmul.mubr.msk.f32.gmra.mrb[26].mxu0 %vm418_vm2, %v388_v31  ;;  %v1696_v31 = vld [vmem:[%s14346_s10 + $0x32] sm:$0xff] }
  0x49   : > { %12053 = vmatmul.mubr.msk.f32.gmra.mrb[26].mxu1 %vm418_vm2, %v346_v32  ;;  %11930 = vmatprep.mubr.msk.f32.mxu0 %vm14273_vm1, %v20362_v1  ;;  %v1697_v32 = vld [vmem:[%s14346_s10 + $0x3a] sm:$0xff] }
  0x4a   : > { %12055 = vmatprep.mubr.msk.f32.mxu1 %vm14273_vm1, %v20362_v1 }
  0x4c   : > { %11931 = vmatmul.mubr.msk.f32.gmra.mrb[28].mxu0 %vm418_vm2, %v389_v33  ;;  %v1698_v33 = vld [vmem:[%s14346_s10 + $0x42] sm:$0xff] }
  0x4d   : > { %12056 = vmatmul.mubr.msk.f32.gmra.mrb[28].mxu1 %vm418_vm2, %v347_v34  ;;  %11933 = vmatprep.mubr.msk.f32.mxu0 %vm14273_vm1, %v20362_v1  ;;  %v1699_v34 = vld [vmem:[%s14346_s10 + $0x4a] sm:$0xff] }
  0x4e   : > { %12058 = vmatprep.mubr.msk.f32.mxu1 %vm14273_vm1, %v20362_v1 }
  0x50   : > { %11934 = vmatmul.mubr.msk.f32.gmra.mrb[30].mxu0 %vm418_vm2, %v390_v35  ;;  %v1700_v35 = vld [vmem:[%s14346_s10 + $0x52] sm:$0xff] }
  0x51   : > { %12059 = vmatmul.mubr.msk.f32.gmra.mrb[30].mxu1 %vm418_vm2, %v348_v36  ;;  %11936 = vmatprep.mubr.msk.f32.mxu0 %vm14273_vm1, %v20362_v1  ;;  %v10526_v36 = vld [vmem:[%s20356_s2 + $0x14] sm:$0xf] }
  0x52   : > { %12061 = vmatprep.mubr.msk.f32.mxu1 %vm14273_vm1, %v20362_v1 }
  0x54   : > { %11937 = vmatmul.mubr.msk.f32.gmra.mrb[32].mxu0 %vm418_vm2, %v391_v37  ;;  %v1701_v37 = vld [vmem:[%s14346_s10 + $0x5a] sm:$0xff] }
  0x55   : > { %12062 = vmatmul.mubr.msk.f32.gmra.mrb[32].mxu1 %vm418_vm2, %v349_v38  ;;  %11939 = vmatprep.mubr.msk.f32.mxu0 %vm14273_vm1, %v20362_v1  ;;  %v1702_v38 = vld [vmem:[%s14346_s10 + $0x62] sm:$0xff] }
  0x56   : > { %12064 = vmatprep.mubr.msk.f32.mxu1 %vm14273_vm1, %v20362_v1 }
  0x58   : > { %11940 = vmatmul.mubr.msk.f32.gmra.mrb[34].mxu0 %vm418_vm2, %v392_v39  ;;  %v1703_v39 = vld [vmem:[%s14346_s10 + $0x6a] sm:$0xff] }
  0x59   : > { %12065 = vmatmul.mubr.msk.f32.gmra.mrb[34].mxu1 %vm418_vm2, %v350_v40  ;;  %11942 = vmatprep.mubr.msk.f32.mxu0 %vm14273_vm1, %v20362_v1  ;;  %v1704_v40 = vld [vmem:[%s14346_s10 + $0x72] sm:$0xff] }
  0x5a   : > { %12067 = vmatprep.mubr.msk.f32.mxu1 %vm14273_vm1, %v20362_v1 }
  0x5c   : > { %11943 = vmatmul.mubr.msk.f32.gmra.mrb[36].mxu0 %vm418_vm2, %v393_v41 }
  0x5d   : > { %12068 = vmatmul.mubr.msk.f32.gmra.mrb[36].mxu1 %vm418_vm2, %v351_v42  ;;  %11945 = vmatprep.mubr.msk.f32.mxu0 %vm14273_vm1, %v20362_v1 }
  0x5e   : > { %12070 = vmatprep.mubr.msk.f32.mxu1 %vm14273_vm1, %v20362_v1 }
  0x60   : > { %11946 = vmatmul.mubr.msk.f32.gmra.mrb[38].mxu0 %vm418_vm2, %v394_v43 }
  0x61   : > { %12071 = vmatmul.mubr.msk.f32.gmra.mrb[38].mxu1 %vm418_vm2, %v352_v44  ;;  %11948 = vmatprep.mubr.msk.f32.mxu0 %vm14273_vm1, %v20362_v1 }
  0x62   : > { %12073 = vmatprep.mubr.msk.f32.mxu1 %vm14273_vm1, %v20362_v1 }
  0x64   : > { %11949 = vmatmul.mubr.msk.f32.gmra.mrb[40].mxu0 %vm418_vm2, %v395_v45 }
  0x65   : > { %12074 = vmatmul.mubr.msk.f32.gmra.mrb[40].mxu1 %vm418_vm2, %v353_v46  ;;  %11951 = vmatprep.mubr.msk.f32.mxu0 %vm14273_vm1, %v20362_v1  ;;  %v1705_v46 = vld [vmem:[%s14346_s10 + $0x7a] sm:$0xff] }
  0x66   : > { %12076 = vmatprep.mubr.msk.f32.mxu1 %vm14273_vm1, %v20362_v1 }
  0x68   : > { %11952 = vmatmul.mubr.msk.f32.gmra.mrb[42].mxu0 %vm418_vm2, %v396_v47 }
  0x69   : > { %12077 = vmatmul.mubr.msk.f32.gmra.mrb[42].mxu1 %vm418_vm2, %v354_v48  ;;  %11954 = vmatprep.mubr.msk.f32.mxu0 %vm14273_vm1, %v20362_v1 }
  0x6a   : > { %12079 = vmatprep.mubr.msk.f32.mxu1 %vm14273_vm1, %v20362_v1 }
  0x6c   : > { %11955 = vmatmul.mubr.msk.f32.gmra.mrb[44].mxu0 %vm418_vm2, %v397_v49 }
  0x6d   : > { %12080 = vmatmul.mubr.msk.f32.gmra.mrb[44].mxu1 %vm418_vm2, %v355_v50  ;;  %11957 = vmatprep.mubr.msk.f32.mxu0 %vm14273_vm1, %v20362_v1 }
  0x6e   : > { %12082 = vmatprep.mubr.msk.f32.mxu1 %vm14273_vm1, %v20362_v1 }
  0x70   : > { %11958 = vmatmul.mubr.msk.f32.gmra.mrb[46].mxu0 %vm418_vm2, %v398_v51 }
  0x71   : > { %12083 = vmatmul.mubr.msk.f32.gmra.mrb[46].mxu1 %vm418_vm2, %v356_v52  ;;  %11960 = vmatprep.mubr.msk.f32.mxu0 %vm14273_vm1, %v20362_v1  ;;  %v1706_v52 = vld [vmem:[%s14346_s10 + $0x82] sm:$0xff] }
  0x72   : > { %12085 = vmatprep.mubr.msk.f32.mxu1 %vm14273_vm1, %v20362_v1 }
  0x74   : > { %11961 = vmatmul.mubr.msk.f32.gmra.mrb[48].mxu0 %vm418_vm2, %v399_v53 }
  0x75   : > { %12086 = vmatmul.mubr.msk.f32.gmra.mrb[48].mxu1 %vm418_vm2, %v357_v54  ;;  %11963 = vmatprep.mubr.msk.f32.mxu0 %vm14273_vm1, %v20362_v1 }
  0x76   : > { %12088 = vmatprep.mubr.msk.f32.mxu1 %vm14273_vm1, %v20362_v1 }
  0x78   : > { %11964 = vmatmul.mubr.msk.f32.gmra.mrb[50].mxu0 %vm418_vm2, %v400_v55 }
  0x79   : > { %12089 = vmatmul.mubr.msk.f32.gmra.mrb[50].mxu1 %vm418_vm2, %v358_v56  ;;  %11966 = vmatprep.mubr.msk.f32.mxu0 %vm14273_vm1, %v20362_v1 }
  0x7a   : > { %12091 = vmatprep.mubr.msk.f32.mxu1 %vm14273_vm1, %v20362_v1 }
  0x7c   : > { %11967 = vmatmul.mubr.msk.f32.gmra.mrb[52].mxu0 %vm418_vm2, %v401_v57 }
  0x7d   : > { %12092 = vmatmul.mubr.msk.f32.gmra.mrb[52].mxu1 %vm418_vm2, %v359_v58  ;;  %11969 = vmatprep.mubr.msk.f32.mxu0 %vm14273_vm1, %v20362_v1  ;;  %v1707_v58 = vld [vmem:[%s14346_s10 + $0x8a] sm:$0xff] }
  0x7e   : > { %12094 = vmatprep.mubr.msk.f32.mxu1 %vm14273_vm1, %v20362_v1 }
  0x80   : > { %11970 = vmatmul.mubr.msk.f32.gmra.mrb[54].mxu0 %vm418_vm2, %v402_v59 }
  0x81   : > { %12095 = vmatmul.mubr.msk.f32.gmra.mrb[54].mxu1 %vm418_vm2, %v360_v60  ;;  %11972 = vmatprep.mubr.msk.f32.mxu0 %vm14273_vm1, %v20362_v1 }
  0x82   : > { %12097 = vmatprep.mubr.msk.f32.mxu1 %vm14273_vm1, %v20362_v1 }
  0x84   : > { %11973 = vmatmul.mubr.msk.f32.gmra.mrb[56].mxu0 %vm418_vm2, %v403_v61 }
  0x85   : > { %12098 = vmatmul.mubr.msk.f32.gmra.mrb[56].mxu1 %vm418_vm2, %v361_v62  ;;  %11975 = vmatprep.mubr.msk.f32.mxu0 %vm14273_vm1, %v20362_v1 }
  0x86   : > { %12100 = vmatprep.mubr.msk.f32.mxu1 %vm14273_vm1, %v20362_v1 }
  0x88   : > { %11976 = vmatmul.mubr.msk.f32.gmra.mrb[58].mxu0 %vm418_vm2, %v404_v63 }
  0x89   : > { %12101 = vmatmul.mubr.msk.f32.gmra.mrb[58].mxu1 %vm418_vm2, %v362_v0  ;;  %11978 = vmatprep.mubr.msk.f32.mxu0 %vm14273_vm1, %v20362_v1  ;;  %v1708_v0 = vld [vmem:[%s14346_s10 + $0x92] sm:$0xff] }
  0x8a   : > { %12103 = vmatprep.mubr.msk.f32.mxu1 %vm14273_vm1, %v20362_v1 }
  0x8c   : > { %11979 = vmatmul.mubr.msk.f32.gmra.mrb[60].mxu0 %vm418_vm2, %v405_v2 }
  0x8d   : > { %12104 = vmatmul.mubr.msk.f32.gmra.mrb[60].mxu1 %vm418_vm2, %v363_v3  ;;  %11981 = vmatprep.mubr.msk.f32.mxu0 %vm14273_vm1, %v20362_v1 }
  0x8e   : > { %12106 = vmatprep.mubr.msk.f32.mxu1 %vm14273_vm1, %v20362_v1 }
  0x90   : > { %11982 = vmatmul.mubr.msk.f32.gmra.mrb[62].mxu0 %vm418_vm2, %v406_v4 }
  0x91   : > { %12107 = vmatmul.mubr.msk.f32.gmra.mrb[62].mxu1 %vm418_vm2, %v364_v5  ;;  %11984 = vmatprep.mubr.msk.f32.mxu0 %vm14273_vm1, %v20362_v1 }
  0x92   : > { %12109 = vmatprep.mubr.msk.f32.mxu1 %vm14273_vm1, %v20362_v1 }
  0x94   : > { %11985 = vmatmul.mubr.msk.f32.gmra.mrb[64].mxu0 %vm418_vm2, %v407_v6 }
  0x95   : > { %12110 = vmatmul.mubr.msk.f32.gmra.mrb[64].mxu1 %vm418_vm2, %v365_v7  ;;  %11987 = vmatprep.mubr.msk.f32.mxu0 %vm14273_vm1, %v20362_v1  ;;  %v1709_v7 = vld [vmem:[%s14346_s10 + $0x9a] sm:$0xff] }
  0x96   : > { %12112 = vmatprep.mubr.msk.f32.mxu1 %vm14273_vm1, %v20362_v1 }
  0x98   : > { %11988 = vmatmul.mubr.msk.f32.gmra.mrb[66].mxu0 %vm418_vm2, %v408_v8 }
  0x99   : > { %12113 = vmatmul.mubr.msk.f32.gmra.mrb[66].mxu1 %vm418_vm2, %v366_v9  ;;  %11990 = vmatprep.mubr.msk.f32.mxu0 %vm14273_vm1, %v20362_v1 }
  0x9a   : > { %12115 = vmatprep.mubr.msk.f32.mxu1 %vm14273_vm1, %v20362_v1 }
  0x9c   : > { %11991 = vmatmul.mubr.msk.f32.gmra.mrb[68].mxu0 %vm418_vm2, %v409_v10 }
  0x9d   : > { %12116 = vmatmul.mubr.msk.f32.gmra.mrb[68].mxu1 %vm418_vm2, %v367_v11  ;;  %11993 = vmatprep.mubr.msk.f32.mxu0 %vm14273_vm1, %v20362_v1 }
  0x9e   : > { %12118 = vmatprep.mubr.msk.f32.mxu1 %vm14273_vm1, %v20362_v1 }
  0xa0   : > { %11994 = vmatmul.mubr.msk.f32.gmra.mrb[70].mxu0 %vm418_vm2, %v410_v12 }
  0xa1   : > { %12119 = vmatmul.mubr.msk.f32.gmra.mrb[70].mxu1 %vm418_vm2, %v368_v13  ;;  %11996 = vmatprep.mubr.msk.f32.mxu0 %vm14273_vm1, %v20362_v1  ;;  %v1710_v13 = vld [vmem:[%s14346_s10 + $0xa2] sm:$0xff] }
  0xa2   : > { %12121 = vmatprep.mubr.msk.f32.mxu1 %vm14273_vm1, %v20362_v1 }
  0xa4   : > { %11997 = vmatmul.mubr.msk.f32.gmra.mrb[72].mxu0 %vm418_vm2, %v411_v14 }
  0xa5   : > { %12122 = vmatmul.mubr.msk.f32.gmra.mrb[72].mxu1 %vm418_vm2, %v369_v15  ;;  %11999 = vmatprep.mubr.msk.f32.mxu0 %vm14273_vm1, %v20362_v1 }
  0xa6   : > { %12124 = vmatprep.mubr.msk.f32.mxu1 %vm14273_vm1, %v20362_v1 }
  0xa8   : > { %12000 = vmatmul.mubr.msk.f32.gmra.mrb[74].mxu0 %vm418_vm2, %v412_v16 }
  0xa9   : > { %12125 = vmatmul.mubr.msk.f32.gmra.mrb[74].mxu1 %vm418_vm2, %v370_v17  ;;  %12002 = vmatprep.mubr.msk.f32.mxu0 %vm14273_vm1, %v20362_v1 }
  0xaa   : > { %12127 = vmatprep.mubr.msk.f32.mxu1 %vm14273_vm1, %v20362_v1 }
  0xac   : > { %12003 = vmatmul.mubr.msk.f32.gmra.mrb[76].mxu0 %vm418_vm2, %v413_v18 }
  0xad   : > { %12128 = vmatmul.mubr.msk.f32.gmra.mrb[76].mxu1 %vm418_vm2, %v371_v19  ;;  %12005 = vmatprep.mubr.msk.f32.mxu0 %vm14273_vm1, %v20362_v1  ;;  %v1711_v19 = vld [vmem:[%s14346_s10 + $0xaa] sm:$0xff] }
  0xae   : > { %12130 = vmatprep.mubr.msk.f32.mxu1 %vm14273_vm1, %v20362_v1 }
  0xb0   : > { %12006 = vmatmul.mubr.msk.f32.gmra.mrb[78].mxu0 %vm418_vm2, %v414_v20 }
  0xb1   : > { %12131 = vmatmul.mubr.msk.f32.gmra.mrb[78].mxu1 %vm418_vm2, %v372_v21  ;;  %12008 = vmatprep.mubr.msk.f32.mxu0 %vm14273_vm1, %v20362_v1 }
  0xb2   : > { %12133 = vmatprep.mubr.msk.f32.mxu1 %vm14273_vm1, %v20362_v1 }
  0xb4   : > { %12009 = vmatmul.mubr.msk.f32.gmra.mrb[80].mxu0 %vm418_vm2, %v415_v22 }
  0xb5   : > { %12134 = vmatmul.mubr.msk.f32.gmra.mrb[80].mxu1 %vm418_vm2, %v373_v23  ;;  %12138 = vmatprep.mubr.msk.f32.mxu0 %vm14273_vm1, %v20362_v1 }
  0xb6   : > { %12263 = vmatprep.mubr.msk.f32.mxu1 %vm14273_vm1, %v20362_v1 }
  0xb8   : > { %12139 = vmatmul.mubr.msk.f32.vlgmr.msra.gmra.mrb[82].mxu0 %vm418_vm2, %v1212_v24 }
  0xb9   : > { %12264 = vmatmul.mubr.msk.f32.vlgmr.msra.gmra.mrb[82].mxu1 %vm418_vm2, %v1692_v25  ;;  %12387 = vmatpush3.msk.msra.mxu0 %vm542_vm0, %v10483_v26 }
  0xba   : > { %12141 = vmatprep.mubr.msk.f32.mxu0 %vm14273_vm1, %v20362_v1  ;;  %12266 = vmatprep.mubr.msk.f32.mxu1 %vm14273_vm1, %v20362_v1 }
  0xbb   : > { %12636 = vmatprep.subr.mxu0 %v20362_v1  ;;  %12512 = vmatpush3.msk.msra.mxu1 %vm542_vm0, %v10526_v36 }
  0xbc   : > { %12142 = vmatmul.mubr.msk.f32.gmra.mrb[84].mxu0 %vm418_vm2, %v1213_v27  ;;  %12761 = vmatprep.subr.mxu1 %v20362_v1 }
  0xbd   : > { %12267 = vmatmul.mubr.msk.f32.gmra.mrb[84].mxu1 %vm418_vm2, %v1693_v28  ;;  %12144 = vmatprep.mubr.msk.f32.mxu0 %vm14273_vm1, %v20362_v1 }
  0xbe   : > { %12269 = vmatprep.mubr.msk.f32.mxu1 %vm14273_vm1, %v20362_v1 }
  0xc0   : > { %12145 = vmatmul.mubr.msk.f32.gmra.mrb[86].mxu0 %vm418_vm2, %v1692_v25  ;;  %v1712_v25 = vld [vmem:[%s14346_s10 + $0xb2] sm:$0xff] }
  0xc1   : > { %12270 = vmatmul.mubr.msk.f32.gmra.mrb[86].mxu1 %vm418_vm2, %v1694_v29  ;;  %12147 = vmatprep.mubr.msk.f32.mxu0 %vm14273_vm1, %v20362_v1 }
  0xc2   : > { %12272 = vmatprep.mubr.msk.f32.mxu1 %vm14273_vm1, %v20362_v1 }
  0xc4   : > { %12148 = vmatmul.mubr.msk.f32.gmra.mrb[88].mxu0 %vm418_vm2, %v1693_v28 }
  0xc5   : > { %12273 = vmatmul.mubr.msk.f32.gmra.mrb[88].mxu1 %vm418_vm2, %v1695_v30  ;;  %12150 = vmatprep.mubr.msk.f32.mxu0 %vm14273_vm1, %v20362_v1 }
  0xc6   : > { %12275 = vmatprep.mubr.msk.f32.mxu1 %vm14273_vm1, %v20362_v1 }
  0xc8   : > { %12151 = vmatmul.mubr.msk.f32.gmra.mrb[90].mxu0 %vm418_vm2, %v1694_v29 }
  0xc9   : > { %12276 = vmatmul.mubr.msk.f32.gmra.mrb[90].mxu1 %vm418_vm2, %v1696_v31  ;;  %12153 = vmatprep.mubr.msk.f32.mxu0 %vm14273_vm1, %v20362_v1 }
  0xca   : > { %12278 = vmatprep.mubr.msk.f32.mxu1 %vm14273_vm1, %v20362_v1 }
  0xcc   : > { %12154 = vmatmul.mubr.msk.f32.gmra.mrb[92].mxu0 %vm418_vm2, %v1695_v30 }
  0xcd   : > { %12279 = vmatmul.mubr.msk.f32.gmra.mrb[92].mxu1 %vm418_vm2, %v1697_v32  ;;  %12156 = vmatprep.mubr.msk.f32.mxu0 %vm14273_vm1, %v20362_v1 }
  0xce   : > { %12281 = vmatprep.mubr.msk.f32.mxu1 %vm14273_vm1, %v20362_v1 }
  0xd0   : > { %12157 = vmatmul.mubr.msk.f32.gmra.mrb[94].mxu0 %vm418_vm2, %v1696_v31  ;;  %v1713_v31 = vld [vmem:[%s14346_s10 + $0xba] sm:$0xff] }
  0xd1   : > { %12282 = vmatmul.mubr.msk.f32.gmra.mrb[94].mxu1 %vm418_vm2, %v1698_v33  ;;  %12159 = vmatprep.mubr.msk.f32.mxu0 %vm14273_vm1, %v20362_v1 }
  0xd2   : > { %12284 = vmatprep.mubr.msk.f32.mxu1 %vm14273_vm1, %v20362_v1 }
  0xd4   : > { %12160 = vmatmul.mubr.msk.f32.gmra.mrb[96].mxu0 %vm418_vm2, %v1697_v32 }
  0xd5   : > { %12285 = vmatmul.mubr.msk.f32.gmra.mrb[96].mxu1 %vm418_vm2, %v1699_v34  ;;  %12162 = vmatprep.mubr.msk.f32.mxu0 %vm14273_vm1, %v20362_v1 }
  0xd6   : > { %12287 = vmatprep.mubr.msk.f32.mxu1 %vm14273_vm1, %v20362_v1 }
  0xd8   : > { %12163 = vmatmul.mubr.msk.f32.gmra.mrb[98].mxu0 %vm418_vm2, %v1698_v33 }
  0xd9   : > { %12288 = vmatmul.mubr.msk.f32.gmra.mrb[98].mxu1 %vm418_vm2, %v1700_v35  ;;  %12165 = vmatprep.mubr.msk.f32.mxu0 %vm14273_vm1, %v20362_v1 }
  0xda   : > { %12290 = vmatprep.mubr.msk.f32.mxu1 %vm14273_vm1, %v20362_v1 }
  0xdc   : > { %12166 = vmatmul.mubr.msk.f32.gmra.mrb[100].mxu0 %vm418_vm2, %v1699_v34 }
  0xdd   : > { %12291 = vmatmul.mubr.msk.f32.gmra.mrb[100].mxu1 %vm418_vm2, %v1701_v37  ;;  %12168 = vmatprep.mubr.msk.f32.mxu0 %vm14273_vm1, %v20362_v1 }
  0xde   : > { %12293 = vmatprep.mubr.msk.f32.mxu1 %vm14273_vm1, %v20362_v1 }
  0xe0   : > { %12169 = vmatmul.mubr.msk.f32.gmra.mrb[102].mxu0 %vm418_vm2, %v1700_v35 }
  0xe1   : > { %12294 = vmatmul.mubr.msk.f32.gmra.mrb[102].mxu1 %vm418_vm2, %v1702_v38  ;;  %12171 = vmatprep.mubr.msk.f32.mxu0 %vm14273_vm1, %v20362_v1 }
  0xe2   : > { %12296 = vmatprep.mubr.msk.f32.mxu1 %vm14273_vm1, %v20362_v1 }
  0xe4   : > { %12172 = vmatmul.mubr.msk.f32.gmra.mrb[104].mxu0 %vm418_vm2, %v1701_v37  ;;  %v1714_v37 = vld [vmem:[%s14346_s10 + $0xc2] sm:$0xff] }
  0xe5   : > { %12297 = vmatmul.mubr.msk.f32.gmra.mrb[104].mxu1 %vm418_vm2, %v1703_v39  ;;  %12174 = vmatprep.mubr.msk.f32.mxu0 %vm14273_vm1, %v20362_v1 }
  0xe6   : > { %12299 = vmatprep.mubr.msk.f32.mxu1 %vm14273_vm1, %v20362_v1 }
  0xe7   : > { %v612_v41 = vpop.f32.mrb[0].mxu0 }
  0xe8   : > { %v1008_v42 = vpop.f32.mrb[0].mxu1  ;;  %v11890_v44 = vpop.f32.mrb[1].mxu0  ;;  %12175 = vmatmul.mubr.msk.f32.gmra.mrb[106].mxu0 %vm418_vm2, %v1702_v38 }
  0xe9   : > { %v14783_v43 = vadd.f32 %v1008_v42, %v612_v41  ;;  %v12015_v45 = vpop.f32.mrb[1].mxu1  ;;  %12300 = vmatmul.mubr.msk.f32.gmra.mrb[106].mxu1 %vm418_vm2, %v1704_v40  ;;  %12177 = vmatprep.mubr.msk.f32.mxu0 %vm14273_vm1, %v20362_v1  ;;  %v1715_v44 = vld [vmem:[%s14346_s10 + $0xca] sm:$0xff] }
  0xea   : > { %12302 = vmatprep.mubr.msk.f32.mxu1 %vm14273_vm1, %v20362_v1 }
  0xeb   : > { %v617_v47 = vpop.f32.mrb[2].mxu0 }
  0xec   : > { %v1013_v48 = vpop.f32.mrb[2].mxu1  ;;  %v11893_v50 = vpop.f32.mrb[3].mxu0  ;;  %12178 = vmatmul.mubr.msk.f32.gmra.mrb[108].mxu0 %vm418_vm2, %v1703_v39 }
  0xed   : > { %v14792_v49 = vadd.f32 %v1013_v48, %v617_v47  ;;  %v12018_v51 = vpop.f32.mrb[3].mxu1  ;;  %12303 = vmatmul.mubr.msk.f32.gmra.mrb[108].mxu1 %vm418_vm2, %v1705_v46  ;;  %12180 = vmatprep.mubr.msk.f32.mxu0 %vm14273_vm1, %v20362_v1 }
  0xee   : > { %12305 = vmatprep.mubr.msk.f32.mxu1 %vm14273_vm1, %v20362_v1  ;;  %v1716_v51 = vld [vmem:[%s14346_s10 + $0xd2] sm:$0xff] }
  0xef   : > { %v622_v53 = vpop.f32.mrb[4].mxu0 }
  0xf0   : > { %v1018_v54 = vpop.f32.mrb[4].mxu1  ;;  %v11896_v56 = vpop.f32.mrb[5].mxu0  ;;  %12181 = vmatmul.mubr.msk.f32.gmra.mrb[110].mxu0 %vm418_vm2, %v1704_v40 }
  0xf1   : > { %v14801_v55 = vadd.f32 %v1018_v54, %v622_v53  ;;  %v12021_v57 = vpop.f32.mrb[5].mxu1  ;;  %12306 = vmatmul.mubr.msk.f32.gmra.mrb[110].mxu1 %vm418_vm2, %v1706_v52  ;;  %12183 = vmatprep.mubr.msk.f32.mxu0 %vm14273_vm1, %v20362_v1 }
  0xf2   : > { %12308 = vmatprep.mubr.msk.f32.mxu1 %vm14273_vm1, %v20362_v1 }
  0xf3   : > { %v627_v59 = vpop.f32.mrb[6].mxu0 }
  0xf4   : > { %v1023_v60 = vpop.f32.mrb[6].mxu1  ;;  %v11899_v62 = vpop.f32.mrb[7].mxu0  ;;  %12184 = vmatmul.mubr.msk.f32.gmra.mrb[112].mxu0 %vm418_vm2, %v1705_v46 }
  0xf5   : > { %v14810_v61 = vadd.f32 %v1023_v60, %v627_v59  ;;  %v12024_v63 = vpop.f32.mrb[7].mxu1  ;;  %12309 = vmatmul.mubr.msk.f32.gmra.mrb[112].mxu1 %vm418_vm2, %v1707_v58  ;;  %12186 = vmatprep.mubr.msk.f32.mxu0 %vm14273_vm1, %v20362_v1 }
  0xf6   : > { %12311 = vmatprep.mubr.msk.f32.mxu1 %vm14273_vm1, %v20362_v1 }
  0xf7   : > { %v632_v2 = vpop.f32.mrb[8].mxu0 }
  0xf8   : > { %v1028_v3 = vpop.f32.mrb[8].mxu1  ;;  %v11902_v5 = vpop.f32.mrb[9].mxu0  ;;  %12187 = vmatmul.mubr.msk.f32.gmra.mrb[114].mxu0 %vm418_vm2, %v1706_v52 }
  0xf9   : > { %v14819_v4 = vadd.f32 %v1028_v3, %v632_v2  ;;  %v12027_v6 = vpop.f32.mrb[9].mxu1  ;;  %12312 = vmatmul.mubr.msk.f32.gmra.mrb[114].mxu1 %vm418_vm2, %v1708_v0  ;;  %12189 = vmatprep.mubr.msk.f32.mxu0 %vm14273_vm1, %v20362_v1  ;;  %v1718_v2 = vld [vmem:[%s14346_s10 + $0xe2] sm:$0xff] }
  0xfa   : > { %12314 = vmatprep.mubr.msk.f32.mxu1 %vm14273_vm1, %v20362_v1 }
  0xfb   : > { %v637_v8 = vpop.f32.mrb[10].mxu0 }
  0xfc   : > { %v1033_v9 = vpop.f32.mrb[10].mxu1  ;;  %v11905_v11 = vpop.f32.mrb[11].mxu0  ;;  %12190 = vmatmul.mubr.msk.f32.gmra.mrb[116].mxu0 %vm418_vm2, %v1707_v58  ;;  %v1717_v58 = vld [vmem:[%s14346_s10 + $0xda] sm:$0xff] }
  0xfd   : > { %v14828_v10 = vadd.f32 %v1033_v9, %v637_v8  ;;  %v12030_v12 = vpop.f32.mrb[11].mxu1  ;;  %12315 = vmatmul.mubr.msk.f32.gmra.mrb[116].mxu1 %vm418_vm2, %v1709_v7  ;;  %12192 = vmatprep.mubr.msk.f32.mxu0 %vm14273_vm1, %v20362_v1  ;;  %v1719_v9 = vld [vmem:[%s14346_s10 + $0xea] sm:$0xff] }
  0xfe   : > { %12317 = vmatprep.mubr.msk.f32.mxu1 %vm14273_vm1, %v20362_v1 }
  0xff   : > { %v642_v14 = vpop.f32.mrb[12].mxu0 }
 0x100   : > { %v1038_v15 = vpop.f32.mrb[12].mxu1  ;;  %v11908_v17 = vpop.f32.mrb[13].mxu0  ;;  %12193 = vmatmul.mubr.msk.f32.gmra.mrb[118].mxu0 %vm418_vm2, %v1708_v0 }
 0x101   : > { %v14837_v16 = vadd.f32 %v1038_v15, %v642_v14  ;;  %v12033_v18 = vpop.f32.mrb[13].mxu1  ;;  %12318 = vmatmul.mubr.msk.f32.gmra.mrb[118].mxu1 %vm418_vm2, %v1710_v13  ;;  %12195 = vmatprep.mubr.msk.f32.mxu0 %vm14273_vm1, %v20362_v1  ;;  %v1720_v17 = vld [vmem:[%s14346_s10 + $0xf2] sm:$0xff] }
 0x102   : > { %12320 = vmatprep.mubr.msk.f32.mxu1 %vm14273_vm1, %v20362_v1 }
 0x103   : > { %v647_v20 = vpop.f32.mrb[14].mxu0 }
 0x104   : > { %v1043_v21 = vpop.f32.mrb[14].mxu1  ;;  %v11911_v23 = vpop.f32.mrb[15].mxu0  ;;  %12196 = vmatmul.mubr.msk.f32.gmra.mrb[120].mxu0 %vm418_vm2, %v1709_v7 }
 0x105   : > { %v14846_v22 = vadd.f32 %v1043_v21, %v647_v20  ;;  %v12036_v24 = vpop.f32.mrb[15].mxu1  ;;  %12321 = vmatmul.mubr.msk.f32.gmra.mrb[120].mxu1 %vm418_vm2, %v1711_v19  ;;  %12198 = vmatprep.mubr.msk.f32.mxu0 %vm14273_vm1, %v20362_v1 }
 0x106   : > { %12323 = vmatprep.mubr.msk.f32.mxu1 %vm14273_vm1, %v20362_v1  ;;  %v1721_v24 = vld [vmem:[%s14346_s10 + $0xfa] sm:$0xff] }
 0x107   : > { %v652_v26 = vpop.f32.mrb[16].mxu0 }
 0x108   : > { %v1048_v27 = vpop.f32.mrb[16].mxu1  ;;  %v11914_v29 = vpop.f32.mrb[17].mxu0  ;;  %12199 = vmatmul.mubr.msk.f32.gmra.mrb[122].mxu0 %vm418_vm2, %v1710_v13 }
 0x109   : > { %v14855_v28 = vadd.f32 %v1048_v27, %v652_v26  ;;  %v12039_v30 = vpop.f32.mrb[17].mxu1  ;;  %12324 = vmatmul.mubr.msk.f32.gmra.mrb[122].mxu1 %vm418_vm2, %v1712_v25  ;;  %12201 = vmatprep.mubr.msk.f32.mxu0 %vm14273_vm1, %v20362_v1 }
 0x10a   : > { %12326 = vmatprep.mubr.msk.f32.mxu1 %vm14273_vm1, %v20362_v1 }
 0x10b   : > { %v657_v32 = vpop.f32.mrb[18].mxu0 }
 0x10c   : > { %v1053_v33 = vpop.f32.mrb[18].mxu1  ;;  %v11917_v35 = vpop.f32.mrb[19].mxu0  ;;  %12202 = vmatmul.mubr.msk.f32.gmra.mrb[124].mxu0 %vm418_vm2, %v1711_v19 }
 0x10d   : > { %v14864_v34 = vadd.f32 %v1053_v33, %v657_v32  ;;  %v12042_v36 = vpop.f32.mrb[19].mxu1  ;;  %12327 = vmatmul.mubr.msk.f32.gmra.mrb[124].mxu1 %vm418_vm2, %v1713_v31  ;;  %12204 = vmatprep.mubr.msk.f32.mxu0 %vm14273_vm1, %v20362_v1 }
 0x10e   : > { %12329 = vmatprep.mubr.msk.f32.mxu1 %vm14273_vm1, %v20362_v1 }
 0x10f   : > { %v662_v38 = vpop.f32.mrb[20].mxu0 }
 0x110   : > { %v1058_v39 = vpop.f32.mrb[20].mxu1  ;;  %v11920_v41 = vpop.f32.mrb[21].mxu0  ;;  %12205 = vmatmul.mubr.msk.f32.gmra.mrb[126].mxu0 %vm418_vm2, %v1712_v25 }
 0x111   : > { %v14873_v40 = vadd.f32 %v1058_v39, %v662_v38  ;;  %v12045_v42 = vpop.f32.mrb[21].mxu1  ;;  %12330 = vmatmul.mubr.msk.f32.gmra.mrb[126].mxu1 %vm418_vm2, %v1714_v37  ;;  %12207 = vmatprep.mubr.msk.f32.mxu0 %vm14273_vm1, %v20362_v1  ;;  %v1723_v38 = vld [vmem:[%s14346_s10 + $0x10a] sm:$0xff] }
 0x112   : > { %12332 = vmatprep.mubr.msk.f32.mxu1 %vm14273_vm1, %v20362_v1 }
 0x113   : > { %v667_v45 = vpop.f32.mrb[22].mxu0 }
 0x114   : > { %v1063_v46 = vpop.f32.mrb[22].mxu1  ;;  %v11923_v48 = vpop.f32.mrb[23].mxu0  ;;  %12208 = vmatmul.mubr.msk.f32.gmra.mrb[128].mxu0 %vm418_vm2, %v1713_v31  ;;  %v1722_v31 = vld [vmem:[%s14346_s10 + $0x102] sm:$0xff] }
 0x115   : > { %v14882_v47 = vadd.f32 %v1063_v46, %v667_v45  ;;  %v12048_v50 = vpop.f32.mrb[23].mxu1  ;;  %12333 = vmatmul.mubr.msk.f32.gmra.mrb[128].mxu1 %vm418_vm2, %v1715_v44  ;;  %12210 = vmatprep.mubr.msk.f32.mxu0 %vm14273_vm1, %v20362_v1  ;;  %v1724_v46 = vld [vmem:[%s14346_s10 + $0x112] sm:$0xff] }
 0x116   : > { %12335 = vmatprep.mubr.msk.f32.mxu1 %vm14273_vm1, %v20362_v1 }
 0x117   : > { %v672_v52 = vpop.f32.mrb[24].mxu0 }
 0x118   : > { %v1068_v53 = vpop.f32.mrb[24].mxu1  ;;  %v11926_v56 = vpop.f32.mrb[25].mxu0  ;;  %12211 = vmatmul.mubr.msk.f32.gmra.mrb[130].mxu0 %vm418_vm2, %v1714_v37 }
 0x119   : > { %v14891_v54 = vadd.f32 %v1068_v53, %v672_v52  ;;  %v12051_v57 = vpop.f32.mrb[25].mxu1  ;;  %12336 = vmatmul.mubr.msk.f32.gmra.mrb[130].mxu1 %vm418_vm2, %v1716_v51  ;;  %12213 = vmatprep.mubr.msk.f32.mxu0 %vm14273_vm1, %v20362_v1  ;;  %v1725_v56 = vld [vmem:[%s14346_s10 + $0x11a] sm:$0xff] }
 0x11a   : > { %12338 = vmatprep.mubr.msk.f32.mxu1 %vm14273_vm1, %v20362_v1 }
 0x11b   : > { %v677_v59 = vpop.f32.mrb[26].mxu0 }
 0x11c   : > { %v1073_v60 = vpop.f32.mrb[26].mxu1  ;;  %v11929_v63 = vpop.f32.mrb[27].mxu0  ;;  %12214 = vmatmul.mubr.msk.f32.gmra.mrb[132].mxu0 %vm418_vm2, %v1715_v44 }
 0x11d   : > { %v14900_v62 = vadd.f32 %v1073_v60, %v677_v59  ;;  %v12054_v0 = vpop.f32.mrb[27].mxu1  ;;  %12339 = vmatmul.mubr.msk.f32.gmra.mrb[132].mxu1 %vm418_vm2, %v1717_v58  ;;  %12216 = vmatprep.mubr.msk.f32.mxu0 %vm14273_vm1, %v20362_v1 }
 0x11e   : > { %12341 = vmatprep.mubr.msk.f32.mxu1 %vm14273_vm1, %v20362_v1  ;;  %v1726_v0 = vld [vmem:[%s14346_s10 + $0x122] sm:$0xff] }
 0x11f   : > { %v682_v3 = vpop.f32.mrb[28].mxu0 }
 0x120   : > { %v1078_v5 = vpop.f32.mrb[28].mxu1  ;;  %v11932_v7 = vpop.f32.mrb[29].mxu0  ;;  %12217 = vmatmul.mubr.msk.f32.gmra.mrb[134].mxu0 %vm418_vm2, %v1716_v51 }
 0x121   : > { %v14909_v6 = vadd.f32 %v1078_v5, %v682_v3  ;;  %v12057_v8 = vpop.f32.mrb[29].mxu1  ;;  %12342 = vmatmul.mubr.msk.f32.gmra.mrb[134].mxu1 %vm418_vm2, %v1718_v2  ;;  %12219 = vmatprep.mubr.msk.f32.mxu0 %vm14273_vm1, %v20362_v1 }
 0x122   : > { %12344 = vmatprep.mubr.msk.f32.mxu1 %vm14273_vm1, %v20362_v1 }
 0x123   : > { %v687_v11 = vpop.f32.mrb[30].mxu0 }
 0x124   : > { %v1083_v12 = vpop.f32.mrb[30].mxu1  ;;  %v11935_v14 = vpop.f32.mrb[31].mxu0  ;;  %12220 = vmatmul.mubr.msk.f32.gmra.mrb[136].mxu0 %vm418_vm2, %v1717_v58 }
 0x125   : > { %v14918_v13 = vadd.f32 %v1083_v12, %v687_v11  ;;  %v12060_v15 = vpop.f32.mrb[31].mxu1  ;;  %12345 = vmatmul.mubr.msk.f32.gmra.mrb[136].mxu1 %vm418_vm2, %v1719_v9  ;;  %12222 = vmatprep.mubr.msk.f32.mxu0 %vm14273_vm1, %v20362_v1 }
 0x126   : > { %12347 = vmatprep.mubr.msk.f32.mxu1 %vm14273_vm1, %v20362_v1 }
 0x127   : > { %v692_v18 = vpop.f32.mrb[32].mxu0 }
 0x128   : > { %v1088_v19 = vpop.f32.mrb[32].mxu1  ;;  %v11938_v21 = vpop.f32.mrb[33].mxu0  ;;  %12223 = vmatmul.mubr.msk.f32.gmra.mrb[138].mxu0 %vm418_vm2, %v1718_v2 }
 0x129   : > { %v14927_v20 = vadd.f32 %v1088_v19, %v692_v18  ;;  %v12063_v23 = vpop.f32.mrb[33].mxu1  ;;  %12348 = vmatmul.mubr.msk.f32.gmra.mrb[138].mxu1 %vm418_vm2, %v1720_v17  ;;  %12225 = vmatprep.mubr.msk.f32.mxu0 %vm14273_vm1, %v20362_v1  ;;  %v1728_v18 = vld [vmem:[%s14346_s10 + $0x132] sm:$0xff] }
 0x12a   : > { %12350 = vmatprep.mubr.msk.f32.mxu1 %vm14273_vm1, %v20362_v1 }
 0x12b   : > { %v697_v25 = vpop.f32.mrb[34].mxu0 }
 0x12c   : > { %v1093_v26 = vpop.f32.mrb[34].mxu1  ;;  %v11941_v29 = vpop.f32.mrb[35].mxu0  ;;  %12226 = vmatmul.mubr.msk.f32.gmra.mrb[140].mxu0 %vm418_vm2, %v1719_v9  ;;  %v1727_v9 = vld [vmem:[%s14346_s10 + $0x12a] sm:$0xff] }
 0x12d   : > { %v14936_v27 = vadd.f32 %v1093_v26, %v697_v25  ;;  %v12066_v30 = vpop.f32.mrb[35].mxu1  ;;  %12351 = vmatmul.mubr.msk.f32.gmra.mrb[140].mxu1 %vm418_vm2, %v1721_v24  ;;  %12228 = vmatprep.mubr.msk.f32.mxu0 %vm14273_vm1, %v20362_v1  ;;  %v1729_v26 = vld [vmem:[%s14346_s10 + $0x13a] sm:$0xff] }
 0x12e   : > { %12353 = vmatprep.mubr.msk.f32.mxu1 %vm14273_vm1, %v20362_v1 }
 0x12f   : > { %v702_v32 = vpop.f32.mrb[36].mxu0 }
 0x130   : > { %v1098_v33 = vpop.f32.mrb[36].mxu1  ;;  %v11944_v36 = vpop.f32.mrb[37].mxu0  ;;  %12229 = vmatmul.mubr.msk.f32.gmra.mrb[142].mxu0 %vm418_vm2, %v1720_v17 }
 0x131   : > { %v14945_v35 = vadd.f32 %v1098_v33, %v702_v32  ;;  %v12069_v37 = vpop.f32.mrb[37].mxu1  ;;  %12354 = vmatmul.mubr.msk.f32.gmra.mrb[142].mxu1 %vm418_vm2, %v1722_v31  ;;  %12231 = vmatprep.mubr.msk.f32.mxu0 %vm14273_vm1, %v20362_v1  ;;  %v1730_v36 = vld [vmem:[%s14346_s10 + $0x142] sm:$0xff] }
 0x132   : > { %12356 = vmatprep.mubr.msk.f32.mxu1 %vm14273_vm1, %v20362_v1 }
 0x133   : > { %v707_v39 = vpop.f32.mrb[38].mxu0 }
 0x134   : > { %v1103_v41 = vpop.f32.mrb[38].mxu1  ;;  %v11947_v44 = vpop.f32.mrb[39].mxu0  ;;  %12232 = vmatmul.mubr.msk.f32.gmra.mrb[144].mxu0 %vm418_vm2, %v1721_v24 }
 0x135   : > { %v14954_v42 = vadd.f32 %v1103_v41, %v707_v39  ;;  %v12072_v45 = vpop.f32.mrb[39].mxu1  ;;  %12357 = vmatmul.mubr.msk.f32.gmra.mrb[144].mxu1 %vm418_vm2, %v1723_v38  ;;  %12234 = vmatprep.mubr.msk.f32.mxu0 %vm14273_vm1, %v20362_v1 }
 0x136   : > { %12359 = vmatprep.mubr.msk.f32.mxu1 %vm14273_vm1, %v20362_v1  ;;  %v1731_v45 = vld [vmem:[%s14346_s10 + $0x14a] sm:$0xff] }
 0x137   : > { %v712_v48 = vpop.f32.mrb[40].mxu0 }
 0x138   : > { %v1108_v50 = vpop.f32.mrb[40].mxu1  ;;  %v11950_v52 = vpop.f32.mrb[41].mxu0  ;;  %12235 = vmatmul.mubr.msk.f32.gmra.mrb[146].mxu0 %vm418_vm2, %v1722_v31 }
 0x139   : > { %v14963_v51 = vadd.f32 %v1108_v50, %v712_v48  ;;  %v12075_v53 = vpop.f32.mrb[41].mxu1  ;;  %12360 = vmatmul.mubr.msk.f32.gmra.mrb[146].mxu1 %vm418_vm2, %v1724_v46  ;;  %12237 = vmatprep.mubr.msk.f32.mxu0 %vm14273_vm1, %v20362_v1 }
 0x13a   : > { %12362 = vmatprep.mubr.msk.f32.mxu1 %vm14273_vm1, %v20362_v1 }
 0x13b   : > { %v717_v57 = vpop.f32.mrb[42].mxu0 }
 0x13c   : > { %v1113_v58 = vpop.f32.mrb[42].mxu1  ;;  %v11953_v60 = vpop.f32.mrb[43].mxu0  ;;  %12238 = vmatmul.mubr.msk.f32.gmra.mrb[148].mxu0 %vm418_vm2, %v1723_v38 }
 0x13d   : > { %v14972_v59 = vadd.f32 %v1113_v58, %v717_v57  ;;  %v12078_v63 = vpop.f32.mrb[43].mxu1  ;;  %12363 = vmatmul.mubr.msk.f32.gmra.mrb[148].mxu1 %vm418_vm2, %v1725_v56  ;;  %12240 = vmatprep.mubr.msk.f32.mxu0 %vm14273_vm1, %v20362_v1  ;;  %v1732_v57 = vld [vmem:[%s14346_s10 + $0x152] sm:$0xf] }
 0x13e   : > { %12365 = vmatprep.mubr.msk.f32.mxu1 %vm14273_vm1, %v20362_v1 }
 0x13f   : > { %v722_v2 = vpop.f32.mrb[44].mxu0 }
 0x140   : > { %v1118_v3 = vpop.f32.mrb[44].mxu1  ;;  %v11956_v7 = vpop.f32.mrb[45].mxu0  ;;  %12241 = vmatmul.mubr.msk.f32.gmra.mrb[150].mxu0 %vm418_vm2, %v1724_v46 }
 0x141   : > { %v14981_v5 = vadd.f32 %v1118_v3, %v722_v2  ;;  %v12081_v8 = vpop.f32.mrb[45].mxu1  ;;  %12366 = vmatmul.mubr.msk.f32.gmra.mrb[150].mxu1 %vm418_vm2, %v1726_v0  ;;  %12243 = vmatprep.mubr.msk.f32.mxu0 %vm14273_vm1, %v20362_v1  ;;  %v2172_v3 = vld [vmem:[%s14346_s10 + $0x13] sm:$0xff] }
 0x142   : > { %12368 = vmatprep.mubr.msk.f32.mxu1 %vm14273_vm1, %v20362_v1  ;;  %v2652_v7 = vld [vmem:[%s14346_s10 + $0x14] sm:$0xff] }
 0x143   : > { %v727_v11 = vpop.f32.mrb[46].mxu0  ;;  %v10569_v8 = vld [vmem:[%s20356_s2 + $0x18] sm:$0xf] }
 0x144   : > { %v1123_v12 = vpop.f32.mrb[46].mxu1  ;;  %v11959_v15 = vpop.f32.mrb[47].mxu0  ;;  %12244 = vmatmul.mubr.msk.f32.gmra.mrb[152].mxu0 %vm418_vm2, %v1725_v56  ;;  %v1252_v56 = vld [vmem:[%s14346_s10 + $0x142] sm:$0xf] }
 0x145   : > { %v14990_v14 = vadd.f32 %v1123_v12, %v727_v11  ;;  %v12084_v17 = vpop.f32.mrb[47].mxu1  ;;  %12369 = vmatmul.mubr.msk.f32.gmra.mrb[152].mxu1 %vm418_vm2, %v1727_v9  ;;  %12246 = vmatprep.mubr.msk.f32.mxu0 %vm14273_vm1, %v20362_v1 }
 0x146   : > { %12371 = vmatprep.mubr.msk.f32.mxu1 %vm14273_vm1, %v20362_v1 }
 0x147   : > { %v732_v19 = vpop.f32.mrb[48].mxu0 }
 0x148   : > { %v1128_v21 = vpop.f32.mrb[48].mxu1  ;;  %v11962_v24 = vpop.f32.mrb[49].mxu0  ;;  %12247 = vmatmul.mubr.msk.f32.gmra.mrb[154].mxu0 %vm418_vm2, %v1726_v0 }
 0x149   : > { %v14999_v23 = vadd.f32 %v1128_v21, %v732_v19  ;;  %v12087_v25 = vpop.f32.mrb[49].mxu1  ;;  %12372 = vmatmul.mubr.msk.f32.gmra.mrb[154].mxu1 %vm418_vm2, %v1728_v18  ;;  %12249 = vmatprep.mubr.msk.f32.mxu0 %vm14273_vm1, %v20362_v1  ;;  %v2653_v19 = vld [vmem:[%s14346_s10 + $0x1c] sm:$0xff] }
 0x14a   : > { %12374 = vmatprep.mubr.msk.f32.mxu1 %vm14273_vm1, %v20362_v1 }
 0x14b   : > { %v737_v29 = vpop.f32.mrb[50].mxu0 }
 0x14c   : > { %v1133_v30 = vpop.f32.mrb[50].mxu1  ;;  %v11965_v32 = vpop.f32.mrb[51].mxu0  ;;  %12250 = vmatmul.mubr.msk.f32.gmra.mrb[156].mxu0 %vm418_vm2, %v1727_v9 }
 0x14d   : > { %v15008_v31 = vadd.f32 %v1133_v30, %v737_v29  ;;  %v12090_v33 = vpop.f32.mrb[51].mxu1  ;;  %12375 = vmatmul.mubr.msk.f32.gmra.mrb[156].mxu1 %vm418_vm2, %v1729_v26  ;;  %12252 = vmatprep.mubr.msk.f32.mxu0 %vm14273_vm1, %v20362_v1  ;;  %v2174_v30 = vld [vmem:[%s14346_s10 + $0x23] sm:$0xff] }
 0x14e   : > { %12377 = vmatprep.mubr.msk.f32.mxu1 %vm14273_vm1, %v20362_v1  ;;  %v15071_v32 = vld [vmem:[%s14346_s10 + $0x24] sm:$0xff] }
 0x14f   : > { %v742_v37 = vpop.f32.mrb[52].mxu0 }
 0x150   : > { %v1138_v38 = vpop.f32.mrb[52].mxu1  ;;  %v11968_v41 = vpop.f32.mrb[53].mxu0  ;;  %12253 = vmatmul.mubr.msk.f32.gmra.mrb[158].mxu0 %vm418_vm2, %v1728_v18  ;;  %v2173_v18 = vld [vmem:[%s14346_s10 + $0x1b] sm:$0xff] }
 0x151   : > { %v15017_v39 = vadd.f32 %v1138_v38, %v742_v37  ;;  %v12093_v44 = vpop.f32.mrb[53].mxu1  ;;  %12378 = vmatmul.mubr.msk.f32.gmra.mrb[158].mxu1 %vm418_vm2, %v1730_v36  ;;  %12255 = vmatprep.mubr.msk.f32.mxu0 %vm14273_vm1, %v20362_v1 }
 0x152   : > { %12380 = vmatprep.mubr.msk.f32.mxu1 %vm14273_vm1, %v20362_v1  ;;  %v2175_v44 = vld [vmem:[%s14346_s10 + $0x2b] sm:$0xff] }
 0x153   : > { %v747_v46 = vpop.f32.mrb[54].mxu0 }
 0x154   : > { %v1143_v48 = vpop.f32.mrb[54].mxu1  ;;  %v11971_v52 = vpop.f32.mrb[55].mxu0  ;;  %12256 = vmatmul.mubr.msk.f32.gmra.mrb[160].mxu0 %vm418_vm2, %v1729_v26 }
 0x155   : > { %v15026_v50 = vadd.f32 %v1143_v48, %v747_v46  ;;  %v12096_v53 = vpop.f32.mrb[55].mxu1  ;;  %12381 = vmatmul.mubr.msk.f32.gmra.mrb[160].mxu1 %vm418_vm2, %v1731_v45  ;;  %12258 = vmatprep.mubr.msk.f32.mxu0 %vm14273_vm1, %v20362_v1  ;;  %v15084_v45 = vld [vmem:[%s14346_s10 + $0x2c] sm:$0xff] }
 0x156   : > { %12383 = vmatprep.mubr.msk.f32.mxu1 %vm14273_vm1, %v20362_v1 }
 0x157   : > { %v752_v58 = vpop.f32.mrb[56].mxu0 }
 0x158   : > { %v1148_v60 = vpop.f32.mrb[56].mxu1  ;;  %v11974_v0 = vpop.f32.mrb[57].mxu0  ;;  %12259 = vmatmul.mubr.msk.f32.gmra.mrb[162].mxu0 %vm418_vm2, %v1252_v56 }
 0x159   : > { %v15036_v63 = vadd.f32 %v1148_v60, %v752_v58  ;;  %v12099_v2 = vpop.f32.mrb[57].mxu1  ;;  %12384 = vmatmul.mubr.msk.f32.gmra.mrb[162].mxu1 %vm418_vm2, %v1732_v57  ;;  %12388 = vmatprep.mubr.msk.f32.mxu0 %vm14273_vm1, %v20362_v1  ;;  %v2176_v57 = vld [vmem:[%s14346_s10 + $0x33] sm:$0xff] }
 0x15a   : > { %12513 = vmatprep.mubr.msk.f32.mxu1 %vm14273_vm1, %v20362_v1  ;;  %v15097_v58 = vld [vmem:[%s14346_s10 + $0x34] sm:$0xff] }
 0x15b   : > { %v757_v9 = vpop.f32.mrb[58].mxu0 }
 0x15c   : > { %v1153_v11 = vpop.f32.mrb[58].mxu1  ;;  %v11977_v15 = vpop.f32.mrb[59].mxu0  ;;  %12389 = vmatmul.mubr.msk.f32.vlgmr.msra.gmra.mrb[164].mxu0 %vm418_vm2, %v2172_v3 }
 0x15d   : > { %v15049_v12 = vadd.f32 %v1153_v11, %v757_v9  ;;  %v12102_v17 = vpop.f32.mrb[59].mxu1  ;;  %12514 = vmatmul.mubr.msk.f32.vlgmr.msra.gmra.mrb[164].mxu1 %vm418_vm2, %v2652_v7  ;;  %12637 = vmatpush3.msk.msra.mxu0 %vm542_vm0, %v10569_v8  ;;  %v2177_v8 = vld [vmem:[%s14346_s10 + $0x3b] sm:$0xff] }
 0x15e   : > { %12391 = vmatprep.mubr.msk.f32.mxu0 %vm14273_vm1, %v20362_v1  ;;  %12516 = vmatprep.mubr.msk.f32.mxu1 %vm14273_vm1, %v20362_v1  ;;  %v15110_v9 = vld [vmem:[%s14346_s10 + $0x3c] sm:$0xff] }
 0x15f   : > { %12886 = vmatprep.subr.mxu0 %v20362_v1  ;;  %v762_v21 = vpop.f32.mrb[60].mxu0 }
 0x160   : > { %v1158_v24 = vpop.f32.mrb[60].mxu1  ;;  %v11980_v26 = vpop.f32.mrb[61].mxu0  ;;  %12392 = vmatmul.mubr.msk.f32.gmra.mrb[166].mxu0 %vm418_vm2, %v2173_v18 }
 0x161   : > { %v15061_v25 = vadd.f32 %v1158_v24, %v762_v21  ;;  %v12105_v29 = vpop.f32.mrb[61].mxu1  ;;  %12517 = vmatmul.mubr.msk.f32.gmra.mrb[166].mxu1 %vm418_vm2, %v2653_v19  ;;  %12394 = vmatprep.mubr.msk.f32.mxu0 %vm14273_vm1, %v20362_v1  ;;  %v2178_v21 = vld [vmem:[%s14346_s10 + $0x43] sm:$0xff] }
 0x162   : > { %12519 = vmatprep.mubr.msk.f32.mxu1 %vm14273_vm1, %v20362_v1  ;;  %v15123_v24 = vld [vmem:[%s14346_s10 + $0x44] sm:$0xff] }
 0x163   : > { %v767_v33 = vpop.f32.mrb[62].mxu0 }
 0x164   : > { %v1163_v36 = vpop.f32.mrb[62].mxu1  ;;  %v11983_v38 = vpop.f32.mrb[63].mxu0  ;;  %12395 = vmatmul.mubr.msk.f32.gmra.mrb[168].mxu0 %vm418_vm2, %v2174_v30 }
 0x165   : > { %v15073_v37 = vadd.f32 %v1163_v36, %v767_v33  ;;  %v12108_v41 = vpop.f32.mrb[63].mxu1  ;;  %12520 = vmatmul.mubr.msk.f32.gmra.mrb[168].mxu1 %vm418_vm2, %v15071_v32  ;;  %12397 = vmatprep.mubr.msk.f32.mxu0 %vm14273_vm1, %v20362_v1  ;;  %v2179_v38 = vld [vmem:[%s14346_s10 + $0x4b] sm:$0xff] }
 0x166   : > { %12522 = vmatprep.mubr.msk.f32.mxu1 %vm14273_vm1, %v20362_v1  ;;  %v15136_v41 = vld [vmem:[%s14346_s10 + $0x4c] sm:$0xff] }
 0x167   : > { %v772_v46 = vpop.f32.mrb[64].mxu0 }
 0x168   : > { %v1168_v48 = vpop.f32.mrb[64].mxu1  ;;  %v11986_v53 = vpop.f32.mrb[65].mxu0  ;;  %12398 = vmatmul.mubr.msk.f32.gmra.mrb[170].mxu0 %vm418_vm2, %v2175_v44 }
 0x169   : > { %v15086_v52 = vadd.f32 %v1168_v48, %v772_v46  ;;  %v12111_v56 = vpop.f32.mrb[65].mxu1  ;;  %12523 = vmatmul.mubr.msk.f32.gmra.mrb[170].mxu1 %vm418_vm2, %v15084_v45  ;;  %12400 = vmatprep.mubr.msk.f32.mxu0 %vm14273_vm1, %v20362_v1 }
 0x16a   : > { %12525 = vmatprep.mubr.msk.f32.mxu1 %vm14273_vm1, %v20362_v1 }
 0x16b   : > { %v777_v60 = vpop.f32.mrb[66].mxu0 }
 0x16c   : > { %v1173_v0 = vpop.f32.mrb[66].mxu1  ;;  %v11989_v3 = vpop.f32.mrb[67].mxu0  ;;  %12401 = vmatmul.mubr.msk.f32.gmra.mrb[172].mxu0 %vm418_vm2, %v2176_v57  ;;  %v2180_v57 = vld [vmem:[%s14346_s10 + $0x53] sm:$0xff] }
 0x16d   : > { %v15099_v2 = vadd.f32 %v1173_v0, %v777_v60  ;;  %v12114_v7 = vpop.f32.mrb[67].mxu1  ;;  %12526 = vmatmul.mubr.msk.f32.gmra.mrb[172].mxu1 %vm418_vm2, %v15097_v58  ;;  %12403 = vmatprep.mubr.msk.f32.mxu0 %vm14273_vm1, %v20362_v1  ;;  %v15149_v60 = vld [vmem:[%s14346_s10 + $0x54] sm:$0xff] }
 0x16e   : > { %12528 = vmatprep.mubr.msk.f32.mxu1 %vm14273_vm1, %v20362_v1 }
 0x16f   : > { %v782_v11 = vpop.f32.mrb[68].mxu0 }
 0x170   : > { %v1178_v15 = vpop.f32.mrb[68].mxu1  ;;  %v11992_v18 = vpop.f32.mrb[69].mxu0  ;;  %12404 = vmatmul.mubr.msk.f32.gmra.mrb[174].mxu0 %vm418_vm2, %v2177_v8 }
 0x171   : > { %v15112_v17 = vadd.f32 %v1178_v15, %v782_v11  ;;  %v12117_v19 = vpop.f32.mrb[69].mxu1  ;;  %12529 = vmatmul.mubr.msk.f32.gmra.mrb[174].mxu1 %vm418_vm2, %v15110_v9  ;;  %12406 = vmatprep.mubr.msk.f32.mxu0 %vm14273_vm1, %v20362_v1  ;;  %v2181_v15 = vld [vmem:[%s14346_s10 + $0x5b] sm:$0xff] }
 0x172   : > { %12531 = vmatprep.mubr.msk.f32.mxu1 %vm14273_vm1, %v20362_v1  ;;  %v15162_v18 = vld [vmem:[%s14346_s10 + $0x5c] sm:$0xff] }
 0x173   : > { %v787_v26 = vpop.f32.mrb[70].mxu0  ;;  %v10612_v19 = vld [vmem:[%s20356_s2 + $0x1c] sm:$0xf] }
 0x174   : > { %v1183_v29 = vpop.f32.mrb[70].mxu1  ;;  %v11995_v33 = vpop.f32.mrb[71].mxu0  ;;  %12407 = vmatmul.mubr.msk.f32.gmra.mrb[176].mxu0 %vm418_vm2, %v2178_v21  ;;  %12762 = vmatpush3.msk.msra.mxu1 %vm542_vm0, %v10612_v19 }
 0x175   : > { %v15125_v30 = vadd.f32 %v1183_v29, %v787_v26  ;;  %v12120_v36 = vpop.f32.mrb[71].mxu1  ;;  %12532 = vmatmul.mubr.msk.f32.gmra.mrb[176].mxu1 %vm418_vm2, %v15123_v24  ;;  %12409 = vmatprep.mubr.msk.f32.mxu0 %vm14273_vm1, %v20362_v1 }
 0x176   : > { %12534 = vmatprep.mubr.msk.f32.mxu1 %vm14273_vm1, %v20362_v1 }
 0x177   : > { %v792_v44 = vpop.f32.mrb[72].mxu0 }
 0x178   : > { %v1188_v46 = vpop.f32.mrb[72].mxu1  ;;  %v11998_v53 = vpop.f32.mrb[73].mxu0  ;;  %12410 = vmatmul.mubr.msk.f32.gmra.mrb[178].mxu0 %vm418_vm2, %v2179_v38  ;;  %v2182_v38 = vld [vmem:[%s14346_s10 + $0x63] sm:$0xff] }
 0x179   : > { %v15138_v48 = vadd.f32 %v1188_v46, %v792_v44  ;;  %v12123_v56 = vpop.f32.mrb[73].mxu1  ;;  %12535 = vmatmul.mubr.msk.f32.gmra.mrb[178].mxu1 %vm418_vm2, %v15136_v41  ;;  %12412 = vmatprep.mubr.msk.f32.mxu0 %vm14273_vm1, %v20362_v1  ;;  %v15179_v44 = vld [vmem:[%s14346_s10 + $0x64] sm:$0xff] }
 0x17a   : > { %12537 = vmatprep.mubr.msk.f32.mxu1 %vm14273_vm1, %v20362_v1 }
 0x17b   : > { %v797_v0 = vpop.f32.mrb[74].mxu0 }
 0x17c   : > { %v1193_v3 = vpop.f32.mrb[74].mxu1  ;;  %v12001_v8 = vpop.f32.mrb[75].mxu0  ;;  %12413 = vmatmul.mubr.msk.f32.gmra.mrb[180].mxu0 %vm418_vm2, %v2180_v57 }
 0x17d   : > { %v15151_v7 = vadd.f32 %v1193_v3, %v797_v0  ;;  %v12126_v11 = vpop.f32.mrb[75].mxu1  ;;  %12538 = vmatmul.mubr.msk.f32.gmra.mrb[180].mxu1 %vm418_vm2, %v15149_v60  ;;  %12415 = vmatprep.mubr.msk.f32.mxu0 %vm14273_vm1, %v20362_v1  ;;  %v2183_v3 = vld [vmem:[%s14346_s10 + $0x6b] sm:$0xff] }
 0x17e   : > { %12540 = vmatprep.mubr.msk.f32.mxu1 %vm14273_vm1, %v20362_v1  ;;  %v15192_v8 = vld [vmem:[%s14346_s10 + $0x6c] sm:$0xff] }
 0x17f   : > { %v802_v21 = vpop.f32.mrb[76].mxu0 }
 0x180   : > { %v1198_v26 = vpop.f32.mrb[76].mxu1  ;;  %v12004_v33 = vpop.f32.mrb[77].mxu0  ;;  %12416 = vmatmul.mubr.msk.f32.gmra.mrb[182].mxu0 %vm418_vm2, %v2181_v15 }
 0x181   : > { %v15168_v29 = vadd.f32 %v1198_v26, %v802_v21  ;;  %v12129_v36 = vpop.f32.mrb[77].mxu1  ;;  %12541 = vmatmul.mubr.msk.f32.gmra.mrb[182].mxu1 %vm418_vm2, %v15162_v18  ;;  %12418 = vmatprep.mubr.msk.f32.mxu0 %vm14273_vm1, %v20362_v1  ;;  %v2184_v33 = vld [vmem:[%s14346_s10 + $0x73] sm:$0xff] }
 0x182   : > { %12543 = vmatprep.mubr.msk.f32.mxu1 %vm14273_vm1, %v20362_v1  ;;  %v15205_v36 = vld [vmem:[%s14346_s10 + $0x74] sm:$0xff] }
 0x183   : > { %v807_v46 = vpop.f32.mrb[78].mxu0 }
 0x184   : > { %v1203_v53 = vpop.f32.mrb[78].mxu1  ;;  %v12007_v57 = vpop.f32.mrb[79].mxu0  ;;  %12419 = vmatmul.mubr.msk.f32.gmra.mrb[184].mxu0 %vm418_vm2, %v2182_v38 }
 0x185   : > { %v15181_v56 = vadd.f32 %v1203_v53, %v807_v46  ;;  %v12132_v0 = vpop.f32.mrb[79].mxu1  ;;  %12544 = vmatmul.mubr.msk.f32.gmra.mrb[184].mxu1 %vm418_vm2, %v15179_v44  ;;  %12421 = vmatprep.mubr.msk.f32.mxu0 %vm14273_vm1, %v20362_v1 }
 0x186   : > { %12546 = vmatprep.mubr.msk.f32.mxu1 %vm14273_vm1, %v20362_v1 }
 0x187   : > { %v812_v11 = vpop.f32.mrb[80].mxu0 }
 0x188   : > { %v1208_v15 = vpop.f32.mrb[80].mxu1  ;;  %v12010_v21 = vpop.f32.mrb[81].mxu0  ;;  %12422 = vmatmul.mubr.msk.f32.gmra.mrb[186].mxu0 %vm418_vm2, %v2183_v3  ;;  %v2185_v3 = vld [vmem:[%s14346_s10 + $0x7b] sm:$0xff] }
 0x189   : > { %v15194_v19 = vadd.f32 %v1208_v15, %v812_v11  ;;  %12547 = vmatmul.mubr.msk.f32.gmra.mrb[186].mxu1 %vm418_vm2, %v15192_v8  ;;  %v12135_v26 = vpop.f32.mrb[81].mxu1  ;;  %12424 = vmatprep.mubr.msk.f32.mxu0 %vm14273_vm1, %v20362_v1  ;;  %v15217_v11 = vld [vmem:[%s14346_s10 + $0x7c] sm:$0xff] }
 0x18a   : > { %12549 = vmatprep.mubr.msk.f32.mxu1 %vm14273_vm1, %v20362_v1 }
 0x18b   : > { %v1447_v38 = vpop.f32.mrb[82].mxu0 }
 0x18c   : > { %v1927_v46 = vpop.f32.mrb[82].mxu1  ;;  %v1651_v53 = vadd.f32 %v1447_v38, %v14783_v43  ;;  %v12140_v57 = vpop.f32.mrb[83].mxu0  ;;  %12425 = vmatmul.mubr.msk.f32.gmra.mrb[188].mxu0 %vm418_vm2, %v2184_v33 }
 0x18d   : > { %12550 = vmatmul.mubr.msk.f32.gmra.mrb[188].mxu1 %vm418_vm2, %v15205_v36  ;;  %v12265_v0 = vpop.f32.mrb[83].mxu1  ;;  %12427 = vmatprep.mubr.msk.f32.mxu0 %vm14273_vm1, %v20362_v1  ;;  %v2186_v57 = vld [vmem:[%s14346_s10 + $0x83] sm:$0xff] }
 0x18e   : > { %12552 = vmatprep.mubr.msk.f32.mxu1 %vm14273_vm1, %v20362_v1  ;;  %v15219_v15 = vadd.f32 %v1927_v46, %v1651_v53  ;;  %v15231_v46 = vld [vmem:[%s14346_s10 + $0x84] sm:$0xff] }
 0x18f   : > { %v1452_v43 = vpop.f32.mrb[84].mxu0 }
 0x190   : > { %v1932_v21 = vpop.f32.mrb[84].mxu1  ;;  %v1652_v26 = vadd.f32 %v1452_v43, %v14792_v49  ;;  %v12143_v33 = vpop.f32.mrb[85].mxu0  ;;  %12428 = vmatmul.mubr.msk.f32.gmra.mrb[190].mxu0 %vm418_vm2, %v2185_v3 }
 0x191   : > { %12553 = vmatmul.mubr.msk.f32.gmra.mrb[190].mxu1 %vm418_vm2, %v15217_v11  ;;  %v12268_v38 = vpop.f32.mrb[85].mxu1  ;;  %12430 = vmatprep.mubr.msk.f32.mxu0 %vm14273_vm1, %v20362_v1 }
 0x192   : > { %12555 = vmatprep.mubr.msk.f32.mxu1 %vm14273_vm1, %v20362_v1  ;;  %v15233_v53 = vadd.f32 %v1932_v21, %v1652_v26  ;;  %v2187_v38 = vld [vmem:[%s14346_s10 + $0x8b] sm:$0xff] }
 0x193   : > { %v1457_v49 = vpop.f32.mrb[86].mxu0  ;;  %v15245_v21 = vld [vmem:[%s14346_s10 + $0x8c] sm:$0xff] }
 0x194   : > { %20499 = vst [vmem:[#allocation3_spill] sm:$0xff] %v15233_v53  ;;  %v1937_v0 = vpop.f32.mrb[86].mxu1  ;;  %v1653_v3 = vadd.f32 %v1457_v49, %v14801_v55  ;;  %v12146_v43 = vpop.f32.mrb[87].mxu0  ;;  %12431 = vmatmul.mubr.msk.f32.gmra.mrb[192].mxu0 %vm418_vm2, %v2186_v57  ;;  %v2188_v53 = vld [vmem:[%s14346_s10 + $0x93] sm:$0xff] }
 0x195   : > { %12556 = vmatmul.mubr.msk.f32.gmra.mrb[192].mxu1 %vm418_vm2, %v15231_v46  ;;  %v12271_v33 = vpop.f32.mrb[87].mxu1  ;;  %12433 = vmatprep.mubr.msk.f32.mxu0 %vm14273_vm1, %v20362_v1 }
 0x196   : > { %12558 = vmatprep.mubr.msk.f32.mxu1 %vm14273_vm1, %v20362_v1  ;;  %v15247_v26 = vadd.f32 %v1937_v0, %v1653_v3  ;;  %v15259_v0 = vld [vmem:[%s14346_s10 + $0x94] sm:$0xff] }
 0x197   : > { %v1462_v55 = vpop.f32.mrb[88].mxu0 }
 0x198   : > { %20500 = vst [vmem:[#allocation4_spill] sm:$0xff] %v15247_v26  ;;  %v1942_v49 = vpop.f32.mrb[88].mxu1  ;;  %v1654_v57 = vadd.f32 %v1462_v55, %v14810_v61  ;;  %v12149_v43 = vpop.f32.mrb[89].mxu0  ;;  %12434 = vmatmul.mubr.msk.f32.gmra.mrb[194].mxu0 %vm418_vm2, %v2187_v38  ;;  %v2189_v26 = vld [vmem:[%s14346_s10 + $0x9b] sm:$0xff] }
 0x199   : > { %12559 = vmatmul.mubr.msk.f32.gmra.mrb[194].mxu1 %vm418_vm2, %v15245_v21  ;;  %v12274_v33 = vpop.f32.mrb[89].mxu1  ;;  %12436 = vmatprep.mubr.msk.f32.mxu0 %vm14273_vm1, %v20362_v1 }
 0x19a   : > { %12561 = vmatprep.mubr.msk.f32.mxu1 %vm14273_vm1, %v20362_v1  ;;  %v15261_v3 = vadd.f32 %v1942_v49, %v1654_v57  ;;  %v15273_v49 = vld [vmem:[%s14346_s10 + $0x9c] sm:$0xff] }
 0x19b   : > { %v1467_v61 = vpop.f32.mrb[90].mxu0 }
 0x19c   : > { %20501 = vst [vmem:[#allocation5_spill] sm:$0xff] %v15261_v3  ;;  %v1947_v55 = vpop.f32.mrb[90].mxu1  ;;  %v1655_v38 = vadd.f32 %v1467_v61, %v14819_v4  ;;  %v12152_v43 = vpop.f32.mrb[91].mxu0  ;;  %12437 = vmatmul.mubr.msk.f32.gmra.mrb[196].mxu0 %vm418_vm2, %v2188_v53  ;;  %v2190_v3 = vld [vmem:[%s14346_s10 + $0xa3] sm:$0xff] }
 0x19d   : > { %12562 = vmatmul.mubr.msk.f32.gmra.mrb[196].mxu1 %vm418_vm2, %v15259_v0  ;;  %v12277_v33 = vpop.f32.mrb[91].mxu1  ;;  %12439 = vmatprep.mubr.msk.f32.mxu0 %vm14273_vm1, %v20362_v1 }
 0x19e   : > { %12564 = vmatprep.mubr.msk.f32.mxu1 %vm14273_vm1, %v20362_v1  ;;  %v15275_v57 = vadd.f32 %v1947_v55, %v1655_v38  ;;  %v15287_v55 = vld [vmem:[%s14346_s10 + $0xa4] sm:$0xff] }
 0x19f   : > { %v1472_v4 = vpop.f32.mrb[92].mxu0 }
 0x1a0   : > { %20502 = vst [vmem:[#allocation6_spill] sm:$0xff] %v15275_v57  ;;  %v1952_v61 = vpop.f32.mrb[92].mxu1  ;;  %v1656_v53 = vadd.f32 %v1472_v4, %v14828_v10  ;;  %v12155_v43 = vpop.f32.mrb[93].mxu0  ;;  %12440 = vmatmul.mubr.msk.f32.gmra.mrb[198].mxu0 %vm418_vm2, %v2189_v26  ;;  %v2191_v57 = vld [vmem:[%s14346_s10 + $0xab] sm:$0xff] }
 0x1a1   : > { %12565 = vmatmul.mubr.msk.f32.gmra.mrb[198].mxu1 %vm418_vm2, %v15273_v49  ;;  %v12280_v33 = vpop.f32.mrb[93].mxu1  ;;  %12442 = vmatprep.mubr.msk.f32.mxu0 %vm14273_vm1, %v20362_v1 }
 0x1a2   : > { %12567 = vmatprep.mubr.msk.f32.mxu1 %vm14273_vm1, %v20362_v1  ;;  %v15289_v38 = vadd.f32 %v1952_v61, %v1656_v53  ;;  %v15301_v61 = vld [vmem:[%s14346_s10 + $0xac] sm:$0xff] }
 0x1a3   : > { %v1477_v10 = vpop.f32.mrb[94].mxu0 }
 0x1a4   : > { %20503 = vst [vmem:[#allocation7_spill] sm:$0xff] %v15289_v38  ;;  %v1957_v4 = vpop.f32.mrb[94].mxu1  ;;  %v1657_v26 = vadd.f32 %v1477_v10, %v14837_v16  ;;  %v12158_v43 = vpop.f32.mrb[95].mxu0  ;;  %12443 = vmatmul.mubr.msk.f32.gmra.mrb[200].mxu0 %vm418_vm2, %v2190_v3  ;;  %v2192_v38 = vld [vmem:[%s14346_s10 + $0xb3] sm:$0xff] }
 0x1a5   : > { %12568 = vmatmul.mubr.msk.f32.gmra.mrb[200].mxu1 %vm418_vm2, %v15287_v55  ;;  %v12283_v33 = vpop.f32.mrb[95].mxu1  ;;  %12445 = vmatprep.mubr.msk.f32.mxu0 %vm14273_vm1, %v20362_v1 }
 0x1a6   : > { %12570 = vmatprep.mubr.msk.f32.mxu1 %vm14273_vm1, %v20362_v1  ;;  %v15303_v53 = vadd.f32 %v1957_v4, %v1657_v26  ;;  %v15315_v4 = vld [vmem:[%s14346_s10 + $0xb4] sm:$0xff] }
 0x1a7   : > { %v1482_v16 = vpop.f32.mrb[96].mxu0 }
 0x1a8   : > { %20504 = vst [vmem:[#allocation8_spill] sm:$0xff] %v15303_v53  ;;  %v1962_v10 = vpop.f32.mrb[96].mxu1  ;;  %v1658_v3 = vadd.f32 %v1482_v16, %v14846_v22  ;;  %v12161_v43 = vpop.f32.mrb[97].mxu0  ;;  %12446 = vmatmul.mubr.msk.f32.gmra.mrb[202].mxu0 %vm418_vm2, %v2191_v57  ;;  %v2193_v53 = vld [vmem:[%s14346_s10 + $0xbb] sm:$0xff] }
 0x1a9   : > { %12571 = vmatmul.mubr.msk.f32.gmra.mrb[202].mxu1 %vm418_vm2, %v15301_v61  ;;  %v12286_v33 = vpop.f32.mrb[97].mxu1  ;;  %12448 = vmatprep.mubr.msk.f32.mxu0 %vm14273_vm1, %v20362_v1 }
 0x1aa   : > { %12573 = vmatprep.mubr.msk.f32.mxu1 %vm14273_vm1, %v20362_v1  ;;  %v15317_v26 = vadd.f32 %v1962_v10, %v1658_v3  ;;  %v15329_v10 = vld [vmem:[%s14346_s10 + $0xbc] sm:$0xff] }
 0x1ab   : > { %v1487_v22 = vpop.f32.mrb[98].mxu0 }
 0x1ac   : > { %20505 = vst [vmem:[#allocation9_spill] sm:$0xff] %v15317_v26  ;;  %v1967_v16 = vpop.f32.mrb[98].mxu1  ;;  %v1659_v57 = vadd.f32 %v1487_v22, %v14855_v28  ;;  %v12164_v43 = vpop.f32.mrb[99].mxu0  ;;  %12449 = vmatmul.mubr.msk.f32.gmra.mrb[204].mxu0 %vm418_vm2, %v2192_v38  ;;  %v2194_v26 = vld [vmem:[%s14346_s10 + $0xc3] sm:$0xff] }
 0x1ad   : > { %12574 = vmatmul.mubr.msk.f32.gmra.mrb[204].mxu1 %vm418_vm2, %v15315_v4  ;;  %v12289_v33 = vpop.f32.mrb[99].mxu1  ;;  %12451 = vmatprep.mubr.msk.f32.mxu0 %vm14273_vm1, %v20362_v1 }
 0x1ae   : > { %12576 = vmatprep.mubr.msk.f32.mxu1 %vm14273_vm1, %v20362_v1  ;;  %v15331_v3 = vadd.f32 %v1967_v16, %v1659_v57  ;;  %v15343_v16 = vld [vmem:[%s14346_s10 + $0xc4] sm:$0xff] }
 0x1af   : > { %v1492_v28 = vpop.f32.mrb[100].mxu0 }
 0x1b0   : > { %20506 = vst [vmem:[#allocation10_spill] sm:$0xff] %v15331_v3  ;;  %v1972_v22 = vpop.f32.mrb[100].mxu1  ;;  %v1660_v38 = vadd.f32 %v1492_v28, %v14864_v34  ;;  %v12167_v43 = vpop.f32.mrb[101].mxu0  ;;  %12452 = vmatmul.mubr.msk.f32.gmra.mrb[206].mxu0 %vm418_vm2, %v2193_v53  ;;  %v2195_v3 = vld [vmem:[%s14346_s10 + $0xcb] sm:$0xff] }
 0x1b1   : > { %12577 = vmatmul.mubr.msk.f32.gmra.mrb[206].mxu1 %vm418_vm2, %v15329_v10  ;;  %v12292_v33 = vpop.f32.mrb[101].mxu1  ;;  %12454 = vmatprep.mubr.msk.f32.mxu0 %vm14273_vm1, %v20362_v1 }
 0x1b2   : > { %12579 = vmatprep.mubr.msk.f32.mxu1 %vm14273_vm1, %v20362_v1  ;;  %v15345_v57 = vadd.f32 %v1972_v22, %v1660_v38  ;;  %v15357_v22 = vld [vmem:[%s14346_s10 + $0xcc] sm:$0xff] }
 0x1b3   : > { %v1497_v34 = vpop.f32.mrb[102].mxu0 }
 0x1b4   : > { %20507 = vst [vmem:[#allocation11_spill] sm:$0xff] %v15345_v57  ;;  %v1977_v28 = vpop.f32.mrb[102].mxu1  ;;  %v1661_v53 = vadd.f32 %v1497_v34, %v14873_v40  ;;  %v12170_v43 = vpop.f32.mrb[103].mxu0  ;;  %12455 = vmatmul.mubr.msk.f32.gmra.mrb[208].mxu0 %vm418_vm2, %v2194_v26  ;;  %v2196_v57 = vld [vmem:[%s14346_s10 + $0xd3] sm:$0xff] }
 0x1b5   : > { %12580 = vmatmul.mubr.msk.f32.gmra.mrb[208].mxu1 %vm418_vm2, %v15343_v16  ;;  %v12295_v33 = vpop.f32.mrb[103].mxu1  ;;  %12457 = vmatprep.mubr.msk.f32.mxu0 %vm14273_vm1, %v20362_v1 }
 0x1b6   : > { %12582 = vmatprep.mubr.msk.f32.mxu1 %vm14273_vm1, %v20362_v1  ;;  %v15359_v38 = vadd.f32 %v1977_v28, %v1661_v53  ;;  %v15371_v28 = vld [vmem:[%s14346_s10 + $0xd4] sm:$0xff] }
 0x1b7   : > { %v1502_v40 = vpop.f32.mrb[104].mxu0 }
 0x1b8   : > { %20508 = vst [vmem:[#allocation12_spill] sm:$0xff] %v15359_v38  ;;  %v1982_v34 = vpop.f32.mrb[104].mxu1  ;;  %v1662_v26 = vadd.f32 %v1502_v40, %v14882_v47  ;;  %v12173_v43 = vpop.f32.mrb[105].mxu0  ;;  %12458 = vmatmul.mubr.msk.f32.gmra.mrb[210].mxu0 %vm418_vm2, %v2195_v3  ;;  %v2197_v38 = vld [vmem:[%s14346_s10 + $0xdb] sm:$0xff] }
 0x1b9   : > { %12583 = vmatmul.mubr.msk.f32.gmra.mrb[210].mxu1 %vm418_vm2, %v15357_v22  ;;  %v12298_v33 = vpop.f32.mrb[105].mxu1  ;;  %12460 = vmatprep.mubr.msk.f32.mxu0 %vm14273_vm1, %v20362_v1 }
 0x1ba   : > { %12585 = vmatprep.mubr.msk.f32.mxu1 %vm14273_vm1, %v20362_v1  ;;  %v15373_v53 = vadd.f32 %v1982_v34, %v1662_v26  ;;  %v15385_v34 = vld [vmem:[%s14346_s10 + $0xdc] sm:$0xff] }
 0x1bb   : > { %v1507_v47 = vpop.f32.mrb[106].mxu0 }
 0x1bc   : > { %20509 = vst [vmem:[#allocation13_spill] sm:$0xff] %v15373_v53  ;;  %v1987_v40 = vpop.f32.mrb[106].mxu1  ;;  %v1663_v3 = vadd.f32 %v1507_v47, %v14891_v54  ;;  %v12176_v43 = vpop.f32.mrb[107].mxu0  ;;  %12461 = vmatmul.mubr.msk.f32.gmra.mrb[212].mxu0 %vm418_vm2, %v2196_v57  ;;  %v2198_v53 = vld [vmem:[%s14346_s10 + $0xe3] sm:$0xff] }
 0x1bd   : > { %12586 = vmatmul.mubr.msk.f32.gmra.mrb[212].mxu1 %vm418_vm2, %v15371_v28  ;;  %v12301_v33 = vpop.f32.mrb[107].mxu1  ;;  %12463 = vmatprep.mubr.msk.f32.mxu0 %vm14273_vm1, %v20362_v1 }
 0x1be   : > { %12588 = vmatprep.mubr.msk.f32.mxu1 %vm14273_vm1, %v20362_v1  ;;  %v15387_v26 = vadd.f32 %v1987_v40, %v1663_v3  ;;  %v15399_v40 = vld [vmem:[%s14346_s10 + $0xe4] sm:$0xff] }
 0x1bf   : > { %v1512_v54 = vpop.f32.mrb[108].mxu0 }
 0x1c0   : > { %20510 = vst [vmem:[#allocation14_spill] sm:$0xff] %v15387_v26  ;;  %v1992_v47 = vpop.f32.mrb[108].mxu1  ;;  %v1664_v57 = vadd.f32 %v1512_v54, %v14900_v62  ;;  %v12179_v43 = vpop.f32.mrb[109].mxu0  ;;  %12464 = vmatmul.mubr.msk.f32.gmra.mrb[214].mxu0 %vm418_vm2, %v2197_v38  ;;  %v2199_v26 = vld [vmem:[%s14346_s10 + $0xeb] sm:$0xff] }
 0x1c1   : > { %12589 = vmatmul.mubr.msk.f32.gmra.mrb[214].mxu1 %vm418_vm2, %v15385_v34  ;;  %v12304_v33 = vpop.f32.mrb[109].mxu1  ;;  %12466 = vmatprep.mubr.msk.f32.mxu0 %vm14273_vm1, %v20362_v1 }
 0x1c2   : > { %12591 = vmatprep.mubr.msk.f32.mxu1 %vm14273_vm1, %v20362_v1  ;;  %v15401_v3 = vadd.f32 %v1992_v47, %v1664_v57  ;;  %v15413_v47 = vld [vmem:[%s14346_s10 + $0xec] sm:$0xff] }
 0x1c3   : > { %v1517_v62 = vpop.f32.mrb[110].mxu0 }
 0x1c4   : > { %20511 = vst [vmem:[#allocation15_spill] sm:$0xff] %v15401_v3  ;;  %v1997_v54 = vpop.f32.mrb[110].mxu1  ;;  %v1665_v38 = vadd.f32 %v1517_v62, %v14909_v6  ;;  %v12182_v43 = vpop.f32.mrb[111].mxu0  ;;  %12467 = vmatmul.mubr.msk.f32.gmra.mrb[216].mxu0 %vm418_vm2, %v2198_v53  ;;  %v2200_v3 = vld [vmem:[%s14346_s10 + $0xf3] sm:$0xff] }
 0x1c5   : > { %12592 = vmatmul.mubr.msk.f32.gmra.mrb[216].mxu1 %vm418_vm2, %v15399_v40  ;;  %v12307_v33 = vpop.f32.mrb[111].mxu1  ;;  %12469 = vmatprep.mubr.msk.f32.mxu0 %vm14273_vm1, %v20362_v1 }
 0x1c6   : > { %12594 = vmatprep.mubr.msk.f32.mxu1 %vm14273_vm1, %v20362_v1  ;;  %v15415_v57 = vadd.f32 %v1997_v54, %v1665_v38  ;;  %v15427_v54 = vld [vmem:[%s14346_s10 + $0xf4] sm:$0xff] }
 0x1c7   : > { %v1522_v6 = vpop.f32.mrb[112].mxu0 }
 0x1c8   : > { %20512 = vst [vmem:[#allocation16_spill] sm:$0xff] %v15415_v57  ;;  %v2002_v62 = vpop.f32.mrb[112].mxu1  ;;  %v1666_v53 = vadd.f32 %v1522_v6, %v14918_v13  ;;  %v12185_v43 = vpop.f32.mrb[113].mxu0  ;;  %12470 = vmatmul.mubr.msk.f32.gmra.mrb[218].mxu0 %vm418_vm2, %v2199_v26  ;;  %v2201_v57 = vld [vmem:[%s14346_s10 + $0xfb] sm:$0xff] }
 0x1c9   : > { %12595 = vmatmul.mubr.msk.f32.gmra.mrb[218].mxu1 %vm418_vm2, %v15413_v47  ;;  %v12310_v33 = vpop.f32.mrb[113].mxu1  ;;  %12472 = vmatprep.mubr.msk.f32.mxu0 %vm14273_vm1, %v20362_v1 }
 0x1ca   : > { %12597 = vmatprep.mubr.msk.f32.mxu1 %vm14273_vm1, %v20362_v1  ;;  %v15429_v38 = vadd.f32 %v2002_v62, %v1666_v53  ;;  %v15441_v62 = vld [vmem:[%s14346_s10 + $0xfc] sm:$0xff] }
 0x1cb   : > { %v1527_v13 = vpop.f32.mrb[114].mxu0 }
 0x1cc   : > { %20513 = vst [vmem:[#allocation17_spill] sm:$0xff] %v15429_v38  ;;  %v2007_v6 = vpop.f32.mrb[114].mxu1  ;;  %v1667_v26 = vadd.f32 %v1527_v13, %v14927_v20  ;;  %v12188_v43 = vpop.f32.mrb[115].mxu0  ;;  %12473 = vmatmul.mubr.msk.f32.gmra.mrb[220].mxu0 %vm418_vm2, %v2200_v3  ;;  %v2202_v38 = vld [vmem:[%s14346_s10 + $0x103] sm:$0xff] }
 0x1cd   : > { %12598 = vmatmul.mubr.msk.f32.gmra.mrb[220].mxu1 %vm418_vm2, %v15427_v54  ;;  %v12313_v33 = vpop.f32.mrb[115].mxu1  ;;  %12475 = vmatprep.mubr.msk.f32.mxu0 %vm14273_vm1, %v20362_v1 }
 0x1ce   : > { %12600 = vmatprep.mubr.msk.f32.mxu1 %vm14273_vm1, %v20362_v1  ;;  %v15443_v53 = vadd.f32 %v2007_v6, %v1667_v26  ;;  %v15455_v6 = vld [vmem:[%s14346_s10 + $0x104] sm:$0xff] }
 0x1cf   : > { %v1532_v20 = vpop.f32.mrb[116].mxu0 }
 0x1d0   : > { %20514 = vst [vmem:[#allocation18_spill] sm:$0xff] %v15443_v53  ;;  %v2012_v13 = vpop.f32.mrb[116].mxu1  ;;  %v1668_v3 = vadd.f32 %v1532_v20, %v14936_v27  ;;  %v12191_v43 = vpop.f32.mrb[117].mxu0  ;;  %12476 = vmatmul.mubr.msk.f32.gmra.mrb[222].mxu0 %vm418_vm2, %v2201_v57  ;;  %v2203_v53 = vld [vmem:[%s14346_s10 + $0x10b] sm:$0xff] }
 0x1d1   : > { %12601 = vmatmul.mubr.msk.f32.gmra.mrb[222].mxu1 %vm418_vm2, %v15441_v62  ;;  %v12316_v33 = vpop.f32.mrb[117].mxu1  ;;  %12478 = vmatprep.mubr.msk.f32.mxu0 %vm14273_vm1, %v20362_v1 }
 0x1d2   : > { %12603 = vmatprep.mubr.msk.f32.mxu1 %vm14273_vm1, %v20362_v1  ;;  %v15457_v26 = vadd.f32 %v2012_v13, %v1668_v3  ;;  %v15469_v13 = vld [vmem:[%s14346_s10 + $0x10c] sm:$0xff] }
 0x1d3   : > { %v1537_v27 = vpop.f32.mrb[118].mxu0 }
 0x1d4   : > { %20515 = vst [vmem:[#allocation19_spill] sm:$0xff] %v15457_v26  ;;  %v2017_v20 = vpop.f32.mrb[118].mxu1  ;;  %v1669_v57 = vadd.f32 %v1537_v27, %v14945_v35  ;;  %v12194_v43 = vpop.f32.mrb[119].mxu0  ;;  %12479 = vmatmul.mubr.msk.f32.gmra.mrb[224].mxu0 %vm418_vm2, %v2202_v38  ;;  %v2204_v26 = vld [vmem:[%s14346_s10 + $0x113] sm:$0xff] }
 0x1d5   : > { %12604 = vmatmul.mubr.msk.f32.gmra.mrb[224].mxu1 %vm418_vm2, %v15455_v6  ;;  %v12319_v33 = vpop.f32.mrb[119].mxu1  ;;  %12481 = vmatprep.mubr.msk.f32.mxu0 %vm14273_vm1, %v20362_v1 }
 0x1d6   : > { %12606 = vmatprep.mubr.msk.f32.mxu1 %vm14273_vm1, %v20362_v1  ;;  %v15471_v3 = vadd.f32 %v2017_v20, %v1669_v57  ;;  %v15483_v20 = vld [vmem:[%s14346_s10 + $0x114] sm:$0xff] }
 0x1d7   : > { %v1542_v35 = vpop.f32.mrb[120].mxu0 }
 0x1d8   : > { %20516 = vst [vmem:[#allocation20_spill] sm:$0xff] %v15471_v3  ;;  %v2022_v27 = vpop.f32.mrb[120].mxu1  ;;  %v1670_v38 = vadd.f32 %v1542_v35, %v14954_v42  ;;  %v12197_v43 = vpop.f32.mrb[121].mxu0  ;;  %12482 = vmatmul.mubr.msk.f32.gmra.mrb[226].mxu0 %vm418_vm2, %v2203_v53  ;;  %v2205_v3 = vld [vmem:[%s14346_s10 + $0x11b] sm:$0xff] }
 0x1d9   : > { %12607 = vmatmul.mubr.msk.f32.gmra.mrb[226].mxu1 %vm418_vm2, %v15469_v13  ;;  %v12322_v33 = vpop.f32.mrb[121].mxu1  ;;  %12484 = vmatprep.mubr.msk.f32.mxu0 %vm14273_vm1, %v20362_v1 }
 0x1da   : > { %12609 = vmatprep.mubr.msk.f32.mxu1 %vm14273_vm1, %v20362_v1  ;;  %v15485_v57 = vadd.f32 %v2022_v27, %v1670_v38  ;;  %v15497_v27 = vld [vmem:[%s14346_s10 + $0x11c] sm:$0xff] }
 0x1db   : > { %v1547_v42 = vpop.f32.mrb[122].mxu0 }
 0x1dc   : > { %20517 = vst [vmem:[#allocation21_spill] sm:$0xff] %v15485_v57  ;;  %v2027_v35 = vpop.f32.mrb[122].mxu1  ;;  %v1671_v53 = vadd.f32 %v1547_v42, %v14963_v51  ;;  %v12200_v43 = vpop.f32.mrb[123].mxu0  ;;  %12485 = vmatmul.mubr.msk.f32.gmra.mrb[228].mxu0 %vm418_vm2, %v2204_v26  ;;  %v2206_v57 = vld [vmem:[%s14346_s10 + $0x123] sm:$0xff] }
 0x1dd   : > { %12610 = vmatmul.mubr.msk.f32.gmra.mrb[228].mxu1 %vm418_vm2, %v15483_v20  ;;  %v12325_v33 = vpop.f32.mrb[123].mxu1  ;;  %12487 = vmatprep.mubr.msk.f32.mxu0 %vm14273_vm1, %v20362_v1 }
 0x1de   : > { %12612 = vmatprep.mubr.msk.f32.mxu1 %vm14273_vm1, %v20362_v1  ;;  %v15499_v38 = vadd.f32 %v2027_v35, %v1671_v53  ;;  %v15511_v35 = vld [vmem:[%s14346_s10 + $0x124] sm:$0xff] }
 0x1df   : > { %v1552_v51 = vpop.f32.mrb[124].mxu0 }
 0x1e0   : > { %20518 = vst [vmem:[#allocation22_spill] sm:$0xff] %v15499_v38  ;;  %v2032_v42 = vpop.f32.mrb[124].mxu1  ;;  %v1672_v26 = vadd.f32 %v1552_v51, %v14972_v59  ;;  %v12203_v43 = vpop.f32.mrb[125].mxu0  ;;  %12488 = vmatmul.mubr.msk.f32.gmra.mrb[230].mxu0 %vm418_vm2, %v2205_v3  ;;  %v2207_v38 = vld [vmem:[%s14346_s10 + $0x12b] sm:$0xff] }
 0x1e1   : > { %12613 = vmatmul.mubr.msk.f32.gmra.mrb[230].mxu1 %vm418_vm2, %v15497_v27  ;;  %v12328_v33 = vpop.f32.mrb[125].mxu1  ;;  %12490 = vmatprep.mubr.msk.f32.mxu0 %vm14273_vm1, %v20362_v1 }
 0x1e2   : > { %12615 = vmatprep.mubr.msk.f32.mxu1 %vm14273_vm1, %v20362_v1  ;;  %v15513_v53 = vadd.f32 %v2032_v42, %v1672_v26  ;;  %v15525_v42 = vld [vmem:[%s14346_s10 + $0x12c] sm:$0xff] }
 0x1e3   : > { %v1557_v59 = vpop.f32.mrb[126].mxu0 }
 0x1e4   : > { %20519 = vst [vmem:[#allocation23_spill] sm:$0xff] %v15513_v53  ;;  %v2037_v51 = vpop.f32.mrb[126].mxu1  ;;  %v1673_v3 = vadd.f32 %v1557_v59, %v14981_v5  ;;  %v12206_v43 = vpop.f32.mrb[127].mxu0  ;;  %12491 = vmatmul.mubr.msk.f32.gmra.mrb[232].mxu0 %vm418_vm2, %v2206_v57  ;;  %v2208_v53 = vld [vmem:[%s14346_s10 + $0x133] sm:$0xff] }
 0x1e5   : > { %12616 = vmatmul.mubr.msk.f32.gmra.mrb[232].mxu1 %vm418_vm2, %v15511_v35  ;;  %v12331_v33 = vpop.f32.mrb[127].mxu1  ;;  %12493 = vmatprep.mubr.msk.f32.mxu0 %vm14273_vm1, %v20362_v1 }
 0x1e6   : > { %12618 = vmatprep.mubr.msk.f32.mxu1 %vm14273_vm1, %v20362_v1  ;;  %v15527_v26 = vadd.f32 %v2037_v51, %v1673_v3  ;;  %v15539_v51 = vld [vmem:[%s14346_s10 + $0x134] sm:$0xff] }
 0x1e7   : > { %v1562_v5 = vpop.f32.mrb[128].mxu0 }
 0x1e8   : > { %20520 = vst [vmem:[#allocation24_spill] sm:$0xff] %v15527_v26  ;;  %v2042_v59 = vpop.f32.mrb[128].mxu1  ;;  %v1674_v57 = vadd.f32 %v1562_v5, %v14990_v14  ;;  %v12209_v43 = vpop.f32.mrb[129].mxu0  ;;  %12494 = vmatmul.mubr.msk.f32.gmra.mrb[234].mxu0 %vm418_vm2, %v2207_v38  ;;  %v2209_v26 = vld [vmem:[%s14346_s10 + $0x13b] sm:$0xff] }
 0x1e9   : > { %12619 = vmatmul.mubr.msk.f32.gmra.mrb[234].mxu1 %vm418_vm2, %v15525_v42  ;;  %v12334_v33 = vpop.f32.mrb[129].mxu1  ;;  %12496 = vmatprep.mubr.msk.f32.mxu0 %vm14273_vm1, %v20362_v1 }
 0x1ea   : > { %12621 = vmatprep.mubr.msk.f32.mxu1 %vm14273_vm1, %v20362_v1  ;;  %v15541_v3 = vadd.f32 %v2042_v59, %v1674_v57  ;;  %v15553_v59 = vld [vmem:[%s14346_s10 + $0x13c] sm:$0xff] }
 0x1eb   : > { %v1567_v14 = vpop.f32.mrb[130].mxu0 }
 0x1ec   : > { %20521 = vst [vmem:[#allocation25_spill] sm:$0xff] %v15541_v3  ;;  %v2047_v5 = vpop.f32.mrb[130].mxu1  ;;  %v1675_v38 = vadd.f32 %v1567_v14, %v14999_v23  ;;  %v12212_v43 = vpop.f32.mrb[131].mxu0  ;;  %12497 = vmatmul.mubr.msk.f32.gmra.mrb[236].mxu0 %vm418_vm2, %v2208_v53  ;;  %v2210_v3 = vld [vmem:[%s14346_s10 + $0x143] sm:$0xff] }
 0x1ed   : > { %12622 = vmatmul.mubr.msk.f32.gmra.mrb[236].mxu1 %vm418_vm2, %v15539_v51  ;;  %v12337_v33 = vpop.f32.mrb[131].mxu1  ;;  %12499 = vmatprep.mubr.msk.f32.mxu0 %vm14273_vm1, %v20362_v1 }
 0x1ee   : > { %12624 = vmatprep.mubr.msk.f32.mxu1 %vm14273_vm1, %v20362_v1  ;;  %v15555_v57 = vadd.f32 %v2047_v5, %v1675_v38  ;;  %v15567_v5 = vld [vmem:[%s14346_s10 + $0x144] sm:$0xff] }
 0x1ef   : > { %v1572_v23 = vpop.f32.mrb[132].mxu0 }
 0x1f0   : > { %20522 = vst [vmem:[#allocation26_spill] sm:$0xff] %v15555_v57  ;;  %v2052_v14 = vpop.f32.mrb[132].mxu1  ;;  %v1676_v53 = vadd.f32 %v1572_v23, %v15008_v31  ;;  %v12215_v43 = vpop.f32.mrb[133].mxu0  ;;  %12500 = vmatmul.mubr.msk.f32.gmra.mrb[238].mxu0 %vm418_vm2, %v2209_v26  ;;  %v2211_v57 = vld [vmem:[%s14346_s10 + $0x14b] sm:$0xff] }
 0x1f1   : > { %12625 = vmatmul.mubr.msk.f32.gmra.mrb[238].mxu1 %vm418_vm2, %v15553_v59  ;;  %v12340_v33 = vpop.f32.mrb[133].mxu1  ;;  %12502 = vmatprep.mubr.msk.f32.mxu0 %vm14273_vm1, %v20362_v1 }
 0x1f2   : > { %12627 = vmatprep.mubr.msk.f32.mxu1 %vm14273_vm1, %v20362_v1  ;;  %v15569_v38 = vadd.f32 %v2052_v14, %v1676_v53  ;;  %v15581_v14 = vld [vmem:[%s14346_s10 + $0x14c] sm:$0xff] }
 0x1f3   : > { %v1577_v31 = vpop.f32.mrb[134].mxu0 }
 0x1f4   : > { %20523 = vst [vmem:[#allocation27_spill] sm:$0xff] %v15569_v38  ;;  %v2057_v23 = vpop.f32.mrb[134].mxu1  ;;  %v1677_v26 = vadd.f32 %v1577_v31, %v15017_v39  ;;  %v12218_v43 = vpop.f32.mrb[135].mxu0  ;;  %12503 = vmatmul.mubr.msk.f32.gmra.mrb[240].mxu0 %vm418_vm2, %v2210_v3  ;;  %v2212_v38 = vld [vmem:[%s14346_s10 + $0x153] sm:$0xf] }
 0x1f5   : > { %12628 = vmatmul.mubr.msk.f32.gmra.mrb[240].mxu1 %vm418_vm2, %v15567_v5  ;;  %v12343_v33 = vpop.f32.mrb[135].mxu1  ;;  %12505 = vmatprep.mubr.msk.f32.mxu0 %vm14273_vm1, %v20362_v1 }
 0x1f6   : > { %12630 = vmatprep.mubr.msk.f32.mxu1 %vm14273_vm1, %v20362_v1  ;;  %v15583_v53 = vadd.f32 %v2057_v23, %v1677_v26  ;;  %v2692_v23 = vld [vmem:[%s14346_s10 + $0x154] sm:$0xf] }
 0x1f7   : > { %v1582_v39 = vpop.f32.mrb[136].mxu0 }
 0x1f8   : > { %20524 = vst [vmem:[#allocation28_spill] sm:$0xff] %v15583_v53  ;;  %v2062_v31 = vpop.f32.mrb[136].mxu1  ;;  %v1678_v3 = vadd.f32 %v1582_v39, %v15026_v50  ;;  %v12221_v43 = vpop.f32.mrb[137].mxu0  ;;  %12506 = vmatmul.mubr.msk.f32.gmra.mrb[242].mxu0 %vm418_vm2, %v2211_v57 }
 0x1f9   : > { %12631 = vmatmul.mubr.msk.f32.gmra.mrb[242].mxu1 %vm418_vm2, %v15581_v14  ;;  %v12346_v33 = vpop.f32.mrb[137].mxu1  ;;  %12508 = vmatprep.mubr.msk.f32.mxu0 %vm14273_vm1, %v20362_v1 }
 0x1fa   : > { %12633 = vmatprep.mubr.msk.f32.mxu1 %vm14273_vm1, %v20362_v1  ;;  %v15595_v26 = vadd.f32 %v2062_v31, %v1678_v3  ;;  %v3612_v33 = vld [vmem:[%s14346_s10 + $0x25] sm:$0xff] }
 0x1fb   : > { %v1587_v53 = vpop.f32.mrb[138].mxu0 }
 0x1fc   : > { %v2067_v50 = vpop.f32.mrb[138].mxu1  ;;  %v1679_v39 = vadd.f32 %v1587_v53, %v15036_v63  ;;  %v12224_v57 = vpop.f32.mrb[139].mxu0  ;;  %12509 = vmatmul.mubr.msk.f32.gmra.mrb[244].mxu0 %vm418_vm2, %v2212_v38  ;;  %v10655_v63 = vld [vmem:[%s20356_s2 + $0x20] sm:$0xf] }
 0x1fd   : > { %12634 = vmatmul.mubr.msk.f32.gmra.mrb[244].mxu1 %vm418_vm2, %v2692_v23  ;;  %v12349_v43 = vpop.f32.mrb[139].mxu1  ;;  %12638 = vmatprep.mubr.msk.f32.mxu0 %vm14273_vm1, %v20362_v1 }
 0x1fe   : > { %12763 = vmatprep.mubr.msk.f32.mxu1 %vm14273_vm1, %v20362_v1  ;;  %v15605_v31 = vadd.f32 %v2067_v50, %v1679_v39  ;;  %v3613_v50 = vld [vmem:[%s14346_s10 + $0x2d] sm:$0xff] }
 0x1ff   : > { %v1592_v53 = vpop.f32.mrb[140].mxu0 }
 0x200   : > { %v2072_v3 = vpop.f32.mrb[140].mxu1  ;;  %v1680_v38 = vadd.f32 %v1592_v53, %v15049_v12  ;;  %v12227_v23 = vpop.f32.mrb[141].mxu0  ;;  %12639 = vmatmul.mubr.msk.f32.vlgmr.msra.gmra.mrb[246].mxu0 %vm418_vm2, %v15071_v32 }
 0x201   : > { %12764 = vmatmul.mubr.msk.f32.vlgmr.msra.gmra.mrb[246].mxu1 %vm418_vm2, %v3612_v33  ;;  %v12352_v57 = vpop.f32.mrb[141].mxu1  ;;  %12887 = vmatpush3.msk.msra.mxu0 %vm542_vm0, %v10655_v63  ;;  %v3614_v63 = vld [vmem:[%s14346_s10 + $0x35] sm:$0xff] }
 0x202   : > { %12641 = vmatprep.mubr.msk.f32.mxu0 %vm14273_vm1, %v20362_v1  ;;  %v15618_v39 = vadd.f32 %v2072_v3, %v1680_v38  ;;  %12766 = vmatprep.mubr.msk.f32.mxu1 %vm14273_vm1, %v20362_v1 }
 0x203   : > { %v1597_v12 = vpop.f32.mrb[142].mxu0 }
 0x204   : > { %v2077_v43 = vpop.f32.mrb[142].mxu1  ;;  %v1681_v53 = vadd.f32 %v1597_v12, %v15061_v25  ;;  %v12230_v32 = vpop.f32.mrb[143].mxu0  ;;  %12642 = vmatmul.mubr.msk.f32.gmra.mrb[248].mxu0 %vm418_vm2, %v15084_v45 }
 0x205   : > { %12767 = vmatmul.mubr.msk.f32.gmra.mrb[248].mxu1 %vm418_vm2, %v3613_v50  ;;  %v12355_v33 = vpop.f32.mrb[143].mxu1  ;;  %12644 = vmatprep.mubr.msk.f32.mxu0 %vm14273_vm1, %v20362_v1  ;;  %v3615_v50 = vld [vmem:[%s14346_s10 + $0x3d] sm:$0xff] }
 0x206   : > { %12769 = vmatprep.mubr.msk.f32.mxu1 %vm14273_vm1, %v20362_v1  ;;  %v15631_v3 = vadd.f32 %v2077_v43, %v1681_v53  ;;  %v3616_v33 = vld [vmem:[%s14346_s10 + $0x45] sm:$0xff] }
 0x207   : > { %v1602_v38 = vpop.f32.mrb[144].mxu0 }
 0x208   : > { %v2082_v23 = vpop.f32.mrb[144].mxu1  ;;  %v1682_v25 = vadd.f32 %v1602_v38, %v15073_v37  ;;  %v12233_v57 = vpop.f32.mrb[145].mxu0  ;;  %12645 = vmatmul.mubr.msk.f32.gmra.mrb[250].mxu0 %vm418_vm2, %v15097_v58 }
 0x209   : > { %12770 = vmatmul.mubr.msk.f32.gmra.mrb[250].mxu1 %vm418_vm2, %v3614_v63  ;;  %v12358_v45 = vpop.f32.mrb[145].mxu1  ;;  %12647 = vmatprep.mubr.msk.f32.mxu0 %vm14273_vm1, %v20362_v1  ;;  %v3617_v57 = vld [vmem:[%s14346_s10 + $0x4d] sm:$0xff] }
 0x20a   : > { %12772 = vmatprep.mubr.msk.f32.mxu1 %vm14273_vm1, %v20362_v1  ;;  %v15642_v12 = vadd.f32 %v2082_v23, %v1682_v25 }
 0x20b   : > { %v1607_v43 = vpop.f32.mrb[146].mxu0 }
 0x20c   : > { %v2087_v53 = vpop.f32.mrb[146].mxu1  ;;  %v1683_v37 = vadd.f32 %v1607_v43, %v15086_v52  ;;  %v12236_v32 = vpop.f32.mrb[147].mxu0  ;;  %12648 = vmatmul.mubr.msk.f32.gmra.mrb[252].mxu0 %vm418_vm2, %v15110_v9 }
 0x20d   : > { %12773 = vmatmul.mubr.msk.f32.gmra.mrb[252].mxu1 %vm418_vm2, %v3615_v50  ;;  %v12361_v58 = vpop.f32.mrb[147].mxu1  ;;  %12650 = vmatprep.mubr.msk.f32.mxu0 %vm14273_vm1, %v20362_v1 }
 0x20e   : > { %12775 = vmatprep.mubr.msk.f32.mxu1 %vm14273_vm1, %v20362_v1  ;;  %v15653_v63 = vadd.f32 %v2087_v53, %v1683_v37  ;;  %v3618_v37 = vld [vmem:[%s14346_s10 + $0x55] sm:$0xff] }
 0x20f   : > { %v1612_v38 = vpop.f32.mrb[148].mxu0 }
 0x210   : > { %v2092_v23 = vpop.f32.mrb[148].mxu1  ;;  %v1684_v52 = vadd.f32 %v1612_v38, %v15099_v2  ;;  %v12239_v25 = vpop.f32.mrb[149].mxu0  ;;  %12651 = vmatmul.mubr.msk.f32.gmra.mrb[254].mxu0 %vm418_vm2, %v15123_v24 }
 0x211   : > { %12776 = vmatmul.mubr.msk.f32.gmra.mrb[254].mxu1 %vm418_vm2, %v3616_v33  ;;  %v12364_v9 = vpop.f32.mrb[149].mxu1  ;;  %12653 = vmatprep.mubr.msk.f32.mxu0 %vm14273_vm1, %v20362_v1 }
 0x212   : > { %12778 = vmatprep.mubr.msk.f32.mxu1 %vm14273_vm1, %v20362_v1  ;;  %v15664_v45 = vadd.f32 %v2092_v23, %v1684_v52  ;;  %v3619_v23 = vld [vmem:[%s14346_s10 + $0x5d] sm:$0xff] }
 0x213   : > { %v1617_v50 = vpop.f32.mrb[150].mxu0 }
 0x214   : > { %v2097_v43 = vpop.f32.mrb[150].mxu1  ;;  %v1685_v2 = vadd.f32 %v1617_v50, %v15112_v17  ;;  %v12242_v53 = vpop.f32.mrb[151].mxu0  ;;  %12654 = vmatmul.mubr.msk.f32.gmra.mrb[0].mxu0 %vm418_vm2, %v15136_v41  ;;  %v3620_v50 = vld [vmem:[%s14346_s10 + $0x65] sm:$0xff] }
 0x215   : > { %12779 = vmatmul.mubr.msk.f32.gmra.mrb[0].mxu1 %vm418_vm2, %v3617_v57  ;;  %v12367_v24 = vpop.f32.mrb[151].mxu1  ;;  %12656 = vmatprep.mubr.msk.f32.mxu0 %vm14273_vm1, %v20362_v1 }
 0x216   : > { %12781 = vmatprep.mubr.msk.f32.mxu1 %vm14273_vm1, %v20362_v1  ;;  %v15675_v32 = vadd.f32 %v2097_v43, %v1685_v2 }
 0x217   : > { %v1622_v58 = vpop.f32.mrb[152].mxu0 }
 0x218   : > { %v2102_v33 = vpop.f32.mrb[152].mxu1  ;;  %v1686_v17 = vadd.f32 %v1622_v58, %v15125_v30  ;;  %v12245_v38 = vpop.f32.mrb[153].mxu0  ;;  %12657 = vmatmul.mubr.msk.f32.gmra.mrb[2].mxu0 %vm418_vm2, %v15149_v60 }
 0x219   : > { %12782 = vmatmul.mubr.msk.f32.gmra.mrb[2].mxu1 %vm418_vm2, %v3618_v37  ;;  %v12370_v41 = vpop.f32.mrb[153].mxu1  ;;  %12659 = vmatprep.mubr.msk.f32.mxu0 %vm14273_vm1, %v20362_v1  ;;  %v3621_v37 = vld [vmem:[%s14346_s10 + $0x6d] sm:$0xff] }
 0x21a   : > { %12784 = vmatprep.mubr.msk.f32.mxu1 %vm14273_vm1, %v20362_v1  ;;  %v15686_v52 = vadd.f32 %v2102_v33, %v1686_v17  ;;  %v3622_v41 = vld [vmem:[%s14346_s10 + $0x75] sm:$0xff] }
 0x21b   : > { %v1627_v25 = vpop.f32.mrb[154].mxu0 }
 0x21c   : > { %v2107_v9 = vpop.f32.mrb[154].mxu1  ;;  %v1687_v30 = vadd.f32 %v1627_v25, %v15138_v48  ;;  %v12248_v57 = vpop.f32.mrb[155].mxu0  ;;  %12660 = vmatmul.mubr.msk.f32.gmra.mrb[4].mxu0 %vm418_vm2, %v15162_v18 }
 0x21d   : > { %12785 = vmatmul.mubr.msk.f32.gmra.mrb[4].mxu1 %vm418_vm2, %v3619_v23  ;;  %v12373_v60 = vpop.f32.mrb[155].mxu1  ;;  %12662 = vmatprep.mubr.msk.f32.mxu0 %vm14273_vm1, %v20362_v1  ;;  %v3623_v57 = vld [vmem:[%s14346_s10 + $0x7d] sm:$0xff] }
 0x21e   : > { %12787 = vmatprep.mubr.msk.f32.mxu1 %vm14273_vm1, %v20362_v1  ;;  %v15697_v43 = vadd.f32 %v2107_v9, %v1687_v30 }
 0x21f   : > { %v1632_v2 = vpop.f32.mrb[156].mxu0 }
 0x220   : > { %v2112_v53 = vpop.f32.mrb[156].mxu1  ;;  %v1688_v48 = vadd.f32 %v1632_v2, %v15151_v7  ;;  %v12251_v24 = vpop.f32.mrb[157].mxu0  ;;  %12663 = vmatmul.mubr.msk.f32.gmra.mrb[6].mxu0 %vm418_vm2, %v15179_v44 }
 0x221   : > { %12788 = vmatmul.mubr.msk.f32.gmra.mrb[6].mxu1 %vm418_vm2, %v3620_v50  ;;  %v12376_v18 = vpop.f32.mrb[157].mxu1  ;;  %12665 = vmatprep.mubr.msk.f32.mxu0 %vm14273_vm1, %v20362_v1 }
 0x222   : > { %12790 = vmatprep.mubr.msk.f32.mxu1 %vm14273_vm1, %v20362_v1  ;;  %v15708_v58 = vadd.f32 %v2112_v53, %v1688_v48  ;;  %v3624_v48 = vld [vmem:[%s14346_s10 + $0x85] sm:$0xff] }
 0x223   : > { %v1637_v33 = vpop.f32.mrb[158].mxu0 }
 0x224   : > { %v2117_v17 = vpop.f32.mrb[158].mxu1  ;;  %v1689_v7 = vadd.f32 %v1637_v33, %v15168_v29  ;;  %v12254_v38 = vpop.f32.mrb[159].mxu0  ;;  %12666 = vmatmul.mubr.msk.f32.gmra.mrb[8].mxu0 %vm418_vm2, %v15192_v8 }
 0x225   : > { %12791 = vmatmul.mubr.msk.f32.gmra.mrb[8].mxu1 %vm418_vm2, %v3621_v37  ;;  %v12379_v44 = vpop.f32.mrb[159].mxu1  ;;  %12668 = vmatprep.mubr.msk.f32.mxu0 %vm14273_vm1, %v20362_v1 }
 0x226   : > { %12793 = vmatprep.mubr.msk.f32.mxu1 %vm14273_vm1, %v20362_v1  ;;  %v15719_v23 = vadd.f32 %v2117_v17, %v1689_v7  ;;  %v3625_v17 = vld [vmem:[%s14346_s10 + $0x8d] sm:$0xff] }
 0x227   : > { %v1642_v25 = vpop.f32.mrb[160].mxu0 }
 0x228   : > { %v2122_v9 = vpop.f32.mrb[160].mxu1  ;;  %v1690_v29 = vadd.f32 %v1642_v25, %v15181_v56  ;;  %v12257_v30 = vpop.f32.mrb[161].mxu0  ;;  %12669 = vmatmul.mubr.msk.f32.gmra.mrb[10].mxu0 %vm418_vm2, %v15205_v36 }
 0x229   : > { %12794 = vmatmul.mubr.msk.f32.gmra.mrb[10].mxu1 %vm418_vm2, %v3622_v41  ;;  %v12382_v8 = vpop.f32.mrb[161].mxu1  ;;  %12671 = vmatprep.mubr.msk.f32.mxu0 %vm14273_vm1, %v20362_v1 }
 0x22a   : > { %12796 = vmatprep.mubr.msk.f32.mxu1 %vm14273_vm1, %v20362_v1  ;;  %v15730_v60 = vadd.f32 %v2122_v9, %v1690_v29  ;;  %v3626_v9 = vld [vmem:[%s14346_s10 + $0x95] sm:$0xff] }
 0x22b   : > { %v1647_v50 = vpop.f32.mrb[162].mxu0 }
 0x22c   : > { %v2127_v2 = vpop.f32.mrb[162].mxu1  ;;  %v1691_v56 = vadd.f32 %v1647_v50, %v15194_v19  ;;  %v12260_v53 = vpop.f32.mrb[163].mxu0  ;;  %12672 = vmatmul.mubr.msk.f32.gmra.mrb[12].mxu0 %vm418_vm2, %v15217_v11 }
 0x22d   : > { %12797 = vmatmul.mubr.msk.f32.gmra.mrb[12].mxu1 %vm418_vm2, %v3623_v57  ;;  %v12385_v36 = vpop.f32.mrb[163].mxu1  ;;  %12674 = vmatprep.mubr.msk.f32.mxu0 %vm14273_vm1, %v20362_v1  ;;  %v20526_v57 = vld [vmem:[#allocation4_spill] sm:$0xff] }
 0x22e   : > { %12799 = vmatprep.mubr.msk.f32.mxu1 %vm14273_vm1, %v20362_v1  ;;  %v15741_v24 = vadd.f32 %v2127_v2, %v1691_v56  ;;  %v3627_v56 = vld [vmem:[%s14346_s10 + $0x9d] sm:$0xff] }
 0x22f   : > { %v2407_v18 = vpop.f32.mrb[164].mxu0 }
 0x230   : > { %v2887_v37 = vpop.f32.mrb[164].mxu1  ;;  %v2611_v19 = vadd.f32 %v2407_v18, %v15219_v15  ;;  %v12390_v33 = vpop.f32.mrb[165].mxu0  ;;  %12675 = vmatmul.mubr.msk.f32.gmra.mrb[14].mxu0 %vm418_vm2, %v15231_v46  ;;  %v20525_v15 = vld [vmem:[#allocation3_spill] sm:$0xff]  ;;  %v20527_v18 = vld [vmem:[#allocation5_spill] sm:$0xff] }
 0x231   : > { %12800 = vmatmul.mubr.msk.f32.gmra.mrb[14].mxu1 %vm418_vm2, %v3624_v48  ;;  %v12515_v11 = vpop.f32.mrb[165].mxu1  ;;  %12677 = vmatprep.mubr.msk.f32.mxu0 %vm14273_vm1, %v20362_v1  ;;  %v3628_v33 = vld [vmem:[%s14346_s10 + $0xa5] sm:$0xff] }
 0x232   : > { %12802 = vmatprep.mubr.msk.f32.mxu1 %vm14273_vm1, %v20362_v1  ;;  %v15752_v7 = vadd.f32 %v2887_v37, %v2611_v19 }
 0x233   : > { %v2412_v38 = vpop.f32.mrb[166].mxu0 }
 0x234   : > { %v2892_v44 = vpop.f32.mrb[166].mxu1  ;;  %v2612_v41 = vadd.f32 %v2412_v38, %v20525_v15  ;;  %v12393_v25 = vpop.f32.mrb[167].mxu0  ;;  %12678 = vmatmul.mubr.msk.f32.gmra.mrb[16].mxu0 %vm418_vm2, %v15245_v21 }
 0x235   : > { %12803 = vmatmul.mubr.msk.f32.gmra.mrb[16].mxu1 %vm418_vm2, %v3625_v17  ;;  %v12518_v46 = vpop.f32.mrb[167].mxu1  ;;  %12680 = vmatprep.mubr.msk.f32.mxu0 %vm14273_vm1, %v20362_v1  ;;  %v3629_v25 = vld [vmem:[%s14346_s10 + $0xad] sm:$0xff] }
 0x236   : > { %12805 = vmatprep.mubr.msk.f32.mxu1 %vm14273_vm1, %v20362_v1  ;;  %v15763_v29 = vadd.f32 %v2892_v44, %v2612_v41  ;;  %v20528_v44 = vld [vmem:[#allocation6_spill] sm:$0xff] }
 0x237   : > { %v2417_v30 = vpop.f32.mrb[168].mxu0 }
 0x238   : > { %v2897_v8 = vpop.f32.mrb[168].mxu1  ;;  %v2613_v50 = vadd.f32 %v2417_v30, %v20526_v57  ;;  %v12396_v2 = vpop.f32.mrb[169].mxu0  ;;  %12681 = vmatmul.mubr.msk.f32.gmra.mrb[18].mxu0 %vm418_vm2, %v15259_v0 }
 0x239   : > { %12806 = vmatmul.mubr.msk.f32.gmra.mrb[18].mxu1 %vm418_vm2, %v3626_v9  ;;  %v12521_v21 = vpop.f32.mrb[169].mxu1  ;;  %12683 = vmatprep.mubr.msk.f32.mxu0 %vm14273_vm1, %v20362_v1  ;;  %v3630_v2 = vld [vmem:[%s14346_s10 + $0xb5] sm:$0xff] }
 0x23a   : > { %12808 = vmatprep.mubr.msk.f32.mxu1 %vm14273_vm1, %v20362_v1  ;;  %v15774_v53 = vadd.f32 %v2897_v8, %v2613_v50  ;;  %v20529_v8 = vld [vmem:[#allocation7_spill] sm:$0xff] }
 0x23b   : > { %v2422_v36 = vpop.f32.mrb[170].mxu0 }
 0x23c   : > { %v2902_v48 = vpop.f32.mrb[170].mxu1  ;;  %v2614_v37 = vadd.f32 %v2422_v36, %v20527_v18  ;;  %v12399_v19 = vpop.f32.mrb[171].mxu0  ;;  %12684 = vmatmul.mubr.msk.f32.gmra.mrb[20].mxu0 %vm418_vm2, %v15273_v49 }
 0x23d   : > { %12809 = vmatmul.mubr.msk.f32.gmra.mrb[20].mxu1 %vm418_vm2, %v3627_v56  ;;  %v12524_v0 = vpop.f32.mrb[171].mxu1  ;;  %12686 = vmatprep.mubr.msk.f32.mxu0 %vm14273_vm1, %v20362_v1  ;;  %v3631_v19 = vld [vmem:[%s14346_s10 + $0xbd] sm:$0xff] }
 0x23e   : > { %12811 = vmatprep.mubr.msk.f32.mxu1 %vm14273_vm1, %v20362_v1  ;;  %v15785_v11 = vadd.f32 %v2902_v48, %v2614_v37  ;;  %v20530_v48 = vld [vmem:[#allocation8_spill] sm:$0xff] }
 0x23f   : > { %v2427_v17 = vpop.f32.mrb[172].mxu0 }
 0x240   : > { %v2907_v38 = vpop.f32.mrb[172].mxu1  ;;  %v2615_v15 = vadd.f32 %v2427_v17, %v20528_v44  ;;  %v12402_v41 = vpop.f32.mrb[173].mxu0  ;;  %12687 = vmatmul.mubr.msk.f32.gmra.mrb[22].mxu0 %vm418_vm2, %v15287_v55 }
 0x241   : > { %12812 = vmatmul.mubr.msk.f32.gmra.mrb[22].mxu1 %vm418_vm2, %v3628_v33  ;;  %v12527_v49 = vpop.f32.mrb[173].mxu1  ;;  %12689 = vmatprep.mubr.msk.f32.mxu0 %vm14273_vm1, %v20362_v1  ;;  %v3632_v41 = vld [vmem:[%s14346_s10 + $0xc5] sm:$0xff] }
 0x242   : > { %12814 = vmatprep.mubr.msk.f32.mxu1 %vm14273_vm1, %v20362_v1  ;;  %v15796_v46 = vadd.f32 %v2907_v38, %v2615_v15  ;;  %v20531_v38 = vld [vmem:[#allocation9_spill] sm:$0xff] }
 0x243   : > { %v2432_v9 = vpop.f32.mrb[174].mxu0 }
 0x244   : > { %v2912_v30 = vpop.f32.mrb[174].mxu1  ;;  %v2616_v57 = vadd.f32 %v2432_v9, %v20529_v8  ;;  %v12405_v50 = vpop.f32.mrb[175].mxu0  ;;  %12690 = vmatmul.mubr.msk.f32.gmra.mrb[24].mxu0 %vm418_vm2, %v15301_v61 }
 0x245   : > { %12815 = vmatmul.mubr.msk.f32.gmra.mrb[24].mxu1 %vm418_vm2, %v3629_v25  ;;  %v12530_v55 = vpop.f32.mrb[175].mxu1  ;;  %12692 = vmatprep.mubr.msk.f32.mxu0 %vm14273_vm1, %v20362_v1  ;;  %v3633_v50 = vld [vmem:[%s14346_s10 + $0xcd] sm:$0xff] }
 0x246   : > { %12817 = vmatprep.mubr.msk.f32.mxu1 %vm14273_vm1, %v20362_v1  ;;  %v15807_v21 = vadd.f32 %v2912_v30, %v2616_v57  ;;  %v20532_v30 = vld [vmem:[#allocation10_spill] sm:$0xff] }
 0x247   : > { %v2437_v56 = vpop.f32.mrb[176].mxu0 }
 0x248   : > { %v2917_v36 = vpop.f32.mrb[176].mxu1  ;;  %v2617_v18 = vadd.f32 %v2437_v56, %v20530_v48  ;;  %v12408_v37 = vpop.f32.mrb[177].mxu0  ;;  %12693 = vmatmul.mubr.msk.f32.gmra.mrb[26].mxu0 %vm418_vm2, %v15315_v4 }
 0x249   : > { %12818 = vmatmul.mubr.msk.f32.gmra.mrb[26].mxu1 %vm418_vm2, %v3630_v2  ;;  %v12533_v61 = vpop.f32.mrb[177].mxu1  ;;  %12695 = vmatprep.mubr.msk.f32.mxu0 %vm14273_vm1, %v20362_v1  ;;  %v3634_v37 = vld [vmem:[%s14346_s10 + $0xd5] sm:$0xff] }
 0x24a   : > { %12820 = vmatprep.mubr.msk.f32.mxu1 %vm14273_vm1, %v20362_v1  ;;  %v15818_v0 = vadd.f32 %v2917_v36, %v2617_v18  ;;  %v20533_v36 = vld [vmem:[#allocation11_spill] sm:$0xff] }
 0x24b   : > { %v2442_v33 = vpop.f32.mrb[178].mxu0 }
 0x24c   : > { %v2922_v17 = vpop.f32.mrb[178].mxu1  ;;  %v2618_v44 = vadd.f32 %v2442_v33, %v20531_v38  ;;  %v12411_v15 = vpop.f32.mrb[179].mxu0  ;;  %12696 = vmatmul.mubr.msk.f32.gmra.mrb[28].mxu0 %vm418_vm2, %v15329_v10 }
 0x24d   : > { %12821 = vmatmul.mubr.msk.f32.gmra.mrb[28].mxu1 %vm418_vm2, %v3631_v19  ;;  %v12536_v4 = vpop.f32.mrb[179].mxu1  ;;  %12698 = vmatprep.mubr.msk.f32.mxu0 %vm14273_vm1, %v20362_v1  ;;  %v3635_v15 = vld [vmem:[%s14346_s10 + $0xdd] sm:$0xff] }
 0x24e   : > { %12823 = vmatprep.mubr.msk.f32.mxu1 %vm14273_vm1, %v20362_v1  ;;  %v15829_v49 = vadd.f32 %v2922_v17, %v2618_v44  ;;  %v20534_v17 = vld [vmem:[#allocation12_spill] sm:$0xff] }
 0x24f   : > { %v2447_v25 = vpop.f32.mrb[180].mxu0 }
 0x250   : > { %v2927_v9 = vpop.f32.mrb[180].mxu1  ;;  %v2619_v8 = vadd.f32 %v2447_v25, %v20532_v30  ;;  %v12414_v57 = vpop.f32.mrb[181].mxu0  ;;  %12699 = vmatmul.mubr.msk.f32.gmra.mrb[30].mxu0 %vm418_vm2, %v15343_v16 }
 0x251   : > { %12824 = vmatmul.mubr.msk.f32.gmra.mrb[30].mxu1 %vm418_vm2, %v3632_v41  ;;  %v12539_v10 = vpop.f32.mrb[181].mxu1  ;;  %12701 = vmatprep.mubr.msk.f32.mxu0 %vm14273_vm1, %v20362_v1  ;;  %v3636_v57 = vld [vmem:[%s14346_s10 + $0xe5] sm:$0xff] }
 0x252   : > { %12826 = vmatprep.mubr.msk.f32.mxu1 %vm14273_vm1, %v20362_v1  ;;  %v15840_v55 = vadd.f32 %v2927_v9, %v2619_v8  ;;  %v20535_v9 = vld [vmem:[#allocation13_spill] sm:$0xff] }
 0x253   : > { %v2452_v2 = vpop.f32.mrb[182].mxu0 }
 0x254   : > { %v2932_v56 = vpop.f32.mrb[182].mxu1  ;;  %v2620_v48 = vadd.f32 %v2452_v2, %v20533_v36  ;;  %v12417_v18 = vpop.f32.mrb[183].mxu0  ;;  %12702 = vmatmul.mubr.msk.f32.gmra.mrb[32].mxu0 %vm418_vm2, %v15357_v22 }
 0x255   : > { %12827 = vmatmul.mubr.msk.f32.gmra.mrb[32].mxu1 %vm418_vm2, %v3633_v50  ;;  %v12542_v16 = vpop.f32.mrb[183].mxu1  ;;  %12704 = vmatprep.mubr.msk.f32.mxu0 %vm14273_vm1, %v20362_v1  ;;  %v3637_v18 = vld [vmem:[%s14346_s10 + $0xed] sm:$0xff] }
 0x256   : > { %12829 = vmatprep.mubr.msk.f32.mxu1 %vm14273_vm1, %v20362_v1  ;;  %v15851_v61 = vadd.f32 %v2932_v56, %v2620_v48  ;;  %v20536_v56 = vld [vmem:[#allocation14_spill] sm:$0xff] }
 0x257   : > { %v2457_v19 = vpop.f32.mrb[184].mxu0 }
 0x258   : > { %v2937_v33 = vpop.f32.mrb[184].mxu1  ;;  %v2621_v38 = vadd.f32 %v2457_v19, %v20534_v17  ;;  %v12420_v44 = vpop.f32.mrb[185].mxu0  ;;  %12705 = vmatmul.mubr.msk.f32.gmra.mrb[34].mxu0 %vm418_vm2, %v15371_v28 }
 0x259   : > { %12830 = vmatmul.mubr.msk.f32.gmra.mrb[34].mxu1 %vm418_vm2, %v3634_v37  ;;  %v12545_v22 = vpop.f32.mrb[185].mxu1  ;;  %12707 = vmatprep.mubr.msk.f32.mxu0 %vm14273_vm1, %v20362_v1  ;;  %v3638_v44 = vld [vmem:[%s14346_s10 + $0xf5] sm:$0xff] }
 0x25a   : > { %12832 = vmatprep.mubr.msk.f32.mxu1 %vm14273_vm1, %v20362_v1  ;;  %v15862_v4 = vadd.f32 %v2937_v33, %v2621_v38  ;;  %v20537_v33 = vld [vmem:[#allocation15_spill] sm:$0xff] }
 0x25b   : > { %v2462_v41 = vpop.f32.mrb[186].mxu0 }
 0x25c   : > { %v2942_v25 = vpop.f32.mrb[186].mxu1  ;;  %v2622_v30 = vadd.f32 %v2462_v41, %v20535_v9  ;;  %v12423_v8 = vpop.f32.mrb[187].mxu0  ;;  %12708 = vmatmul.mubr.msk.f32.gmra.mrb[36].mxu0 %vm418_vm2, %v15385_v34 }
 0x25d   : > { %12833 = vmatmul.mubr.msk.f32.gmra.mrb[36].mxu1 %vm418_vm2, %v3635_v15  ;;  %v12548_v28 = vpop.f32.mrb[187].mxu1  ;;  %12710 = vmatprep.mubr.msk.f32.mxu0 %vm14273_vm1, %v20362_v1  ;;  %v3639_v8 = vld [vmem:[%s14346_s10 + $0xfd] sm:$0xff] }
 0x25e   : > { %12835 = vmatprep.mubr.msk.f32.mxu1 %vm14273_vm1, %v20362_v1  ;;  %v15873_v10 = vadd.f32 %v2942_v25, %v2622_v30  ;;  %v20538_v25 = vld [vmem:[#allocation16_spill] sm:$0xff] }
 0x25f   : > { %v2467_v50 = vpop.f32.mrb[188].mxu0 }
 0x260   : > { %v2947_v2 = vpop.f32.mrb[188].mxu1  ;;  %v2623_v36 = vadd.f32 %v2467_v50, %v20536_v56  ;;  %v12426_v48 = vpop.f32.mrb[189].mxu0  ;;  %12711 = vmatmul.mubr.msk.f32.gmra.mrb[38].mxu0 %vm418_vm2, %v15399_v40 }
 0x261   : > { %12836 = vmatmul.mubr.msk.f32.gmra.mrb[38].mxu1 %vm418_vm2, %v3636_v57  ;;  %v12551_v34 = vpop.f32.mrb[189].mxu1  ;;  %12713 = vmatprep.mubr.msk.f32.mxu0 %vm14273_vm1, %v20362_v1  ;;  %v3640_v48 = vld [vmem:[%s14346_s10 + $0x105] sm:$0xff] }
 0x262   : > { %12838 = vmatprep.mubr.msk.f32.mxu1 %vm14273_vm1, %v20362_v1  ;;  %v15884_v16 = vadd.f32 %v2947_v2, %v2623_v36  ;;  %v20539_v2 = vld [vmem:[#allocation17_spill] sm:$0xff] }
 0x263   : > { %v2472_v37 = vpop.f32.mrb[190].mxu0 }
 0x264   : > { %v2952_v19 = vpop.f32.mrb[190].mxu1  ;;  %v2624_v17 = vadd.f32 %v2472_v37, %v20537_v33  ;;  %v12429_v38 = vpop.f32.mrb[191].mxu0  ;;  %12714 = vmatmul.mubr.msk.f32.gmra.mrb[40].mxu0 %vm418_vm2, %v15413_v47 }
 0x265   : > { %12839 = vmatmul.mubr.msk.f32.gmra.mrb[40].mxu1 %vm418_vm2, %v3637_v18  ;;  %v12554_v40 = vpop.f32.mrb[191].mxu1  ;;  %12716 = vmatprep.mubr.msk.f32.mxu0 %vm14273_vm1, %v20362_v1  ;;  %v3641_v38 = vld [vmem:[%s14346_s10 + $0x10d] sm:$0xff] }
 0x266   : > { %12841 = vmatprep.mubr.msk.f32.mxu1 %vm14273_vm1, %v20362_v1  ;;  %v15895_v22 = vadd.f32 %v2952_v19, %v2624_v17  ;;  %v20540_v19 = vld [vmem:[#allocation18_spill] sm:$0xff] }
 0x267   : > { %v2477_v15 = vpop.f32.mrb[192].mxu0 }
 0x268   : > { %v2957_v41 = vpop.f32.mrb[192].mxu1  ;;  %v2625_v9 = vadd.f32 %v2477_v15, %v20538_v25  ;;  %v12432_v30 = vpop.f32.mrb[193].mxu0  ;;  %12717 = vmatmul.mubr.msk.f32.gmra.mrb[42].mxu0 %vm418_vm2, %v15427_v54 }
 0x269   : > { %12842 = vmatmul.mubr.msk.f32.gmra.mrb[42].mxu1 %vm418_vm2, %v3638_v44  ;;  %v12557_v47 = vpop.f32.mrb[193].mxu1  ;;  %12719 = vmatprep.mubr.msk.f32.mxu0 %vm14273_vm1, %v20362_v1  ;;  %v3642_v30 = vld [vmem:[%s14346_s10 + $0x115] sm:$0xff] }
 0x26a   : > { %12844 = vmatprep.mubr.msk.f32.mxu1 %vm14273_vm1, %v20362_v1  ;;  %v15906_v28 = vadd.f32 %v2957_v41, %v2625_v9  ;;  %v20541_v41 = vld [vmem:[#allocation19_spill] sm:$0xff] }
 0x26b   : > { %v2482_v57 = vpop.f32.mrb[194].mxu0 }
 0x26c   : > { %v2962_v50 = vpop.f32.mrb[194].mxu1  ;;  %v2626_v56 = vadd.f32 %v2482_v57, %v20539_v2  ;;  %v12435_v36 = vpop.f32.mrb[195].mxu0  ;;  %12720 = vmatmul.mubr.msk.f32.gmra.mrb[44].mxu0 %vm418_vm2, %v15441_v62 }
 0x26d   : > { %12845 = vmatmul.mubr.msk.f32.gmra.mrb[44].mxu1 %vm418_vm2, %v3639_v8  ;;  %v12560_v54 = vpop.f32.mrb[195].mxu1  ;;  %12722 = vmatprep.mubr.msk.f32.mxu0 %vm14273_vm1, %v20362_v1  ;;  %v3643_v36 = vld [vmem:[%s14346_s10 + $0x11d] sm:$0xff] }
 0x26e   : > { %12847 = vmatprep.mubr.msk.f32.mxu1 %vm14273_vm1, %v20362_v1  ;;  %v15917_v34 = vadd.f32 %v2962_v50, %v2626_v56  ;;  %v20542_v50 = vld [vmem:[#allocation20_spill] sm:$0xff]  ;;  %v292_v54 = vld [vmem:[%s20355_s1] sm:$0xff] }
 0x26f   : > { %v2487_v18 = vpop.f32.mrb[196].mxu0 }
 0x270   : > { %v2967_v37 = vpop.f32.mrb[196].mxu1  ;;  %v2627_v33 = vadd.f32 %v2487_v18, %v20540_v19  ;;  %v12438_v17 = vpop.f32.mrb[197].mxu0  ;;  %12723 = vmatmul.mubr.msk.f32.gmra.mrb[46].mxu0 %vm418_vm2, %v15455_v6  ;;  %v14274_v18 = vmov 0   ;;  %v20543_v19 = vld [vmem:[#allocation21_spill] sm:$0xff] }
 0x271   : > { %12848 = vmatmul.mubr.msk.f32.gmra.mrb[46].mxu1 %vm418_vm2, %v3640_v48  ;;  %v12563_v62 = vpop.f32.mrb[197].mxu1  ;;  %12725 = vmatprep.mubr.msk.f32.mxu0 %vm14273_vm1, %v20362_v1 }
 0x272   : > { %12850 = vmatprep.mubr.msk.f32.mxu1 %vm14273_vm1, %v20362_v1  ;;  %v15928_v40 = vadd.f32 %v2967_v37, %v2627_v33  ;;  %14258 = vset.pattern.permute.xlu0 %v14274_v18 }
 0x273   : > { %v2492_v44 = vpop.f32.mrb[198].mxu0  ;;  %14259 = vset.pattern.permute.xlu1 %v14274_v18  ;;  %4622 = vperm.xlu0 %14258, %v292_v54  }
 0x274   : > { %v2972_v15 = vpop.f32.mrb[198].mxu1  ;;  %v2628_v25 = vadd.f32 %v2492_v44, %v20541_v41  ;;  %v12441_v9 = vpop.f32.mrb[199].mxu0  ;;  %12726 = vmatmul.mubr.msk.f32.gmra.mrb[48].mxu0 %vm418_vm2, %v15469_v13  ;;  %v293_v44 = vld [vmem:[%s20355_s1 + $0x8] sm:$0xff] }
 0x275   : > { %12851 = vmatmul.mubr.msk.f32.gmra.mrb[48].mxu1 %vm418_vm2, %v3641_v38  ;;  %v12566_v6 = vpop.f32.mrb[199].mxu1  ;;  %12728 = vmatprep.mubr.msk.f32.mxu0 %vm14273_vm1, %v20362_v1  ;;  %v3644_v38 = vld [vmem:[%s14346_s10 + $0x125] sm:$0xff] }
 0x276   : > { %12853 = vmatprep.mubr.msk.f32.mxu1 %vm14273_vm1, %v20362_v1  ;;  %v15939_v47 = vadd.f32 %v2972_v15, %v2628_v25 }
 0x277   : > { %v2497_v8 = vpop.f32.mrb[200].mxu0  ;;  %4627 = vperm.xlu0 %14258, %v293_v44  }
 0x278   : > { %v2977_v57 = vpop.f32.mrb[200].mxu1  ;;  %v2629_v2 = vadd.f32 %v2497_v8, %v20542_v50  ;;  %v12444_v56 = vpop.f32.mrb[201].mxu0  ;;  %12729 = vmatmul.mubr.msk.f32.gmra.mrb[50].mxu0 %vm418_vm2, %v15483_v20  ;;  %v3645_v8 = vld [vmem:[%s14346_s10 + $0x12d] sm:$0xff]  ;;  %v296_v50 = vld [vmem:[%s20355_s1 + $0x20] sm:$0xff] }
 0x279   : > { %12854 = vmatmul.mubr.msk.f32.gmra.mrb[50].mxu1 %vm418_vm2, %v3642_v30  ;;  %v12569_v13 = vpop.f32.mrb[201].mxu1  ;;  %12731 = vmatprep.mubr.msk.f32.mxu0 %vm14273_vm1, %v20362_v1 }
 0x27a   : > { %12856 = vmatprep.mubr.msk.f32.mxu1 %vm14273_vm1, %v20362_v1  ;;  %v15953_v48 = vadd.f32 %v2977_v57, %v2629_v2  ;;  %v294_v57 = vld [vmem:[%s20355_s1 + $0x10] sm:$0xff] }
 0x27b   : > { %v2502_v20 = vpop.f32.mrb[202].mxu0  ;;  %4632 = vperm.xlu1 %14259, %v294_v57   ;;  %4642 = vperm.xlu0 %14258, %v296_v50   ;;  %v20545_v13 = vld [vmem:[#allocation23_spill] sm:$0xff] }
 0x27c   : > { %v2982_v37 = vpop.f32.mrb[202].mxu1  ;;  %v2630_v33 = vadd.f32 %v2502_v20, %v20543_v19  ;;  %v12447_v17 = vpop.f32.mrb[203].mxu0  ;;  %12732 = vmatmul.mubr.msk.f32.gmra.mrb[52].mxu0 %vm418_vm2, %v15497_v27  ;;  %v20544_v27 = vld [vmem:[#allocation22_spill] sm:$0xff]  ;;  %v3646_v20 = vld [vmem:[%s14346_s10 + $0x135] sm:$0xff] }
 0x27d   : > { %12857 = vmatmul.mubr.msk.f32.gmra.mrb[52].mxu1 %vm418_vm2, %v3643_v36  ;;  %v12572_v62 = vpop.f32.mrb[203].mxu1  ;;  %12734 = vmatprep.mubr.msk.f32.mxu0 %vm14273_vm1, %v20362_v1  ;;  %v298_v19 = vld [vmem:[%s20355_s1 + $0x30] sm:$0xff] }
 0x27e   : > { %12859 = vmatprep.mubr.msk.f32.mxu1 %vm14273_vm1, %v20362_v1  ;;  %v15967_v15 = vadd.f32 %v2982_v37, %v2630_v33  ;;  %v295_v37 = vld [vmem:[%s20355_s1 + $0x18] sm:$0xff] }
 0x27f   : > { %v2507_v41 = vpop.f32.mrb[204].mxu0  ;;  %4637 = vperm.xlu1 %14259, %v295_v37   ;;  %4652 = vperm.xlu0 %14258, %v298_v19   ;;  %v20546_v62 = vld [vmem:[#allocation24_spill] sm:$0xff] }
 0x280   : > { %v2987_v25 = vpop.f32.mrb[204].mxu1  ;;  %v2631_v9 = vadd.f32 %v2507_v41, %v20544_v27  ;;  %v12450_v6 = vpop.f32.mrb[205].mxu0  ;;  %12735 = vmatmul.mubr.msk.f32.gmra.mrb[54].mxu0 %vm418_vm2, %v15511_v35  ;;  %v297_v27 = vld [vmem:[%s20355_s1 + $0x28] sm:$0xff] }
 0x281   : > { %12860 = vmatmul.mubr.msk.f32.gmra.mrb[54].mxu1 %vm418_vm2, %v3644_v38  ;;  %v12575_v30 = vpop.f32.mrb[205].mxu1  ;;  %12737 = vmatprep.mubr.msk.f32.mxu0 %vm14273_vm1, %v20362_v1 }
 0x282   : > { %12862 = vmatprep.mubr.msk.f32.mxu1 %vm14273_vm1, %v20362_v1  ;;  %v15984_v35 = vadd.f32 %v2987_v25, %v2631_v9  ;;  %v3647_v25 = vld [vmem:[%s14346_s10 + $0x13d] sm:$0xff] }
 0x283   : > { %v2512_v2 = vpop.f32.mrb[206].mxu0  ;;  %v300_v9 = vld [vmem:[%s20355_s1 + $0x40] sm:$0xff]  ;;  %4647 = vperm.xlu1 %14259, %v297_v27  }
 0x284   : > { %v2992_v56 = vpop.f32.mrb[206].mxu1  ;;  %v2632_v36 = vadd.f32 %v2512_v2, %v20545_v13  ;;  %v12453_v54 = vpop.f32.mrb[207].mxu0  ;;  %12738 = vmatmul.mubr.msk.f32.gmra.mrb[56].mxu0 %vm418_vm2, %v15525_v42  ;;  %4662 = vperm.xlu0 %14258, %v300_v9   ;;  %v299_v13 = vld [vmem:[%s20355_s1 + $0x38] sm:$0xff] }
 0x285   : > { %12863 = vmatmul.mubr.msk.f32.gmra.mrb[56].mxu1 %vm418_vm2, %v3645_v8  ;;  %v12578_v18 = vpop.f32.mrb[207].mxu1  ;;  %12740 = vmatprep.mubr.msk.f32.mxu0 %vm14273_vm1, %v20362_v1  ;;  %v20547_v8 = vld [vmem:[#allocation25_spill] sm:$0xff] }
 0x286   : > { %12865 = vmatprep.mubr.msk.f32.mxu1 %vm14273_vm1, %v20362_v1  ;;  %v16001_v42 = vadd.f32 %v2992_v56, %v2632_v36  ;;  %v3648_v56 = vld [vmem:[%s14346_s10 + $0x145] sm:$0xff]  ;;  %v302_v36 = vld [vmem:[%s20355_s1 + $0x50] sm:$0xff] }
 0x287   : > { %v2517_v33 = vpop.f32.mrb[208].mxu0  ;;  %4657 = vperm.xlu1 %14259, %v299_v13   ;;  %v20550_v13 = vld [vmem:[#allocation28_spill] sm:$0xff] }
 0x288   : > { %v2997_v17 = vpop.f32.mrb[208].mxu1  ;;  %v2633_v38 = vadd.f32 %v2517_v33, %v20546_v62  ;;  %v12456_v44 = vpop.f32.mrb[209].mxu0  ;;  %12741 = vmatmul.mubr.msk.f32.gmra.mrb[58].mxu0 %vm418_vm2, %v15539_v51  ;;  %4672 = vperm.xlu0 %14258, %v302_v36   ;;  %v301_v62 = vld [vmem:[%s20355_s1 + $0x48] sm:$0xff] }
 0x289   : > { %12866 = vmatmul.mubr.msk.f32.gmra.mrb[58].mxu1 %vm418_vm2, %v3646_v20  ;;  %v12581_v41 = vpop.f32.mrb[209].mxu1  ;;  %12743 = vmatprep.mubr.msk.f32.mxu0 %vm14273_vm1, %v20362_v1  ;;  %v20548_v20 = vld [vmem:[#allocation26_spill] sm:$0xff] }
 0x28a   : > { %12868 = vmatprep.mubr.msk.f32.mxu1 %vm14273_vm1, %v20362_v1  ;;  %v16018_v51 = vadd.f32 %v2997_v17, %v2633_v38  ;;  %v3649_v17 = vld [vmem:[%s14346_s10 + $0x14d] sm:$0xff] }
 0x28b   : > { %v2522_v6 = vpop.f32.mrb[210].mxu0  ;;  %4667 = vperm.xlu1 %14259, %v301_v62  }
 0x28c   : > { %v3002_v30 = vpop.f32.mrb[210].mxu1  ;;  %v2634_v57 = vadd.f32 %v2522_v6, %v20547_v8  ;;  %v12459_v50 = vpop.f32.mrb[211].mxu0  ;;  %12744 = vmatmul.mubr.msk.f32.gmra.mrb[60].mxu0 %vm418_vm2, %v15553_v59  ;;  %v3650_v8 = vld [vmem:[%s14346_s10 + $0x155] sm:$0xff] }
 0x28d   : > { %12869 = vmatmul.mubr.msk.f32.gmra.mrb[60].mxu1 %vm418_vm2, %v3647_v25  ;;  %v12584_v2 = vpop.f32.mrb[211].mxu1  ;;  %12746 = vmatprep.mubr.msk.f32.mxu0 %vm14273_vm1, %v20362_v1  ;;  %v20549_v25 = vld [vmem:[#allocation27_spill] sm:$0xff] }
 0x28e   : > { %12871 = vmatprep.mubr.msk.f32.mxu1 %vm14273_vm1, %v20362_v1  ;;  %v16035_v59 = vadd.f32 %v3002_v30, %v2634_v57  ;;  %v3170_v30 = vld [vmem:[%s14346_s10 + $0x154] sm:$0xff] }
 0x28f   : > { %v2527_v54 = vpop.f32.mrb[212].mxu0  ;;  %v303_v57 = vld [vmem:[%s20355_s1 + $0x58] sm:$0xff] }
 0x290   : > { %v3007_v18 = vpop.f32.mrb[212].mxu1  ;;  %v2635_v37 = vadd.f32 %v2527_v54, %v20548_v20  ;;  %v12462_v19 = vpop.f32.mrb[213].mxu0  ;;  %12747 = vmatmul.mubr.msk.f32.gmra.mrb[62].mxu0 %vm418_vm2, %v15567_v5  ;;  %v304_v5 = vld [vmem:[%s20355_s1 + $0x60] sm:$0xff]  ;;  %4677 = vperm.xlu1 %14259, %v303_v57  }
 0x291   : > { %12872 = vmatmul.mubr.msk.f32.gmra.mrb[62].mxu1 %vm418_vm2, %v3648_v56  ;;  %v12587_v33 = vpop.f32.mrb[213].mxu1  ;;  %12749 = vmatprep.mubr.msk.f32.mxu0 %vm14273_vm1, %v20362_v1  ;;  %v3171_v20 = vld [vmem:[%s14346_s10 + $0x15c] sm:$0xff]  ;;  %v305_v19 = vld [vmem:[%s20355_s1 + $0x68] sm:$0xff] }
 0x292   : > { %12874 = vmatprep.mubr.msk.f32.mxu1 %vm14273_vm1, %v20362_v1  ;;  %v16052_v38 = vadd.f32 %v3007_v18, %v2635_v37  ;;  %4682 = vperm.xlu0 %14258, %v304_v5   ;;  %v3651_v37 = vld [vmem:[%s14346_s10 + $0x15d] sm:$0xff] }
 0x293   : > { %v2532_v44 = vpop.f32.mrb[214].mxu0  ;;  %v308_v33 = vld [vmem:[%s20355_s1 + $0x80] sm:$0xff] }
 0x294   : > { %v3012_v41 = vpop.f32.mrb[214].mxu1  ;;  %v2636_v27 = vadd.f32 %v2532_v44, %v20549_v25  ;;  %v12465_v9 = vpop.f32.mrb[215].mxu0  ;;  %12750 = vmatmul.mubr.msk.f32.gmra.mrb[64].mxu0 %vm418_vm2, %v15581_v14  ;;  %v306_v14 = vld [vmem:[%s20355_s1 + $0x70] sm:$0xff]  ;;  %4687 = vperm.xlu1 %14259, %v305_v19  }
 0x295   : > { %12875 = vmatmul.mubr.msk.f32.gmra.mrb[64].mxu1 %vm418_vm2, %v3649_v17  ;;  %v12590_v6 = vpop.f32.mrb[215].mxu1  ;;  %12752 = vmatprep.mubr.msk.f32.mxu0 %vm14273_vm1, %v20362_v1  ;;  %v3652_v9 = vld [vmem:[%s14346_s10 + $0x165] sm:$0xf] }
 0x296   : > { %12877 = vmatprep.mubr.msk.f32.mxu1 %vm14273_vm1, %v20362_v1  ;;  %v16070_v50 = vadd.f32 %v3012_v41, %v2636_v27  ;;  %4692 = vperm.xlu0 %14258, %v306_v14   ;;  %v3172_v27 = vld [vmem:[%s14346_s10 + $0x164] sm:$0xf]  ;;  %v307_v6 = vld [vmem:[%s20355_s1 + $0x78] sm:$0xff] }
 0x297   : > { %v2537_v2 = vpop.f32.mrb[216].mxu0 }
 0x298   : > { %v3017_v56 = vpop.f32.mrb[216].mxu1  ;;  %v2637_v36 = vadd.f32 %v2537_v2, %v20550_v13  ;;  %v12468_v54 = vpop.f32.mrb[217].mxu0  ;;  %12753 = vmatmul.mubr.msk.f32.gmra.mrb[66].mxu0 %vm418_vm2, %v3170_v30  ;;  %4697 = vperm.xlu1 %14259, %v307_v6   ;;  %v4092_v13 = vld [vmem:[%s14346_s10 + $0x26] sm:$0xff] }
 0x299   : > { %12878 = vmatmul.mubr.msk.f32.gmra.mrb[66].mxu1 %vm418_vm2, %v3650_v8  ;;  %v12593_v18 = vpop.f32.mrb[217].mxu1  ;;  %12755 = vmatprep.mubr.msk.f32.mxu0 %vm14273_vm1, %v20362_v1  ;;  %v312_v54 = vld [vmem:[%s20355_s1 + $0xa0] sm:$0xff] }
 0x29a   : > { %12880 = vmatprep.mubr.msk.f32.mxu1 %vm14273_vm1, %v20362_v1  ;;  %v16087_v17 = vadd.f32 %v3017_v56, %v2637_v36  ;;  %4702 = vperm.xlu0 %14258, %v308_v33   ;;  %v309_v36 = vld [vmem:[%s20355_s1 + $0x88] sm:$0xff] }
 0x29b   : > { %v2542_v62 = vpop.f32.mrb[218].mxu0 }
 0x29c   : > { %v3022_v5 = vpop.f32.mrb[218].mxu1  ;;  %v2638_v44 = vadd.f32 %v2542_v62, %v15595_v26  ;;  %v12471_v41 = vpop.f32.mrb[219].mxu0  ;;  %12756 = vmatmul.mubr.msk.f32.gmra.mrb[68].mxu0 %vm418_vm2, %v3171_v20  ;;  %v310_v26 = vld [vmem:[%s20355_s1 + $0x90] sm:$0xff]  ;;  %4707 = vperm.xlu1 %14259, %v309_v36  }
 0x29d   : > { %12881 = vmatmul.mubr.msk.f32.gmra.mrb[68].mxu1 %vm418_vm2, %v3651_v37  ;;  %v12596_v25 = vpop.f32.mrb[219].mxu1  ;;  %12758 = vmatprep.mubr.msk.f32.mxu0 %vm14273_vm1, %v20362_v1  ;;  %v4093_v62 = vld [vmem:[%s14346_s10 + $0x2e] sm:$0xff] }
 0x29e   : > { %12883 = vmatprep.mubr.msk.f32.mxu1 %vm14273_vm1, %v20362_v1  ;;  %v16104_v30 = vadd.f32 %v3022_v5, %v2638_v44  ;;  %4712 = vperm.xlu0 %14258, %v310_v26   ;;  %v311_v5 = vld [vmem:[%s20355_s1 + $0x98] sm:$0xff]  ;;  %v314_v44 = vld [vmem:[%s20355_s1 + $0xb0] sm:$0xff] }
 0x29f   : > { %v2547_v8 = vpop.f32.mrb[220].mxu0  ;;  %v4094_v26 = vld [vmem:[%s14346_s10 + $0x36] sm:$0xff] }
 0x2a0   : > { %v3027_v57 = vpop.f32.mrb[220].mxu1  ;;  %v2639_v14 = vadd.f32 %v2547_v8, %v15605_v31  ;;  %v12474_v2 = vpop.f32.mrb[221].mxu0  ;;  %12759 = vmatmul.mubr.msk.f32.gmra.mrb[70].mxu0 %vm418_vm2, %v3172_v27  ;;  %4717 = vperm.xlu1 %14259, %v311_v5   ;;  %v313_v8 = vld [vmem:[%s20355_s1 + $0xa8] sm:$0xff] }
 0x2a1   : > { %12884 = vmatmul.mubr.msk.f32.gmra.mrb[70].mxu1 %vm418_vm2, %v3652_v9  ;;  %v12599_v56 = vpop.f32.mrb[221].mxu1  ;;  %12888 = vmatprep.mubr.msk.f32.mxu0 %vm14273_vm1, %v20362_v1 }
 0x2a2   : > { %13019 = vmatprep.mubr.msk.f32.mxu1 %vm14273_vm1, %v20362_v1  ;;  %v16120_v31 = vadd.f32 %v3027_v57, %v2639_v14  ;;  %4722 = vperm.xlu0 %14258, %v312_v54   ;;  %v316_v57 = vld [vmem:[%s20355_s1 + $0xc0] sm:$0xff] }
 0x2a3   : > { %v2552_v18 = vpop.f32.mrb[222].mxu0  ;;  %v4095_v54 = vld [vmem:[%s14346_s10 + $0x3e] sm:$0xff] }
 0x2a4   : > { %v3032_v20 = vpop.f32.mrb[222].mxu1  ;;  %v2640_v37 = vadd.f32 %v2552_v18, %v15618_v39  ;;  %v12477_v19 = vpop.f32.mrb[223].mxu0  ;;  %12889 = vmatmul.mubr.msk.f32.vlgmr.msra.gmra.mrb[72].mxu0 %vm418_vm2, %v4092_v13  ;;  %4727 = vperm.xlu1 %14259, %v313_v8   ;;  %v315_v18 = vld [vmem:[%s20355_s1 + $0xb8] sm:$0xff] }
 0x2a5   : > { %v12602_v33 = vpop.f32.mrb[223].mxu1  ;;  %12891 = vmatprep.mubr.msk.f32.mxu0 %vm14273_vm1, %v20362_v1 }
 0x2a6   : > { %v16133_v41 = vadd.f32 %v3032_v20, %v2640_v37  ;;  %4732 = vperm.xlu0 %14258, %v314_v44   ;;  %v318_v20 = vld [vmem:[%s20355_s1 + $0xd0] sm:$0xff]  ;;  %v4096_v44 = vld [vmem:[%s14346_s10 + $0x46] sm:$0xff] }
 0x2a7   : > { %v2557_v39 = vpop.f32.mrb[224].mxu0 }
 0x2a8   : > { %v3037_v25 = vpop.f32.mrb[224].mxu1  ;;  %v2641_v27 = vadd.f32 %v2557_v39, %v15631_v3  ;;  %v12480_v9 = vpop.f32.mrb[225].mxu0  ;;  %12892 = vmatmul.mubr.msk.f32.gmra.mrb[74].mxu0 %vm418_vm2, %v4093_v62  ;;  %4737 = vperm.xlu1 %14259, %v315_v18   ;;  %v317_v39 = vld [vmem:[%s20355_s1 + $0xc8] sm:$0xff] }
 0x2a9   : > { %v12605_v6 = vpop.f32.mrb[225].mxu1  ;;  %12894 = vmatprep.mubr.msk.f32.mxu0 %vm14273_vm1, %v20362_v1 }
 0x2aa   : > { %v16146_v14 = vadd.f32 %v3037_v25, %v2641_v27  ;;  %4742 = vperm.xlu0 %14258, %v316_v57   ;;  %v320_v25 = vld [vmem:[%s20355_s1 + $0xe0] sm:$0xff]  ;;  %v4097_v57 = vld [vmem:[%s14346_s10 + $0x4e] sm:$0xff] }
 0x2ab   : > { %v2562_v3 = vpop.f32.mrb[226].mxu0 }
 0x2ac   : > { %v3042_v2 = vpop.f32.mrb[226].mxu1  ;;  %v2642_v56 = vadd.f32 %v2562_v3, %v15642_v12  ;;  %v12483_v13 = vpop.f32.mrb[227].mxu0  ;;  %12895 = vmatmul.mubr.msk.f32.gmra.mrb[76].mxu0 %vm418_vm2, %v4094_v26  ;;  %4747 = vperm.xlu1 %14259, %v317_v39   ;;  %v319_v3 = vld [vmem:[%s20355_s1 + $0xd8] sm:$0xff] }
 0x2ad   : > { %v12608_v36 = vpop.f32.mrb[227].mxu1  ;;  %12897 = vmatprep.mubr.msk.f32.mxu0 %vm14273_vm1, %v20362_v1 }
 0x2ae   : > { %v16159_v37 = vadd.f32 %v3042_v2, %v2642_v56  ;;  %4752 = vperm.xlu0 %14258, %v318_v20   ;;  %v322_v2 = vld [vmem:[%s20355_s1 + $0xf0] sm:$0xff] }
 0x2af   : > { %v2567_v12 = vpop.f32.mrb[228].mxu0  ;;  %v4098_v20 = vld [vmem:[%s14346_s10 + $0x56] sm:$0xff] }
 0x2b0   : > { %v3047_v19 = vpop.f32.mrb[228].mxu1  ;;  %v2643_v33 = vadd.f32 %v2567_v12, %v15653_v63  ;;  %v12486_v62 = vpop.f32.mrb[229].mxu0  ;;  %12898 = vmatmul.mubr.msk.f32.gmra.mrb[78].mxu0 %vm418_vm2, %v4095_v54  ;;  %4757 = vperm.xlu1 %14259, %v319_v3   ;;  %v321_v12 = vld [vmem:[%s20355_s1 + $0xe8] sm:$0xff] }
 0x2b1   : > { %v12611_v5 = vpop.f32.mrb[229].mxu1  ;;  %12900 = vmatprep.mubr.msk.f32.mxu0 %vm14273_vm1, %v20362_v1 }
 0x2b2   : > { %v16172_v27 = vadd.f32 %v3047_v19, %v2643_v33  ;;  %4762 = vperm.xlu0 %14258, %v320_v25   ;;  %v324_v19 = vld [vmem:[%s20355_s1 + $0x100] sm:$0xff] }
 0x2b3   : > { %v2572_v63 = vpop.f32.mrb[230].mxu0  ;;  %v4099_v25 = vld [vmem:[%s14346_s10 + $0x5e] sm:$0xff] }
 0x2b4   : > { %v3052_v9 = vpop.f32.mrb[230].mxu1  ;;  %v2644_v6 = vadd.f32 %v2572_v63, %v15664_v45  ;;  %v12489_v26 = vpop.f32.mrb[231].mxu0  ;;  %12901 = vmatmul.mubr.msk.f32.gmra.mrb[80].mxu0 %vm418_vm2, %v4096_v44  ;;  %4767 = vperm.xlu1 %14259, %v321_v12   ;;  %v323_v63 = vld [vmem:[%s20355_s1 + $0xf8] sm:$0xff] }
 0x2b5   : > { %v12614_v8 = vpop.f32.mrb[231].mxu1  ;;  %12903 = vmatprep.mubr.msk.f32.mxu0 %vm14273_vm1, %v20362_v1 }
 0x2b6   : > { %v16185_v56 = vadd.f32 %v3052_v9, %v2644_v6  ;;  %4772 = vperm.xlu0 %14258, %v322_v2   ;;  %v326_v9 = vld [vmem:[%s20355_s1 + $0x110] sm:$0xff]  ;;  %v4100_v2 = vld [vmem:[%s14346_s10 + $0x66] sm:$0xff] }
 0x2b7   : > { %v2577_v45 = vpop.f32.mrb[232].mxu0 }
 0x2b8   : > { %v3057_v13 = vpop.f32.mrb[232].mxu1  ;;  %v2645_v36 = vadd.f32 %v2577_v45, %v15675_v32  ;;  %v12492_v54 = vpop.f32.mrb[233].mxu0  ;;  %12904 = vmatmul.mubr.msk.f32.gmra.mrb[82].mxu0 %vm418_vm2, %v4097_v57  ;;  %4777 = vperm.xlu1 %14259, %v323_v63   ;;  %v325_v45 = vld [vmem:[%s20355_s1 + $0x108] sm:$0xff] }
 0x2b9   : > { %v12617_v18 = vpop.f32.mrb[233].mxu1  ;;  %12906 = vmatprep.mubr.msk.f32.mxu0 %vm14273_vm1, %v20362_v1 }
 0x2ba   : > { %v16198_v33 = vadd.f32 %v3057_v13, %v2645_v36  ;;  %4782 = vperm.xlu0 %14258, %v324_v19   ;;  %v328_v13 = vld [vmem:[%s20355_s1 + $0x120] sm:$0xff]  ;;  %v4101_v19 = vld [vmem:[%s14346_s10 + $0x6e] sm:$0xff] }
 0x2bb   : > { %v2582_v32 = vpop.f32.mrb[234].mxu0 }
 0x2bc   : > { %v3062_v62 = vpop.f32.mrb[234].mxu1  ;;  %v2646_v5 = vadd.f32 %v2582_v32, %v15686_v52  ;;  %v12495_v44 = vpop.f32.mrb[235].mxu0  ;;  %12907 = vmatmul.mubr.msk.f32.gmra.mrb[84].mxu0 %vm418_vm2, %v4098_v20  ;;  %4787 = vperm.xlu1 %14259, %v325_v45   ;;  %v327_v32 = vld [vmem:[%s20355_s1 + $0x118] sm:$0xff] }
 0x2bd   : > { %v12620_v39 = vpop.f32.mrb[235].mxu1  ;;  %12909 = vmatprep.mubr.msk.f32.mxu0 %vm14273_vm1, %v20362_v1 }
 0x2be   : > { %v16211_v6 = vadd.f32 %v3062_v62, %v2646_v5  ;;  %4792 = vperm.xlu0 %14258, %v326_v9   ;;  %v330_v62 = vld [vmem:[%s20355_s1 + $0x130] sm:$0xff] }
 0x2bf   : > { %v2587_v52 = vpop.f32.mrb[236].mxu0  ;;  %v4102_v9 = vld [vmem:[%s14346_s10 + $0x76] sm:$0xff] }
 0x2c0   : > { %v3067_v26 = vpop.f32.mrb[236].mxu1  ;;  %v2647_v8 = vadd.f32 %v2587_v52, %v15697_v43  ;;  %v12498_v57 = vpop.f32.mrb[237].mxu0  ;;  %12910 = vmatmul.mubr.msk.f32.gmra.mrb[86].mxu0 %vm418_vm2, %v4099_v25  ;;  %4797 = vperm.xlu1 %14259, %v327_v32   ;;  %v329_v52 = vld [vmem:[%s20355_s1 + $0x128] sm:$0xff] }
 0x2c1   : > { %v12623_v3 = vpop.f32.mrb[237].mxu1  ;;  %12912 = vmatprep.mubr.msk.f32.mxu0 %vm14273_vm1, %v20362_v1  ;;  %v4104_v32 = vld [vmem:[%s14346_s10 + $0x86] sm:$0xff] }
 0x2c2   : > { %v16224_v36 = vadd.f32 %v3067_v26, %v2647_v8  ;;  %4802 = vperm.xlu0 %14258, %v328_v13   ;;  %v332_v26 = vld [vmem:[%s20355_s1 + $0x140] sm:$0xf] }
 0x2c3   : > { %v2592_v43 = vpop.f32.mrb[238].mxu0  ;;  %v4103_v13 = vld [vmem:[%s14346_s10 + $0x7e] sm:$0xff] }
 0x2c4   : > { %v3072_v54 = vpop.f32.mrb[238].mxu1  ;;  %v2648_v18 = vadd.f32 %v2592_v43, %v15708_v58  ;;  %v12501_v20 = vpop.f32.mrb[239].mxu0  ;;  %12913 = vmatmul.mubr.msk.f32.gmra.mrb[88].mxu0 %vm418_vm2, %v4100_v2  ;;  %4807 = vperm.xlu1 %14259, %v329_v52   ;;  %v331_v43 = vld [vmem:[%s20355_s1 + $0x138] sm:$0xff] }
 0x2c5   : > { %v12626_v12 = vpop.f32.mrb[239].mxu1  ;;  %12915 = vmatprep.mubr.msk.f32.mxu0 %vm14273_vm1, %v20362_v1 }
 0x2c6   : > { %v16237_v5 = vadd.f32 %v3072_v54, %v2648_v18  ;;  %4812 = vperm.xlu0 %14258, %v330_v62  }
 0x2c7   : > { %v2597_v58 = vpop.f32.mrb[240].mxu0 }
 0x2c8   : > { %v3077_v44 = vpop.f32.mrb[240].mxu1  ;;  %v2649_v39 = vadd.f32 %v2597_v58, %v15719_v23  ;;  %v12504_v25 = vpop.f32.mrb[241].mxu0  ;;  %12916 = vmatmul.mubr.msk.f32.gmra.mrb[90].mxu0 %vm418_vm2, %v4101_v19  ;;  %4817 = vperm.xlu1 %14259, %v331_v43  }
 0x2c9   : > { %v12629_v63 = vpop.f32.mrb[241].mxu1  ;;  %12918 = vmatprep.mubr.msk.f32.mxu0 %vm14273_vm1, %v20362_v1 }
 0x2ca   : > { %v16250_v8 = vadd.f32 %v3077_v44, %v2649_v39  ;;  %4822 = vperm.xlu0 %14258, %v332_v26  }
 0x2cb   : > { %v2602_v23 = vpop.f32.mrb[242].mxu0 }
 0x2cc   : > { %v3082_v57 = vpop.f32.mrb[242].mxu1  ;;  %v2650_v3 = vadd.f32 %v2602_v23, %v15730_v60  ;;  %v12507_v2 = vpop.f32.mrb[243].mxu0  ;;  %12919 = vmatmul.mubr.msk.f32.gmra.mrb[92].mxu0 %vm418_vm2, %v4102_v9 }
 0x2cd   : > { %v12632_v45 = vpop.f32.mrb[243].mxu1  ;;  %12921 = vmatprep.mubr.msk.f32.mxu0 %vm14273_vm1, %v20362_v1 }
 0x2ce   : > { %v16260_v54 = vadd.f32 %v3082_v57, %v2650_v3 }
 0x2cf   : > { %v2607_v18 = vpop.f32.mrb[244].mxu0 }
 0x2d0   : > { %v3087_v20 = vpop.f32.mrb[244].mxu1  ;;  %v2651_v60 = vadd.f32 %v2607_v18, %v15741_v24  ;;  %v12510_v12 = vpop.f32.mrb[245].mxu0  ;;  %12922 = vmatmul.mubr.msk.f32.gmra.mrb[94].mxu0 %vm418_vm2, %v4103_v13  ;;  %v4105_v24 = vld [vmem:[%s14346_s10 + $0x8e] sm:$0xff] }
 0x2d1   : > { %v12635_v19 = vpop.f32.mrb[245].mxu1  ;;  %12924 = vmatprep.mubr.msk.f32.mxu0 %vm14273_vm1, %v20362_v1 }
 0x2d2   : > { %v16267_v62 = vadd.f32 %v3087_v20, %v2651_v60 }
 0x2d3   : > { %v3367_v58 = vpop.f32.mrb[246].mxu0 }
 0x2d4   : > { %v3847_v44 = vpop.f32.mrb[246].mxu1  ;;  %v3571_v39 = vadd.f32 %v3367_v58, %v15752_v7  ;;  %v12640_v25 = vpop.f32.mrb[247].mxu0  ;;  %12925 = vmatmul.mubr.msk.f32.gmra.mrb[96].mxu0 %vm418_vm2, %v4104_v32  ;;  %v4106_v7 = vld [vmem:[%s14346_s10 + $0x96] sm:$0xff] }
 0x2d5   : > { %v12765_v63 = vpop.f32.mrb[247].mxu1  ;;  %12927 = vmatprep.mubr.msk.f32.mxu0 %vm14273_vm1, %v20362_v1 }
 0x2d6   : > { %v16274_v9 = vadd.f32 %v3847_v44, %v3571_v39 }
 0x2d7   : > { %v3372_v52 = vpop.f32.mrb[248].mxu0 }
 0x2d8   : > { %v3852_v26 = vpop.f32.mrb[248].mxu1  ;;  %v3572_v23 = vadd.f32 %v3372_v52, %v15763_v29  ;;  %v12643_v57 = vpop.f32.mrb[249].mxu0  ;;  %12928 = vmatmul.mubr.msk.f32.gmra.mrb[98].mxu0 %vm418_vm2, %v4105_v24  ;;  %v4107_v29 = vld [vmem:[%s14346_s10 + $0x9e] sm:$0xff] }
 0x2d9   : > { %v12768_v3 = vpop.f32.mrb[249].mxu1  ;;  %12930 = vmatprep.mubr.msk.f32.mxu0 %vm14273_vm1, %v20362_v1 }
 0x2da   : > { %v16281_v2 = vadd.f32 %v3852_v26, %v3572_v23 }
 0x2db   : > { %v3377_v45 = vpop.f32.mrb[250].mxu0 }
 0x2dc   : > { %v3857_v13 = vpop.f32.mrb[250].mxu1  ;;  %v3573_v43 = vadd.f32 %v3377_v45, %v15774_v53  ;;  %v12646_v18 = vpop.f32.mrb[251].mxu0  ;;  %12931 = vmatmul.mubr.msk.f32.gmra.mrb[100].mxu0 %vm418_vm2, %v4106_v7  ;;  %v4108_v53 = vld [vmem:[%s14346_s10 + $0xa6] sm:$0xff] }
 0x2dd   : > { %v12771_v20 = vpop.f32.mrb[251].mxu1  ;;  %12933 = vmatprep.mubr.msk.f32.mxu0 %vm14273_vm1, %v20362_v1 }
 0x2de   : > { %v16288_v60 = vadd.f32 %v3857_v13, %v3573_v43 }
 0x2df   : > { %v3382_v12 = vpop.f32.mrb[252].mxu0 }
 0x2e0   : > { %v3862_v19 = vpop.f32.mrb[252].mxu1  ;;  %v3574_v32 = vadd.f32 %v3382_v12, %v15785_v11  ;;  %v12649_v58 = vpop.f32.mrb[253].mxu0  ;;  %12934 = vmatmul.mubr.msk.f32.gmra.mrb[102].mxu0 %vm418_vm2, %v4107_v29  ;;  %v4109_v11 = vld [vmem:[%s14346_s10 + $0xae] sm:$0xff] }
 0x2e1   : > { %v12774_v44 = vpop.f32.mrb[253].mxu1  ;;  %12936 = vmatprep.mubr.msk.f32.mxu0 %vm14273_vm1, %v20362_v1 }
 0x2e2   : > { %v16295_v39 = vadd.f32 %v3862_v19, %v3574_v32 }
 0x2e3   : > { %v3387_v25 = vpop.f32.mrb[254].mxu0 }
 0x2e4   : > { %v3867_v63 = vpop.f32.mrb[254].mxu1  ;;  %v3575_v24 = vadd.f32 %v3387_v25, %v15796_v46  ;;  %v12652_v52 = vpop.f32.mrb[255].mxu0  ;;  %12937 = vmatmul.mubr.msk.f32.gmra.mrb[104].mxu0 %vm418_vm2, %v4108_v53  ;;  %v4110_v46 = vld [vmem:[%s14346_s10 + $0xb6] sm:$0xff] }
 0x2e5   : > { %v12777_v26 = vpop.f32.mrb[255].mxu1  ;;  %12939 = vmatprep.mubr.msk.f32.mxu0 %vm14273_vm1, %v20362_v1 }
 0x2e6   : > { %v16302_v23 = vadd.f32 %v3867_v63, %v3575_v24 }
 0x2e7   : > { %v3392_v57 = vpop.f32.mrb[0].mxu0 }
 0x2e8   : > { %v3872_v3 = vpop.f32.mrb[0].mxu1  ;;  %v3576_v7 = vadd.f32 %v3392_v57, %v15807_v21  ;;  %v12655_v45 = vpop.f32.mrb[1].mxu0  ;;  %12940 = vmatmul.mubr.msk.f32.gmra.mrb[106].mxu0 %vm418_vm2, %v4109_v11  ;;  %v4111_v21 = vld [vmem:[%s14346_s10 + $0xbe] sm:$0xff] }
 0x2e9   : > { %v12780_v13 = vpop.f32.mrb[1].mxu1  ;;  %12942 = vmatprep.mubr.msk.f32.mxu0 %vm14273_vm1, %v20362_v1 }
 0x2ea   : > { %v16309_v43 = vadd.f32 %v3872_v3, %v3576_v7 }
 0x2eb   : > { %v3397_v18 = vpop.f32.mrb[2].mxu0 }
 0x2ec   : > { %v3877_v20 = vpop.f32.mrb[2].mxu1  ;;  %v3577_v29 = vadd.f32 %v3397_v18, %v15818_v0  ;;  %v12658_v12 = vpop.f32.mrb[3].mxu0  ;;  %12943 = vmatmul.mubr.msk.f32.gmra.mrb[108].mxu0 %vm418_vm2, %v4110_v46  ;;  %v4112_v0 = vld [vmem:[%s14346_s10 + $0xc6] sm:$0xff] }
 0x2ed   : > { %v12783_v19 = vpop.f32.mrb[3].mxu1  ;;  %12945 = vmatprep.mubr.msk.f32.mxu0 %vm14273_vm1, %v20362_v1 }
 0x2ee   : > { %v16316_v32 = vadd.f32 %v3877_v20, %v3577_v29 }
 0x2ef   : > { %v3402_v58 = vpop.f32.mrb[4].mxu0 }
 0x2f0   : > { %v3882_v44 = vpop.f32.mrb[4].mxu1  ;;  %v3578_v53 = vadd.f32 %v3402_v58, %v15829_v49  ;;  %v12661_v25 = vpop.f32.mrb[5].mxu0  ;;  %12946 = vmatmul.mubr.msk.f32.gmra.mrb[110].mxu0 %vm418_vm2, %v4111_v21  ;;  %v4113_v49 = vld [vmem:[%s14346_s10 + $0xce] sm:$0xff] }
 0x2f1   : > { %v12786_v63 = vpop.f32.mrb[5].mxu1  ;;  %12948 = vmatprep.mubr.msk.f32.mxu0 %vm14273_vm1, %v20362_v1 }
 0x2f2   : > { %v16323_v24 = vadd.f32 %v3882_v44, %v3578_v53 }
 0x2f3   : > { %v3407_v52 = vpop.f32.mrb[6].mxu0 }
 0x2f4   : > { %v3887_v26 = vpop.f32.mrb[6].mxu1  ;;  %v3579_v11 = vadd.f32 %v3407_v52, %v15840_v55  ;;  %v12664_v57 = vpop.f32.mrb[7].mxu0  ;;  %12949 = vmatmul.mubr.msk.f32.gmra.mrb[112].mxu0 %vm418_vm2, %v4112_v0  ;;  %v4114_v55 = vld [vmem:[%s14346_s10 + $0xd6] sm:$0xff] }
 0x2f5   : > { %v12789_v3 = vpop.f32.mrb[7].mxu1  ;;  %12951 = vmatprep.mubr.msk.f32.mxu0 %vm14273_vm1, %v20362_v1 }
 0x2f6   : > { %v16330_v7 = vadd.f32 %v3887_v26, %v3579_v11  ;;  %v4116_v26 = vld [vmem:[%s14346_s10 + $0xe6] sm:$0xff] }
 0x2f7   : > { %v3412_v45 = vpop.f32.mrb[8].mxu0 }
 0x2f8   : > { %v3892_v13 = vpop.f32.mrb[8].mxu1  ;;  %v3580_v46 = vadd.f32 %v3412_v45, %v15851_v61  ;;  %v12667_v18 = vpop.f32.mrb[9].mxu0  ;;  %12952 = vmatmul.mubr.msk.f32.gmra.mrb[114].mxu0 %vm418_vm2, %v4113_v49  ;;  %v4115_v61 = vld [vmem:[%s14346_s10 + $0xde] sm:$0xff] }
 0x2f9   : > { %v12792_v20 = vpop.f32.mrb[9].mxu1  ;;  %12954 = vmatprep.mubr.msk.f32.mxu0 %vm14273_vm1, %v20362_v1 }
 0x2fa   : > { %v16337_v29 = vadd.f32 %v3892_v13, %v3580_v46 }
 0x2fb   : > { %v3417_v12 = vpop.f32.mrb[10].mxu0 }
 0x2fc   : > { %v3897_v19 = vpop.f32.mrb[10].mxu1  ;;  %v3581_v21 = vadd.f32 %v3417_v12, %v15862_v4  ;;  %v12670_v58 = vpop.f32.mrb[11].mxu0  ;;  %12955 = vmatmul.mubr.msk.f32.gmra.mrb[116].mxu0 %vm418_vm2, %v4114_v55 }
 0x2fd   : > { %v12795_v44 = vpop.f32.mrb[11].mxu1  ;;  %12957 = vmatprep.mubr.msk.f32.mxu0 %vm14273_vm1, %v20362_v1 }
 0x2fe   : > { %v16434_v4 = vadd.f32 %v3897_v19, %v3581_v21 }
 0x2ff   : > { %v3422_v53 = vpop.f32.mrb[12].mxu0 }
 0x300   : > { %v3902_v25 = vpop.f32.mrb[12].mxu1  ;;  %v3582_v63 = vadd.f32 %v3422_v53, %v15873_v10  ;;  %v12673_v0 = vpop.f32.mrb[13].mxu0  ;;  %12958 = vmatmul.mubr.msk.f32.gmra.mrb[118].mxu0 %vm418_vm2, %v4115_v61  ;;  %v4117_v10 = vld [vmem:[%s14346_s10 + $0xee] sm:$0xff] }
 0x301   : > { %v12798_v52 = vpop.f32.mrb[13].mxu1  ;;  %12960 = vmatprep.mubr.msk.f32.mxu0 %vm14273_vm1, %v20362_v1 }
 0x302   : > { %v16441_v11 = vadd.f32 %v3902_v25, %v3582_v63 }
 0x303   : > { %v3427_v57 = vpop.f32.mrb[14].mxu0 }
 0x304   : > { %v3907_v3 = vpop.f32.mrb[14].mxu1  ;;  %v3583_v49 = vadd.f32 %v3427_v57, %v15884_v16  ;;  %v12676_v45 = vpop.f32.mrb[15].mxu0  ;;  %12961 = vmatmul.mubr.msk.f32.gmra.mrb[120].mxu0 %vm418_vm2, %v4116_v26  ;;  %v4118_v16 = vld [vmem:[%s14346_s10 + $0xf6] sm:$0xff] }
 0x305   : > { %v12801_v13 = vpop.f32.mrb[15].mxu1  ;;  %12963 = vmatprep.mubr.msk.f32.mxu0 %vm14273_vm1, %v20362_v1 }
 0x306   : > { %v16448_v46 = vadd.f32 %v3907_v3, %v3583_v49 }
 0x307   : > { %v3432_v18 = vpop.f32.mrb[16].mxu0 }
 0x308   : > { %v3912_v20 = vpop.f32.mrb[16].mxu1  ;;  %v3584_v55 = vadd.f32 %v3432_v18, %v15895_v22  ;;  %v12679_v12 = vpop.f32.mrb[17].mxu0  ;;  %12964 = vmatmul.mubr.msk.f32.gmra.mrb[122].mxu0 %vm418_vm2, %v4117_v10  ;;  %v4119_v22 = vld [vmem:[%s14346_s10 + $0xfe] sm:$0xff] }
 0x309   : > { %v12804_v19 = vpop.f32.mrb[17].mxu1  ;;  %12966 = vmatprep.mubr.msk.f32.mxu0 %vm14273_vm1, %v20362_v1 }
 0x30a   : > { %v16455_v21 = vadd.f32 %v3912_v20, %v3584_v55 }
 0x30b   : > { %v3437_v58 = vpop.f32.mrb[18].mxu0 }
 0x30c   : > { %v3917_v44 = vpop.f32.mrb[18].mxu1  ;;  %v3585_v61 = vadd.f32 %v3437_v58, %v15906_v28  ;;  %v12682_v53 = vpop.f32.mrb[19].mxu0  ;;  %12967 = vmatmul.mubr.msk.f32.gmra.mrb[124].mxu0 %vm418_vm2, %v4118_v16  ;;  %v4120_v28 = vld [vmem:[%s14346_s10 + $0x106] sm:$0xff] }
 0x30d   : > { %v12807_v25 = vpop.f32.mrb[19].mxu1  ;;  %12969 = vmatprep.mubr.msk.f32.mxu0 %vm14273_vm1, %v20362_v1 }
 0x30e   : > { %v16462_v63 = vadd.f32 %v3917_v44, %v3585_v61 }
 0x30f   : > { %v3442_v0 = vpop.f32.mrb[20].mxu0 }
 0x310   : > { %v3922_v52 = vpop.f32.mrb[20].mxu1  ;;  %v3586_v26 = vadd.f32 %v3442_v0, %v15917_v34  ;;  %v12685_v57 = vpop.f32.mrb[21].mxu0  ;;  %12970 = vmatmul.mubr.msk.f32.gmra.mrb[126].mxu0 %vm418_vm2, %v4119_v22  ;;  %v4121_v34 = vld [vmem:[%s14346_s10 + $0x10e] sm:$0xff] }
 0x311   : > { %v12810_v3 = vpop.f32.mrb[21].mxu1  ;;  %12972 = vmatprep.mubr.msk.f32.mxu0 %vm14273_vm1, %v20362_v1 }
 0x312   : > { %v16469_v49 = vadd.f32 %v3922_v52, %v3586_v26 }
 0x313   : > { %v3447_v45 = vpop.f32.mrb[22].mxu0 }
 0x314   : > { %v3927_v13 = vpop.f32.mrb[22].mxu1  ;;  %v3587_v10 = vadd.f32 %v3447_v45, %v15928_v40  ;;  %v12688_v18 = vpop.f32.mrb[23].mxu0  ;;  %12973 = vmatmul.mubr.msk.f32.gmra.mrb[128].mxu0 %vm418_vm2, %v4120_v28  ;;  %v4122_v40 = vld [vmem:[%s14346_s10 + $0x116] sm:$0xff] }
 0x315   : > { %v12813_v20 = vpop.f32.mrb[23].mxu1  ;;  %12975 = vmatprep.mubr.msk.f32.mxu0 %vm14273_vm1, %v20362_v1 }
 0x316   : > { %v16476_v55 = vadd.f32 %v3927_v13, %v3587_v10 }
 0x317   : > { %v3452_v12 = vpop.f32.mrb[24].mxu0 }
 0x318   : > { %v3932_v19 = vpop.f32.mrb[24].mxu1  ;;  %v3588_v16 = vadd.f32 %v3452_v12, %v15939_v47  ;;  %v12691_v58 = vpop.f32.mrb[25].mxu0  ;;  %12976 = vmatmul.mubr.msk.f32.gmra.mrb[130].mxu0 %vm418_vm2, %v4121_v34  ;;  %v4123_v47 = vld [vmem:[%s14346_s10 + $0x11e] sm:$0xff] }
 0x319   : > { %v12816_v44 = vpop.f32.mrb[25].mxu1  ;;  %12978 = vmatprep.mubr.msk.f32.mxu0 %vm14273_vm1, %v20362_v1 }
 0x31a   : > { %v16483_v61 = vadd.f32 %v3932_v19, %v3588_v16 }
 0x31b   : > { %v3457_v53 = vpop.f32.mrb[26].mxu0 }
 0x31c   : > { %v3937_v25 = vpop.f32.mrb[26].mxu1  ;;  %v3589_v22 = vadd.f32 %v3457_v53, %v15953_v48  ;;  %v12694_v0 = vpop.f32.mrb[27].mxu0  ;;  %12979 = vmatmul.mubr.msk.f32.gmra.mrb[132].mxu0 %vm418_vm2, %v4122_v40  ;;  %v4124_v48 = vld [vmem:[%s14346_s10 + $0x126] sm:$0xff] }
 0x31d   : > { %v12819_v52 = vpop.f32.mrb[27].mxu1  ;;  %12981 = vmatprep.mubr.msk.f32.mxu0 %vm14273_vm1, %v20362_v1  ;;  %v10700_v0 = vld [vmem:[%s20358_s4 + $0x28] sm:$0xff] }
 0x31e   : > { %v16490_v26 = vadd.f32 %v3937_v25, %v3589_v22  ;;  %v10699_v22 = vld [vmem:[%s20358_s4 + $0x20] sm:$0xff] }
 0x31f   : > { %v3462_v57 = vpop.f32.mrb[28].mxu0 }
 0x320   : > { %v3942_v3 = vpop.f32.mrb[28].mxu1  ;;  %v3590_v28 = vadd.f32 %v3462_v57, %v15967_v15  ;;  %v12697_v45 = vpop.f32.mrb[29].mxu0  ;;  %12982 = vmatmul.mubr.msk.f32.gmra.mrb[134].mxu0 %vm418_vm2, %v4123_v47  ;;  %v4125_v15 = vld [vmem:[%s14346_s10 + $0x12e] sm:$0xff]  ;;  %v14191_v47 = vpack.c.bf16 %v10700_v0, %v10699_v22 }
 0x321   : > { %v12822_v13 = vpop.f32.mrb[29].mxu1  ;;  %12984 = vmatprep.mubr.msk.f32.mxu0 %vm14273_vm1, %v20362_v1 }
 0x322   : > { %v16497_v10 = vadd.f32 %v3942_v3, %v3590_v28 }
 0x323   : > { %v3467_v18 = vpop.f32.mrb[30].mxu0 }
 0x324   : > { %v3947_v20 = vpop.f32.mrb[30].mxu1  ;;  %v3591_v34 = vadd.f32 %v3467_v18, %v15984_v35  ;;  %v12700_v12 = vpop.f32.mrb[31].mxu0  ;;  %12985 = vmatmul.mubr.msk.f32.gmra.mrb[136].mxu0 %vm418_vm2, %v4124_v48  ;;  %v4126_v35 = vld [vmem:[%s14346_s10 + $0x136] sm:$0xff]  ;;  %v4127_v48 = vld [vmem:[%s14346_s10 + $0x13e] sm:$0xff] }
 0x325   : > { %v12825_v19 = vpop.f32.mrb[31].mxu1  ;;  %12987 = vmatprep.mubr.msk.f32.mxu0 %vm14273_vm1, %v20362_v1 }
 0x326   : > { %v16504_v16 = vadd.f32 %v3947_v20, %v3591_v34 }
 0x327   : > { %v3472_v58 = vpop.f32.mrb[32].mxu0 }
 0x328   : > { %v3952_v44 = vpop.f32.mrb[32].mxu1  ;;  %v3592_v40 = vadd.f32 %v3472_v58, %v16001_v42  ;;  %v12703_v53 = vpop.f32.mrb[33].mxu0  ;;  %12988 = vmatmul.mubr.msk.f32.gmra.mrb[138].mxu0 %vm418_vm2, %v4125_v15  ;;  %v20364_v42 = vmov 0.0|0.0   ;;  %v4128_v15 = vld [vmem:[%s14346_s10 + $0x146] sm:$0xff] }
 0x329   : > { %v12828_v25 = vpop.f32.mrb[33].mxu1  ;;  %12990 = vmatprep.mubr.msk.f32.mxu0 %vm14273_vm1, %v20362_v1  ;;  %14190 = vmatprep.subr.bf16.mxu1 %v20364_v42 }
 0x32a   : > { %v16517_v52 = vadd.f32 %v3952_v44, %v3592_v40  ;;  %14196 = vmatprep.subr.bf16.mxu0 %v20364_v42  ;;  %14192 = vmatpush3.bf16.msra.mxu1 %v14191_v47 }
 0x32b   : > { %v3477_v57 = vpop.f32.mrb[34].mxu0  ;;  %14193 = vmatprep.subr.bf16.mxu1 %v20364_v42 }
 0x32c   : > { %v3957_v3 = vpop.f32.mrb[34].mxu1  ;;  %v3593_v28 = vadd.f32 %v3477_v57, %v16018_v51  ;;  %v12706_v45 = vpop.f32.mrb[35].mxu0  ;;  %12991 = vmatmul.mubr.msk.f32.gmra.mrb[140].mxu0 %vm418_vm2, %v4126_v35 }
 0x32d   : > { %v12831_v13 = vpop.f32.mrb[35].mxu1  ;;  %12993 = vmatprep.mubr.msk.f32.mxu0 %vm14273_vm1, %v20362_v1 }
 0x32e   : > { %v16527_v18 = vadd.f32 %v3957_v3, %v3593_v28 }
 0x32f   : > { %v3482_v20 = vpop.f32.mrb[36].mxu0 }
 0x330   : > { %v3962_v34 = vpop.f32.mrb[36].mxu1  ;;  %v3594_v12 = vadd.f32 %v3482_v20, %v16035_v59  ;;  %v12709_v51 = vpop.f32.mrb[37].mxu0  ;;  %12994 = vmatmul.mubr.msk.f32.gmra.mrb[142].mxu0 %vm418_vm2, %v4127_v48  ;;  %v4129_v59 = vld [vmem:[%s14346_s10 + $0x14e] sm:$0xff] }
 0x331   : > { %v12834_v19 = vpop.f32.mrb[37].mxu1  ;;  %12996 = vmatprep.mubr.msk.f32.mxu0 %vm14273_vm1, %v20362_v1 }
 0x332   : > { %v16534_v58 = vadd.f32 %v3962_v34, %v3594_v12 }
 0x333   : > { %v3487_v44 = vpop.f32.mrb[38].mxu0 }
 0x334   : > { %v3967_v40 = vpop.f32.mrb[38].mxu1  ;;  %v3595_v53 = vadd.f32 %v3487_v44, %v16052_v38  ;;  %v12712_v25 = vpop.f32.mrb[39].mxu0  ;;  %12997 = vmatmul.mubr.msk.f32.gmra.mrb[144].mxu0 %vm418_vm2, %v4128_v15  ;;  %v4130_v38 = vld [vmem:[%s14346_s10 + $0x156] sm:$0xff] }
 0x335   : > { %v12837_v35 = vpop.f32.mrb[39].mxu1  ;;  %12999 = vmatprep.mubr.msk.f32.mxu0 %vm14273_vm1, %v20362_v1 }
 0x336   : > { %v16541_v22 = vadd.f32 %v3967_v40, %v3595_v53 }
 0x337   : > { %v3492_v0 = vpop.f32.mrb[40].mxu0 }
 0x338   : > { %v3972_v47 = vpop.f32.mrb[40].mxu1  ;;  %v3596_v57 = vadd.f32 %v3492_v0, %v16070_v50  ;;  %v12715_v3 = vpop.f32.mrb[41].mxu0  ;;  %13000 = vmatmul.mubr.msk.f32.gmra.mrb[146].mxu0 %vm418_vm2, %v4129_v59  ;;  %v4131_v50 = vld [vmem:[%s14346_s10 + $0x15e] sm:$0xff] }
 0x339   : > { %v12840_v28 = vpop.f32.mrb[41].mxu1  ;;  %13002 = vmatprep.mubr.msk.f32.mxu0 %vm14273_vm1, %v20362_v1 }
 0x33a   : > { %v16548_v45 = vadd.f32 %v3972_v47, %v3596_v57 }
 0x33b   : > { %v3497_v13 = vpop.f32.mrb[42].mxu0 }
 0x33c   : > { %v3977_v48 = vpop.f32.mrb[42].mxu1  ;;  %v3597_v20 = vadd.f32 %v3497_v13, %v16087_v17  ;;  %v12718_v34 = vpop.f32.mrb[43].mxu0  ;;  %13003 = vmatmul.mubr.msk.f32.gmra.mrb[148].mxu0 %vm418_vm2, %v4130_v38  ;;  %v4132_v17 = vld [vmem:[%s14346_s10 + $0x166] sm:$0xf] }
 0x33d   : > { %v12843_v12 = vpop.f32.mrb[43].mxu1  ;;  %13005 = vmatprep.mubr.msk.f32.mxu0 %vm14273_vm1, %v20362_v1 }
 0x33e   : > { %v16555_v51 = vadd.f32 %v3977_v48, %v3597_v20 }
 0x33f   : > { %v3502_v19 = vpop.f32.mrb[44].mxu0 }
 0x340   : > { %v3982_v15 = vpop.f32.mrb[44].mxu1  ;;  %v3598_v44 = vadd.f32 %v3502_v19, %v16104_v30  ;;  %v12721_v40 = vpop.f32.mrb[45].mxu0  ;;  %13006 = vmatmul.mubr.msk.f32.gmra.mrb[150].mxu0 %vm418_vm2, %v4131_v50 }
 0x341   : > { %v12846_v53 = vpop.f32.mrb[45].mxu1  ;;  %13008 = vmatprep.mubr.msk.f32.mxu0 %vm14273_vm1, %v20362_v1 }
 0x342   : > { %v16562_v25 = vadd.f32 %v3982_v15, %v3598_v44 }
 0x343   : > { %v3507_v35 = vpop.f32.mrb[46].mxu0 }
 0x344   : > { %v3987_v59 = vpop.f32.mrb[46].mxu1  ;;  %v3599_v0 = vadd.f32 %v3507_v35, %v16120_v31  ;;  %v12724_v47 = vpop.f32.mrb[47].mxu0  ;;  %13009 = vmatmul.mubr.msk.f32.gmra.mrb[152].mxu0 %vm418_vm2, %v4132_v17 }
 0x345   : > { %v12849_v57 = vpop.f32.mrb[47].mxu1  ;;  %13150 = vmatprep.mubr.msk.f32.mxu0 %vm14273_vm1, %v20362_v1 }
 0x346   : > { %v16568_v30 = vadd.f32 %v3987_v59, %v3599_v0 }
 0x347   : > { %v3512_v3 = vpop.f32.mrb[48].mxu0 }
 0x348   : > { %v3992_v28 = vpop.f32.mrb[48].mxu1  ;;  %v3600_v38 = vadd.f32 %v3512_v3, %v16133_v41  ;;  %v12727_v13 = vpop.f32.mrb[49].mxu0 }
 0x349   : > { %v12852_v48 = vpop.f32.mrb[49].mxu1 }
 0x34a   : > { %v16571_v20 = vadd.f32 %v3992_v28, %v3600_v38 }
 0x34b   : > { %v3517_v34 = vpop.f32.mrb[50].mxu0 }
 0x34c   : > { %v3997_v12 = vpop.f32.mrb[50].mxu1  ;;  %v3601_v31 = vadd.f32 %v3517_v34, %v16146_v14  ;;  %v12730_v50 = vpop.f32.mrb[51].mxu0 }
 0x34d   : > { %v12855_v19 = vpop.f32.mrb[51].mxu1 }
 0x34e   : > { %v16574_v15 = vadd.f32 %v3997_v12, %v3601_v31 }
 0x34f   : > { %v3522_v44 = vpop.f32.mrb[52].mxu0 }
 0x350   : > { %v4002_v40 = vpop.f32.mrb[52].mxu1  ;;  %v3602_v53 = vadd.f32 %v3522_v44, %v16159_v37  ;;  %v12733_v17 = vpop.f32.mrb[53].mxu0 }
 0x351   : > { %v12858_v35 = vpop.f32.mrb[53].mxu1 }
 0x352   : > { %v16577_v59 = vadd.f32 %v4002_v40, %v3602_v53 }
 0x353   : > { %v3527_v41 = vpop.f32.mrb[54].mxu0 }
 0x354   : > { %v4007_v0 = vpop.f32.mrb[54].mxu1  ;;  %v3603_v47 = vadd.f32 %v3527_v41, %v16172_v27  ;;  %v12736_v57 = vpop.f32.mrb[55].mxu0 }
 0x355   : > { %v12861_v3 = vpop.f32.mrb[55].mxu1 }
 0x356   : > { %v16580_v28 = vadd.f32 %v4007_v0, %v3603_v47 }
 0x357   : > { %v3532_v14 = vpop.f32.mrb[56].mxu0 }
 0x358   : > { %v4012_v38 = vpop.f32.mrb[56].mxu1  ;;  %v3604_v13 = vadd.f32 %v3532_v14, %v16185_v56  ;;  %v12739_v48 = vpop.f32.mrb[57].mxu0 }
 0x359   : > { %v12864_v34 = vpop.f32.mrb[57].mxu1 }
 0x35a   : > { %v16583_v12 = vadd.f32 %v4012_v38, %v3604_v13 }
 0x35b   : > { %v3537_v37 = vpop.f32.mrb[58].mxu0 }
 0x35c   : > { %v4017_v31 = vpop.f32.mrb[58].mxu1  ;;  %v3605_v50 = vadd.f32 %v3537_v37, %v16198_v33  ;;  %v12742_v19 = vpop.f32.mrb[59].mxu0 }
 0x35d   : > { %v12867_v44 = vpop.f32.mrb[59].mxu1 }
 0x35e   : > { %v16586_v40 = vadd.f32 %v4017_v31, %v3605_v50 }
 0x35f   : > { %v3542_v27 = vpop.f32.mrb[60].mxu0 }
 0x360   : > { %v4022_v53 = vpop.f32.mrb[60].mxu1  ;;  %v3606_v17 = vadd.f32 %v3542_v27, %v16211_v6  ;;  %v12745_v35 = vpop.f32.mrb[61].mxu0 }
 0x361   : > { %v12870_v41 = vpop.f32.mrb[61].mxu1 }
 0x362   : > { %v16589_v0 = vadd.f32 %v4022_v53, %v3606_v17 }
 0x363   : > { %v3547_v56 = vpop.f32.mrb[62].mxu0 }
 0x364   : > { %v4027_v47 = vpop.f32.mrb[62].mxu1  ;;  %v3607_v57 = vadd.f32 %v3547_v56, %v16224_v36  ;;  %v12748_v3 = vpop.f32.mrb[63].mxu0 }
 0x365   : > { %v12873_v14 = vpop.f32.mrb[63].mxu1 }
 0x366   : > { %v16592_v38 = vadd.f32 %v4027_v47, %v3607_v57 }
 0x367   : > { %v3552_v33 = vpop.f32.mrb[64].mxu0 }
 0x368   : > { %v4032_v13 = vpop.f32.mrb[64].mxu1  ;;  %v3608_v48 = vadd.f32 %v3552_v33, %v16237_v5  ;;  %v12751_v34 = vpop.f32.mrb[65].mxu0 }
 0x369   : > { %v12876_v37 = vpop.f32.mrb[65].mxu1 }
 0x36a   : > { %v16595_v31 = vadd.f32 %v4032_v13, %v3608_v48 }
 0x36b   : > { %v3557_v6 = vpop.f32.mrb[66].mxu0 }
 0x36c   : > { %v4037_v50 = vpop.f32.mrb[66].mxu1  ;;  %v3609_v19 = vadd.f32 %v3557_v6, %v16250_v8  ;;  %v12754_v44 = vpop.f32.mrb[67].mxu0 }
 0x36d   : > { %v12879_v27 = vpop.f32.mrb[67].mxu1 }
 0x36e   : > { %v16598_v53 = vadd.f32 %v4037_v50, %v3609_v19  ;;  %v10701_v50 = vld [vmem:[%s20358_s4 + $0x30] sm:$0xff] }
 0x36f   : > { %v3562_v36 = vpop.f32.mrb[68].mxu0 }
 0x370   : > { %20551 = vst [vmem:[#allocation3_spill] sm:$0xff] %v16598_v53  ;;  %v4042_v17 = vpop.f32.mrb[68].mxu1  ;;  %v3610_v35 = vadd.f32 %v3562_v36, %v16260_v54  ;;  %v12757_v41 = vpop.f32.mrb[69].mxu0 }
 0x371   : > { %v12882_v56 = vpop.f32.mrb[69].mxu1 }
 0x372   : > { %v16601_v47 = vadd.f32 %v4042_v17, %v3610_v35 }
 0x373   : > { %v3567_v5 = vpop.f32.mrb[70].mxu0 }
 0x374   : > { %20552 = vst [vmem:[#allocation4_spill] sm:$0xff] %v16601_v47  ;;  %v4047_v57 = vpop.f32.mrb[70].mxu1  ;;  %v3611_v3 = vadd.f32 %v3567_v5, %v16267_v62  ;;  %v12760_v14 = vpop.f32.mrb[71].mxu0  ;;  %v10702_v62 = vld [vmem:[%s20358_s4 + $0x38] sm:$0xff] }
 0x375   : > { %v12885_v33 = vpop.f32.mrb[71].mxu1  ;;  %v14194_v19 = vpack.c.bf16 %v10702_v62, %v10701_v50 }
 0x376   : > { %v16604_v13 = vadd.f32 %v4047_v57, %v3611_v3 }
 0x377   : > { %v4327_v8 = vpop.f32.mrb[72].mxu0  ;;  %14195 = vmatpush3.bf16.msra.mxu1 %v14194_v19 }
 0x378   : > { %20553 = vst [vmem:[#allocation5_spill] sm:$0xff] %v16604_v13  ;;  %v4531_v48 = vadd.f32 %v4327_v8, %v16274_v9  ;;  %v12890_v34 = vpop.f32.mrb[73].mxu0  ;;  %14202 = vmatprep.subr.bf16.mxu1 %v20364_v42 }
 0x37b   : > { %v4332_v37 = vpop.f32.mrb[74].mxu0 }
 0x37c   : > { %v4532_v6 = vadd.f32 %v4332_v37, %v16281_v2  ;;  %v12893_v54 = vpop.f32.mrb[75].mxu0 }
 0x37f   : > { %v4337_v44 = vpop.f32.mrb[76].mxu0 }
 0x380   : > { %v4533_v27 = vadd.f32 %v4337_v44, %v16288_v60  ;;  %v12896_v36 = vpop.f32.mrb[77].mxu0  ;;  %v16631_v44 = vpop.permute.xlu1 %4632 }
 0x381   : > { %20555 = vst [vmem:[#allocation7_spill] sm:$0xff] %v16631_v44 }
 0x383   : > { %v4342_v9 = vpop.f32.mrb[78].mxu0 }
 0x384   : > { %v4534_v2 = vadd.f32 %v4342_v9, %v16295_v39  ;;  %v12899_v17 = vpop.f32.mrb[79].mxu0 }
 0x385   : > { %v16638_v17 = vpop.permute.xlu1 %4637 }
 0x386   : > { %20557 = vst [vmem:[#allocation9_spill] sm:$0xff] %v16638_v17 }
 0x387   : > { %v4347_v35 = vpop.f32.mrb[80].mxu0 }
 0x388   : > { %v4535_v41 = vadd.f32 %v4347_v35, %v16302_v23  ;;  %v12902_v56 = vpop.f32.mrb[81].mxu0  ;;  %v16626_v23 = vpop.permute.xlu0 %4622 }
 0x389   : > { %20554 = vst [vmem:[#allocation6_spill] sm:$0xff] %v16626_v23 }
 0x38b   : > { %v4352_v5 = vpop.f32.mrb[82].mxu0 }
 0x38c   : > { %v4536_v57 = vadd.f32 %v4352_v5, %v16309_v43  ;;  %v12905_v3 = vpop.f32.mrb[83].mxu0 }
 0x38f   : > { %v4357_v14 = vpop.f32.mrb[84].mxu0 }
 0x390   : > { %v4537_v33 = vadd.f32 %v4357_v14, %v16316_v32  ;;  %v12908_v60 = vpop.f32.mrb[85].mxu0  ;;  %v16633_v32 = vpop.permute.xlu0 %4627 }
 0x391   : > { %20556 = vst [vmem:[#allocation8_spill] sm:$0xff] %v16633_v32  ;;  %v16648_v60 = vpop.permute.xlu1 %4647 }
 0x392   : > { %20559 = vst [vmem:[#allocation11_spill] sm:$0xff] %v16648_v60 }
 0x393   : > { %v4362_v8 = vpop.f32.mrb[86].mxu0 }
 0x394   : > { %v16621_v34 = vadd.f32 %v4362_v8, %v16323_v24  ;;  %v12911_v37 = vpop.f32.mrb[87].mxu0  ;;  %v16643_v5 = vpop.permute.xlu0 %4642 }
 0x395   : > { %20558 = vst [vmem:[#allocation10_spill] sm:$0xff] %v16643_v5  ;;  %v16655_v37 = vld [vmem:[%s20357_s3] ss:$0 sm:$0xff] }
 0x397   : > { %v4367_v54 = vpop.f32.mrb[88].mxu0 }
 0x398   : > { %v16624_v39 = vadd.f32 %v4367_v54, %v16330_v7  ;;  %v12914_v50 = vpop.f32.mrb[89].mxu0  ;;  %v16650_v8 = vpop.permute.xlu0 %4652 }
 0x399   : > { %20560 = vst [vmem:[#allocation12_spill] sm:$0xff] %v16650_v8  ;;  %v16661_v50 = vadd.f32 %v16655_v37, %v4532_v6  ;;  %v16679_v6 = vadd.f32 %v16655_v37, %v4534_v2 }
 0x39a   : > { %v16745_v53 = vadd.f32 %v16655_v37, %v16624_v39 }
 0x39b   : > { %v4372_v62 = vpop.f32.mrb[90].mxu0  ;;  %20561 = vst [vmem:[#allocation13_spill] sm:$0xff] %v16661_v50  ;;  %20566 = vst [vmem:[#allocation18_spill] sm:$0xff] %v16679_v6  ;;  %v4959_v2 = vmul.f32 %v16679_v6, %v16679_v6 }
 0x39c   : > { %v16629_v43 = vadd.f32 %v4372_v62, %v16337_v29  ;;  %v12917_v19 = vpop.f32.mrb[91].mxu0  ;;  %v16666_v62 = vpop.permute.xlu1 %4657 }
 0x39d   : > { %20563 = vst [vmem:[#allocation15_spill] sm:$0xff] %v16666_v62 }
 0x39f   : > { %v4377_v36 = vpop.f32.mrb[92].mxu0 }
 0x3a0   : > { %v16636_v24 = vadd.f32 %v4377_v36, %v16434_v4  ;;  %v12920_v9 = vpop.f32.mrb[93].mxu0  ;;  %v16669_v36 = vadd.f32 %v16655_v37, %v4533_v27 }
 0x3a2   : > { %20564 = vst [vmem:[#allocation16_spill] sm:$0xff] %v16669_v36  ;;  %v4958_v27 = vmul.f32 %v16669_v36, %v16669_v36 }
 0x3a3   : > { %v4382_v7 = vpop.f32.mrb[94].mxu0 }
 0x3a4   : > { %v16641_v35 = vadd.f32 %v4382_v7, %v16441_v11  ;;  %v12923_v56 = vpop.f32.mrb[95].mxu0 }
 0x3a5   : > { %v16674_v56 = vpop.permute.xlu0 %4662 }
 0x3a6   : > { %20565 = vst [vmem:[#allocation17_spill] sm:$0xff] %v16674_v56 }
 0x3a7   : > { %v4387_v29 = vpop.f32.mrb[96].mxu0 }
 0x3a8   : > { %v16646_v3 = vadd.f32 %v4387_v29, %v16448_v46  ;;  %v12926_v14 = vpop.f32.mrb[97].mxu0  ;;  %v16664_v46 = vadd.f32 %v16655_v37, %v4531_v48 }
 0x3aa   : > { %20562 = vst [vmem:[#allocation14_spill] sm:$0xff] %v16664_v46  ;;  %v4956_v48 = vmul.f32 %v16664_v46, %v16664_v46  ;;  %v4825_v1 = vmul.f32 %v16626_v23, %v16664_v46  ;;  %v16714_v46 = vadd.f32 %v16655_v37, %v4537_v33  ;;  %v16728_v33 = vadd.f32 %v16655_v37, %v16621_v34 }
 0x3ab   : > { %v4392_v4 = vpop.f32.mrb[98].mxu0 }
 0x3ac   : > { %v16658_v11 = vadd.f32 %v4392_v4, %v16455_v21  ;;  %v12929_v54 = vpop.f32.mrb[99].mxu0  ;;  %v4957_v21 = vmul.f32 %v16661_v50, %v16661_v50  ;;  %v4826_v4 = vmul.f32 %v16633_v32, %v16661_v50  ;;  %v4962_v34 = vmul.f32 %v16714_v46, %v16714_v46 }
 0x3ad   : > { %v16690_v54 = vpop.permute.xlu1 %4667 }
 0x3ae   : > { %20567 = vst [vmem:[#allocation19_spill] sm:$0xff] %v16690_v54  ;;  %v4868_v13 = vsel %vm4866_vm3, %v4826_v4, 0.0 }
 0x3af   : > { %v4397_v19 = vpop.f32.mrb[100].mxu0 }
 0x3b0   : > { %v16672_v9 = vadd.f32 %v4397_v19, %v16462_v63  ;;  %v12932_v7 = vpop.f32.mrb[101].mxu0  ;;  %v4998_v19 = vmul.f32 %v4957_v21, %v16633_v32  ;;  %v4827_v21 = vmul.f32 %v16631_v44, %v16669_v36  ;;  %v4999_v32 = vmul.f32 %v4958_v27, %v16631_v44 }
 0x3b1   : > { %v16696_v7 = vadd.f32 %v16655_v37, %v4535_v41  ;;  %v4867_v27 = vsel %vm4866_vm3, %v4825_v1, 0.0  ;;  %v16730_v4 = vpop.permute.xlu1 %4677 }
 0x3b2   : > { %20570 = vst [vmem:[#allocation22_spill] sm:$0xff] %v16730_v4  ;;  %v4869_v44 = vadd.f32 %v4868_v13, %v4867_v27 }
 0x3b3   : > { %v4402_v29 = vpop.f32.mrb[102].mxu0  ;;  %20568 = vst [vmem:[#allocation20_spill] sm:$0xff] %v16696_v7  ;;  %v4960_v36 = vmul.f32 %v16696_v7, %v16696_v7 }
 0x3b4   : > { %v16686_v14 = vadd.f32 %v4402_v29, %v16469_v49  ;;  %v12935_v63 = vpop.f32.mrb[103].mxu0  ;;  %v4997_v49 = vmul.f32 %v4956_v48, %v16626_v23  ;;  %v16702_v29 = vadd.f32 %v16655_v37, %v4536_v57  ;;  %v5039_v57 = vsel %vm4866_vm3, %v4998_v19, 0.0 }
 0x3b5   : > { %v16704_v63 = vpop.permute.xlu0 %4672  ;;  %v4828_v48 = vmul.f32 %v16638_v17, %v16679_v6  ;;  %v5000_v23 = vmul.f32 %v4959_v2, %v16638_v17  ;;  %v5041_v2 = vsel %vm4866_vm3, %v4999_v32, 0.0  ;;  %v4829_v17 = vmul.f32 %v16643_v5, %v16696_v7 }
 0x3b6   : > { %20569 = vst [vmem:[#allocation21_spill] sm:$0xff] %v16704_v63  ;;  %v5001_v7 = vmul.f32 %v4960_v36, %v16643_v5 }
 0x3b7   : > { %v4407_v42 = vpop.f32.mrb[104].mxu0  ;;  %v4872_v32 = vsel %vm4866_vm3, %v4828_v48, 0.0  ;;  %v4874_v39 = vsel %vm4866_vm3, %v4829_v17, 0.0  ;;  %v4831_v48 = vmul.f32 %v16650_v8, %v16714_v46 }
 0x3b8   : > { %v16710_v50 = vadd.f32 %v4407_v42, %v16476_v55  ;;  %v12938_v41 = vpop.f32.mrb[105].mxu0  ;;  %v5038_v55 = vsel %vm4866_vm3, %v4997_v49, 0.0  ;;  %v4961_v42 = vmul.f32 %v16702_v29, %v16702_v29  ;;  %v5045_v17 = vsel %vm4866_vm3, %v5001_v7, 0.0 }
 0x3b9   : > { %v4870_v41 = vsel %vm4866_vm3, %v4827_v21, 0.0  ;;  %v5040_v6 = vadd.f32 %v5039_v57, %v5038_v55  ;;  %v16741_v47 = vpop.permute.xlu0 %4682  ;;  %v5043_v21 = vsel %vm4866_vm3, %v5000_v23, 0.0  ;;  %v4963_v55 = vmul.f32 %v16728_v33, %v16728_v33 }
 0x3ba   : > { %20571 = vst [vmem:[#allocation23_spill] sm:$0xff] %v16741_v47  ;;  %v4871_v13 = vadd.f32 %v4870_v41, %v4869_v44  ;;  %v5002_v27 = vmul.f32 %v4961_v42, %v16648_v60  ;;  %v16760_v23 = vadd.f32 %v16655_v37, %v16629_v43  ;;  %v5003_v42 = vmul.f32 %v4962_v34, %v16650_v8 }
 0x3bb   : > { %v4412_v19 = vpop.f32.mrb[106].mxu0  ;;  %v5042_v57 = vadd.f32 %v5041_v2, %v5040_v6  ;;  %v4964_v2 = vmul.f32 %v16745_v53, %v16745_v53  ;;  %v4832_v43 = vmul.f32 %v16666_v62, %v16728_v33  ;;  %v5004_v34 = vmul.f32 %v4963_v55, %v16666_v62 }
 0x3bc   : > { %v16737_v1 = vadd.f32 %v4412_v19, %v16483_v61  ;;  %v12941_v49 = vpop.f32.mrb[107].mxu0  ;;  %v4830_v61 = vmul.f32 %v16648_v60, %v16702_v29  ;;  %v4873_v6 = vadd.f32 %v4872_v32, %v4871_v13 }
 0x3bd   : > { %v5044_v41 = vadd.f32 %v5043_v21, %v5042_v57  ;;  %v16768_v49 = vpop.permute.xlu1 %4687  ;;  %v5047_v21 = vsel %vm4866_vm3, %v5002_v27, 0.0  ;;  %v16780_v13 = vpop.permute.xlu0 %4692  ;;  %v4833_v57 = vmul.f32 %v16674_v56, %v16745_v53  ;;  %v5005_v62 = vmul.f32 %v4964_v2, %v16674_v56 }
 0x3be   : > { %20572 = vst [vmem:[#allocation24_spill] sm:$0xff] %v16768_v49  ;;  %v4876_v60 = vsel %vm4866_vm3, %v4830_v61, 0.0  ;;  %v4875_v32 = vadd.f32 %v4874_v39, %v4873_v6  ;;  %20573 = vst [vmem:[#allocation25_spill] sm:$0xff] %v16780_v13  ;;  %v4878_v61 = vsel %vm4866_vm3, %v4831_v48, 0.0  ;;  %v5049_v6 = vsel %vm4866_vm3, %v5003_v42, 0.0 }
 0x3bf   : > { %v4417_v19 = vpop.f32.mrb[108].mxu0  ;;  %v5046_v55 = vadd.f32 %v5045_v17, %v5044_v41  ;;  %v4880_v8 = vsel %vm4866_vm3, %v4832_v43, 0.0  ;;  %v4834_v48 = vmul.f32 %v16690_v54, %v16760_v23  ;;  %v4882_v41 = vsel %vm4866_vm3, %v4833_v57, 0.0 }
 0x3c0   : > { %v16763_v36 = vadd.f32 %v4417_v19, %v16490_v26  ;;  %v12944_v44 = vpop.f32.mrb[109].mxu0  ;;  %v16776_v26 = vadd.f32 %v16655_v37, %v16636_v24  ;;  %v4965_v19 = vmul.f32 %v16760_v23, %v16760_v23  ;;  %v16789_v24 = vadd.f32 %v16655_v37, %v16641_v35 }
 0x3c1   : > { %v4877_v44 = vadd.f32 %v4876_v60, %v4875_v32  ;;  %v16803_v35 = vadd.f32 %v16655_v37, %v16646_v3  ;;  %v5051_v60 = vsel %vm4866_vm3, %v5004_v34, 0.0  ;;  %v16807_v42 = vpop.permute.xlu1 %4697  ;;  %v16814_v32 = vadd.f32 %v16655_v37, %v16658_v11 }
 0x3c2   : > { %v4966_v5 = vmul.f32 %v16776_v26, %v16776_v26  ;;  %20574 = vst [vmem:[#allocation26_spill] sm:$0xff] %v16807_v42  ;;  %v5006_v17 = vmul.f32 %v4965_v19, %v16690_v54  ;;  %v4967_v43 = vmul.f32 %v16789_v24, %v16789_v24  ;;  %v5053_v57 = vsel %vm4866_vm3, %v5005_v62, 0.0 }
 0x3c3   : > { %v4422_v7 = vpop.f32.mrb[110].mxu0  ;;  %v4835_v19 = vmul.f32 %v16704_v63, %v16776_v26  ;;  %v4968_v11 = vmul.f32 %v16803_v35, %v16803_v35  ;;  %v4836_v62 = vmul.f32 %v16730_v4, %v16789_v24 }
 0x3c4   : > { %v16792_v39 = vadd.f32 %v4422_v7, %v16497_v10  ;;  %v12947_v27 = vpop.f32.mrb[111].mxu0  ;;  %v5048_v10 = vadd.f32 %v5047_v21, %v5046_v55  ;;  %v4879_v7 = vadd.f32 %v4878_v61, %v4877_v44  ;;  %v4884_v55 = vsel %vm4866_vm3, %v4834_v48, 0.0 }
 0x3c5   : > { %v16820_v27 = vpop.permute.xlu0 %4702  ;;  %v5007_v44 = vmul.f32 %v4966_v5, %v16704_v63  ;;  %v4969_v5 = vmul.f32 %v16814_v32, %v16814_v32 }
 0x3c6   : > { %v5050_v61 = vadd.f32 %v5049_v6, %v5048_v10  ;;  %v4881_v34 = vadd.f32 %v4880_v8, %v4879_v7  ;;  %20575 = vst [vmem:[#allocation27_spill] sm:$0xff] %v16820_v27  ;;  %v5055_v7 = vsel %vm4866_vm3, %v5006_v17, 0.0 }
 0x3c7   : > { %v4427_v2 = vpop.f32.mrb[112].mxu0  ;;  %v5057_v17 = vsel %vm4866_vm3, %v5007_v44, 0.0  ;;  %v4888_v44 = vsel %vm4866_vm3, %v4836_v62, 0.0 }
 0x3c8   : > { %v16817_v3 = vadd.f32 %v4427_v2, %v16504_v16  ;;  %v12950_v21 = vpop.f32.mrb[113].mxu0  ;;  %v16830_v16 = vadd.f32 %v16655_v37, %v16672_v9  ;;  %v5052_v6 = vadd.f32 %v5051_v60, %v5050_v61  ;;  %v4883_v8 = vadd.f32 %v4882_v41, %v4881_v34  ;;  %v16842_v41 = vpop.permute.xlu1 %4707 }
 0x3c9   : > { %v5008_v2 = vmul.f32 %v4967_v43, %v16730_v4  ;;  %v4886_v60 = vsel %vm4866_vm3, %v4835_v19, 0.0  ;;  %20576 = vst [vmem:[#allocation28_spill] sm:$0xff] %v16842_v41  ;;  %v16846_v61 = vadd.f32 %v16655_v37, %v16686_v14  ;;  %v4837_v43 = vmul.f32 %v16741_v47, %v16803_v35  ;;  %v5465_v19 = vld [vmem:[%s20358_s4 + $0x8] sm:$0xff] }
 0x3ca   : > { %v5054_v63 = vadd.f32 %v5053_v57, %v5052_v6  ;;  %v4885_v9 = vadd.f32 %v4884_v55, %v4883_v8  ;;  %v5009_v34 = vmul.f32 %v4968_v11, %v16741_v47  ;;  %v5464_v57 = vld [vmem:[%s20358_s4] sm:$0xff]  ;;  %v16860_v55 = vpop.permute.xlu0 %4712  ;;  %v4838_v6 = vmul.f32 %v16768_v49, %v16814_v32 }
 0x3cb   : > { %v4432_v10 = vpop.f32.mrb[114].mxu0  ;;  %20577 = vst [vmem:[#allocation29_spill] sm:$0xff] %v16860_v55  ;;  %v14197_v8 = vpack.c.bf16 %v5465_v19, %v5464_v57  ;;  %v16869_v47 = vadd.f32 %v16655_v37, %v16710_v50  ;;  %v4971_v62 = vmul.f32 %v16846_v61, %v16846_v61  ;;  %v16878_v57 = vadd.f32 %v16655_v37, %v16737_v1 }
 0x3cc   : > { %v16839_v48 = vadd.f32 %v4432_v10, %v16517_v52  ;;  %v12953_v21 = vpop.f32.mrb[115].mxu0  ;;  %v4970_v52 = vmul.f32 %v16830_v16, %v16830_v16  ;;  %v5056_v14 = vadd.f32 %v5055_v7, %v5054_v63  ;;  %v5059_v10 = vsel %vm4866_vm3, %v5008_v2, 0.0 }
 0x3cd   : > { %v5010_v21 = vmul.f32 %v4969_v5, %v16768_v49  ;;  %v4887_v7 = vadd.f32 %v4886_v60, %v4885_v9  ;;  %14198 = vmatpush3.bf16.msra.mxu0 %v14197_v8  ;;  %v4890_v2 = vsel %vm4866_vm3, %v4837_v43, 0.0  ;;  %v5061_v5 = vsel %vm4866_vm3, %v5009_v34, 0.0 }
 0x3ce   : > { %v5058_v54 = vadd.f32 %v5057_v17, %v5056_v14  ;;  %v4839_v50 = vmul.f32 %v16780_v13, %v16830_v16  ;;  %v20578_v19 = vmov 0.0|0.0   ;;  %v16886_v17 = vpop.permute.xlu1 %4717  ;;  %v4892_v14 = vsel %vm4866_vm3, %v4838_v6, 0.0  ;;  %v16899_v8 = vpop.permute.xlu0 %4722 }
 0x3cf   : > { %v4437_v11 = vpop.f32.mrb[116].mxu0  ;;  %14199 = vmatprep.subr.bf16.mxu0 %v20578_v19  ;;  %v4889_v9 = vadd.f32 %v4888_v44, %v4887_v7  ;;  %20579 = vst [vmem:[#allocation30_spill] sm:$0xff] %v16886_v17  ;;  %v16891_v1 = vadd.f32 %v16655_v37, %v16763_v36  ;;  %v5063_v34 = vsel %vm4866_vm3, %v5010_v21, 0.0  ;;  %20580 = vst [vmem:[#allocation31_spill] sm:$0xff] %v16899_v8 }
 0x3d0   : > { %v16872_v4 = vadd.f32 %v4437_v11, %v16527_v18  ;;  %v12956_v63 = vpop.f32.mrb[117].mxu0  ;;  %v5011_v18 = vmul.f32 %v4970_v52, %v16780_v13  ;;  %v5060_v60 = vadd.f32 %v5059_v10, %v5058_v54  ;;  %v4840_v11 = vmul.f32 %v16807_v42, %v16846_v61 }
 0x3d1   : > { %v4972_v52 = vmul.f32 %v16869_v47, %v16869_v47  ;;  %v4891_v10 = vadd.f32 %v4890_v2, %v4889_v9  ;;  %v5012_v63 = vmul.f32 %v4971_v62, %v16807_v42  ;;  %v4973_v36 = vmul.f32 %v16878_v57, %v16878_v57 }
 0x3d2   : > { %v5062_v6 = vadd.f32 %v5061_v5, %v5060_v60  ;;  %v4894_v21 = vsel %vm4866_vm3, %v4839_v50, 0.0  ;;  %v5065_v7 = vsel %vm4866_vm3, %v5011_v18, 0.0  ;;  %v4841_v13 = vmul.f32 %v16820_v27, %v16869_v47  ;;  %v16919_v42 = vpop.permute.xlu1 %4727 }
 0x3d3   : > { %v4442_v43 = vpop.f32.mrb[118].mxu0  ;;  %v4974_v2 = vmul.f32 %v16891_v1, %v16891_v1  ;;  %v4896_v5 = vsel %vm4866_vm3, %v4840_v11, 0.0  ;;  %v5013_v9 = vmul.f32 %v4972_v52, %v16820_v27  ;;  %v4842_v50 = vmul.f32 %v16842_v41, %v16878_v57  ;;  %20581 = vst [vmem:[#allocation32_spill] sm:$0xff] %v16919_v42 }
 0x3d4   : > { %v4554_v44 = vadd.f32 %v4442_v43, %v16534_v58  ;;  %v12959_v54 = vpop.f32.mrb[119].mxu0  ;;  %v16910_v58 = vadd.f32 %v16655_v37, %v16792_v39  ;;  %v4893_v43 = vadd.f32 %v4892_v14, %v4891_v10  ;;  %v5067_v14 = vsel %vm4866_vm3, %v5012_v63, 0.0  ;;  %v5467_v63 = vld [vmem:[%s20358_s4 + $0x18] sm:$0xff] }
 0x3d5   : > { %v5064_v54 = vadd.f32 %v5063_v34, %v5062_v6  ;;  %v5014_v34 = vmul.f32 %v4973_v36, %v16842_v41  ;;  %v4898_v10 = vsel %vm4866_vm3, %v4841_v13, 0.0  ;;  %v4843_v11 = vmul.f32 %v16860_v55, %v16891_v1  ;;  %v5466_v6 = vld [vmem:[%s20358_s4 + $0x10] sm:$0xff]  ;;  %v16938_v36 = vpop.permute.xlu0 %4732 }
 0x3d6   : > { %v4895_v39 = vadd.f32 %v4894_v21, %v4893_v43  ;;  %v4975_v52 = vmul.f32 %v16910_v58, %v16910_v58  ;;  %20582 = vst [vmem:[#allocation33_spill] sm:$0xff] %v16938_v36  ;;  %v5015_v21 = vmul.f32 %v4974_v2, %v16860_v55 }
 0x3d7   : > { %v4447_v62 = vpop.f32.mrb[120].mxu0  ;;  %v5066_v49 = vadd.f32 %v5065_v7, %v5064_v54  ;;  %v16943_v7 = vadd.f32 %v16655_v37, %v16839_v48  ;;  %v5069_v54 = vsel %vm4866_vm3, %v5013_v9, 0.0  ;;  %v5071_v2 = vsel %vm4866_vm3, %v5014_v34, 0.0 }
 0x3d8   : > { %v4555_v18 = vadd.f32 %v4447_v62, %v16541_v22  ;;  %v12962_v60 = vpop.f32.mrb[121].mxu0  ;;  %v16930_v22 = vadd.f32 %v16655_v37, %v16817_v3  ;;  %v4897_v13 = vadd.f32 %v4896_v5, %v4895_v39  ;;  %v14200_v3 = vpack.c.bf16 %v5467_v63, %v5466_v6  ;;  %v5468_v6 = vld [vmem:[#allocation2 + $0x1] sm:$0xff] }
 0x3d9   : > { %v4900_v62 = vsel %vm4866_vm3, %v4842_v50, 0.0  ;;  %v4844_v60 = vmul.f32 %v16886_v17, %v16910_v58  ;;  %v5068_v56 = vadd.f32 %v5067_v14, %v5066_v49  ;;  %v4902_v48 = vsel %vm4866_vm3, %v4843_v11, 0.0  ;;  %13020 = vmatmul.mubr.msk.f32.vlgmr.msra.gmra.mrb[72].mxu1 %vm4866_vm3, %v5468_v6  ;;  %v5423_v11 = vld [vmem:[#allocation2] sm:$0xff]  ;;  %v5424_v6 = vld [vmem:[#allocation2 + $0x8] sm:$0xff] }
 0x3da   : > { %v4899_v5 = vadd.f32 %v4898_v10, %v4897_v13  ;;  %14201 = vmatpush3.bf16.msra.mxu0 %v14200_v3  ;;  %v5016_v39 = vmul.f32 %v4975_v52, %v16886_v17  ;;  %v4976_v9 = vmul.f32 %v16930_v22, %v16930_v22  ;;  %v16957_v50 = vadd.f32 %v16655_v37, %v16872_v4 }
 0x3db   : > { %v4452_v43 = vpop.f32.mrb[122].mxu0  ;;  %14208 = vmatprep.subr.bf16.mxu0 %v20578_v19  ;;  %v5070_v49 = vadd.f32 %v5069_v54, %v5068_v56  ;;  %v5073_v14 = vsel %vm4866_vm3, %v5015_v21, 0.0  ;;  %v4977_v34 = vmul.f32 %v16943_v7, %v16943_v7  ;;  %v4904_v52 = vsel %vm4866_vm3, %v4844_v60, 0.0  ;;  %v10785_v21 = vld [vmem:[%s20358_s4 + $0x40] sm:$0xff]  ;;  %v16982_v54 = vpop.permute.xlu0 %4742 }
 0x3dc   : > { %v4556_v41 = vadd.f32 %v4452_v43, %v16548_v45  ;;  %v12965_v27 = vpop.f32.mrb[123].mxu0  ;;  %v16960_v45 = vpop.permute.xlu1 %4737  ;;  %v4845_v4 = vmul.f32 %v16899_v8, %v16930_v22  ;;  %v16970_v63 = vadd.f32 %v16655_v37, %v4554_v44  ;;  %v10786_v43 = vld [vmem:[%s20358_s4 + $0x48] sm:$0xff]  ;;  %v20584_v3 = vmov 0.0   ;;  %20585 = vst [vmem:[#allocation35_spill] sm:$0xff] %v16982_v54 }
 0x3dd   : > { %20583 = vst [vmem:[#allocation34_spill] sm:$0xff] %v16960_v45  ;;  %v4901_v27 = vadd.f32 %v4900_v62, %v4899_v5  ;;  %13151 = vmatmul.mubr.msk.f32.vlgmr.msra.gmra.mrb[154].mxu0 %vm4866_vm3, %v5423_v11  ;;  %13022 = vmatprep.mubr.msk.f32.mxu1 %vm14273_vm1, %v20584_v3  ;;  %v5072_v44 = vadd.f32 %v5071_v2, %v5070_v49  ;;  %v5469_v5 = vld [vmem:[#allocation2 + $0x9] sm:$0xff] }
 0x3de   : > { %v14203_v60 = vpack.c.bf16 %v10786_v43, %v10785_v21  ;;  %13153 = vmatprep.mubr.msk.f32.mxu0 %vm14273_vm1, %v20584_v3  ;;  %v5017_v11 = vmul.f32 %v4976_v9, %v16899_v8  ;;  %v4978_v2 = vmul.f32 %v16957_v50, %v16957_v50  ;;  %v4906_v43 = vsel %vm4866_vm3, %v4845_v4, 0.0  ;;  %13023 = vmatmul.mubr.msk.f32.gmra.mrb[74].mxu1 %vm4866_vm3, %v5469_v5 }
 0x3df   : > { %v4457_v10 = vpop.f32.mrb[124].mxu0  ;;  %v4903_v62 = vadd.f32 %v4902_v48, %v4901_v27  ;;  %v5074_v48 = vadd.f32 %v5073_v14, %v5072_v44  ;;  %v16997_v27 = vadd.f32 %v16655_v37, %v4556_v41  ;;  %v4979_v9 = vmul.f32 %v16970_v63, %v16970_v63  ;;  %13025 = vmatprep.mubr.msk.f32.mxu1 %vm14273_vm1, %v20584_v3 }
 0x3e0   : > { %v4557_v56 = vadd.f32 %v4457_v10, %v16555_v51  ;;  %v12968_v13 = vpop.f32.mrb[125].mxu0  ;;  %v16985_v51 = vadd.f32 %v16655_v37, %v4555_v18  ;;  %v5075_v10 = vsel %vm4866_vm3, %v5016_v39, 0.0  ;;  %v5018_v18 = vmul.f32 %v4977_v34, %v16919_v42  ;;  %14204 = vmatpush3.bf16.msra.mxu1 %v14203_v60  ;;  %v17007_v14 = vpop.permute.xlu1 %4747 }
 0x3e1   : > { %v4846_v13 = vmul.f32 %v16919_v42, %v16943_v7  ;;  %v4905_v49 = vadd.f32 %v4904_v52, %v4903_v62  ;;  %v4847_v39 = vmul.f32 %v16938_v36, %v16957_v50  ;;  %13154 = vmatmul.mubr.msk.f32.gmra.mrb[156].mxu0 %vm4866_vm3, %v5424_v6  ;;  %20586 = vst [vmem:[#allocation36_spill] sm:$0xff] %v17007_v14  ;;  %v17024_v62 = vpop.permute.xlu0 %4752 }
 0x3e2   : > { %v5076_v41 = vadd.f32 %v5075_v10, %v5074_v48  ;;  %v4980_v34 = vmul.f32 %v16985_v51, %v16985_v51  ;;  %v17012_v52 = vadd.f32 %v16655_v37, %v4557_v56  ;;  %13156 = vmatprep.mubr.msk.f32.mxu0 %vm14273_vm1, %v20584_v3  ;;  %v5019_v4 = vmul.f32 %v4978_v2, %v16938_v36 }
 0x3e3   : > { %v4462_v21 = vpop.f32.mrb[126].mxu0  ;;  %v4848_v44 = vmul.f32 %v16960_v45, %v16970_v63  ;;  %14205 = vmatprep.subr.bf16.mxu1 %v20578_v19  ;;  %20587 = vst [vmem:[#allocation37_spill] sm:$0xff] %v17024_v62  ;;  %v4907_v56 = vadd.f32 %v4906_v43, %v4905_v49  ;;  %v5079_v60 = vsel %vm4866_vm3, %v5018_v18, 0.0  ;;  %v4981_v5 = vmul.f32 %v16997_v27, %v16997_v27 }
 0x3e4   : > { %v4558_v8 = vadd.f32 %v4462_v21, %v16562_v25  ;;  %v12971_v17 = vpop.f32.mrb[127].mxu0  ;;  %v5077_v25 = vsel %vm4866_vm3, %v5017_v11, 0.0  ;;  %v4910_v11 = vsel %vm4866_vm3, %v4847_v39, 0.0  ;;  %v4849_v2 = vmul.f32 %v16982_v54, %v16985_v51 }
 0x3e5   : > { %v4908_v17 = vsel %vm4866_vm3, %v4846_v13, 0.0  ;;  %v5020_v13 = vmul.f32 %v4979_v9, %v16960_v45  ;;  %v5078_v49 = vadd.f32 %v5077_v25, %v5076_v41  ;;  %v5021_v18 = vmul.f32 %v4980_v34, %v16982_v54  ;;  %v17047_v45 = vpop.permute.xlu1 %4757 }
 0x3e6   : > { %v17030_v6 = vadd.f32 %v16655_v37, %v4558_v8  ;;  %v4909_v43 = vadd.f32 %v4908_v17, %v4907_v56  ;;  %v4982_v3 = vmul.f32 %v17012_v52, %v17012_v52  ;;  %v5081_v8 = vsel %vm4866_vm3, %v5019_v4, 0.0  ;;  %20588 = vst [vmem:[#allocation38_spill] sm:$0xff] %v17047_v45 }
 0x3e7   : > { %v4467_v10 = vpop.f32.mrb[128].mxu0  ;;  %v4912_v36 = vsel %vm4866_vm3, %v4848_v44, 0.0  ;;  %v4850_v39 = vmul.f32 %v17007_v14, %v16997_v27  ;;  %v5022_v25 = vmul.f32 %v4981_v5, %v17007_v14  ;;  %v5083_v4 = vsel %vm4866_vm3, %v5020_v13, 0.0 }
 0x3e8   : > { %v4559_v48 = vadd.f32 %v4467_v10, %v16568_v30  ;;  %v12974_v21 = vpop.f32.mrb[129].mxu0  ;;  %v5080_v30 = vadd.f32 %v5079_v60, %v5078_v49  ;;  %v4911_v41 = vadd.f32 %v4910_v11, %v4909_v43  ;;  %v4983_v34 = vmul.f32 %v17030_v6, %v17030_v6 }
 0x3e9   : > { %v4914_v44 = vsel %vm4866_vm3, %v4849_v2, 0.0  ;;  %v4851_v56 = vmul.f32 %v17024_v62, %v17012_v52  ;;  %v17057_v21 = vpop.permute.xlu0 %4762  ;;  %v5085_v5 = vsel %vm4866_vm3, %v5021_v18, 0.0  ;;  %v5023_v49 = vmul.f32 %v4982_v3, %v17024_v62 }
 0x3ea   : > { %v17045_v9 = vadd.f32 %v16655_v37, %v4559_v48  ;;  %20589 = vst [vmem:[#allocation39_spill] sm:$0xff] %v17057_v21  ;;  %v5082_v60 = vadd.f32 %v5081_v8, %v5080_v30  ;;  %v4913_v11 = vadd.f32 %v4912_v36, %v4911_v41  ;;  %v4916_v43 = vsel %vm4866_vm3, %v4850_v39, 0.0 }
 0x3eb   : > { %v4472_v17 = vpop.f32.mrb[130].mxu0  ;;  %v4852_v13 = vmul.f32 %v17047_v45, %v17030_v6  ;;  %v5087_v8 = vsel %vm4866_vm3, %v5022_v25, 0.0  ;;  %v5024_v36 = vmul.f32 %v4983_v34, %v17047_v45  ;;  %v4918_v3 = vsel %vm4866_vm3, %v4851_v56, 0.0 }
 0x3ec   : > { %v4560_v10 = vadd.f32 %v4472_v17, %v16571_v20  ;;  %v12977_v48 = vpop.f32.mrb[131].mxu0  ;;  %v4984_v2 = vmul.f32 %v17045_v9, %v17045_v9  ;;  %v5084_v20 = vadd.f32 %v5083_v4, %v5082_v60  ;;  %v4915_v17 = vadd.f32 %v4914_v44, %v4913_v11 }
 0x3ed   : > { %v4853_v39 = vmul.f32 %v17057_v21, %v17045_v9  ;;  %v5089_v25 = vsel %vm4866_vm3, %v5023_v49, 0.0  ;;  %v4920_v34 = vsel %vm4866_vm3, %v4852_v13, 0.0  ;;  %v17087_v45 = vpop.permute.xlu0 %4772 }
 0x3ee   : > { %v17067_v14 = vadd.f32 %v16655_v37, %v4560_v10  ;;  %v17077_v10 = vpop.permute.xlu1 %4767  ;;  %v5086_v4 = vadd.f32 %v5085_v5, %v5084_v20  ;;  %v4917_v44 = vadd.f32 %v4916_v43, %v4915_v17  ;;  %v5025_v60 = vmul.f32 %v4984_v2, %v17057_v21  ;;  %20591 = vst [vmem:[#allocation41_spill] sm:$0xff] %v17087_v45 }
 0x3ef   : > { %v4477_v18 = vpop.f32.mrb[132].mxu0  ;;  %20590 = vst [vmem:[#allocation40_spill] sm:$0xff] %v17077_v10  ;;  %v4922_v49 = vsel %vm4866_vm3, %v4853_v39, 0.0 }
 0x3f0   : > { %v4985_v30 = vmul.f32 %v17067_v14, %v17067_v14  ;;  %v4561_v41 = vadd.f32 %v4477_v18, %v16574_v15  ;;  %v12980_v48 = vpop.f32.mrb[133].mxu0  ;;  %v4854_v56 = vmul.f32 %v17077_v10, %v17067_v14  ;;  %v5088_v15 = vadd.f32 %v5087_v8, %v5086_v4 }
 0x3f1   : > { %v4919_v18 = vadd.f32 %v4918_v3, %v4917_v44  ;;  %v5091_v48 = vsel %vm4866_vm3, %v5024_v36, 0.0  ;;  %v5093_v8 = vsel %vm4866_vm3, %v5025_v60, 0.0 }
 0x3f2   : > { %v17085_v11 = vadd.f32 %v16655_v37, %v4561_v41  ;;  %v5026_v5 = vmul.f32 %v4985_v30, %v17077_v10  ;;  %v5090_v41 = vadd.f32 %v5089_v25, %v5088_v15  ;;  %v4924_v36 = vsel %vm4866_vm3, %v4854_v56, 0.0  ;;  %v17103_v39 = vpop.permute.xlu1 %4777 }
 0x3f3   : > { %v4482_v43 = vpop.f32.mrb[134].mxu0  ;;  %v4921_v21 = vadd.f32 %v4920_v34, %v4919_v18  ;;  %20592 = vst [vmem:[#allocation42_spill] sm:$0xff] %v17103_v39 }
 0x3f4   : > { %v4855_v13 = vmul.f32 %v17087_v45, %v17085_v11  ;;  %v4986_v2 = vmul.f32 %v17085_v11, %v17085_v11  ;;  %v4562_v20 = vadd.f32 %v4482_v43, %v16577_v59  ;;  %v12983_v17 = vpop.f32.mrb[135].mxu0  ;;  %v5092_v4 = vadd.f32 %v5091_v48, %v5090_v41 }
 0x3f5   : > { %v4923_v44 = vadd.f32 %v4922_v49, %v4921_v21  ;;  %v5095_v10 = vsel %vm4866_vm3, %v5026_v5, 0.0  ;;  %v17118_v49 = vpop.permute.xlu0 %4782 }
 0x3f6   : > { %v5027_v3 = vmul.f32 %v4986_v2, %v17087_v45  ;;  %v17101_v30 = vadd.f32 %v16655_v37, %v4562_v20  ;;  %v4926_v59 = vsel %vm4866_vm3, %v4855_v13, 0.0  ;;  %v5094_v15 = vadd.f32 %v5093_v8, %v5092_v4  ;;  %20593 = vst [vmem:[#allocation43_spill] sm:$0xff] %v17118_v49 }
 0x3f7   : > { %v4487_v62 = vpop.f32.mrb[136].mxu0  ;;  %v4925_v18 = vadd.f32 %v4924_v36, %v4923_v44 }
 0x3f8   : > { %v4856_v25 = vmul.f32 %v17103_v39, %v17101_v30  ;;  %v4987_v34 = vmul.f32 %v17101_v30, %v17101_v30  ;;  %v4563_v60 = vadd.f32 %v4487_v62, %v16580_v28  ;;  %v12986_v56 = vpop.f32.mrb[137].mxu0  ;;  %v5097_v43 = vsel %vm4866_vm3, %v5027_v3, 0.0 }
 0x3f9   : > { %v5096_v13 = vadd.f32 %v5095_v10, %v5094_v15  ;;  %v4927_v2 = vadd.f32 %v4926_v59, %v4925_v18  ;;  %v17131_v59 = vpop.permute.xlu1 %4787 }
 0x3fa   : > { %v4928_v21 = vsel %vm4866_vm3, %v4856_v25, 0.0  ;;  %v5028_v48 = vmul.f32 %v4987_v34, %v17103_v39  ;;  %v17116_v5 = vadd.f32 %v16655_v37, %v4563_v60  ;;  %20594 = vst [vmem:[#allocation44_spill] sm:$0xff] %v17131_v59 }
 0x3fb   : > { %v4492_v20 = vpop.f32.mrb[138].mxu0  ;;  %v5098_v36 = vadd.f32 %v5097_v43, %v5096_v13  ;;  %v4929_v3 = vadd.f32 %v4928_v21, %v4927_v2 }
 0x3fc   : > { %v5099_v17 = vsel %vm4866_vm3, %v5028_v48, 0.0  ;;  %v4857_v28 = vmul.f32 %v17118_v49, %v17116_v5  ;;  %v4988_v62 = vmul.f32 %v17116_v5, %v17116_v5  ;;  %v4564_v41 = vadd.f32 %v4492_v20, %v16583_v12  ;;  %v12989_v8 = vpop.f32.mrb[139].mxu0  ;;  %v17144_v20 = vpop.permute.xlu0 %4792 }
 0x3fd   : > { %v5100_v25 = vadd.f32 %v5099_v17, %v5098_v36  ;;  %20595 = vst [vmem:[#allocation45_spill] sm:$0xff] %v17144_v20 }
 0x3fe   : > { %v4930_v4 = vsel %vm4866_vm3, %v4857_v28, 0.0  ;;  %v5029_v44 = vmul.f32 %v4988_v62, %v17118_v49  ;;  %v17129_v10 = vadd.f32 %v16655_v37, %v4564_v41 }
 0x3ff   : > { %v4931_v34 = vadd.f32 %v4930_v4, %v4929_v3  ;;  %v4497_v60 = vpop.f32.mrb[140].mxu0 }
 0x400   : > { %v5101_v56 = vsel %vm4866_vm3, %v5029_v44, 0.0  ;;  %v4858_v12 = vmul.f32 %v17131_v59, %v17129_v10  ;;  %v4989_v15 = vmul.f32 %v17129_v10, %v17129_v10  ;;  %v4565_v18 = vadd.f32 %v4497_v60, %v16586_v40  ;;  %v12992_v43 = vpop.f32.mrb[141].mxu0 }
 0x401   : > { %v5102_v21 = vadd.f32 %v5101_v56, %v5100_v25 }
 0x402   : > { %v4932_v48 = vsel %vm4866_vm3, %v4858_v12, 0.0  ;;  %v5030_v13 = vmul.f32 %v4989_v15, %v17131_v59  ;;  %v17142_v2 = vadd.f32 %v16655_v37, %v4565_v18 }
 0x403   : > { %v4933_v17 = vadd.f32 %v4932_v48, %v4931_v34  ;;  %v4502_v28 = vpop.f32.mrb[142].mxu0  ;;  %v17157_v34 = vpop.permute.xlu1 %4797 }
 0x404   : > { %v5103_v62 = vsel %vm4866_vm3, %v5030_v13, 0.0  ;;  %v4859_v41 = vmul.f32 %v17144_v20, %v17142_v2  ;;  %v4990_v40 = vmul.f32 %v17142_v2, %v17142_v2  ;;  %v4566_v8 = vadd.f32 %v4502_v28, %v16589_v0  ;;  %v12995_v36 = vpop.f32.mrb[143].mxu0  ;;  %20596 = vst [vmem:[#allocation46_spill] sm:$0xff] %v17157_v34 }
 0x405   : > { %v5104_v3 = vadd.f32 %v5103_v62, %v5102_v21 }
 0x406   : > { %v4934_v4 = vsel %vm4866_vm3, %v4859_v41, 0.0  ;;  %v5031_v44 = vmul.f32 %v4990_v40, %v17144_v20  ;;  %v17155_v25 = vadd.f32 %v16655_v37, %v4566_v8 }
 0x407   : > { %v4935_v60 = vadd.f32 %v4934_v4, %v4933_v17  ;;  %v4507_v56 = vpop.f32.mrb[144].mxu0  ;;  %v17170_v17 = vpop.permute.xlu0 %4802 }
 0x408   : > { %v5105_v12 = vsel %vm4866_vm3, %v5031_v44, 0.0  ;;  %v4860_v15 = vmul.f32 %v17157_v34, %v17155_v25  ;;  %v4991_v0 = vmul.f32 %v17155_v25, %v17155_v25  ;;  %v4567_v18 = vadd.f32 %v4507_v56, %v16592_v38  ;;  %v12998_v43 = vpop.f32.mrb[145].mxu0  ;;  %20597 = vst [vmem:[#allocation47_spill] sm:$0xff] %v17170_v17 }
 0x409   : > { %v5106_v21 = vadd.f32 %v5105_v12, %v5104_v3 }
 0x40a   : > { %v4936_v48 = vsel %vm4866_vm3, %v4860_v15, 0.0  ;;  %v5032_v13 = vmul.f32 %v4991_v0, %v17157_v34  ;;  %v17168_v28 = vadd.f32 %v16655_v37, %v4567_v18 }
 0x40b   : > { %v4937_v62 = vadd.f32 %v4936_v48, %v4935_v60  ;;  %v4512_v41 = vpop.f32.mrb[146].mxu0  ;;  %v17183_v60 = vpop.permute.xlu1 %4807 }
 0x40c   : > { %v5107_v40 = vsel %vm4866_vm3, %v5032_v13, 0.0  ;;  %v4861_v8 = vmul.f32 %v17170_v17, %v17168_v28  ;;  %v4992_v38 = vmul.f32 %v17168_v28, %v17168_v28  ;;  %v4568_v36 = vadd.f32 %v4512_v41, %v16595_v31  ;;  %v13001_v3 = vpop.f32.mrb[147].mxu0  ;;  %20598 = vst [vmem:[#allocation48_spill] sm:$0xff] %v17183_v60 }
 0x40d   : > { %v5108_v4 = vadd.f32 %v5107_v40, %v5106_v21  ;;  %v20599_v21 = vld [vmem:[#allocation3_spill] sm:$0xff] }
 0x40e   : > { %v4938_v44 = vsel %vm4866_vm3, %v4861_v8, 0.0  ;;  %v5033_v56 = vmul.f32 %v4992_v38, %v17170_v17  ;;  %v17181_v12 = vadd.f32 %v16655_v37, %v4568_v36 }
 0x40f   : > { %v4939_v15 = vadd.f32 %v4938_v44, %v4937_v62  ;;  %v4517_v0 = vpop.f32.mrb[148].mxu0  ;;  %v17196_v62 = vpop.permute.xlu0 %4812 }
 0x410   : > { %v5109_v18 = vsel %vm4866_vm3, %v5033_v56, 0.0  ;;  %v4862_v43 = vmul.f32 %v17183_v60, %v17181_v12  ;;  %v4993_v31 = vmul.f32 %v17181_v12, %v17181_v12  ;;  %v4569_v48 = vadd.f32 %v4517_v0, %v20599_v21  ;;  %v13004_v13 = vpop.f32.mrb[149].mxu0  ;;  %20600 = vst [vmem:[#allocation3_spill] sm:$0xff] %v17196_v62 }
 0x411   : > { %v5110_v41 = vadd.f32 %v5109_v18, %v5108_v4  ;;  %v20601_v4 = vld [vmem:[#allocation4_spill] sm:$0xff] }
 0x412   : > { %v4940_v40 = vsel %vm4866_vm3, %v4862_v43, 0.0  ;;  %v5034_v8 = vmul.f32 %v4993_v31, %v17183_v60  ;;  %v17194_v38 = vadd.f32 %v16655_v37, %v4569_v48 }
 0x413   : > { %v4941_v36 = vadd.f32 %v4940_v40, %v4939_v15  ;;  %v4522_v3 = vpop.f32.mrb[150].mxu0  ;;  %v17209_v15 = vpop.permute.xlu1 %4817 }
 0x414   : > { %v5111_v44 = vsel %vm4866_vm3, %v5034_v8, 0.0  ;;  %v4863_v56 = vmul.f32 %v17196_v62, %v17194_v38  ;;  %v4994_v0 = vmul.f32 %v17194_v38, %v17194_v38  ;;  %v4570_v18 = vadd.f32 %v4522_v3, %v20601_v4  ;;  %v13007_v43 = vpop.f32.mrb[151].mxu0  ;;  %20602 = vst [vmem:[#allocation4_spill] sm:$0xff] %v17209_v15 }
 0x415   : > { %v5112_v21 = vadd.f32 %v5111_v44, %v5110_v41  ;;  %v20603_v41 = vld [vmem:[#allocation5_spill] sm:$0xff] }
 0x416   : > { %v4942_v31 = vsel %vm4866_vm3, %v4863_v56, 0.0  ;;  %v5035_v48 = vmul.f32 %v4994_v0, %v17196_v62  ;;  %v17207_v13 = vadd.f32 %v16655_v37, %v4570_v18 }
 0x417   : > { %v4943_v40 = vadd.f32 %v4942_v31, %v4941_v36  ;;  %v4527_v8 = vpop.f32.mrb[152].mxu0  ;;  %v17222_v36 = vpop.permute.xlu0 %4822 }
 0x418   : > { %v5113_v60 = vsel %vm4866_vm3, %v5035_v48, 0.0  ;;  %v4864_v17 = vmul.f32 %v17209_v15, %v17207_v13  ;;  %v4995_v3 = vmul.f32 %v17207_v13, %v17207_v13  ;;  %v4571_v44 = vadd.f32 %v4527_v8, %v20603_v41  ;;  %v13010_v56 = vpop.f32.mrb[153].mxu0  ;;  %20604 = vst [vmem:[#allocation5_spill] sm:$0xff] %v17222_v36 }
 0x419   : > { %v5114_v4 = vadd.f32 %v5113_v60, %v5112_v21 }
 0x41a   : > { %v4944_v0 = vsel %vm4866_vm3, %v4864_v17, 0.0  ;;  %v5036_v18 = vmul.f32 %v4995_v3, %v17209_v15  ;;  %v17220_v43 = vadd.f32 %v16655_v37, %v4571_v44  ;;  %v10787_v15 = vld [vmem:[%s20358_s4 + $0x50] sm:$0xff] }
 0x41b   : > { %v4945_v31 = vadd.f32 %v4944_v0, %v4943_v40 }
 0x41c   : > { %v5115_v48 = vsel %vm4866_vm3, %v5036_v18, 0.0  ;;  %v4865_v62 = vmul.f32 %v17222_v36, %v17220_v43  ;;  %v4996_v8 = vmul.f32 %v17220_v43, %v17220_v43 }
 0x41d   : > { %v5116_v60 = vadd.f32 %v5115_v48, %v5114_v4  ;;  %v10788_v4 = vld [vmem:[%s20358_s4 + $0x58] sm:$0xff] }
 0x41e   : > { %v4947_v17 = vsel %vm4946_vm4, %v4865_v62, 0.0  ;;  %v5037_v21 = vmul.f32 %v4996_v8, %v17222_v36  ;;  %v14206_v8 = vpack.c.bf16 %v10788_v4, %v10787_v15  ;;  %v20605_v15 = vld [vmem:[#allocation14_spill] sm:$0xff]  ;;  %v20606_v4 = vld [vmem:[#allocation13_spill] sm:$0xff] }
 0x41f   : > { %v4948_v3 = vadd.f32 %v4947_v17, %v4945_v31 }
 0x420   : > { %v5117_v37 = vsel %vm4946_vm4, %v5037_v21, 0.0  ;;  %14207 = vmatpush3.bf16.msra.mxu1 %v14206_v8 }
 0x421   : > { %v4949_v41 = vrot.slane %v4948_v3, 4  ;;  %v5118_v44 = vadd.f32 %v5117_v37, %v5116_v60  ;;  %14214 = vmatprep.subr.bf16.mxu1 %v20578_v19 }
 0x423   : > { %v4950_v40 = vadd.f32 %v4949_v41, %v4948_v3  ;;  %v5119_v56 = vrot.slane %v5118_v44, 4 }
 0x425   : > { %v4951_v0 = vrot.slane %v4950_v40, 2  ;;  %v5120_v18 = vadd.f32 %v5119_v56, %v5118_v44 }
 0x427   : > { %v4952_v62 = vadd.f32 %v4951_v0, %v4950_v40  ;;  %v5121_v48 = vrot.slane %v5120_v18, 2 }
 0x429   : > { %v4953_v31 = vrot.slane %v4952_v62, 1  ;;  %v5122_v17 = vadd.f32 %v5121_v48, %v5120_v18  ;;  %v20607_v48 = vld [vmem:[#allocation16_spill] sm:$0xff] }
 0x42b   : > { %v4954_v60 = vadd.f32 %v4953_v31, %v4952_v62  ;;  %v5123_v21 = vrot.slane %v5122_v17, 1  ;;  %v20608_v31 = vld [vmem:[#allocation18_spill] sm:$0xff] }
 0x42d   : > { %v17239_v3 = vmul.f32 0.00390625, %v4954_v60  ;;  %v5124_v37 = vadd.f32 %v5123_v21, %v5122_v17 }
 0x42f   : > { %v5125_v41 = vmul.f32 0.00390625, %v5124_v37  ;;  %v5166_v44 = vsub.f32 %v17220_v43, %v17239_v3  ;;  %v5167_v56 = vmul.f32 %v17239_v3, %v17239_v3  ;;  %v5126_v18 = vsub.f32 %v20605_v15, %v17239_v3  ;;  %v20609_v43 = vld [vmem:[#allocation20_spill] sm:$0xff] }
 0x430   : > { %v5127_v62 = vsub.f32 %v20606_v4, %v17239_v3  ;;  %v5128_v8 = vsub.f32 %v20607_v48, %v17239_v3  ;;  %v5129_v17 = vsub.f32 %v20608_v31, %v17239_v3  ;;  %v5130_v60 = vsub.f32 %v20609_v43, %v17239_v3 }
 0x431   : > { %v5168_v40 = vsub.f32 %v5125_v41, %v5167_v56  ;;  %v5131_v21 = vsub.f32 %v16702_v29, %v17239_v3  ;;  %v5132_v37 = vsub.f32 %v16714_v46, %v17239_v3  ;;  %v5133_v41 = vsub.f32 %v16728_v33, %v17239_v3 }
 0x432   : > { %v5134_v56 = vsub.f32 %v16745_v53, %v17239_v3  ;;  %v5135_v4 = vsub.f32 %v16760_v23, %v17239_v3  ;;  %v5136_v48 = vsub.f32 %v16776_v26, %v17239_v3  ;;  %v5137_v46 = vsub.f32 %v16789_v24, %v17239_v3 }
 0x433   : > { %v5169_v0 = vadd.f32 1e-05, %v5168_v40  ;;  %v5138_v33 = vsub.f32 %v16803_v35, %v17239_v3  ;;  %v5139_v53 = vsub.f32 %v16814_v32, %v17239_v3  ;;  %v5140_v23 = vsub.f32 %v16830_v16, %v17239_v3 }
 0x434   : > { %v5141_v26 = vsub.f32 %v16846_v61, %v17239_v3  ;;  %v5142_v31 = vsub.f32 %v16869_v47, %v17239_v3  ;;  %v5143_v43 = vsub.f32 %v16878_v57, %v17239_v3  ;;  %v5144_v24 = vsub.f32 %v16891_v1, %v17239_v3 }
 0x435   : > { %14260 = vrsqrt.f32 %v5169_v0  ;;  %v5145_v35 = vsub.f32 %v16910_v58, %v17239_v3  ;;  %v5146_v32 = vsub.f32 %v16930_v22, %v17239_v3  ;;  %v5147_v16 = vsub.f32 %v16943_v7, %v17239_v3 }
 0x436   : > { %v5148_v61 = vsub.f32 %v16957_v50, %v17239_v3  ;;  %v5149_v47 = vsub.f32 %v16970_v63, %v17239_v3  ;;  %v5150_v57 = vsub.f32 %v16985_v51, %v17239_v3  ;;  %v5151_v1 = vsub.f32 %v16997_v27, %v17239_v3 }
 0x437   : > { %v5152_v58 = vsub.f32 %v17012_v52, %v17239_v3  ;;  %v5153_v22 = vsub.f32 %v17030_v6, %v17239_v3  ;;  %v5154_v7 = vsub.f32 %v17045_v9, %v17239_v3  ;;  %v5155_v50 = vsub.f32 %v17067_v14, %v17239_v3 }
 0x438   : > { %v5156_v63 = vsub.f32 %v17085_v11, %v17239_v3 }
 0x43f   : > { %v14261_v29 = vpop.eup %14260 }
 0x440   : > { %v5211_v51 = vmul.f32 %v14261_v29, %v5166_v44  ;;  %v17326_v27 = vmul.f32 %v14261_v29, %v5126_v18  ;;  %v17328_v15 = vmul.f32 %v14261_v29, %v5127_v62  ;;  %v17330_v52 = vmul.f32 %v14261_v29, %v5128_v8 }
 0x441   : > { %v17332_v0 = vmul.f32 %v14261_v29, %v5129_v17  ;;  %v17334_v6 = vmul.f32 %v14261_v29, %v5130_v60  ;;  %v17336_v40 = vmul.f32 %v14261_v29, %v5131_v21  ;;  %v17338_v9 = vmul.f32 %v14261_v29, %v5132_v37 }
 0x442   : > { %v5252_v19 = vmax.f32 %v5211_v51, 0.0  ;;  %v17340_v14 = vmul.f32 %v14261_v29, %v5133_v41  ;;  %v17342_v34 = vmul.f32 %v14261_v29, %v5134_v56  ;;  %v17344_v11 = vmul.f32 %v14261_v29, %v5135_v4 }
 0x443   : > { %v17353_v44 = vmul.f32 %v14261_v29, %v5136_v48  ;;  %v17355_v18 = vmul.f32 %v14261_v29, %v5137_v46  ;;  %v17357_v62 = vmul.f32 %v14261_v29, %v5138_v33  ;;  %v17359_v8 = vmul.f32 %v14261_v29, %v5139_v53 }
 0x444   : > { %v5293_v17 = vmul.f32 %v5252_v19, %v17222_v36  ;;  %v17362_v60 = vmul.f32 %v14261_v29, %v5140_v23  ;;  %v17364_v21 = vmul.f32 %v14261_v29, %v5141_v26  ;;  %v17366_v37 = vmul.f32 %v14261_v29, %v5142_v31  ;;  %v20628_v36 = vld [vmem:[#allocation15_spill] sm:$0xff] }
 0x445   : > { %v17368_v41 = vmul.f32 %v14261_v29, %v5143_v43  ;;  %v17370_v56 = vmul.f32 %v14261_v29, %v5144_v24  ;;  %v17372_v4 = vmul.f32 %v14261_v29, %v5145_v35  ;;  %v17374_v46 = vmul.f32 %v14261_v29, %v5146_v32 }
 0x446   : > { %5334 = vst.msk [vmem:[%s17351_s14 + $0x140] sm:$0xf] %vm4946_vm4, %v5293_v17  ;;  %5422 = vst.msk [vmem:[#allocation2 + $0x153] sm:$0xf] %vm4946_vm4, %v5293_v17  ;;  %v17379_v33 = vmul.f32 %v14261_v29, %v5147_v16  ;;  %v17381_v19 = vmul.f32 %v14261_v29, %v5148_v61  ;;  %v17383_v53 = vmul.f32 %v14261_v29, %v5149_v47 }
 0x447   : > { %v17385_v48 = vmul.f32 %v14261_v29, %v5150_v57  ;;  %v17387_v31 = vmul.f32 %v14261_v29, %v5151_v1  ;;  %v17389_v43 = vmul.f32 %v14261_v29, %v5152_v58  ;;  %v17391_v23 = vmul.f32 %v14261_v29, %v5153_v22 }
 0x448   : > { %v17393_v26 = vmul.f32 %v14261_v29, %v5154_v7  ;;  %v17395_v24 = vmul.f32 %v14261_v29, %v5155_v50  ;;  %v17397_v35 = vmul.f32 %v14261_v29, %v5156_v63  ;;  %v20610_v32 = vsub.f32 %v17101_v30, %v17239_v3 }
 0x449   : > { %v20611_v61 = vsub.f32 %v17116_v5, %v17239_v3  ;;  %v20612_v57 = vsub.f32 %v17129_v10, %v17239_v3  ;;  %v20613_v58 = vsub.f32 %v17142_v2, %v17239_v3  ;;  %v20614_v30 = vsub.f32 %v17155_v25, %v17239_v3 }
 0x44a   : > { %v17402_v16 = vmul.f32 %v14261_v29, %v20610_v32  ;;  %v20615_v5 = vsub.f32 %v17168_v28, %v17239_v3  ;;  %v20616_v10 = vsub.f32 %v17181_v12, %v17239_v3  ;;  %v20617_v2 = vsub.f32 %v17194_v38, %v17239_v3 }
 0x44b   : > { %v17407_v47 = vmul.f32 %v14261_v29, %v20611_v61  ;;  %v17412_v1 = vmul.f32 %v14261_v29, %v20612_v57  ;;  %v17417_v22 = vmul.f32 %v14261_v29, %v20613_v58  ;;  %v17422_v7 = vmul.f32 %v14261_v29, %v20614_v30 }
 0x44c   : > { %v17427_v50 = vmul.f32 %v14261_v29, %v20615_v5  ;;  %v17432_v63 = vmul.f32 %v14261_v29, %v20616_v10  ;;  %v17437_v51 = vmul.f32 %v14261_v29, %v20617_v2  ;;  %v20619_v25 = vsub.f32 %v17207_v13, %v17239_v3  ;;  %v20623_v10 = vld [vmem:[#allocation7_spill] sm:$0xff]  ;;  %v20624_v2 = vld [vmem:[#allocation9_spill] sm:$0xff] }
 0x44d   : > { %v5212_v32 = vmax.f32 %v17326_v27, 0.0  ;;  %v5213_v28 = vmax.f32 %v17328_v15, 0.0  ;;  %v5214_v61 = vmax.f32 %v17330_v52, 0.0  ;;  %v5215_v12 = vmax.f32 %v17332_v0, 0.0 }
 0x44e   : > { %20618 = vst [vmem:[#allocation14_spill] sm:$0xff] %v17437_v51  ;;  %v17442_v17 = vmul.f32 %v14261_v29, %v20619_v25  ;;  %v5216_v57 = vmax.f32 %v17334_v6, 0.0  ;;  %v5217_v58 = vmax.f32 %v17336_v40, 0.0  ;;  %v5218_v38 = vmax.f32 %v17338_v9, 0.0 }
 0x44f   : > { %v5219_v30 = vmax.f32 %v17340_v14, 0.0  ;;  %v5220_v13 = vmax.f32 %v17342_v34, 0.0  ;;  %v5221_v3 = vmax.f32 %v17344_v11, 0.0  ;;  %v5222_v29 = vmax.f32 %v17353_v44, 0.0  ;;  %v20627_v44 = vld [vmem:[#allocation12_spill] sm:$0xff] }
 0x450   : > { %20620 = vst [vmem:[#allocation13_spill] sm:$0xff] %v17442_v17  ;;  %v5223_v15 = vmax.f32 %v17355_v18, 0.0  ;;  %v5224_v27 = vmax.f32 %v17357_v62, 0.0  ;;  %v5225_v0 = vmax.f32 %v17359_v8, 0.0  ;;  %v5226_v52 = vmax.f32 %v17362_v60, 0.0  ;;  %v20622_v60 = vld [vmem:[#allocation8_spill] sm:$0xff] }
 0x451   : > { %v5227_v40 = vmax.f32 %v17364_v21, 0.0  ;;  %v5228_v6 = vmax.f32 %v17366_v37, 0.0  ;;  %v5229_v9 = vmax.f32 %v17368_v41, 0.0  ;;  %v5230_v34 = vmax.f32 %v17370_v56, 0.0  ;;  %v20625_v62 = vld [vmem:[#allocation10_spill] sm:$0xff]  ;;  %v20626_v18 = vld [vmem:[#allocation11_spill] sm:$0xff] }
 0x452   : > { %v5231_v14 = vmax.f32 %v17372_v4, 0.0  ;;  %v5232_v11 = vmax.f32 %v17374_v46, 0.0  ;;  %v20621_v4 = vld [vmem:[#allocation6_spill] sm:$0xff]  ;;  %v5254_v5 = vmul.f32 %v5213_v28, %v20622_v60  ;;  %v5255_v8 = vmul.f32 %v5214_v61, %v20623_v10  ;;  %v20629_v17 = vld [vmem:[#allocation17_spill] sm:$0xff] }
 0x453   : > { %v5253_v46 = vmul.f32 %v5212_v32, %v20621_v4  ;;  %v5256_v25 = vmul.f32 %v5215_v12, %v20624_v2  ;;  %v5257_v21 = vmul.f32 %v5216_v57, %v20625_v62  ;;  %v5258_v37 = vmul.f32 %v5217_v58, %v20626_v18  ;;  %v20630_v32 = vld [vmem:[#allocation19_spill] sm:$0xff]  ;;  %v20631_v61 = vld [vmem:[#allocation21_spill] sm:$0xff]  ;;  %v20632_v12 = vld [vmem:[#allocation22_spill] sm:$0xff] }
 0x454   : > { %v5259_v41 = vmul.f32 %v5218_v38, %v20627_v44  ;;  %v5260_v56 = vmul.f32 %v5219_v30, %v20628_v36  ;;  %v5261_v51 = vmul.f32 %v5220_v13, %v20629_v17  ;;  %v5262_v28 = vmul.f32 %v5221_v3, %v20630_v32  ;;  %v20633_v62 = vld [vmem:[#allocation23_spill] sm:$0xff]  ;;  %5295 = vst.msk [vmem:[%s17351_s14 + $0x8] sm:$0xff] %vm4866_vm3, %v5254_v5  ;;  %v20634_v38 = vld [vmem:[#allocation24_spill] sm:$0xff]  ;;  %v20635_v13 = vld [vmem:[#allocation25_spill] sm:$0xff] }
 0x455   : > { %5294 = vst.msk [vmem:[%s17351_s14] sm:$0xff] %vm4866_vm3, %v5253_v46  ;;  %5382 = vst.msk [vmem:[#allocation2 + $0x13] sm:$0xff] %vm4866_vm3, %v5253_v46  ;;  %v5263_v10 = vmul.f32 %v5222_v29, %v20631_v61  ;;  %v5264_v57 = vmul.f32 %v5223_v15, %v20632_v12  ;;  %v5265_v58 = vmul.f32 %v5224_v27, %v20633_v62  ;;  %v20636_v29 = vld [vmem:[#allocation26_spill] sm:$0xff]  ;;  %v20637_v27 = vld [vmem:[#allocation27_spill] sm:$0xff] }
 0x456   : > { %5296 = vst.msk [vmem:[%s17351_s14 + $0x10] sm:$0xff] %vm4866_vm3, %v5255_v8  ;;  %5297 = vst.msk [vmem:[%s17351_s14 + $0x18] sm:$0xff] %vm4866_vm3, %v5256_v25  ;;  %v5266_v30 = vmul.f32 %v5225_v0, %v20634_v38  ;;  %v5267_v3 = vmul.f32 %v5226_v52, %v20635_v13  ;;  %v5268_v15 = vmul.f32 %v5227_v40, %v20636_v29  ;;  %v20638_v0 = vld [vmem:[#allocation28_spill] sm:$0xff] }
 0x457   : > { %5298 = vst.msk [vmem:[%s17351_s14 + $0x20] sm:$0xff] %vm4866_vm3, %v5257_v21  ;;  %5383 = vst.msk [vmem:[#allocation2 + $0x1b] sm:$0xff] %vm4866_vm3, %v5254_v5  ;;  %v5269_v46 = vmul.f32 %v5228_v6, %v20637_v27  ;;  %v5270_v52 = vmul.f32 %v5229_v9, %v20638_v0  ;;  %v5271_v40 = vmul.f32 %v5230_v34, %v16860_v55  ;;  %v20639_v6 = vld [vmem:[#allocation30_spill] sm:$0xff]  ;;  %v20642_v34 = vld [vmem:[#allocation33_spill] sm:$0xff] }
 0x458   : > { %5384 = vst.msk [vmem:[#allocation2 + $0x23] sm:$0xff] %vm4866_vm3, %v5255_v8  ;;  %5385 = vst.msk [vmem:[#allocation2 + $0x2b] sm:$0xff] %vm4866_vm3, %v5256_v25  ;;  %v5272_v8 = vmul.f32 %v5231_v14, %v20639_v6  ;;  %v20643_v14 = vmax.f32 %v17381_v19, 0.0  ;;  %v20648_v19 = vmax.f32 %v17387_v31, 0.0  ;;  %v20655_v31 = vld [vmem:[#allocation40_spill] sm:$0xff] }
 0x459   : > { %5386 = vst.msk [vmem:[#allocation2 + $0x33] sm:$0xff] %vm4866_vm3, %v5257_v21  ;;  %5299 = vst.msk [vmem:[%s17351_s14 + $0x28] sm:$0xff] %vm4866_vm3, %v5258_v37  ;;  %v20640_v21 = vld [vmem:[#allocation31_spill] sm:$0xff] }
 0x45a   : > { %5300 = vst.msk [vmem:[%s17351_s14 + $0x30] sm:$0xff] %vm4866_vm3, %v5259_v41  ;;  %5301 = vst.msk [vmem:[%s17351_s14 + $0x38] sm:$0xff] %vm4866_vm3, %v5260_v56  ;;  %v5273_v5 = vmul.f32 %v5232_v11, %v20640_v21  ;;  %v5275_v11 = vmul.f32 %v20643_v14, %v20642_v34  ;;  %v20653_v14 = vld [vmem:[#allocation39_spill] sm:$0xff] }
 0x45b   : > { %5302 = vst.msk [vmem:[%s17351_s14 + $0x40] sm:$0xff] %vm4866_vm3, %v5261_v51  ;;  %5387 = vst.msk [vmem:[#allocation2 + $0x3b] sm:$0xff] %vm4866_vm3, %v5258_v37  ;;  %v20644_v37 = vld [vmem:[#allocation34_spill] sm:$0xff] }
 0x45c   : > { %5388 = vst.msk [vmem:[#allocation2 + $0x43] sm:$0xff] %vm4866_vm3, %v5259_v41  ;;  %5389 = vst.msk [vmem:[#allocation2 + $0x4b] sm:$0xff] %vm4866_vm3, %v5260_v56  ;;  %v20645_v41 = vmax.f32 %v17383_v53, 0.0 }
 0x45d   : > { %5390 = vst.msk [vmem:[#allocation2 + $0x53] sm:$0xff] %vm4866_vm3, %v5261_v51  ;;  %5303 = vst.msk [vmem:[%s17351_s14 + $0x48] sm:$0xff] %vm4866_vm3, %v5262_v28  ;;  %v20641_v51 = vmax.f32 %v17379_v33, 0.0  ;;  %v20647_v33 = vld [vmem:[#allocation36_spill] sm:$0xff] }
 0x45e   : > { %5304 = vst.msk [vmem:[%s17351_s14 + $0x50] sm:$0xff] %vm4866_vm3, %v5263_v10  ;;  %5305 = vst.msk [vmem:[%s17351_s14 + $0x58] sm:$0xff] %vm4866_vm3, %v5264_v57  ;;  %v5276_v56 = vmul.f32 %v20645_v41, %v20644_v37  ;;  %v5278_v53 = vmul.f32 %v20648_v19, %v20647_v33  ;;  %v20658_v41 = vmax.f32 %v17402_v16, 0.0  ;;  %v20661_v16 = vmax.f32 %v17417_v22, 0.0  ;;  %v5425_v22 = vld [vmem:[#allocation2 + $0x10] sm:$0xff] }
 0x45f   : > { %5306 = vst.msk [vmem:[%s17351_s14 + $0x60] sm:$0xff] %vm4866_vm3, %v5265_v58  ;;  %5391 = vst.msk [vmem:[#allocation2 + $0x5b] sm:$0xff] %vm4866_vm3, %v5262_v28  ;;  %v5274_v9 = vmul.f32 %v20641_v51, %v16919_v42  ;;  %v20650_v28 = vmax.f32 %v17389_v43, 0.0  ;;  %v20652_v51 = vmax.f32 %v17391_v23, 0.0  ;;  %v20656_v43 = vmax.f32 %v17395_v24, 0.0  ;;  %13157 = vmatmul.mubr.msk.f32.gmra.mrb[158].mxu0 %vm4866_vm3, %v5425_v22  ;;  %v7740_v34 = vld [vmem:[#allocation2 + $0x14] sm:$0xff] }
 0x460   : > { %5392 = vst.msk [vmem:[#allocation2 + $0x63] sm:$0xff] %vm4866_vm3, %v5263_v10  ;;  %5393 = vst.msk [vmem:[#allocation2 + $0x6b] sm:$0xff] %vm4866_vm3, %v5264_v57  ;;  %v20646_v10 = vmax.f32 %v17385_v48, 0.0  ;;  %v20649_v48 = vld [vmem:[#allocation37_spill] sm:$0xff]  ;;  %v20660_v24 = vmax.f32 %v17412_v1, 0.0  ;;  %v5470_v1 = vld [vmem:[#allocation2 + $0x11] sm:$0xff] }
 0x461   : > { %5394 = vst.msk [vmem:[#allocation2 + $0x73] sm:$0xff] %vm4866_vm3, %v5265_v58  ;;  %5307 = vst.msk [vmem:[%s17351_s14 + $0x68] sm:$0xff] %vm4866_vm3, %v5266_v30  ;;  %v5279_v57 = vmul.f32 %v20650_v28, %v20649_v48  ;;  %v20651_v58 = vld [vmem:[#allocation38_spill] sm:$0xff]  ;;  %v5282_v23 = vmul.f32 %v20656_v43, %v20655_v31  ;;  %v20668_v28 = vld [vmem:[#allocation3_spill] sm:$0xff]  ;;  %13026 = vmatmul.mubr.msk.f32.gmra.mrb[76].mxu1 %vm4866_vm3, %v5470_v1 }
 0x462   : > { %v5277_v25 = vmul.f32 %v20646_v10, %v16982_v54  ;;  %5308 = vst.msk [vmem:[%s17351_s14 + $0x70] sm:$0xff] %vm4866_vm3, %v5267_v3  ;;  %5309 = vst.msk [vmem:[%s17351_s14 + $0x78] sm:$0xff] %vm4866_vm3, %v5268_v15  ;;  %v20663_v10 = vmax.f32 %v17422_v7, 0.0  ;;  %v20666_v7 = vld [vmem:[#allocation48_spill] sm:$0xff] }
 0x463   : > { %5310 = vst.msk [vmem:[%s17351_s14 + $0x80] sm:$0xff] %vm4866_vm3, %v5269_v46  ;;  %5395 = vst.msk [vmem:[#allocation2 + $0x7b] sm:$0xff] %vm4866_vm3, %v5266_v30  ;;  %v5280_v30 = vmul.f32 %v20652_v51, %v20651_v58  ;;  %v20669_v51 = vld [vmem:[#allocation14_spill] sm:$0xff]  ;;  %v20671_v43 = vld [vmem:[#allocation4_spill] sm:$0xff] }
 0x464   : > { %5396 = vst.msk [vmem:[#allocation2 + $0x83] sm:$0xff] %vm4866_vm3, %v5267_v3  ;;  %5397 = vst.msk [vmem:[#allocation2 + $0x8b] sm:$0xff] %vm4866_vm3, %v5268_v15  ;;  %v20654_v3 = vmax.f32 %v17393_v26, 0.0  ;;  %v20657_v26 = vmax.f32 %v17397_v35, 0.0  ;;  %v5286_v35 = vmul.f32 %v20660_v24, %v17131_v59  ;;  %v5429_v24 = vld [vmem:[#allocation2 + $0x30] sm:$0xff]  ;;  %v5432_v22 = vld [vmem:[#allocation2 + $0x48] sm:$0xff] }
 0x465   : > { %5398 = vst.msk [vmem:[#allocation2 + $0x93] sm:$0xff] %vm4866_vm3, %v5269_v46  ;;  %5311 = vst.msk [vmem:[%s17351_s14 + $0x88] sm:$0xff] %vm4866_vm3, %v5270_v52  ;;  %v7264_v42 = vld [vmem:[#allocation2 + $0x33] sm:$0xff]  ;;  %v7265_v6 = vld [vmem:[#allocation2 + $0x3b] sm:$0xff] }
 0x466   : > { %v5281_v15 = vmul.f32 %v20654_v3, %v20653_v14  ;;  %5312 = vst.msk [vmem:[%s17351_s14 + $0x90] sm:$0xff] %vm4866_vm3, %v5271_v40  ;;  %5313 = vst.msk [vmem:[%s17351_s14 + $0x98] sm:$0xff] %vm4866_vm3, %v5272_v8  ;;  %v5283_v46 = vmul.f32 %v20657_v26, %v17087_v45  ;;  %v20670_v3 = vmax.f32 %v20669_v51, 0.0  ;;  %v18314_v21 = vld [vmem:[#allocation2 + $0x34] sm:$0xff]  ;;  %v18325_v55 = vld [vmem:[#allocation2 + $0x3c] sm:$0xff] }
 0x467   : > { %5314 = vst.msk [vmem:[%s17351_s14 + $0xa0] sm:$0xff] %vm4866_vm3, %v5273_v5  ;;  %5399 = vst.msk [vmem:[#allocation2 + $0x9b] sm:$0xff] %vm4866_vm3, %v5270_v52  ;;  %v5284_v52 = vmul.f32 %v20658_v41, %v17103_v39  ;;  %v5427_v41 = vld [vmem:[#allocation2 + $0x20] sm:$0xff]  ;;  %v7267_v29 = vld [vmem:[#allocation2 + $0x4b] sm:$0xff] }
 0x468   : > { %5400 = vst.msk [vmem:[#allocation2 + $0xa3] sm:$0xff] %vm4866_vm3, %v5271_v40  ;;  %5401 = vst.msk [vmem:[#allocation2 + $0xab] sm:$0xff] %vm4866_vm3, %v5272_v8  ;;  %v20659_v40 = vmax.f32 %v17407_v47, 0.0  ;;  %v5287_v47 = vmul.f32 %v20661_v16, %v17144_v20  ;;  %v5430_v16 = vld [vmem:[#allocation2 + $0x38] sm:$0xff]  ;;  %v7266_v0 = vld [vmem:[#allocation2 + $0x43] sm:$0xff] }
 0x469   : > { %5402 = vst.msk [vmem:[#allocation2 + $0xb3] sm:$0xff] %vm4866_vm3, %v5273_v5  ;;  %5315 = vst.msk [vmem:[%s17351_s14 + $0xa8] sm:$0xff] %vm4866_vm3, %v5274_v9  ;;  %v20662_v5 = vld [vmem:[#allocation46_spill] sm:$0xff]  ;;  %v7272_v18 = vld [vmem:[#allocation2 + $0x73] sm:$0xff] }
 0x46a   : > { %v5285_v8 = vmul.f32 %v20659_v40, %v17118_v49  ;;  %5316 = vst.msk [vmem:[%s17351_s14 + $0xb0] sm:$0xff] %vm4866_vm3, %v5275_v11  ;;  %5317 = vst.msk [vmem:[%s17351_s14 + $0xb8] sm:$0xff] %vm4866_vm3, %v5276_v56  ;;  %v5288_v19 = vmul.f32 %v20663_v10, %v20662_v5  ;;  %v5428_v40 = vld [vmem:[#allocation2 + $0x28] sm:$0xff]  ;;  %v5431_v10 = vld [vmem:[#allocation2 + $0x40] sm:$0xff] }
 0x46b   : > { %5318 = vst.msk [vmem:[%s17351_s14 + $0xc0] sm:$0xff] %vm4866_vm3, %v5277_v25  ;;  %5403 = vst.msk [vmem:[#allocation2 + $0xbb] sm:$0xff] %vm4866_vm3, %v5274_v9  ;;  %v20664_v9 = vld [vmem:[#allocation47_spill] sm:$0xff]  ;;  %v18336_v27 = vld [vmem:[#allocation2 + $0x44] sm:$0xff] }
 0x46c   : > { %5404 = vst.msk [vmem:[#allocation2 + $0xc3] sm:$0xff] %vm4866_vm3, %v5275_v11  ;;  %5405 = vst.msk [vmem:[#allocation2 + $0xcb] sm:$0xff] %vm4866_vm3, %v5276_v56  ;;  %v20665_v11 = vmax.f32 %v17427_v50, 0.0  ;;  %v20667_v50 = vmax.f32 %v17432_v63, 0.0  ;;  %v20674_v63 = vmov 0.0   ;;  %v18347_v13 = vld [vmem:[#allocation2 + $0x4c] sm:$0xff] }
 0x46d   : > { %5406 = vst.msk [vmem:[#allocation2 + $0xd3] sm:$0xff] %vm4866_vm3, %v5277_v25  ;;  %5319 = vst.msk [vmem:[%s17351_s14 + $0xc8] sm:$0xff] %vm4866_vm3, %v5278_v53  ;;  %13028 = vmatprep.mubr.msk.f32.mxu1 %vm14273_vm1, %v20674_v63  ;;  %13159 = vmatprep.mubr.msk.f32.mxu0 %vm14273_vm1, %v20674_v63  ;;  %v7270_v44 = vld [vmem:[#allocation2 + $0x63] sm:$0xff]  ;;  %v18415_v2 = vld [vmem:[#allocation2 + $0x74] sm:$0xff] }
 0x46e   : > { %v5289_v56 = vmul.f32 %v20665_v11, %v20664_v9  ;;  %5320 = vst.msk [vmem:[%s17351_s14 + $0xd0] sm:$0xff] %vm4866_vm3, %v5279_v57  ;;  %5321 = vst.msk [vmem:[%s17351_s14 + $0xd8] sm:$0xff] %vm4866_vm3, %v5280_v30  ;;  %v5290_v25 = vmul.f32 %v20667_v50, %v20666_v7  ;;  %v10831_v11 = vld [vmem:[%s20358_s4 + $0x68] sm:$0xff]  ;;  %v10832_v50 = vld [vmem:[%s20358_s4 + $0x70] sm:$0xff] }
 0x46f   : > { %5322 = vst.msk [vmem:[%s17351_s14 + $0xe0] sm:$0xff] %vm4866_vm3, %v5281_v15  ;;  %5407 = vst.msk [vmem:[#allocation2 + $0xdb] sm:$0xff] %vm4866_vm3, %v5278_v53  ;;  %v5291_v53 = vmul.f32 %v20670_v3, %v20668_v28  ;;  %v5478_v3 = vld [vmem:[#allocation2 + $0x51] sm:$0xff]  ;;  %v7273_v60 = vld [vmem:[#allocation2 + $0x7b] sm:$0xff] }
 0x470   : > { %5408 = vst.msk [vmem:[#allocation2 + $0xe3] sm:$0xff] %vm4866_vm3, %v5279_v57  ;;  %5409 = vst.msk [vmem:[#allocation2 + $0xeb] sm:$0xff] %vm4866_vm3, %v5280_v30  ;;  %v20672_v57 = vld [vmem:[#allocation13_spill] sm:$0xff] }
 0x471   : > { %5410 = vst.msk [vmem:[#allocation2 + $0xf3] sm:$0xff] %vm4866_vm3, %v5281_v15  ;;  %v20673_v26 = vmax.f32 %v20672_v57, 0.0  ;;  %5323 = vst.msk [vmem:[%s17351_s14 + $0xe8] sm:$0xff] %vm4866_vm3, %v5282_v23  ;;  %v5471_v15 = vld [vmem:[#allocation2 + $0x19] sm:$0xff]  ;;  %v20675_v57 = vmov 0.0|0.0  }
 0x472   : > { %5324 = vst.msk [vmem:[%s17351_s14 + $0xf0] sm:$0xff] %vm4866_vm3, %v5283_v46  ;;  %5325 = vst.msk [vmem:[%s17351_s14 + $0xf8] sm:$0xff] %vm4866_vm3, %v5284_v52  ;;  %13029 = vmatmul.mubr.msk.f32.gmra.mrb[78].mxu1 %vm4866_vm3, %v5471_v15  ;;  %v5480_v15 = vld [vmem:[#allocation2 + $0x61] sm:$0xff] }
 0x473   : > { %v5292_v30 = vmul.f32 %v20673_v26, %v20671_v43  ;;  %5326 = vst.msk [vmem:[%s17351_s14 + $0x100] sm:$0xff] %vm4866_vm3, %v5285_v8  ;;  %5411 = vst.msk [vmem:[#allocation2 + $0xfb] sm:$0xff] %vm4866_vm3, %v5282_v23  ;;  %v5426_v23 = vld [vmem:[#allocation2 + $0x18] sm:$0xff]  ;;  %13031 = vmatprep.mubr.msk.f32.mxu1 %vm14273_vm1, %v20674_v63 }
 0x474   : > { %5412 = vst.msk [vmem:[#allocation2 + $0x103] sm:$0xff] %vm4866_vm3, %v5283_v46  ;;  %5413 = vst.msk [vmem:[#allocation2 + $0x10b] sm:$0xff] %vm4866_vm3, %v5284_v52  ;;  %13160 = vmatmul.mubr.msk.f32.gmra.mrb[160].mxu0 %vm4866_vm3, %v5426_v23  ;;  %v5472_v46 = vld [vmem:[#allocation2 + $0x21] sm:$0xff]  ;;  %v5473_v52 = vld [vmem:[#allocation2 + $0x29] sm:$0xff] }
 0x475   : > { %5414 = vst.msk [vmem:[#allocation2 + $0x113] sm:$0xff] %vm4866_vm3, %v5285_v8  ;;  %5327 = vst.msk [vmem:[%s17351_s14 + $0x108] sm:$0xff] %vm4866_vm3, %v5286_v35  ;;  %13162 = vmatprep.mubr.msk.f32.mxu0 %vm14273_vm1, %v20674_v63  ;;  %v5474_v8 = vld [vmem:[#allocation2 + $0x31] sm:$0xff]  ;;  %v5479_v26 = vld [vmem:[#allocation2 + $0x59] sm:$0xff] }
 0x476   : > { %5328 = vst.msk [vmem:[%s17351_s14 + $0x110] sm:$0xff] %vm4866_vm3, %v5287_v47  ;;  %5329 = vst.msk [vmem:[%s17351_s14 + $0x118] sm:$0xff] %vm4866_vm3, %v5288_v19  ;;  %13032 = vmatmul.mubr.msk.f32.gmra.mrb[80].mxu1 %vm4866_vm3, %v5472_v46  ;;  %v5435_v23 = vld [vmem:[#allocation2 + $0x60] sm:$0xff]  ;;  %v5481_v46 = vld [vmem:[#allocation2 + $0x69] sm:$0xff] }
 0x477   : > { %5330 = vst.msk [vmem:[%s17351_s14 + $0x120] sm:$0xff] %vm4866_vm3, %v5289_v56  ;;  %5415 = vst.msk [vmem:[#allocation2 + $0x11b] sm:$0xff] %vm4866_vm3, %v5286_v35  ;;  %13034 = vmatprep.mubr.msk.f32.mxu1 %vm14273_vm1, %v20674_v63  ;;  %v5475_v35 = vld [vmem:[#allocation2 + $0x39] sm:$0xff] }
 0x478   : > { %5416 = vst.msk [vmem:[#allocation2 + $0x123] sm:$0xff] %vm4866_vm3, %v5287_v47  ;;  %5417 = vst.msk [vmem:[#allocation2 + $0x12b] sm:$0xff] %vm4866_vm3, %v5288_v19  ;;  %13163 = vmatmul.mubr.msk.f32.gmra.mrb[162].mxu0 %vm4866_vm3, %v5427_v41  ;;  %v5476_v47 = vld [vmem:[#allocation2 + $0x41] sm:$0xff] }
 0x479   : > { %5418 = vst.msk [vmem:[#allocation2 + $0x133] sm:$0xff] %vm4866_vm3, %v5289_v56  ;;  %5331 = vst.msk [vmem:[%s17351_s14 + $0x128] sm:$0xff] %vm4866_vm3, %v5290_v25  ;;  %13165 = vmatprep.mubr.msk.f32.mxu0 %vm14273_vm1, %v20674_v63  ;;  %v10830_v19 = vld [vmem:[%s20358_s4 + $0x60] sm:$0xff]  ;;  %v5477_v56 = vld [vmem:[#allocation2 + $0x49] sm:$0xff] }
 0x47a   : > { %5332 = vst.msk [vmem:[%s17351_s14 + $0x130] sm:$0xff] %vm4866_vm3, %v5291_v53  ;;  %5333 = vst.msk [vmem:[%s17351_s14 + $0x138] sm:$0xff] %vm4866_vm3, %v5292_v30  ;;  %13035 = vmatmul.mubr.msk.f32.gmra.mrb[82].mxu1 %vm4866_vm3, %v5473_v52  ;;  %v14209_v1 = vpack.c.bf16 %v10831_v11, %v10830_v19  ;;  %v5436_v41 = vld [vmem:[#allocation2 + $0x68] sm:$0xff]  ;;  %v5482_v52 = vld [vmem:[#allocation2 + $0x71] sm:$0xff] }
 0x47b   : > { %5419 = vst.msk [vmem:[#allocation2 + $0x13b] sm:$0xff] %vm4866_vm3, %v5290_v25  ;;  %5420 = vst.msk [vmem:[#allocation2 + $0x143] sm:$0xff] %vm4866_vm3, %v5291_v53  ;;  %13037 = vmatprep.mubr.msk.f32.mxu1 %vm14273_vm1, %v20674_v63  ;;  %v10833_v25 = vld [vmem:[%s20358_s4 + $0x78] sm:$0xff]  ;;  %v5433_v53 = vld [vmem:[#allocation2 + $0x50] sm:$0xff] }
 0x47c   : > { %5421 = vst.msk [vmem:[#allocation2 + $0x14b] sm:$0xff] %vm4866_vm3, %v5292_v30  ;;  %13166 = vmatmul.mubr.msk.f32.gmra.mrb[164].mxu0 %vm4866_vm3, %v5428_v40  ;;  %v14212_v51 = vpack.c.bf16 %v10833_v25, %v10832_v50  ;;  %v5434_v30 = vld [vmem:[#allocation2 + $0x58] sm:$0xff]  ;;  %v5437_v40 = vld [vmem:[#allocation2 + $0x70] sm:$0xff]  ;;  %v5443_v50 = vld [vmem:[#allocation2 + $0xa0] sm:$0xff] }
 0x47d   : > { %13168 = vmatprep.mubr.msk.f32.mxu0 %vm14273_vm1, %v20674_v63  ;;  %14210 = vmatpush3.bf16.msra.mxu0 %v14209_v1  ;;  %v5486_v19 = vld [vmem:[#allocation2 + $0x91] sm:$0xff]  ;;  %v5489_v25 = vld [vmem:[#allocation2 + $0xa9] sm:$0xff]  ;;  %5381 = vst.msk [vmem:[#allocation2 + $0x168] sm:$0x3] %vm5380_vm5, %v20674_v63 }
 0x47e   : > { %13038 = vmatmul.mubr.msk.f32.gmra.mrb[84].mxu1 %vm4866_vm3, %v5474_v8  ;;  %14211 = vmatprep.subr.bf16.mxu0 %v20675_v57  ;;  %v5483_v8 = vld [vmem:[#allocation2 + $0x79] sm:$0xff]  ;;  %v5441_v11 = vld [vmem:[#allocation2 + $0x90] sm:$0xff] }
 0x47f   : > { %13040 = vmatprep.mubr.msk.f32.mxu1 %vm14273_vm1, %v20674_v63  ;;  %v5442_v1 = vld [vmem:[#allocation2 + $0x98] sm:$0xff] }
 0x480   : > { %13169 = vmatmul.mubr.msk.f32.gmra.mrb[166].mxu0 %vm4866_vm3, %v5429_v24  ;;  %v5438_v24 = vld [vmem:[#allocation2 + $0x78] sm:$0xff] }
 0x481   : > { %13171 = vmatprep.mubr.msk.f32.mxu0 %vm14273_vm1, %v20674_v63  ;;  %14213 = vmatpush3.bf16.msra.mxu0 %v14212_v51  ;;  %v5444_v51 = vld [vmem:[#allocation2 + $0xa8] sm:$0xff] }
 0x482   : > { %13041 = vmatmul.mubr.msk.f32.gmra.mrb[86].mxu1 %vm4866_vm3, %v5475_v35  ;;  %14220 = vmatprep.subr.bf16.mxu0 %v20675_v57  ;;  %v5484_v35 = vld [vmem:[#allocation2 + $0x81] sm:$0xff] }
 0x483   : > { %13043 = vmatprep.mubr.msk.f32.mxu1 %vm14273_vm1, %v20674_v63 }
 0x484   : > { %13172 = vmatmul.mubr.msk.f32.gmra.mrb[168].mxu0 %vm4866_vm3, %v5430_v16  ;;  %v5439_v16 = vld [vmem:[#allocation2 + $0x80] sm:$0xff] }
 0x485   : > { %13174 = vmatprep.mubr.msk.f32.mxu0 %vm14273_vm1, %v20674_v63 }
 0x486   : > { %13044 = vmatmul.mubr.msk.f32.gmra.mrb[88].mxu1 %vm4866_vm3, %v5476_v47  ;;  %v5485_v47 = vld [vmem:[#allocation2 + $0x89] sm:$0xff] }
 0x487   : > { %13046 = vmatprep.mubr.msk.f32.mxu1 %vm14273_vm1, %v20674_v63 }
 0x488   : > { %13175 = vmatmul.mubr.msk.f32.gmra.mrb[170].mxu0 %vm4866_vm3, %v5431_v10  ;;  %v5440_v10 = vld [vmem:[#allocation2 + $0x88] sm:$0xff] }
 0x489   : > { %13177 = vmatprep.mubr.msk.f32.mxu0 %vm14273_vm1, %v20674_v63 }
 0x48a   : > { %13047 = vmatmul.mubr.msk.f32.gmra.mrb[90].mxu1 %vm4866_vm3, %v5477_v56  ;;  %v5487_v56 = vld [vmem:[#allocation2 + $0x99] sm:$0xff] }
 0x48b   : > { %13049 = vmatprep.mubr.msk.f32.mxu1 %vm14273_vm1, %v20674_v63 }
 0x48c   : > { %13178 = vmatmul.mubr.msk.f32.gmra.mrb[172].mxu0 %vm4866_vm3, %v5432_v22  ;;  %v5488_v22 = vld [vmem:[#allocation2 + $0xa1] sm:$0xff] }
 0x48d   : > { %13180 = vmatprep.mubr.msk.f32.mxu0 %vm14273_vm1, %v20674_v63 }
 0x48e   : > { %13050 = vmatmul.mubr.msk.f32.gmra.mrb[92].mxu1 %vm4866_vm3, %v5478_v3  ;;  %v5490_v3 = vld [vmem:[#allocation2 + $0xb1] sm:$0xff] }
 0x48f   : > { %13052 = vmatprep.mubr.msk.f32.mxu1 %vm14273_vm1, %v20674_v63 }
 0x490   : > { %13181 = vmatmul.mubr.msk.f32.gmra.mrb[174].mxu0 %vm4866_vm3, %v5433_v53  ;;  %v5445_v53 = vld [vmem:[#allocation2 + $0xb0] sm:$0xff] }
 0x491   : > { %13183 = vmatprep.mubr.msk.f32.mxu0 %vm14273_vm1, %v20674_v63 }
 0x492   : > { %13053 = vmatmul.mubr.msk.f32.gmra.mrb[94].mxu1 %vm4866_vm3, %v5479_v26  ;;  %v5491_v26 = vld [vmem:[#allocation2 + $0xb9] sm:$0xff] }
 0x493   : > { %13055 = vmatprep.mubr.msk.f32.mxu1 %vm14273_vm1, %v20674_v63 }
 0x494   : > { %13184 = vmatmul.mubr.msk.f32.gmra.mrb[176].mxu0 %vm4866_vm3, %v5434_v30  ;;  %v5446_v30 = vld [vmem:[#allocation2 + $0xb8] sm:$0xff] }
 0x495   : > { %13186 = vmatprep.mubr.msk.f32.mxu0 %vm14273_vm1, %v20674_v63 }
 0x496   : > { %13056 = vmatmul.mubr.msk.f32.gmra.mrb[96].mxu1 %vm4866_vm3, %v5480_v15 }
 0x497   : > { %13058 = vmatprep.mubr.msk.f32.mxu1 %vm14273_vm1, %v20674_v63 }
 0x498   : > { %13187 = vmatmul.mubr.msk.f32.gmra.mrb[178].mxu0 %vm4866_vm3, %v5435_v23 }
 0x499   : > { %13189 = vmatprep.mubr.msk.f32.mxu0 %vm14273_vm1, %v20674_v63 }
 0x49a   : > { %13059 = vmatmul.mubr.msk.f32.gmra.mrb[98].mxu1 %vm4866_vm3, %v5481_v46 }
 0x49b   : > { %13061 = vmatprep.mubr.msk.f32.mxu1 %vm14273_vm1, %v20674_v63 }
 0x49c   : > { %13190 = vmatmul.mubr.msk.f32.gmra.mrb[180].mxu0 %vm4866_vm3, %v5436_v41 }
 0x49d   : > { %13192 = vmatprep.mubr.msk.f32.mxu0 %vm14273_vm1, %v20674_v63 }
 0x49e   : > { %13062 = vmatmul.mubr.msk.f32.gmra.mrb[100].mxu1 %vm4866_vm3, %v5482_v52 }
 0x49f   : > { %13064 = vmatprep.mubr.msk.f32.mxu1 %vm14273_vm1, %v20674_v63 }
 0x4a0   : > { %13193 = vmatmul.mubr.msk.f32.gmra.mrb[182].mxu0 %vm4866_vm3, %v5437_v40  ;;  %v5492_v40 = vld [vmem:[#allocation2 + $0xc1] sm:$0xff] }
 0x4a1   : > { %13195 = vmatprep.mubr.msk.f32.mxu0 %vm14273_vm1, %v20674_v63 }
 0x4a2   : > { %13065 = vmatmul.mubr.msk.f32.gmra.mrb[102].mxu1 %vm4866_vm3, %v5483_v8  ;;  %v5447_v8 = vld [vmem:[#allocation2 + $0xc0] sm:$0xff] }
 0x4a3   : > { %13067 = vmatprep.mubr.msk.f32.mxu1 %vm14273_vm1, %v20674_v63 }
 0x4a4   : > { %13196 = vmatmul.mubr.msk.f32.gmra.mrb[184].mxu0 %vm4866_vm3, %v5438_v24 }
 0x4a5   : > { %13198 = vmatprep.mubr.msk.f32.mxu0 %vm14273_vm1, %v20674_v63 }
 0x4a6   : > { %13068 = vmatmul.mubr.msk.f32.gmra.mrb[104].mxu1 %vm4866_vm3, %v5484_v35 }
 0x4a7   : > { %13070 = vmatprep.mubr.msk.f32.mxu1 %vm14273_vm1, %v20674_v63 }
 0x4a8   : > { %13199 = vmatmul.mubr.msk.f32.gmra.mrb[186].mxu0 %vm4866_vm3, %v5439_v16 }
 0x4a9   : > { %13201 = vmatprep.mubr.msk.f32.mxu0 %vm14273_vm1, %v20674_v63 }
 0x4aa   : > { %13071 = vmatmul.mubr.msk.f32.gmra.mrb[106].mxu1 %vm4866_vm3, %v5485_v47 }
 0x4ab   : > { %13073 = vmatprep.mubr.msk.f32.mxu1 %vm14273_vm1, %v20674_v63 }
 0x4ac   : > { %13202 = vmatmul.mubr.msk.f32.gmra.mrb[188].mxu0 %vm4866_vm3, %v5440_v10  ;;  %v5703_v15 = vpop.f32.mrb[72].mxu1 }
 0x4ad   : > { %13204 = vmatprep.mubr.msk.f32.mxu0 %vm14273_vm1, %v20674_v63  ;;  %v13021_v23 = vpop.f32.mrb[73].mxu1 }
 0x4ae   : > { %13074 = vmatmul.mubr.msk.f32.gmra.mrb[108].mxu1 %vm4866_vm3, %v5486_v19  ;;  %v5493_v19 = vld [vmem:[#allocation2 + $0xc9] sm:$0xff]  ;;  %v5454_v23 = vld [vmem:[#allocation2 + $0xf8] sm:$0xff] }
 0x4af   : > { %13076 = vmatprep.mubr.msk.f32.mxu1 %vm14273_vm1, %v20674_v63 }
 0x4b0   : > { %13205 = vmatmul.mubr.msk.f32.gmra.mrb[190].mxu0 %vm4866_vm3, %v5441_v11  ;;  %v6096_v46 = vpop.f32.mrb[154].mxu0  ;;  %v5448_v11 = vld [vmem:[#allocation2 + $0xc8] sm:$0xff] }
 0x4b1   : > { %13207 = vmatprep.mubr.msk.f32.mxu0 %vm14273_vm1, %v20674_v63  ;;  %v17828_v41 = vadd.f32 %v6096_v46, %v5703_v15  ;;  %v13152_v52 = vpop.f32.mrb[155].mxu0  ;;  %v5708_v24 = vpop.f32.mrb[74].mxu1  ;;  %v5499_v15 = vld [vmem:[#allocation2 + $0xf9] sm:$0xff]  ;;  %v5500_v46 = vld [vmem:[#allocation2 + $0x101] sm:$0xff] }
 0x4b2   : > { %13077 = vmatmul.mubr.msk.f32.gmra.mrb[110].mxu1 %vm4866_vm3, %v5487_v56  ;;  %v13024_v16 = vpop.f32.mrb[75].mxu1  ;;  %v5494_v56 = vld [vmem:[#allocation2 + $0xd1] sm:$0xff]  ;;  %v5455_v52 = vld [vmem:[#allocation2 + $0x100] sm:$0xff] }
 0x4b3   : > { %13079 = vmatprep.mubr.msk.f32.mxu1 %vm14273_vm1, %v20674_v63  ;;  %v5503_v16 = vld [vmem:[#allocation2 + $0x119] sm:$0xff] }
 0x4b4   : > { %13208 = vmatmul.mubr.msk.f32.gmra.mrb[192].mxu0 %vm4866_vm3, %v5442_v1  ;;  %v6101_v35 = vpop.f32.mrb[156].mxu0  ;;  %v5449_v1 = vld [vmem:[#allocation2 + $0xd0] sm:$0xff] }
 0x4b5   : > { %13210 = vmatprep.mubr.msk.f32.mxu0 %vm14273_vm1, %v20674_v63  ;;  %v17836_v47 = vadd.f32 %v6101_v35, %v5708_v24  ;;  %v13155_v10 = vpop.f32.mrb[157].mxu0  ;;  %v5502_v24 = vld [vmem:[#allocation2 + $0x111] sm:$0xff] }
 0x4b6   : > { %13080 = vmatmul.mubr.msk.f32.gmra.mrb[112].mxu1 %vm4866_vm3, %v5488_v22  ;;  %v5495_v22 = vld [vmem:[#allocation2 + $0xd9] sm:$0xff]  ;;  %v5457_v35 = vld [vmem:[#allocation2 + $0x110] sm:$0xff] }
 0x4b7   : > { %13082 = vmatprep.mubr.msk.f32.mxu1 %vm14273_vm1, %v20674_v63  ;;  %v5458_v10 = vld [vmem:[#allocation2 + $0x118] sm:$0xff] }
 0x4b8   : > { %13211 = vmatmul.mubr.msk.f32.gmra.mrb[194].mxu0 %vm4866_vm3, %v5443_v50  ;;  %v5450_v50 = vld [vmem:[#allocation2 + $0xd8] sm:$0xff] }
 0x4b9   : > { %13213 = vmatprep.mubr.msk.f32.mxu0 %vm14273_vm1, %v20674_v63 }
 0x4ba   : > { %13083 = vmatmul.mubr.msk.f32.gmra.mrb[114].mxu1 %vm4866_vm3, %v5489_v25  ;;  %v5496_v25 = vld [vmem:[#allocation2 + $0xe1] sm:$0xff] }
 0x4bb   : > { %13085 = vmatprep.mubr.msk.f32.mxu1 %vm14273_vm1, %v20674_v63 }
 0x4bc   : > { %13214 = vmatmul.mubr.msk.f32.gmra.mrb[196].mxu0 %vm4866_vm3, %v5444_v51  ;;  %v5451_v51 = vld [vmem:[#allocation2 + $0xe0] sm:$0xff] }
 0x4bd   : > { %13216 = vmatprep.mubr.msk.f32.mxu0 %vm14273_vm1, %v20674_v63 }
 0x4be   : > { %13086 = vmatmul.mubr.msk.f32.gmra.mrb[116].mxu1 %vm4866_vm3, %v5490_v3  ;;  %v5497_v3 = vld [vmem:[#allocation2 + $0xe9] sm:$0xff] }
 0x4bf   : > { %13088 = vmatprep.mubr.msk.f32.mxu1 %vm14273_vm1, %v20674_v63 }
 0x4c0   : > { %13217 = vmatmul.mubr.msk.f32.gmra.mrb[198].mxu0 %vm4866_vm3, %v5445_v53  ;;  %v5452_v53 = vld [vmem:[#allocation2 + $0xe8] sm:$0xff] }
 0x4c1   : > { %13219 = vmatprep.mubr.msk.f32.mxu0 %vm14273_vm1, %v20674_v63 }
 0x4c2   : > { %13089 = vmatmul.mubr.msk.f32.gmra.mrb[118].mxu1 %vm4866_vm3, %v5491_v26  ;;  %v5498_v26 = vld [vmem:[#allocation2 + $0xf1] sm:$0xff] }
 0x4c3   : > { %13091 = vmatprep.mubr.msk.f32.mxu1 %vm14273_vm1, %v20674_v63 }
 0x4c4   : > { %13220 = vmatmul.mubr.msk.f32.gmra.mrb[200].mxu0 %vm4866_vm3, %v5446_v30  ;;  %v5453_v30 = vld [vmem:[#allocation2 + $0xf0] sm:$0xff] }
 0x4c5   : > { %13222 = vmatprep.mubr.msk.f32.mxu0 %vm14273_vm1, %v20674_v63 }
 0x4c6   : > { %13092 = vmatmul.mubr.msk.f32.gmra.mrb[120].mxu1 %vm4866_vm3, %v5492_v40  ;;  %v5501_v40 = vld [vmem:[#allocation2 + $0x109] sm:$0xff] }
 0x4c7   : > { %13094 = vmatprep.mubr.msk.f32.mxu1 %vm14273_vm1, %v20674_v63 }
 0x4c8   : > { %13223 = vmatmul.mubr.msk.f32.gmra.mrb[202].mxu0 %vm4866_vm3, %v5447_v8  ;;  %v5456_v8 = vld [vmem:[#allocation2 + $0x108] sm:$0xff] }
 0x4c9   : > { %13225 = vmatprep.mubr.msk.f32.mxu0 %vm14273_vm1, %v20674_v63 }
 0x4ca   : > { %13095 = vmatmul.mubr.msk.f32.gmra.mrb[122].mxu1 %vm4866_vm3, %v5493_v19  ;;  %v5504_v19 = vld [vmem:[#allocation2 + $0x121] sm:$0xff] }
 0x4cb   : > { %13097 = vmatprep.mubr.msk.f32.mxu1 %vm14273_vm1, %v20674_v63 }
 0x4cc   : > { %13226 = vmatmul.mubr.msk.f32.gmra.mrb[204].mxu0 %vm4866_vm3, %v5448_v11  ;;  %v5459_v11 = vld [vmem:[#allocation2 + $0x120] sm:$0xff] }
 0x4cd   : > { %13228 = vmatprep.mubr.msk.f32.mxu0 %vm14273_vm1, %v20674_v63 }
 0x4ce   : > { %13098 = vmatmul.mubr.msk.f32.gmra.mrb[124].mxu1 %vm4866_vm3, %v5494_v56  ;;  %v5505_v56 = vld [vmem:[#allocation2 + $0x129] sm:$0xff] }
 0x4cf   : > { %13100 = vmatprep.mubr.msk.f32.mxu1 %vm14273_vm1, %v20674_v63 }
 0x4d0   : > { %13229 = vmatmul.mubr.msk.f32.gmra.mrb[206].mxu0 %vm4866_vm3, %v5449_v1  ;;  %v5460_v1 = vld [vmem:[#allocation2 + $0x128] sm:$0xff] }
 0x4d1   : > { %13231 = vmatprep.mubr.msk.f32.mxu0 %vm14273_vm1, %v20674_v63 }
 0x4d2   : > { %13101 = vmatmul.mubr.msk.f32.gmra.mrb[126].mxu1 %vm4866_vm3, %v5495_v22  ;;  %v5506_v22 = vld [vmem:[#allocation2 + $0x131] sm:$0xff] }
 0x4d3   : > { %13103 = vmatprep.mubr.msk.f32.mxu1 %vm14273_vm1, %v20674_v63 }
 0x4d4   : > { %13232 = vmatmul.mubr.msk.f32.gmra.mrb[208].mxu0 %vm4866_vm3, %v5450_v50  ;;  %v5461_v50 = vld [vmem:[#allocation2 + $0x130] sm:$0xff] }
 0x4d5   : > { %13234 = vmatprep.mubr.msk.f32.mxu0 %vm14273_vm1, %v20674_v63 }
 0x4d6   : > { %13104 = vmatmul.mubr.msk.f32.gmra.mrb[128].mxu1 %vm4866_vm3, %v5496_v25  ;;  %v5507_v25 = vld [vmem:[#allocation2 + $0x139] sm:$0xff] }
 0x4d7   : > { %13106 = vmatprep.mubr.msk.f32.mxu1 %vm14273_vm1, %v20674_v63 }
 0x4d8   : > { %13235 = vmatmul.mubr.msk.f32.gmra.mrb[210].mxu0 %vm4866_vm3, %v5451_v51  ;;  %v5462_v51 = vld [vmem:[#allocation2 + $0x138] sm:$0xff] }
 0x4d9   : > { %13237 = vmatprep.mubr.msk.f32.mxu0 %vm14273_vm1, %v20674_v63 }
 0x4da   : > { %13107 = vmatmul.mubr.msk.f32.gmra.mrb[130].mxu1 %vm4866_vm3, %v5497_v3  ;;  %v10875_v3 = vld [vmem:[%s20358_s4 + $0x80] sm:$0xff] }
 0x4db   : > { %13109 = vmatprep.mubr.msk.f32.mxu1 %vm14273_vm1, %v20674_v63 }
 0x4dc   : > { %13238 = vmatmul.mubr.msk.f32.gmra.mrb[212].mxu0 %vm4866_vm3, %v5452_v53  ;;  %v10876_v53 = vld [vmem:[%s20358_s4 + $0x88] sm:$0xff] }
 0x4dd   : > { %13240 = vmatprep.mubr.msk.f32.mxu0 %vm14273_vm1, %v20674_v63 }
 0x4de   : > { %13110 = vmatmul.mubr.msk.f32.gmra.mrb[132].mxu1 %vm4866_vm3, %v5498_v26  ;;  %v5508_v26 = vld [vmem:[#allocation2 + $0x141] sm:$0xf] }
 0x4df   : > { %13112 = vmatprep.mubr.msk.f32.mxu1 %vm14273_vm1, %v20674_v63 }
 0x4e0   : > { %13241 = vmatmul.mubr.msk.f32.gmra.mrb[214].mxu0 %vm4866_vm3, %v5453_v30  ;;  %v5463_v30 = vld [vmem:[#allocation2 + $0x140] sm:$0xf] }
 0x4e1   : > { %13243 = vmatprep.mubr.msk.f32.mxu0 %vm14273_vm1, %v20674_v63 }
 0x4e2   : > { %13113 = vmatmul.mubr.msk.f32.gmra.mrb[134].mxu1 %vm4866_vm3, %v5499_v15  ;;  %v6300_v15 = vld [vmem:[#allocation2 + $0x2] sm:$0xff] }
 0x4e3   : > { %13115 = vmatprep.mubr.msk.f32.mxu1 %vm14273_vm1, %v20674_v63 }
 0x4e4   : > { %13244 = vmatmul.mubr.msk.f32.gmra.mrb[216].mxu0 %vm4866_vm3, %v5454_v23  ;;  %v14215_v23 = vpack.c.bf16 %v10876_v53, %v10875_v3  ;;  %v10922_v3 = vld [vmem:[%s20358_s4 + $0xb0] sm:$0xff]  ;;  %v10923_v53 = vld [vmem:[%s20358_s4 + $0xb8] sm:$0xff] }
 0x4e5   : > { %13246 = vmatprep.mubr.msk.f32.mxu0 %vm14273_vm1, %v20674_v63 }
 0x4e6   : > { %13116 = vmatmul.mubr.msk.f32.gmra.mrb[136].mxu1 %vm4866_vm3, %v5500_v46  ;;  %v6780_v46 = vld [vmem:[#allocation2 + $0x12] sm:$0xff] }
 0x4e7   : > { %13118 = vmatprep.mubr.msk.f32.mxu1 %vm14273_vm1, %v20674_v63 }
 0x4e8   : > { %13247 = vmatmul.mubr.msk.f32.gmra.mrb[218].mxu0 %vm4866_vm3, %v5455_v52  ;;  %v10877_v52 = vld [vmem:[%s20358_s4 + $0x90] sm:$0xff] }
 0x4e9   : > { %13249 = vmatprep.mubr.msk.f32.mxu0 %vm14273_vm1, %v20674_v63 }
 0x4ea   : > { %13119 = vmatmul.mubr.msk.f32.gmra.mrb[138].mxu1 %vm4866_vm3, %v5501_v40  ;;  %v10878_v40 = vld [vmem:[%s20358_s4 + $0x98] sm:$0xff] }
 0x4eb   : > { %13121 = vmatprep.mubr.msk.f32.mxu1 %vm14273_vm1, %v20674_v63 }
 0x4ec   : > { %13250 = vmatmul.mubr.msk.f32.gmra.mrb[220].mxu0 %vm4866_vm3, %v5456_v8  ;;  %v6301_v8 = vld [vmem:[#allocation2 + $0xa] sm:$0xff] }
 0x4ed   : > { %13252 = vmatprep.mubr.msk.f32.mxu0 %vm14273_vm1, %v20674_v63 }
 0x4ee   : > { %13122 = vmatmul.mubr.msk.f32.gmra.mrb[140].mxu1 %vm4866_vm3, %v5502_v24  ;;  %v14218_v24 = vpack.c.bf16 %v10878_v40, %v10877_v52  ;;  %v6793_v52 = vld [vmem:[#allocation2 + $0x7a] sm:$0xff] }
 0x4ef   : > { %13124 = vmatprep.mubr.msk.f32.mxu1 %vm14273_vm1, %v20674_v63 }
 0x4f0   : > { %13253 = vmatmul.mubr.msk.f32.gmra.mrb[222].mxu0 %vm4866_vm3, %v5457_v35  ;;  %v6781_v35 = vld [vmem:[#allocation2 + $0x1a] sm:$0xff] }
 0x4f1   : > { %13255 = vmatprep.mubr.msk.f32.mxu0 %vm14273_vm1, %v20674_v63 }
 0x4f2   : > { %13125 = vmatmul.mubr.msk.f32.gmra.mrb[142].mxu1 %vm4866_vm3, %v5503_v16  ;;  %v6782_v16 = vld [vmem:[#allocation2 + $0x22] sm:$0xff] }
 0x4f3   : > { %13127 = vmatprep.mubr.msk.f32.mxu1 %vm14273_vm1, %v20674_v63 }
 0x4f4   : > { %13256 = vmatmul.mubr.msk.f32.gmra.mrb[224].mxu0 %vm4866_vm3, %v5458_v10  ;;  %v6783_v10 = vld [vmem:[#allocation2 + $0x2a] sm:$0xff] }
 0x4f5   : > { %13258 = vmatprep.mubr.msk.f32.mxu0 %vm14273_vm1, %v20674_v63 }
 0x4f6   : > { %13128 = vmatmul.mubr.msk.f32.gmra.mrb[144].mxu1 %vm4866_vm3, %v5504_v19  ;;  %v6784_v19 = vld [vmem:[#allocation2 + $0x32] sm:$0xff] }
 0x4f7   : > { %13130 = vmatprep.mubr.msk.f32.mxu1 %vm14273_vm1, %v20674_v63 }
 0x4f8   : > { %13259 = vmatmul.mubr.msk.f32.gmra.mrb[226].mxu0 %vm4866_vm3, %v5459_v11  ;;  %v6785_v11 = vld [vmem:[#allocation2 + $0x3a] sm:$0xff] }
 0x4f9   : > { %13261 = vmatprep.mubr.msk.f32.mxu0 %vm14273_vm1, %v20674_v63 }
 0x4fa   : > { %13131 = vmatmul.mubr.msk.f32.gmra.mrb[146].mxu1 %vm4866_vm3, %v5505_v56  ;;  %v6786_v56 = vld [vmem:[#allocation2 + $0x42] sm:$0xff] }
 0x4fb   : > { %13133 = vmatprep.mubr.msk.f32.mxu1 %vm14273_vm1, %v20674_v63 }
 0x4fc   : > { %13262 = vmatmul.mubr.msk.f32.gmra.mrb[228].mxu0 %vm4866_vm3, %v5460_v1  ;;  %v6787_v1 = vld [vmem:[#allocation2 + $0x4a] sm:$0xff] }
 0x4fd   : > { %13264 = vmatprep.mubr.msk.f32.mxu0 %vm14273_vm1, %v20674_v63 }
 0x4fe   : > { %13134 = vmatmul.mubr.msk.f32.gmra.mrb[148].mxu1 %vm4866_vm3, %v5506_v22  ;;  %v10920_v22 = vld [vmem:[%s20358_s4 + $0xa0] sm:$0xff] }
 0x4ff   : > { %13136 = vmatprep.mubr.msk.f32.mxu1 %vm14273_vm1, %v20674_v63 }
 0x500   : > { %13265 = vmatmul.mubr.msk.f32.gmra.mrb[230].mxu0 %vm4866_vm3, %v5461_v50  ;;  %v10921_v50 = vld [vmem:[%s20358_s4 + $0xa8] sm:$0xff] }
 0x501   : > { %13267 = vmatprep.mubr.msk.f32.mxu0 %vm14273_vm1, %v20674_v63 }
 0x502   : > { %13137 = vmatmul.mubr.msk.f32.gmra.mrb[150].mxu1 %vm4866_vm3, %v5507_v25  ;;  %v14221_v25 = vpack.c.bf16 %v10921_v50, %v10920_v22 }
 0x503   : > { %13139 = vmatprep.mubr.msk.f32.mxu1 %vm14273_vm1, %v20674_v63 }
 0x504   : > { %13268 = vmatmul.mubr.msk.f32.gmra.mrb[232].mxu0 %vm4866_vm3, %v5462_v51  ;;  %v6788_v51 = vld [vmem:[#allocation2 + $0x52] sm:$0xff] }
 0x505   : > { %13270 = vmatprep.mubr.msk.f32.mxu0 %vm14273_vm1, %v20674_v63 }
 0x506   : > { %13140 = vmatmul.mubr.msk.f32.gmra.mrb[152].mxu1 %vm4866_vm3, %v5508_v26  ;;  %v14224_v26 = vpack.c.bf16 %v10923_v53, %v10922_v3  ;;  %v6796_v3 = vld [vmem:[#allocation2 + $0x92] sm:$0xff] }
 0x507   : > { %13281 = vmatprep.mubr.msk.f32.mxu1 %vm14273_vm1, %v20674_v63 }
 0x508   : > { %13271 = vmatmul.mubr.msk.f32.gmra.mrb[234].mxu0 %vm4866_vm3, %v5463_v30  ;;  %v6789_v30 = vld [vmem:[#allocation2 + $0x5a] sm:$0xff] }
 0x509   : > { %13412 = vmatprep.mubr.msk.f32.mxu0 %vm14273_vm1, %v20674_v63 }
 0x50a   : > { %13282 = vmatmul.mubr.msk.f32.vlgmr.msra.gmra.mrb[154].mxu1 %vm4866_vm3, %v6300_v15  ;;  %v6790_v15 = vld [vmem:[#allocation2 + $0x62] sm:$0xff] }
 0x50b   : > { %14216 = vmatpush3.bf16.msra.mxu1 %v14215_v23  ;;  %13284 = vmatprep.mubr.msk.f32.mxu1 %vm14273_vm1, %v20674_v63  ;;  %v6791_v23 = vld [vmem:[#allocation2 + $0x6a] sm:$0xff] }
 0x50c   : > { %13413 = vmatmul.mubr.msk.f32.vlgmr.msra.gmra.mrb[236].mxu0 %vm4866_vm3, %v6780_v46  ;;  %14217 = vmatprep.subr.bf16.mxu1 %v20675_v57 }
 0x50d   : > { %13415 = vmatprep.mubr.msk.f32.mxu0 %vm14273_vm1, %v20674_v63  ;;  %14222 = vmatpush3.bf16.msra.mxu0 %v14221_v25 }
 0x50e   : > { %13285 = vmatmul.mubr.msk.f32.gmra.mrb[156].mxu1 %vm4866_vm3, %v6301_v8  ;;  %14223 = vmatprep.subr.bf16.mxu0 %v20675_v57 }
 0x50f   : > { %13287 = vmatprep.mubr.msk.f32.mxu1 %vm14273_vm1, %v20674_v63  ;;  %14219 = vmatpush3.bf16.msra.mxu1 %v14218_v24  ;;  %v6794_v24 = vld [vmem:[#allocation2 + $0x82] sm:$0xff] }
 0x510   : > { %13416 = vmatmul.mubr.msk.f32.gmra.mrb[238].mxu0 %vm4866_vm3, %v6781_v35  ;;  %14226 = vmatprep.subr.bf16.mxu1 %v20675_v57 }
 0x511   : > { %13418 = vmatprep.mubr.msk.f32.mxu0 %vm14273_vm1, %v20674_v63  ;;  %14225 = vmatpush3.bf16.msra.mxu0 %v14224_v26 }
 0x512   : > { %13288 = vmatmul.mubr.msk.f32.gmra.mrb[158].mxu1 %vm4866_vm3, %v6780_v46  ;;  %14232 = vmatprep.subr.bf16.mxu0 %v20675_v57  ;;  %v6792_v46 = vld [vmem:[#allocation2 + $0x72] sm:$0xff] }
 0x513   : > { %13290 = vmatprep.mubr.msk.f32.mxu1 %vm14273_vm1, %v20674_v63 }
 0x514   : > { %13419 = vmatmul.mubr.msk.f32.gmra.mrb[240].mxu0 %vm4866_vm3, %v6782_v16 }
 0x515   : > { %13421 = vmatprep.mubr.msk.f32.mxu0 %vm14273_vm1, %v20674_v63 }
 0x516   : > { %13291 = vmatmul.mubr.msk.f32.gmra.mrb[160].mxu1 %vm4866_vm3, %v6781_v35 }
 0x517   : > { %13293 = vmatprep.mubr.msk.f32.mxu1 %vm14273_vm1, %v20674_v63 }
 0x518   : > { %13422 = vmatmul.mubr.msk.f32.gmra.mrb[242].mxu0 %vm4866_vm3, %v6783_v10 }
 0x519   : > { %13424 = vmatprep.mubr.msk.f32.mxu0 %vm14273_vm1, %v20674_v63 }
 0x51a   : > { %13294 = vmatmul.mubr.msk.f32.gmra.mrb[162].mxu1 %vm4866_vm3, %v6782_v16 }
 0x51b   : > { %13296 = vmatprep.mubr.msk.f32.mxu1 %vm14273_vm1, %v20674_v63 }
 0x51c   : > { %13425 = vmatmul.mubr.msk.f32.gmra.mrb[244].mxu0 %vm4866_vm3, %v6784_v19 }
 0x51d   : > { %13427 = vmatprep.mubr.msk.f32.mxu0 %vm14273_vm1, %v20674_v63 }
 0x51e   : > { %13297 = vmatmul.mubr.msk.f32.gmra.mrb[164].mxu1 %vm4866_vm3, %v6783_v10 }
 0x51f   : > { %13299 = vmatprep.mubr.msk.f32.mxu1 %vm14273_vm1, %v20674_v63 }
 0x520   : > { %13428 = vmatmul.mubr.msk.f32.gmra.mrb[246].mxu0 %vm4866_vm3, %v6785_v11 }
 0x521   : > { %13430 = vmatprep.mubr.msk.f32.mxu0 %vm14273_vm1, %v20674_v63 }
 0x522   : > { %13300 = vmatmul.mubr.msk.f32.gmra.mrb[166].mxu1 %vm4866_vm3, %v6784_v19 }
 0x523   : > { %13302 = vmatprep.mubr.msk.f32.mxu1 %vm14273_vm1, %v20674_v63 }
 0x524   : > { %13431 = vmatmul.mubr.msk.f32.gmra.mrb[248].mxu0 %vm4866_vm3, %v6786_v56 }
 0x525   : > { %13433 = vmatprep.mubr.msk.f32.mxu0 %vm14273_vm1, %v20674_v63 }
 0x526   : > { %13303 = vmatmul.mubr.msk.f32.gmra.mrb[168].mxu1 %vm4866_vm3, %v6785_v11 }
 0x527   : > { %13305 = vmatprep.mubr.msk.f32.mxu1 %vm14273_vm1, %v20674_v63 }
 0x528   : > { %13434 = vmatmul.mubr.msk.f32.gmra.mrb[250].mxu0 %vm4866_vm3, %v6787_v1 }
 0x529   : > { %13436 = vmatprep.mubr.msk.f32.mxu0 %vm14273_vm1, %v20674_v63 }
 0x52a   : > { %13306 = vmatmul.mubr.msk.f32.gmra.mrb[170].mxu1 %vm4866_vm3, %v6786_v56  ;;  %v6795_v56 = vld [vmem:[#allocation2 + $0x8a] sm:$0xff] }
 0x52b   : > { %13308 = vmatprep.mubr.msk.f32.mxu1 %vm14273_vm1, %v20674_v63 }
 0x52c   : > { %13437 = vmatmul.mubr.msk.f32.gmra.mrb[252].mxu0 %vm4866_vm3, %v6788_v51 }
 0x52d   : > { %13439 = vmatprep.mubr.msk.f32.mxu0 %vm14273_vm1, %v20674_v63 }
 0x52e   : > { %13309 = vmatmul.mubr.msk.f32.gmra.mrb[172].mxu1 %vm4866_vm3, %v6787_v1 }
 0x52f   : > { %13311 = vmatprep.mubr.msk.f32.mxu1 %vm14273_vm1, %v20674_v63 }
 0x530   : > { %13440 = vmatmul.mubr.msk.f32.gmra.mrb[254].mxu0 %vm4866_vm3, %v6789_v30 }
 0x531   : > { %13442 = vmatprep.mubr.msk.f32.mxu0 %vm14273_vm1, %v20674_v63 }
 0x532   : > { %13312 = vmatmul.mubr.msk.f32.gmra.mrb[174].mxu1 %vm4866_vm3, %v6788_v51  ;;  %v6106_v8 = vpop.f32.mrb[158].mxu0 }
 0x533   : > { %13314 = vmatprep.mubr.msk.f32.mxu1 %vm14273_vm1, %v20674_v63  ;;  %v13158_v10 = vpop.f32.mrb[159].mxu0 }
 0x534   : > { %13443 = vmatmul.mubr.msk.f32.gmra.mrb[0].mxu0 %vm4866_vm3, %v6790_v15  ;;  %v5713_v40 = vpop.f32.mrb[76].mxu1  ;;  %v6798_v10 = vld [vmem:[#allocation2 + $0xa2] sm:$0xff] }
 0x535   : > { %13445 = vmatprep.mubr.msk.f32.mxu0 %vm14273_vm1, %v20674_v63  ;;  %v18046_v35 = vadd.f32 %v6106_v8, %v5713_v40  ;;  %v13027_v16 = vpop.f32.mrb[77].mxu1 }
 0x536   : > { %13315 = vmatmul.mubr.msk.f32.gmra.mrb[176].mxu1 %vm4866_vm3, %v6789_v30 }
 0x537   : > { %13317 = vmatprep.mubr.msk.f32.mxu1 %vm14273_vm1, %v20674_v63 }
 0x538   : > { %13446 = vmatmul.mubr.msk.f32.gmra.mrb[2].mxu0 %vm4866_vm3, %v6791_v23 }
 0x539   : > { %13448 = vmatprep.mubr.msk.f32.mxu0 %vm14273_vm1, %v20674_v63 }
 0x53a   : > { %13318 = vmatmul.mubr.msk.f32.gmra.mrb[178].mxu1 %vm4866_vm3, %v6790_v15 }
 0x53b   : > { %13320 = vmatprep.mubr.msk.f32.mxu1 %vm14273_vm1, %v20674_v63 }
 0x53c   : > { %13449 = vmatmul.mubr.msk.f32.gmra.mrb[4].mxu0 %vm4866_vm3, %v6792_v46 }
 0x53d   : > { %13451 = vmatprep.mubr.msk.f32.mxu0 %vm14273_vm1, %v20674_v63 }
 0x53e   : > { %13321 = vmatmul.mubr.msk.f32.gmra.mrb[180].mxu1 %vm4866_vm3, %v6791_v23 }
 0x53f   : > { %13323 = vmatprep.mubr.msk.f32.mxu1 %vm14273_vm1, %v20674_v63 }
 0x540   : > { %13452 = vmatmul.mubr.msk.f32.gmra.mrb[6].mxu0 %vm4866_vm3, %v6793_v52 }
 0x541   : > { %13454 = vmatprep.mubr.msk.f32.mxu0 %vm14273_vm1, %v20674_v63 }
 0x542   : > { %13324 = vmatmul.mubr.msk.f32.gmra.mrb[182].mxu1 %vm4866_vm3, %v6792_v46  ;;  %v6797_v46 = vld [vmem:[#allocation2 + $0x9a] sm:$0xff] }
 0x543   : > { %13326 = vmatprep.mubr.msk.f32.mxu1 %vm14273_vm1, %v20674_v63 }
 0x544   : > { %13455 = vmatmul.mubr.msk.f32.gmra.mrb[8].mxu0 %vm4866_vm3, %v6794_v24 }
 0x545   : > { %13457 = vmatprep.mubr.msk.f32.mxu0 %vm14273_vm1, %v20674_v63  ;;  %v5718_v19 = vpop.f32.mrb[78].mxu1 }
 0x546   : > { %v13030_v22 = vpop.f32.mrb[79].mxu1  ;;  %13327 = vmatmul.mubr.msk.f32.gmra.mrb[184].mxu1 %vm4866_vm3, %v6793_v52 }
 0x547   : > { %v6111_v11 = vpop.f32.mrb[160].mxu0  ;;  %13329 = vmatprep.mubr.msk.f32.mxu1 %vm14273_vm1, %v20674_v63 }
 0x548   : > { %v18054_v1 = vadd.f32 %v6111_v11, %v5718_v19  ;;  %v13161_v50 = vpop.f32.mrb[161].mxu0  ;;  %13458 = vmatmul.mubr.msk.f32.gmra.mrb[10].mxu0 %vm4866_vm3, %v6795_v56 }
 0x549   : > { %13460 = vmatprep.mubr.msk.f32.mxu0 %vm14273_vm1, %v20674_v63  ;;  %v5723_v25 = vpop.f32.mrb[80].mxu1 }
 0x54a   : > { %v13033_v26 = vpop.f32.mrb[81].mxu1  ;;  %13330 = vmatmul.mubr.msk.f32.gmra.mrb[186].mxu1 %vm4866_vm3, %v6794_v24 }
 0x54b   : > { %v6116_v51 = vpop.f32.mrb[162].mxu0  ;;  %13332 = vmatprep.mubr.msk.f32.mxu1 %vm14273_vm1, %v20674_v63 }
 0x54c   : > { %v18062_v53 = vadd.f32 %v6116_v51, %v5723_v25  ;;  %v13164_v30 = vpop.f32.mrb[163].mxu0  ;;  %13461 = vmatmul.mubr.msk.f32.gmra.mrb[12].mxu0 %vm4866_vm3, %v6796_v3  ;;  %v6799_v25 = vld [vmem:[#allocation2 + $0xaa] sm:$0xff] }
 0x54d   : > { %13463 = vmatprep.mubr.msk.f32.mxu0 %vm14273_vm1, %v20674_v63  ;;  %v5728_v15 = vpop.f32.mrb[82].mxu1 }
 0x54e   : > { %v13036_v40 = vpop.f32.mrb[83].mxu1  ;;  %13333 = vmatmul.mubr.msk.f32.gmra.mrb[188].mxu1 %vm4866_vm3, %v6795_v56 }
 0x54f   : > { %v6121_v23 = vpop.f32.mrb[164].mxu0  ;;  %13335 = vmatprep.mubr.msk.f32.mxu1 %vm14273_vm1, %v20674_v63 }
 0x550   : > { %v18070_v52 = vadd.f32 %v6121_v23, %v5728_v15  ;;  %v13167_v8 = vpop.f32.mrb[165].mxu0  ;;  %13464 = vmatmul.mubr.msk.f32.gmra.mrb[14].mxu0 %vm4866_vm3, %v6797_v46  ;;  %v6800_v23 = vld [vmem:[#allocation2 + $0xb2] sm:$0xff] }
 0x551   : > { %13466 = vmatprep.mubr.msk.f32.mxu0 %vm14273_vm1, %v20674_v63  ;;  %v5733_v24 = vpop.f32.mrb[84].mxu1 }
 0x552   : > { %v13039_v11 = vpop.f32.mrb[85].mxu1  ;;  %13336 = vmatmul.mubr.msk.f32.gmra.mrb[190].mxu1 %vm4866_vm3, %v6796_v3 }
 0x553   : > { %v6126_v16 = vpop.f32.mrb[166].mxu0  ;;  %13338 = vmatprep.mubr.msk.f32.mxu1 %vm14273_vm1, %v20674_v63  ;;  %v6801_v11 = vld [vmem:[#allocation2 + $0xba] sm:$0xff] }
 0x554   : > { %v18078_v19 = vadd.f32 %v6126_v16, %v5733_v24  ;;  %v13170_v22 = vpop.f32.mrb[167].mxu0  ;;  %13467 = vmatmul.mubr.msk.f32.gmra.mrb[16].mxu0 %vm4866_vm3, %v6798_v10 }
 0x555   : > { %13469 = vmatprep.mubr.msk.f32.mxu0 %vm14273_vm1, %v20674_v63  ;;  %v5738_v56 = vpop.f32.mrb[86].mxu1 }
 0x556   : > { %v13042_v26 = vpop.f32.mrb[87].mxu1  ;;  %13339 = vmatmul.mubr.msk.f32.gmra.mrb[192].mxu1 %vm4866_vm3, %v6797_v46 }
 0x557   : > { %v6131_v50 = vpop.f32.mrb[168].mxu0  ;;  %13341 = vmatprep.mubr.msk.f32.mxu1 %vm14273_vm1, %v20674_v63 }
 0x558   : > { %v18086_v51 = vadd.f32 %v6131_v50, %v5738_v56  ;;  %v13173_v30 = vpop.f32.mrb[169].mxu0  ;;  %13470 = vmatmul.mubr.msk.f32.gmra.mrb[18].mxu0 %vm4866_vm3, %v6799_v25 }
 0x559   : > { %13472 = vmatprep.mubr.msk.f32.mxu0 %vm14273_vm1, %v20674_v63  ;;  %v5743_v3 = vpop.f32.mrb[88].mxu1  ;;  %v6802_v30 = vld [vmem:[#allocation2 + $0xc2] sm:$0xff] }
 0x55a   : > { %v13045_v8 = vpop.f32.mrb[89].mxu1  ;;  %13342 = vmatmul.mubr.msk.f32.gmra.mrb[194].mxu1 %vm4866_vm3, %v6798_v10 }
 0x55b   : > { %v6136_v15 = vpop.f32.mrb[170].mxu0  ;;  %13344 = vmatprep.mubr.msk.f32.mxu1 %vm14273_vm1, %v20674_v63 }
 0x55c   : > { %v18094_v40 = vadd.f32 %v6136_v15, %v5743_v3  ;;  %v13176_v24 = vpop.f32.mrb[171].mxu0  ;;  %13473 = vmatmul.mubr.msk.f32.gmra.mrb[20].mxu0 %vm4866_vm3, %v6800_v23 }
 0x55d   : > { %13475 = vmatprep.mubr.msk.f32.mxu0 %vm14273_vm1, %v20674_v63  ;;  %v5748_v46 = vpop.f32.mrb[90].mxu1 }
 0x55e   : > { %v13048_v56 = vpop.f32.mrb[91].mxu1  ;;  %13345 = vmatmul.mubr.msk.f32.gmra.mrb[196].mxu1 %vm4866_vm3, %v6799_v25 }
 0x55f   : > { %v6141_v16 = vpop.f32.mrb[172].mxu0  ;;  %13347 = vmatprep.mubr.msk.f32.mxu1 %vm14273_vm1, %v20674_v63 }
 0x560   : > { %v18102_v22 = vadd.f32 %v6141_v16, %v5748_v46  ;;  %v13179_v50 = vpop.f32.mrb[173].mxu0  ;;  %13476 = vmatmul.mubr.msk.f32.gmra.mrb[22].mxu0 %vm4866_vm3, %v6801_v11  ;;  %v6803_v46 = vld [vmem:[#allocation2 + $0xca] sm:$0xff] }
 0x561   : > { %13478 = vmatprep.mubr.msk.f32.mxu0 %vm14273_vm1, %v20674_v63  ;;  %v5753_v10 = vpop.f32.mrb[92].mxu1 }
 0x562   : > { %v13051_v15 = vpop.f32.mrb[93].mxu1  ;;  %13348 = vmatmul.mubr.msk.f32.gmra.mrb[198].mxu1 %vm4866_vm3, %v6800_v23 }
 0x563   : > { %v6146_v26 = vpop.f32.mrb[174].mxu0  ;;  %13350 = vmatprep.mubr.msk.f32.mxu1 %vm14273_vm1, %v20674_v63 }
 0x564   : > { %v18110_v3 = vadd.f32 %v6146_v26, %v5753_v10  ;;  %v13182_v8 = vpop.f32.mrb[175].mxu0  ;;  %13479 = vmatmul.mubr.msk.f32.gmra.mrb[24].mxu0 %vm4866_vm3, %v6802_v30  ;;  %v6804_v26 = vld [vmem:[#allocation2 + $0xd2] sm:$0xff] }
 0x565   : > { %13481 = vmatprep.mubr.msk.f32.mxu0 %vm14273_vm1, %v20674_v63  ;;  %v5758_v25 = vpop.f32.mrb[94].mxu1 }
 0x566   : > { %v13054_v56 = vpop.f32.mrb[95].mxu1  ;;  %13351 = vmatmul.mubr.msk.f32.gmra.mrb[200].mxu1 %vm4866_vm3, %v6801_v11 }
 0x567   : > { %v6151_v24 = vpop.f32.mrb[176].mxu0  ;;  %13353 = vmatprep.mubr.msk.f32.mxu1 %vm14273_vm1, %v20674_v63  ;;  %v6805_v56 = vld [vmem:[#allocation2 + $0xda] sm:$0xff] }
 0x568   : > { %v18118_v16 = vadd.f32 %v6151_v24, %v5758_v25  ;;  %v13185_v50 = vpop.f32.mrb[177].mxu0  ;;  %13482 = vmatmul.mubr.msk.f32.gmra.mrb[26].mxu0 %vm4866_vm3, %v6803_v46 }
 0x569   : > { %13484 = vmatprep.mubr.msk.f32.mxu0 %vm14273_vm1, %v20674_v63  ;;  %v5763_v23 = vpop.f32.mrb[96].mxu1 }
 0x56a   : > { %v13057_v8 = vpop.f32.mrb[97].mxu1  ;;  %13354 = vmatmul.mubr.msk.f32.gmra.mrb[202].mxu1 %vm4866_vm3, %v6802_v30 }
 0x56b   : > { %v6156_v10 = vpop.f32.mrb[178].mxu0  ;;  %13356 = vmatprep.mubr.msk.f32.mxu1 %vm14273_vm1, %v20674_v63  ;;  %v6806_v8 = vld [vmem:[#allocation2 + $0xe2] sm:$0xff] }
 0x56c   : > { %v18126_v15 = vadd.f32 %v6156_v10, %v5763_v23  ;;  %v13188_v25 = vpop.f32.mrb[179].mxu0  ;;  %13485 = vmatmul.mubr.msk.f32.gmra.mrb[28].mxu0 %vm4866_vm3, %v6804_v26 }
 0x56d   : > { %13487 = vmatprep.mubr.msk.f32.mxu0 %vm14273_vm1, %v20674_v63  ;;  %v5768_v11 = vpop.f32.mrb[98].mxu1 }
 0x56e   : > { %v13060_v43 = vpop.f32.mrb[99].mxu1  ;;  %13357 = vmatmul.mubr.msk.f32.gmra.mrb[204].mxu1 %vm4866_vm3, %v6803_v46 }
 0x56f   : > { %v6161_v24 = vpop.f32.mrb[180].mxu0  ;;  %13359 = vmatprep.mubr.msk.f32.mxu1 %vm14273_vm1, %v20674_v63 }
 0x570   : > { %v18134_v50 = vadd.f32 %v6161_v24, %v5768_v11  ;;  %v13191_v23 = vpop.f32.mrb[181].mxu0  ;;  %13488 = vmatmul.mubr.msk.f32.gmra.mrb[30].mxu0 %vm4866_vm3, %v6805_v56  ;;  %v6807_v24 = vld [vmem:[#allocation2 + $0xea] sm:$0xff] }
 0x571   : > { %13490 = vmatprep.mubr.msk.f32.mxu0 %vm14273_vm1, %v20674_v63  ;;  %v5773_v30 = vpop.f32.mrb[100].mxu1 }
 0x572   : > { %v13063_v28 = vpop.f32.mrb[101].mxu1  ;;  %13360 = vmatmul.mubr.msk.f32.gmra.mrb[206].mxu1 %vm4866_vm3, %v6804_v26 }
 0x573   : > { %v6166_v10 = vpop.f32.mrb[182].mxu0  ;;  %13362 = vmatprep.mubr.msk.f32.mxu1 %vm14273_vm1, %v20674_v63 }
 0x574   : > { %v18142_v25 = vadd.f32 %v6166_v10, %v5773_v30  ;;  %v13194_v11 = vpop.f32.mrb[183].mxu0  ;;  %13491 = vmatmul.mubr.msk.f32.gmra.mrb[32].mxu0 %vm4866_vm3, %v6806_v8  ;;  %v6808_v10 = vld [vmem:[#allocation2 + $0xf2] sm:$0xff] }
 0x575   : > { %13493 = vmatprep.mubr.msk.f32.mxu0 %vm14273_vm1, %v20674_v63  ;;  %v5778_v43 = vpop.f32.mrb[102].mxu1 }
 0x576   : > { %v13066_v7 = vpop.f32.mrb[103].mxu1  ;;  %13363 = vmatmul.mubr.msk.f32.gmra.mrb[208].mxu1 %vm4866_vm3, %v6805_v56 }
 0x577   : > { %v6171_v46 = vpop.f32.mrb[184].mxu0  ;;  %13365 = vmatprep.mubr.msk.f32.mxu1 %vm14273_vm1, %v20674_v63 }
 0x578   : > { %v18150_v23 = vadd.f32 %v6171_v46, %v5778_v43  ;;  %v13197_v30 = vpop.f32.mrb[185].mxu0  ;;  %13494 = vmatmul.mubr.msk.f32.gmra.mrb[34].mxu0 %vm4866_vm3, %v6807_v24  ;;  %v6809_v46 = vld [vmem:[#allocation2 + $0xfa] sm:$0xff] }
 0x579   : > { %13496 = vmatprep.mubr.msk.f32.mxu0 %vm14273_vm1, %v20674_v63  ;;  %v5783_v28 = vpop.f32.mrb[104].mxu1 }
 0x57a   : > { %v13069_v9 = vpop.f32.mrb[105].mxu1  ;;  %13366 = vmatmul.mubr.msk.f32.gmra.mrb[210].mxu1 %vm4866_vm3, %v6806_v8 }
 0x57b   : > { %v6176_v26 = vpop.f32.mrb[186].mxu0  ;;  %13368 = vmatprep.mubr.msk.f32.mxu1 %vm14273_vm1, %v20674_v63 }
 0x57c   : > { %v18158_v11 = vadd.f32 %v6176_v26, %v5783_v28  ;;  %v13200_v43 = vpop.f32.mrb[187].mxu0  ;;  %13497 = vmatmul.mubr.msk.f32.gmra.mrb[36].mxu0 %vm4866_vm3, %v6808_v10  ;;  %v6810_v26 = vld [vmem:[#allocation2 + $0x102] sm:$0xff] }
 0x57d   : > { %13499 = vmatprep.mubr.msk.f32.mxu0 %vm14273_vm1, %v20674_v63  ;;  %v5788_v7 = vpop.f32.mrb[106].mxu1 }
 0x57e   : > { %v13072_v5 = vpop.f32.mrb[107].mxu1  ;;  %13369 = vmatmul.mubr.msk.f32.gmra.mrb[212].mxu1 %vm4866_vm3, %v6807_v24 }
 0x57f   : > { %v6181_v56 = vpop.f32.mrb[188].mxu0  ;;  %13371 = vmatprep.mubr.msk.f32.mxu1 %vm14273_vm1, %v20674_v63 }
 0x580   : > { %v18166_v30 = vadd.f32 %v6181_v56, %v5788_v7  ;;  %v13203_v28 = vpop.f32.mrb[189].mxu0  ;;  %13500 = vmatmul.mubr.msk.f32.gmra.mrb[38].mxu0 %vm4866_vm3, %v6809_v46  ;;  %v6811_v56 = vld [vmem:[#allocation2 + $0x10a] sm:$0xff] }
 0x581   : > { %13502 = vmatprep.mubr.msk.f32.mxu0 %vm14273_vm1, %v20674_v63  ;;  %v5793_v9 = vpop.f32.mrb[108].mxu1 }
 0x582   : > { %v13075_v20 = vpop.f32.mrb[109].mxu1  ;;  %13372 = vmatmul.mubr.msk.f32.gmra.mrb[214].mxu1 %vm4866_vm3, %v6808_v10 }
 0x583   : > { %v6186_v8 = vpop.f32.mrb[190].mxu0  ;;  %13374 = vmatprep.mubr.msk.f32.mxu1 %vm14273_vm1, %v20674_v63 }
 0x584   : > { %v18174_v43 = vadd.f32 %v6186_v8, %v5793_v9  ;;  %v13206_v7 = vpop.f32.mrb[191].mxu0  ;;  %13503 = vmatmul.mubr.msk.f32.gmra.mrb[40].mxu0 %vm4866_vm3, %v6810_v26  ;;  %v6812_v8 = vld [vmem:[#allocation2 + $0x112] sm:$0xff] }
 0x585   : > { %13505 = vmatprep.mubr.msk.f32.mxu0 %vm14273_vm1, %v20674_v63  ;;  %v5798_v5 = vpop.f32.mrb[110].mxu1 }
 0x586   : > { %v13078_v59 = vpop.f32.mrb[111].mxu1  ;;  %13375 = vmatmul.mubr.msk.f32.gmra.mrb[216].mxu1 %vm4866_vm3, %v6809_v46 }
 0x587   : > { %v6191_v24 = vpop.f32.mrb[192].mxu0  ;;  %13377 = vmatprep.mubr.msk.f32.mxu1 %vm14273_vm1, %v20674_v63 }
 0x588   : > { %v18182_v28 = vadd.f32 %v6191_v24, %v5798_v5  ;;  %v13209_v9 = vpop.f32.mrb[193].mxu0  ;;  %13506 = vmatmul.mubr.msk.f32.gmra.mrb[42].mxu0 %vm4866_vm3, %v6811_v56  ;;  %v6813_v24 = vld [vmem:[#allocation2 + $0x11a] sm:$0xff] }
 0x589   : > { %13508 = vmatprep.mubr.msk.f32.mxu0 %vm14273_vm1, %v20674_v63  ;;  %v5803_v20 = vpop.f32.mrb[112].mxu1 }
 0x58a   : > { %v13081_v49 = vpop.f32.mrb[113].mxu1  ;;  %13378 = vmatmul.mubr.msk.f32.gmra.mrb[218].mxu1 %vm4866_vm3, %v6810_v26 }
 0x58b   : > { %v6196_v10 = vpop.f32.mrb[194].mxu0  ;;  %13380 = vmatprep.mubr.msk.f32.mxu1 %vm14273_vm1, %v20674_v63 }
 0x58c   : > { %v18190_v7 = vadd.f32 %v6196_v10, %v5803_v20  ;;  %v13212_v5 = vpop.f32.mrb[195].mxu0  ;;  %13509 = vmatmul.mubr.msk.f32.gmra.mrb[44].mxu0 %vm4866_vm3, %v6812_v8  ;;  %v6814_v10 = vld [vmem:[#allocation2 + $0x122] sm:$0xff] }
 0x58d   : > { %13511 = vmatprep.mubr.msk.f32.mxu0 %vm14273_vm1, %v20674_v63  ;;  %v5808_v59 = vpop.f32.mrb[114].mxu1 }
 0x58e   : > { %v13084_v39 = vpop.f32.mrb[115].mxu1  ;;  %13381 = vmatmul.mubr.msk.f32.gmra.mrb[220].mxu1 %vm4866_vm3, %v6811_v56 }
 0x58f   : > { %v6201_v46 = vpop.f32.mrb[196].mxu0  ;;  %13383 = vmatprep.mubr.msk.f32.mxu1 %vm14273_vm1, %v20674_v63 }
 0x590   : > { %v18198_v9 = vadd.f32 %v6201_v46, %v5808_v59  ;;  %v13215_v20 = vpop.f32.mrb[197].mxu0  ;;  %13512 = vmatmul.mubr.msk.f32.gmra.mrb[46].mxu0 %vm4866_vm3, %v6813_v24  ;;  %v6815_v46 = vld [vmem:[#allocation2 + $0x12a] sm:$0xff] }
 0x591   : > { %13514 = vmatprep.mubr.msk.f32.mxu0 %vm14273_vm1, %v20674_v63  ;;  %v5813_v49 = vpop.f32.mrb[116].mxu1 }
 0x592   : > { %v13087_v45 = vpop.f32.mrb[117].mxu1  ;;  %13384 = vmatmul.mubr.msk.f32.gmra.mrb[222].mxu1 %vm4866_vm3, %v6812_v8 }
 0x593   : > { %v6206_v26 = vpop.f32.mrb[198].mxu0  ;;  %13386 = vmatprep.mubr.msk.f32.mxu1 %vm14273_vm1, %v20674_v63 }
 0x594   : > { %v18206_v5 = vadd.f32 %v6206_v26, %v5813_v49  ;;  %v13218_v59 = vpop.f32.mrb[199].mxu0  ;;  %13515 = vmatmul.mubr.msk.f32.gmra.mrb[48].mxu0 %vm4866_vm3, %v6814_v10  ;;  %v6816_v26 = vld [vmem:[#allocation2 + $0x132] sm:$0xff] }
 0x595   : > { %13517 = vmatprep.mubr.msk.f32.mxu0 %vm14273_vm1, %v20674_v63  ;;  %v5818_v39 = vpop.f32.mrb[118].mxu1 }
 0x596   : > { %v13090_v31 = vpop.f32.mrb[119].mxu1  ;;  %13387 = vmatmul.mubr.msk.f32.gmra.mrb[224].mxu1 %vm4866_vm3, %v6813_v24 }
 0x597   : > { %v6211_v56 = vpop.f32.mrb[200].mxu0  ;;  %13389 = vmatprep.mubr.msk.f32.mxu1 %vm14273_vm1, %v20674_v63 }
 0x598   : > { %v18214_v20 = vadd.f32 %v6211_v56, %v5818_v39  ;;  %v13221_v49 = vpop.f32.mrb[201].mxu0  ;;  %13518 = vmatmul.mubr.msk.f32.gmra.mrb[50].mxu0 %vm4866_vm3, %v6815_v46  ;;  %v6817_v56 = vld [vmem:[#allocation2 + $0x13a] sm:$0xff] }
 0x599   : > { %13520 = vmatprep.mubr.msk.f32.mxu0 %vm14273_vm1, %v20674_v63  ;;  %v5823_v45 = vpop.f32.mrb[120].mxu1 }
 0x59a   : > { %v13093_v14 = vpop.f32.mrb[121].mxu1  ;;  %13390 = vmatmul.mubr.msk.f32.gmra.mrb[226].mxu1 %vm4866_vm3, %v6814_v10 }
 0x59b   : > { %v6216_v8 = vpop.f32.mrb[202].mxu0  ;;  %13392 = vmatprep.mubr.msk.f32.mxu1 %vm14273_vm1, %v20674_v63 }
 0x59c   : > { %v18222_v59 = vadd.f32 %v6216_v8, %v5823_v45  ;;  %v13224_v39 = vpop.f32.mrb[203].mxu0  ;;  %13521 = vmatmul.mubr.msk.f32.gmra.mrb[52].mxu0 %vm4866_vm3, %v6816_v26  ;;  %v6818_v8 = vld [vmem:[#allocation2 + $0x142] sm:$0xff] }
 0x59d   : > { %13523 = vmatprep.mubr.msk.f32.mxu0 %vm14273_vm1, %v20674_v63  ;;  %v5828_v31 = vpop.f32.mrb[122].mxu1 }
 0x59e   : > { %v13096_v58 = vpop.f32.mrb[123].mxu1  ;;  %13393 = vmatmul.mubr.msk.f32.gmra.mrb[228].mxu1 %vm4866_vm3, %v6815_v46 }
 0x59f   : > { %v6221_v24 = vpop.f32.mrb[204].mxu0  ;;  %13395 = vmatprep.mubr.msk.f32.mxu1 %vm14273_vm1, %v20674_v63 }
 0x5a0   : > { %v18230_v49 = vadd.f32 %v6221_v24, %v5828_v31  ;;  %v13227_v45 = vpop.f32.mrb[205].mxu0  ;;  %13524 = vmatmul.mubr.msk.f32.gmra.mrb[54].mxu0 %vm4866_vm3, %v6817_v56  ;;  %v6819_v24 = vld [vmem:[#allocation2 + $0x14a] sm:$0xff] }
 0x5a1   : > { %13526 = vmatprep.mubr.msk.f32.mxu0 %vm14273_vm1, %v20674_v63  ;;  %v5833_v14 = vpop.f32.mrb[124].mxu1 }
 0x5a2   : > { %v13099_v48 = vpop.f32.mrb[125].mxu1  ;;  %13396 = vmatmul.mubr.msk.f32.gmra.mrb[230].mxu1 %vm4866_vm3, %v6816_v26  ;;  %v10966_v26 = vld [vmem:[%s20358_s4 + $0xc8] sm:$0xff] }
 0x5a3   : > { %v6226_v10 = vpop.f32.mrb[206].mxu0  ;;  %13398 = vmatprep.mubr.msk.f32.mxu1 %vm14273_vm1, %v20674_v63  ;;  %v10965_v48 = vld [vmem:[%s20358_s4 + $0xc0] sm:$0xff] }
 0x5a4   : > { %v18238_v39 = vadd.f32 %v6226_v10, %v5833_v14  ;;  %v13230_v31 = vpop.f32.mrb[207].mxu0  ;;  %13527 = vmatmul.mubr.msk.f32.gmra.mrb[56].mxu0 %vm4866_vm3, %v6818_v8  ;;  %v6340_v8 = vld [vmem:[#allocation2 + $0x142] sm:$0xf] }
 0x5a5   : > { %13529 = vmatprep.mubr.msk.f32.mxu0 %vm14273_vm1, %v20674_v63  ;;  %v5838_v58 = vpop.f32.mrb[126].mxu1 }
 0x5a6   : > { %v13102_v33 = vpop.f32.mrb[127].mxu1  ;;  %13399 = vmatmul.mubr.msk.f32.gmra.mrb[232].mxu1 %vm4866_vm3, %v6817_v56  ;;  %v6820_v56 = vld [vmem:[#allocation2 + $0x152] sm:$0xf] }
 0x5a7   : > { %v6231_v46 = vpop.f32.mrb[208].mxu0  ;;  %13401 = vmatprep.mubr.msk.f32.mxu1 %vm14273_vm1, %v20674_v63 }
 0x5a8   : > { %v18246_v45 = vadd.f32 %v6231_v46, %v5838_v58  ;;  %v13233_v14 = vpop.f32.mrb[209].mxu0  ;;  %13530 = vmatmul.mubr.msk.f32.gmra.mrb[58].mxu0 %vm4866_vm3, %v6819_v24  ;;  %v14227_v24 = vpack.c.bf16 %v10966_v26, %v10965_v48 }
 0x5a9   : > { %13532 = vmatprep.mubr.msk.f32.mxu0 %vm14273_vm1, %v20674_v63  ;;  %v5843_v33 = vpop.f32.mrb[128].mxu1  ;;  %v7260_v14 = vld [vmem:[#allocation2 + $0x13] sm:$0xff] }
 0x5aa   : > { %v13105_v58 = vpop.f32.mrb[129].mxu1  ;;  %13402 = vmatmul.mubr.msk.f32.gmra.mrb[234].mxu1 %vm4866_vm3, %v6340_v8 }
 0x5ab   : > { %v6236_v10 = vpop.f32.mrb[210].mxu0  ;;  %13543 = vmatprep.mubr.msk.f32.mxu1 %vm14273_vm1, %v20674_v63 }
 0x5ac   : > { %v18260_v31 = vadd.f32 %v6236_v10, %v5843_v33  ;;  %v13236_v46 = vpop.f32.mrb[211].mxu0  ;;  %13533 = vmatmul.mubr.msk.f32.gmra.mrb[60].mxu0 %vm4866_vm3, %v6820_v56  ;;  %v10967_v33 = vld [vmem:[%s20358_s4 + $0xd0] sm:$0xff]  ;;  %v10968_v10 = vld [vmem:[%s20358_s4 + $0xd8] sm:$0xff] }
 0x5ad   : > { %13674 = vmatprep.mubr.msk.f32.mxu0 %vm14273_vm1, %v20674_v63  ;;  %v5848_v54 = vpop.f32.mrb[130].mxu1  ;;  %v14230_v48 = vpack.c.bf16 %v10968_v10, %v10967_v33  ;;  %v7262_v33 = vld [vmem:[#allocation2 + $0x23] sm:$0xff] }
 0x5ae   : > { %v13108_v56 = vpop.f32.mrb[131].mxu1  ;;  %13544 = vmatmul.mubr.msk.f32.vlgmr.msra.gmra.mrb[236].mxu1 %vm4866_vm3, %v7260_v14  ;;  %v18291_v10 = vld [vmem:[#allocation2 + $0x24] sm:$0xff] }
 0x5af   : > { %v6241_v37 = vpop.f32.mrb[212].mxu0  ;;  %14228 = vmatpush3.bf16.msra.mxu1 %v14227_v24  ;;  %13546 = vmatprep.mubr.msk.f32.mxu1 %vm14273_vm1, %v20674_v63 }
 0x5b0   : > { %v18274_v8 = vadd.f32 %v6241_v37, %v5848_v54  ;;  %v13239_v58 = vpop.f32.mrb[213].mxu0  ;;  %13675 = vmatmul.mubr.msk.f32.vlgmr.msra.gmra.mrb[62].mxu0 %vm4866_vm3, %v7740_v34  ;;  %14229 = vmatprep.subr.bf16.mxu1 %v20675_v57  ;;  %v7261_v54 = vld [vmem:[#allocation2 + $0x1b] sm:$0xff] }
 0x5b1   : > { %13677 = vmatprep.mubr.msk.f32.mxu0 %vm14273_vm1, %v20674_v63  ;;  %v5853_v26 = vpop.f32.mrb[132].mxu1  ;;  %v7741_v37 = vld [vmem:[#allocation2 + $0x1c] sm:$0xff] }
 0x5b2   : > { %v13111_v58 = vpop.f32.mrb[133].mxu1  ;;  %13547 = vmatmul.mubr.msk.f32.gmra.mrb[238].mxu1 %vm4866_vm3, %v7261_v54 }
 0x5b3   : > { %v6246_v46 = vpop.f32.mrb[214].mxu0  ;;  %13549 = vmatprep.mubr.msk.f32.mxu1 %vm14273_vm1, %v20674_v63  ;;  %14231 = vmatpush3.bf16.msra.mxu1 %v14230_v48  ;;  %v7263_v58 = vld [vmem:[#allocation2 + $0x2b] sm:$0xff] }
 0x5b4   : > { %v18283_v56 = vadd.f32 %v6246_v46, %v5853_v26  ;;  %v13242_v14 = vpop.f32.mrb[215].mxu0  ;;  %13678 = vmatmul.mubr.msk.f32.gmra.mrb[64].mxu0 %vm4866_vm3, %v7741_v37  ;;  %14238 = vmatprep.subr.bf16.mxu1 %v20675_v57 }
 0x5b5   : > { %13680 = vmatprep.mubr.msk.f32.mxu0 %vm14273_vm1, %v20674_v63  ;;  %v5858_v34 = vpop.f32.mrb[134].mxu1  ;;  %v18303_v14 = vld [vmem:[#allocation2 + $0x2c] sm:$0xff] }
 0x5b6   : > { %v13114_v46 = vpop.f32.mrb[135].mxu1  ;;  %13550 = vmatmul.mubr.msk.f32.gmra.mrb[240].mxu1 %vm4866_vm3, %v7262_v33 }
 0x5b7   : > { %v6251_v24 = vpop.f32.mrb[216].mxu0  ;;  %13552 = vmatprep.mubr.msk.f32.mxu1 %vm14273_vm1, %v20674_v63 }
 0x5b8   : > { %v18294_v26 = vadd.f32 %v6251_v24, %v5858_v34  ;;  %v13245_v54 = vpop.f32.mrb[217].mxu0  ;;  %13681 = vmatmul.mubr.msk.f32.gmra.mrb[66].mxu0 %vm4866_vm3, %v18291_v10 }
 0x5b9   : > { %13683 = vmatprep.mubr.msk.f32.mxu0 %vm14273_vm1, %v20674_v63  ;;  %v5863_v48 = vpop.f32.mrb[136].mxu1 }
 0x5ba   : > { %v13117_v24 = vpop.f32.mrb[137].mxu1  ;;  %13553 = vmatmul.mubr.msk.f32.gmra.mrb[242].mxu1 %vm4866_vm3, %v7263_v58 }
 0x5bb   : > { %v6256_v37 = vpop.f32.mrb[218].mxu0  ;;  %13555 = vmatprep.mubr.msk.f32.mxu1 %vm14273_vm1, %v20674_v63 }
 0x5bc   : > { %v18305_v34 = vadd.f32 %v6256_v37, %v5863_v48  ;;  %v13248_v46 = vpop.f32.mrb[219].mxu0  ;;  %13684 = vmatmul.mubr.msk.f32.gmra.mrb[68].mxu0 %vm4866_vm3, %v18303_v14 }
 0x5bd   : > { %13686 = vmatprep.mubr.msk.f32.mxu0 %vm14273_vm1, %v20674_v63  ;;  %v5868_v33 = vpop.f32.mrb[138].mxu1 }
 0x5be   : > { %v13120_v37 = vpop.f32.mrb[139].mxu1  ;;  %13556 = vmatmul.mubr.msk.f32.gmra.mrb[244].mxu1 %vm4866_vm3, %v7264_v42 }
 0x5bf   : > { %v6261_v54 = vpop.f32.mrb[220].mxu0  ;;  %13558 = vmatprep.mubr.msk.f32.mxu1 %vm14273_vm1, %v20674_v63 }
 0x5c0   : > { %v18316_v48 = vadd.f32 %v6261_v54, %v5868_v33  ;;  %v13251_v24 = vpop.f32.mrb[221].mxu0  ;;  %13687 = vmatmul.mubr.msk.f32.gmra.mrb[70].mxu0 %vm4866_vm3, %v18314_v21 }
 0x5c1   : > { %13689 = vmatprep.mubr.msk.f32.mxu0 %vm14273_vm1, %v20674_v63  ;;  %v5873_v58 = vpop.f32.mrb[140].mxu1 }
 0x5c2   : > { %v13123_v54 = vpop.f32.mrb[141].mxu1  ;;  %13559 = vmatmul.mubr.msk.f32.gmra.mrb[246].mxu1 %vm4866_vm3, %v7265_v6 }
 0x5c3   : > { %v6266_v46 = vpop.f32.mrb[222].mxu0  ;;  %13561 = vmatprep.mubr.msk.f32.mxu1 %vm14273_vm1, %v20674_v63 }
 0x5c4   : > { %v18327_v33 = vadd.f32 %v6266_v46, %v5873_v58  ;;  %v13254_v37 = vpop.f32.mrb[223].mxu0  ;;  %13690 = vmatmul.mubr.msk.f32.gmra.mrb[72].mxu0 %vm4866_vm3, %v18325_v55 }
 0x5c5   : > { %13692 = vmatprep.mubr.msk.f32.mxu0 %vm14273_vm1, %v20674_v63  ;;  %v5878_v42 = vpop.f32.mrb[142].mxu1 }
 0x5c6   : > { %v13126_v46 = vpop.f32.mrb[143].mxu1  ;;  %13562 = vmatmul.mubr.msk.f32.gmra.mrb[248].mxu1 %vm4866_vm3, %v7266_v0  ;;  %v11010_v0 = vld [vmem:[%s20358_s4 + $0xe0] sm:$0xff] }
 0x5c7   : > { %v6271_v24 = vpop.f32.mrb[224].mxu0  ;;  %13564 = vmatprep.mubr.msk.f32.mxu1 %vm14273_vm1, %v20674_v63 }
 0x5c8   : > { %v18338_v58 = vadd.f32 %v6271_v24, %v5878_v42  ;;  %v13257_v54 = vpop.f32.mrb[225].mxu0  ;;  %13693 = vmatmul.mubr.msk.f32.gmra.mrb[74].mxu0 %vm4866_vm3, %v18336_v27 }
 0x5c9   : > { %13695 = vmatprep.mubr.msk.f32.mxu0 %vm14273_vm1, %v20674_v63  ;;  %v5883_v6 = vpop.f32.mrb[144].mxu1  ;;  %v11011_v54 = vld [vmem:[%s20358_s4 + $0xe8] sm:$0xff] }
 0x5ca   : > { %v13129_v24 = vpop.f32.mrb[145].mxu1  ;;  %13565 = vmatmul.mubr.msk.f32.gmra.mrb[250].mxu1 %vm4866_vm3, %v7267_v29  ;;  %v7268_v29 = vld [vmem:[#allocation2 + $0x53] sm:$0xff] }
 0x5cb   : > { %v6276_v37 = vpop.f32.mrb[226].mxu0  ;;  %13567 = vmatprep.mubr.msk.f32.mxu1 %vm14273_vm1, %v20674_v63  ;;  %v18364_v24 = vld [vmem:[#allocation2 + $0x54] sm:$0xff] }
 0x5cc   : > { %v18349_v42 = vadd.f32 %v6276_v37, %v5883_v6  ;;  %v13260_v46 = vpop.f32.mrb[227].mxu0  ;;  %13696 = vmatmul.mubr.msk.f32.gmra.mrb[76].mxu0 %vm4866_vm3, %v18347_v13 }
 0x5cd   : > { %13698 = vmatprep.mubr.msk.f32.mxu0 %vm14273_vm1, %v20674_v63  ;;  %v5888_v6 = vpop.f32.mrb[146].mxu1  ;;  %v14233_v46 = vpack.c.bf16 %v11011_v54, %v11010_v0  ;;  %v11012_v0 = vld [vmem:[%s20358_s4 + $0xf0] sm:$0xff] }
 0x5ce   : > { %v13132_v62 = vpop.f32.mrb[147].mxu1  ;;  %13568 = vmatmul.mubr.msk.f32.gmra.mrb[252].mxu1 %vm4866_vm3, %v7268_v29 }
 0x5cf   : > { %v6281_v37 = vpop.f32.mrb[228].mxu0  ;;  %13570 = vmatprep.mubr.msk.f32.mxu1 %vm14273_vm1, %v20674_v63  ;;  %14234 = vmatpush3.bf16.msra.mxu0 %v14233_v46  ;;  %v11013_v62 = vld [vmem:[%s20358_s4 + $0xf8] sm:$0xff] }
 0x5d0   : > { %v18366_v38 = vadd.f32 %v6281_v37, %v5888_v6  ;;  %v13263_v12 = vpop.f32.mrb[229].mxu0  ;;  %13699 = vmatmul.mubr.msk.f32.gmra.mrb[78].mxu0 %vm4866_vm3, %v18364_v24  ;;  %v7269_v6 = vld [vmem:[#allocation2 + $0x5b] sm:$0xff]  ;;  %14235 = vmatprep.subr.bf16.mxu0 %v20675_v57  ;;  %v14236_v29 = vpack.c.bf16 %v11013_v62, %v11012_v0  ;;  %v18393_v0 = vld [vmem:[#allocation2 + $0x64] sm:$0xff] }
 0x5d1   : > { %13701 = vmatprep.mubr.msk.f32.mxu0 %vm14273_vm1, %v20674_v63  ;;  %v5893_v12 = vpop.f32.mrb[148].mxu1  ;;  %v18381_v37 = vld [vmem:[#allocation2 + $0x5c] sm:$0xff] }
 0x5d2   : > { %v13135_v32 = vpop.f32.mrb[149].mxu1  ;;  %13571 = vmatmul.mubr.msk.f32.gmra.mrb[254].mxu1 %vm4866_vm3, %v7269_v6 }
 0x5d3   : > { %v6286_v54 = vpop.f32.mrb[230].mxu0  ;;  %13573 = vmatprep.mubr.msk.f32.mxu1 %vm14273_vm1, %v20674_v63  ;;  %14237 = vmatpush3.bf16.msra.mxu0 %v14236_v29  ;;  %v7271_v29 = vld [vmem:[#allocation2 + $0x6b] sm:$0xff] }
 0x5d4   : > { %v18384_v61 = vadd.f32 %v6286_v54, %v5893_v12  ;;  %v13266_v46 = vpop.f32.mrb[231].mxu0  ;;  %13702 = vmatmul.mubr.msk.f32.gmra.mrb[80].mxu0 %vm4866_vm3, %v18381_v37 }
 0x5d5   : > { %13704 = vmatprep.mubr.msk.f32.mxu0 %vm14273_vm1, %v20674_v63  ;;  %v5898_v17 = vpop.f32.mrb[150].mxu1  ;;  %v18404_v46 = vld [vmem:[#allocation2 + $0x6c] sm:$0xff] }
 0x5d6   : > { %v13138_v32 = vpop.f32.mrb[151].mxu1  ;;  %13574 = vmatmul.mubr.msk.f32.gmra.mrb[0].mxu1 %vm4866_vm3, %v7270_v44 }
 0x5d7   : > { %v6291_v36 = vpop.f32.mrb[232].mxu0  ;;  %13576 = vmatprep.mubr.msk.f32.mxu1 %vm14273_vm1, %v20674_v63 }
 0x5d8   : > { %v18395_v62 = vadd.f32 %v6291_v36, %v5898_v17  ;;  %v13269_v12 = vpop.f32.mrb[233].mxu0  ;;  %13705 = vmatmul.mubr.msk.f32.gmra.mrb[82].mxu0 %vm4866_vm3, %v18393_v0 }
 0x5d9   : > { %13707 = vmatprep.mubr.msk.f32.mxu0 %vm14273_vm1, %v20674_v63  ;;  %v5903_v54 = vpop.f32.mrb[152].mxu1 }
 0x5da   : > { %v13141_v17 = vpop.f32.mrb[153].mxu1  ;;  %13577 = vmatmul.mubr.msk.f32.gmra.mrb[2].mxu1 %vm4866_vm3, %v7271_v29 }
 0x5db   : > { %v6296_v6 = vpop.f32.mrb[234].mxu0  ;;  %13579 = vmatprep.mubr.msk.f32.mxu1 %vm14273_vm1, %v20674_v63 }
 0x5dc   : > { %v18406_v36 = vadd.f32 %v6296_v6, %v5903_v54  ;;  %v13272_v32 = vpop.f32.mrb[235].mxu0  ;;  %13708 = vmatmul.mubr.msk.f32.gmra.mrb[84].mxu0 %vm4866_vm3, %v18404_v46 }
 0x5dd   : > { %13710 = vmatprep.mubr.msk.f32.mxu0 %vm14273_vm1, %v20674_v63  ;;  %v6535_v44 = vpop.f32.mrb[154].mxu1 }
 0x5de   : > { %20676 = vst [vmem:[#allocation16_spill] sm:$0xff] %v18406_v36  ;;  %v6739_v54 = vadd.f32 %v6535_v44, %v17828_v41  ;;  %v13283_v6 = vpop.f32.mrb[155].mxu1  ;;  %13580 = vmatmul.mubr.msk.f32.gmra.mrb[4].mxu1 %vm4866_vm3, %v7272_v18  ;;  %v18427_v36 = vld [vmem:[#allocation2 + $0x7c] sm:$0xff] }
 0x5df   : > { %v7015_v12 = vpop.f32.mrb[236].mxu0  ;;  %13582 = vmatprep.mubr.msk.f32.mxu1 %vm14273_vm1, %v20674_v63 }
 0x5e0   : > { %v13414_v17 = vpop.f32.mrb[237].mxu0  ;;  %13711 = vmatmul.mubr.msk.f32.gmra.mrb[86].mxu0 %vm4866_vm3, %v18415_v2  ;;  %v18425_v29 = vadd.f32 %v7015_v12, %v6739_v54 }
 0x5e1   : > { %13713 = vmatprep.mubr.msk.f32.mxu0 %vm14273_vm1, %v20674_v63  ;;  %v6540_v32 = vpop.f32.mrb[156].mxu1  ;;  %v7274_v17 = vld [vmem:[#allocation2 + $0x83] sm:$0xff] }
 0x5e2   : > { %20677 = vst [vmem:[#allocation18_spill] sm:$0xff] %v18425_v29  ;;  %v6740_v41 = vadd.f32 %v6540_v32, %v17836_v47  ;;  %v13286_v44 = vpop.f32.mrb[157].mxu1  ;;  %13583 = vmatmul.mubr.msk.f32.gmra.mrb[6].mxu1 %vm4866_vm3, %v7273_v60  ;;  %v18439_v29 = vld [vmem:[#allocation2 + $0x84] sm:$0xff] }
 0x5e3   : > { %v7020_v4 = vpop.f32.mrb[238].mxu0  ;;  %13585 = vmatprep.mubr.msk.f32.mxu1 %vm14273_vm1, %v20674_v63 }
 0x5e4   : > { %v13417_v18 = vpop.f32.mrb[239].mxu0  ;;  %13714 = vmatmul.mubr.msk.f32.gmra.mrb[88].mxu0 %vm4866_vm3, %v18427_v36  ;;  %v18437_v12 = vadd.f32 %v7020_v4, %v6740_v41 }
 0x5e5   : > { %13716 = vmatprep.mubr.msk.f32.mxu0 %vm14273_vm1, %v20674_v63  ;;  %v6545_v54 = vpop.f32.mrb[158].mxu1  ;;  %v7275_v18 = vld [vmem:[#allocation2 + $0x8b] sm:$0xff] }
 0x5e6   : > { %20678 = vst [vmem:[#allocation20_spill] sm:$0xff] %v18437_v12  ;;  %v6741_v47 = vadd.f32 %v6545_v54, %v18046_v35  ;;  %v13289_v32 = vpop.f32.mrb[159].mxu1  ;;  %13586 = vmatmul.mubr.msk.f32.gmra.mrb[8].mxu1 %vm4866_vm3, %v7274_v17  ;;  %v18451_v12 = vld [vmem:[#allocation2 + $0x8c] sm:$0xff] }
 0x5e7   : > { %v7025_v6 = vpop.f32.mrb[240].mxu0  ;;  %13588 = vmatprep.mubr.msk.f32.mxu1 %vm14273_vm1, %v20674_v63 }
 0x5e8   : > { %v13420_v60 = vpop.f32.mrb[241].mxu0  ;;  %13717 = vmatmul.mubr.msk.f32.gmra.mrb[90].mxu0 %vm4866_vm3, %v18439_v29  ;;  %v18449_v4 = vadd.f32 %v7025_v6, %v6741_v47 }
 0x5e9   : > { %13719 = vmatprep.mubr.msk.f32.mxu0 %vm14273_vm1, %v20674_v63  ;;  %v6550_v41 = vpop.f32.mrb[160].mxu1  ;;  %v7276_v60 = vld [vmem:[#allocation2 + $0x93] sm:$0xff] }
 0x5ea   : > { %20679 = vst [vmem:[#allocation14_spill] sm:$0xff] %v18449_v4  ;;  %v6742_v35 = vadd.f32 %v6550_v41, %v18054_v1  ;;  %v13292_v54 = vpop.f32.mrb[161].mxu1  ;;  %13589 = vmatmul.mubr.msk.f32.gmra.mrb[10].mxu1 %vm4866_vm3, %v7275_v18  ;;  %v18463_v4 = vld [vmem:[#allocation2 + $0x94] sm:$0xff] }
 0x5eb   : > { %v7030_v44 = vpop.f32.mrb[242].mxu0  ;;  %13591 = vmatprep.mubr.msk.f32.mxu1 %vm14273_vm1, %v20674_v63 }
 0x5ec   : > { %v13423_v17 = vpop.f32.mrb[243].mxu0  ;;  %13720 = vmatmul.mubr.msk.f32.gmra.mrb[92].mxu0 %vm4866_vm3, %v18451_v12  ;;  %v18461_v6 = vadd.f32 %v7030_v44, %v6742_v35 }
 0x5ed   : > { %13722 = vmatprep.mubr.msk.f32.mxu0 %vm14273_vm1, %v20674_v63  ;;  %v6555_v47 = vpop.f32.mrb[162].mxu1  ;;  %v7277_v17 = vld [vmem:[#allocation2 + $0x9b] sm:$0xff] }
 0x5ee   : > { %20680 = vst [vmem:[#allocation13_spill] sm:$0xff] %v18461_v6  ;;  %v6743_v1 = vadd.f32 %v6555_v47, %v18062_v53  ;;  %v13295_v41 = vpop.f32.mrb[163].mxu1  ;;  %13592 = vmatmul.mubr.msk.f32.gmra.mrb[12].mxu1 %vm4866_vm3, %v7276_v60  ;;  %v18475_v6 = vld [vmem:[#allocation2 + $0x9c] sm:$0xff] }
 0x5ef   : > { %v7035_v32 = vpop.f32.mrb[244].mxu0  ;;  %13594 = vmatprep.mubr.msk.f32.mxu1 %vm14273_vm1, %v20674_v63 }
 0x5f0   : > { %v13426_v18 = vpop.f32.mrb[245].mxu0  ;;  %13723 = vmatmul.mubr.msk.f32.gmra.mrb[94].mxu0 %vm4866_vm3, %v18463_v4  ;;  %v18473_v44 = vadd.f32 %v7035_v32, %v6743_v1 }
 0x5f1   : > { %13725 = vmatprep.mubr.msk.f32.mxu0 %vm14273_vm1, %v20674_v63  ;;  %v6560_v35 = vpop.f32.mrb[164].mxu1  ;;  %v7278_v18 = vld [vmem:[#allocation2 + $0xa3] sm:$0xff] }
 0x5f2   : > { %20681 = vst [vmem:[#allocation49_spill] sm:$0xff] %v18473_v44  ;;  %v6744_v53 = vadd.f32 %v6560_v35, %v18070_v52  ;;  %v13298_v47 = vpop.f32.mrb[165].mxu1  ;;  %13595 = vmatmul.mubr.msk.f32.gmra.mrb[14].mxu1 %vm4866_vm3, %v7277_v17  ;;  %v18487_v44 = vld [vmem:[#allocation2 + $0xa4] sm:$0xff] }
 0x5f3   : > { %v7040_v54 = vpop.f32.mrb[246].mxu0  ;;  %13597 = vmatprep.mubr.msk.f32.mxu1 %vm14273_vm1, %v20674_v63 }
 0x5f4   : > { %v13429_v60 = vpop.f32.mrb[247].mxu0  ;;  %13726 = vmatmul.mubr.msk.f32.gmra.mrb[96].mxu0 %vm4866_vm3, %v18475_v6  ;;  %v18485_v32 = vadd.f32 %v7040_v54, %v6744_v53 }
 0x5f5   : > { %13728 = vmatprep.mubr.msk.f32.mxu0 %vm14273_vm1, %v20674_v63  ;;  %v6565_v1 = vpop.f32.mrb[166].mxu1  ;;  %v7279_v60 = vld [vmem:[#allocation2 + $0xab] sm:$0xff] }
 0x5f6   : > { %20682 = vst [vmem:[#allocation50_spill] sm:$0xff] %v18485_v32  ;;  %v6745_v52 = vadd.f32 %v6565_v1, %v18078_v19  ;;  %v13301_v35 = vpop.f32.mrb[167].mxu1  ;;  %13598 = vmatmul.mubr.msk.f32.gmra.mrb[16].mxu1 %vm4866_vm3, %v7278_v18  ;;  %v18499_v32 = vld [vmem:[#allocation2 + $0xac] sm:$0xff] }
 0x5f7   : > { %v7045_v41 = vpop.f32.mrb[248].mxu0  ;;  %13600 = vmatprep.mubr.msk.f32.mxu1 %vm14273_vm1, %v20674_v63 }
 0x5f8   : > { %v13432_v17 = vpop.f32.mrb[249].mxu0  ;;  %13729 = vmatmul.mubr.msk.f32.gmra.mrb[98].mxu0 %vm4866_vm3, %v18487_v44  ;;  %v18497_v54 = vadd.f32 %v7045_v41, %v6745_v52 }
 0x5f9   : > { %13731 = vmatprep.mubr.msk.f32.mxu0 %vm14273_vm1, %v20674_v63  ;;  %v6570_v53 = vpop.f32.mrb[168].mxu1  ;;  %v7280_v17 = vld [vmem:[#allocation2 + $0xb3] sm:$0xff] }
 0x5fa   : > { %20683 = vst [vmem:[#allocation51_spill] sm:$0xff] %v18497_v54  ;;  %v6746_v19 = vadd.f32 %v6570_v53, %v18086_v51  ;;  %v13304_v1 = vpop.f32.mrb[169].mxu1  ;;  %13601 = vmatmul.mubr.msk.f32.gmra.mrb[18].mxu1 %vm4866_vm3, %v7279_v60  ;;  %v18511_v54 = vld [vmem:[#allocation2 + $0xb4] sm:$0xff] }
 0x5fb   : > { %v7050_v47 = vpop.f32.mrb[250].mxu0  ;;  %13603 = vmatprep.mubr.msk.f32.mxu1 %vm14273_vm1, %v20674_v63 }
 0x5fc   : > { %v13435_v18 = vpop.f32.mrb[251].mxu0  ;;  %13732 = vmatmul.mubr.msk.f32.gmra.mrb[100].mxu0 %vm4866_vm3, %v18499_v32  ;;  %v18509_v41 = vadd.f32 %v7050_v47, %v6746_v19 }
 0x5fd   : > { %13734 = vmatprep.mubr.msk.f32.mxu0 %vm14273_vm1, %v20674_v63  ;;  %v6575_v52 = vpop.f32.mrb[170].mxu1  ;;  %v7281_v18 = vld [vmem:[#allocation2 + $0xbb] sm:$0xff] }
 0x5fe   : > { %20684 = vst [vmem:[#allocation52_spill] sm:$0xff] %v18509_v41  ;;  %v6747_v51 = vadd.f32 %v6575_v52, %v18094_v40  ;;  %v13307_v53 = vpop.f32.mrb[171].mxu1  ;;  %13604 = vmatmul.mubr.msk.f32.gmra.mrb[20].mxu1 %vm4866_vm3, %v7280_v17  ;;  %v18523_v41 = vld [vmem:[#allocation2 + $0xbc] sm:$0xff] }
 0x5ff   : > { %v7055_v35 = vpop.f32.mrb[252].mxu0  ;;  %13606 = vmatprep.mubr.msk.f32.mxu1 %vm14273_vm1, %v20674_v63 }
 0x600   : > { %v13438_v60 = vpop.f32.mrb[253].mxu0  ;;  %13735 = vmatmul.mubr.msk.f32.gmra.mrb[102].mxu0 %vm4866_vm3, %v18511_v54  ;;  %v18521_v47 = vadd.f32 %v7055_v35, %v6747_v51 }
 0x601   : > { %13737 = vmatprep.mubr.msk.f32.mxu0 %vm14273_vm1, %v20674_v63  ;;  %v6580_v19 = vpop.f32.mrb[172].mxu1  ;;  %v7282_v60 = vld [vmem:[#allocation2 + $0xc3] sm:$0xff] }
 0x602   : > { %20685 = vst [vmem:[#allocation53_spill] sm:$0xff] %v18521_v47  ;;  %v6748_v40 = vadd.f32 %v6580_v19, %v18102_v22  ;;  %v13310_v52 = vpop.f32.mrb[173].mxu1  ;;  %13607 = vmatmul.mubr.msk.f32.gmra.mrb[22].mxu1 %vm4866_vm3, %v7281_v18  ;;  %v18535_v47 = vld [vmem:[#allocation2 + $0xc4] sm:$0xff] }
 0x603   : > { %v7060_v1 = vpop.f32.mrb[254].mxu0  ;;  %13609 = vmatprep.mubr.msk.f32.mxu1 %vm14273_vm1, %v20674_v63 }
 0x604   : > { %v13441_v17 = vpop.f32.mrb[255].mxu0  ;;  %13738 = vmatmul.mubr.msk.f32.gmra.mrb[104].mxu0 %vm4866_vm3, %v18523_v41  ;;  %v18533_v35 = vadd.f32 %v7060_v1, %v6748_v40 }
 0x605   : > { %13740 = vmatprep.mubr.msk.f32.mxu0 %vm14273_vm1, %v20674_v63  ;;  %v6585_v51 = vpop.f32.mrb[174].mxu1  ;;  %v7283_v17 = vld [vmem:[#allocation2 + $0xcb] sm:$0xff] }
 0x606   : > { %20686 = vst [vmem:[#allocation54_spill] sm:$0xff] %v18533_v35  ;;  %v6749_v22 = vadd.f32 %v6585_v51, %v18110_v3  ;;  %v13313_v19 = vpop.f32.mrb[175].mxu1  ;;  %13610 = vmatmul.mubr.msk.f32.gmra.mrb[24].mxu1 %vm4866_vm3, %v7282_v60  ;;  %v18547_v35 = vld [vmem:[#allocation2 + $0xcc] sm:$0xff] }
 0x607   : > { %v7065_v53 = vpop.f32.mrb[0].mxu0  ;;  %13612 = vmatprep.mubr.msk.f32.mxu1 %vm14273_vm1, %v20674_v63 }
 0x608   : > { %v13444_v18 = vpop.f32.mrb[1].mxu0  ;;  %13741 = vmatmul.mubr.msk.f32.gmra.mrb[106].mxu0 %vm4866_vm3, %v18535_v47  ;;  %v18545_v1 = vadd.f32 %v7065_v53, %v6749_v22 }
 0x609   : > { %13743 = vmatprep.mubr.msk.f32.mxu0 %vm14273_vm1, %v20674_v63  ;;  %v6590_v40 = vpop.f32.mrb[176].mxu1  ;;  %v7284_v18 = vld [vmem:[#allocation2 + $0xd3] sm:$0xff] }
 0x60a   : > { %20687 = vst [vmem:[#allocation55_spill] sm:$0xff] %v18545_v1  ;;  %v6750_v3 = vadd.f32 %v6590_v40, %v18118_v16  ;;  %v13316_v51 = vpop.f32.mrb[177].mxu1  ;;  %13613 = vmatmul.mubr.msk.f32.gmra.mrb[26].mxu1 %vm4866_vm3, %v7283_v17  ;;  %v18559_v1 = vld [vmem:[#allocation2 + $0xd4] sm:$0xff] }
 0x60b   : > { %v7070_v52 = vpop.f32.mrb[2].mxu0  ;;  %13615 = vmatprep.mubr.msk.f32.mxu1 %vm14273_vm1, %v20674_v63 }
 0x60c   : > { %v13447_v60 = vpop.f32.mrb[3].mxu0  ;;  %13744 = vmatmul.mubr.msk.f32.gmra.mrb[108].mxu0 %vm4866_vm3, %v18547_v35  ;;  %v18557_v53 = vadd.f32 %v7070_v52, %v6750_v3 }
 0x60d   : > { %13746 = vmatprep.mubr.msk.f32.mxu0 %vm14273_vm1, %v20674_v63  ;;  %v6595_v22 = vpop.f32.mrb[178].mxu1  ;;  %v7285_v60 = vld [vmem:[#allocation2 + $0xdb] sm:$0xff] }
 0x60e   : > { %20688 = vst [vmem:[#allocation56_spill] sm:$0xff] %v18557_v53  ;;  %v6751_v16 = vadd.f32 %v6595_v22, %v18126_v15  ;;  %v13319_v40 = vpop.f32.mrb[179].mxu1  ;;  %13616 = vmatmul.mubr.msk.f32.gmra.mrb[28].mxu1 %vm4866_vm3, %v7284_v18  ;;  %v18571_v53 = vld [vmem:[#allocation2 + $0xdc] sm:$0xff] }
 0x60f   : > { %v7075_v19 = vpop.f32.mrb[4].mxu0  ;;  %13618 = vmatprep.mubr.msk.f32.mxu1 %vm14273_vm1, %v20674_v63 }
 0x610   : > { %v13450_v17 = vpop.f32.mrb[5].mxu0  ;;  %13747 = vmatmul.mubr.msk.f32.gmra.mrb[110].mxu0 %vm4866_vm3, %v18559_v1  ;;  %v18569_v52 = vadd.f32 %v7075_v19, %v6751_v16 }
 0x611   : > { %13749 = vmatprep.mubr.msk.f32.mxu0 %vm14273_vm1, %v20674_v63  ;;  %v6600_v3 = vpop.f32.mrb[180].mxu1  ;;  %v7286_v17 = vld [vmem:[#allocation2 + $0xe3] sm:$0xff] }
 0x612   : > { %20689 = vst [vmem:[#allocation57_spill] sm:$0xff] %v18569_v52  ;;  %v6752_v15 = vadd.f32 %v6600_v3, %v18134_v50  ;;  %v13322_v22 = vpop.f32.mrb[181].mxu1  ;;  %13619 = vmatmul.mubr.msk.f32.gmra.mrb[30].mxu1 %vm4866_vm3, %v7285_v60  ;;  %v18583_v52 = vld [vmem:[#allocation2 + $0xe4] sm:$0xff] }
 0x613   : > { %v7080_v51 = vpop.f32.mrb[6].mxu0  ;;  %13621 = vmatprep.mubr.msk.f32.mxu1 %vm14273_vm1, %v20674_v63 }
 0x614   : > { %v13453_v18 = vpop.f32.mrb[7].mxu0  ;;  %13750 = vmatmul.mubr.msk.f32.gmra.mrb[112].mxu0 %vm4866_vm3, %v18571_v53  ;;  %v18581_v19 = vadd.f32 %v7080_v51, %v6752_v15 }
 0x615   : > { %13752 = vmatprep.mubr.msk.f32.mxu0 %vm14273_vm1, %v20674_v63  ;;  %v6605_v16 = vpop.f32.mrb[182].mxu1  ;;  %v7287_v18 = vld [vmem:[#allocation2 + $0xeb] sm:$0xff] }
 0x616   : > { %20690 = vst [vmem:[#allocation58_spill] sm:$0xff] %v18581_v19  ;;  %v6753_v50 = vadd.f32 %v6605_v16, %v18142_v25  ;;  %v13325_v3 = vpop.f32.mrb[183].mxu1  ;;  %13622 = vmatmul.mubr.msk.f32.gmra.mrb[32].mxu1 %vm4866_vm3, %v7286_v17  ;;  %v18595_v19 = vld [vmem:[#allocation2 + $0xec] sm:$0xff] }
 0x617   : > { %v7085_v40 = vpop.f32.mrb[8].mxu0  ;;  %13624 = vmatprep.mubr.msk.f32.mxu1 %vm14273_vm1, %v20674_v63 }
 0x618   : > { %v13456_v60 = vpop.f32.mrb[9].mxu0  ;;  %13753 = vmatmul.mubr.msk.f32.gmra.mrb[114].mxu0 %vm4866_vm3, %v18583_v52  ;;  %v18593_v51 = vadd.f32 %v7085_v40, %v6753_v50 }
 0x619   : > { %13755 = vmatprep.mubr.msk.f32.mxu0 %vm14273_vm1, %v20674_v63  ;;  %v6610_v15 = vpop.f32.mrb[184].mxu1  ;;  %v7288_v60 = vld [vmem:[#allocation2 + $0xf3] sm:$0xff] }
 0x61a   : > { %20691 = vst [vmem:[#allocation59_spill] sm:$0xff] %v18593_v51  ;;  %v6754_v25 = vadd.f32 %v6610_v15, %v18150_v23  ;;  %v13328_v16 = vpop.f32.mrb[185].mxu1  ;;  %13625 = vmatmul.mubr.msk.f32.gmra.mrb[34].mxu1 %vm4866_vm3, %v7287_v18  ;;  %v18607_v51 = vld [vmem:[#allocation2 + $0xf4] sm:$0xff] }
 0x61b   : > { %v7090_v22 = vpop.f32.mrb[10].mxu0  ;;  %13627 = vmatprep.mubr.msk.f32.mxu1 %vm14273_vm1, %v20674_v63 }
 0x61c   : > { %v13459_v17 = vpop.f32.mrb[11].mxu0  ;;  %13756 = vmatmul.mubr.msk.f32.gmra.mrb[116].mxu0 %vm4866_vm3, %v18595_v19  ;;  %v18605_v40 = vadd.f32 %v7090_v22, %v6754_v25 }
 0x61d   : > { %13758 = vmatprep.mubr.msk.f32.mxu0 %vm14273_vm1, %v20674_v63  ;;  %v6615_v50 = vpop.f32.mrb[186].mxu1  ;;  %v7289_v17 = vld [vmem:[#allocation2 + $0xfb] sm:$0xff] }
 0x61e   : > { %20692 = vst [vmem:[#allocation60_spill] sm:$0xff] %v18605_v40  ;;  %v6755_v23 = vadd.f32 %v6615_v50, %v18158_v11  ;;  %v13331_v15 = vpop.f32.mrb[187].mxu1  ;;  %13628 = vmatmul.mubr.msk.f32.gmra.mrb[36].mxu1 %vm4866_vm3, %v7288_v60  ;;  %v18619_v40 = vld [vmem:[#allocation2 + $0xfc] sm:$0xff] }
 0x61f   : > { %v7095_v3 = vpop.f32.mrb[12].mxu0  ;;  %13630 = vmatprep.mubr.msk.f32.mxu1 %vm14273_vm1, %v20674_v63 }
 0x620   : > { %v13462_v18 = vpop.f32.mrb[13].mxu0  ;;  %13759 = vmatmul.mubr.msk.f32.gmra.mrb[118].mxu0 %vm4866_vm3, %v18607_v51  ;;  %v18617_v22 = vadd.f32 %v7095_v3, %v6755_v23 }
 0x621   : > { %13761 = vmatprep.mubr.msk.f32.mxu0 %vm14273_vm1, %v20674_v63  ;;  %v6620_v25 = vpop.f32.mrb[188].mxu1  ;;  %v7290_v18 = vld [vmem:[#allocation2 + $0x103] sm:$0xff] }
 0x622   : > { %20693 = vst [vmem:[#allocation61_spill] sm:$0xff] %v18617_v22  ;;  %v6756_v11 = vadd.f32 %v6620_v25, %v18166_v30  ;;  %v13334_v50 = vpop.f32.mrb[189].mxu1  ;;  %13631 = vmatmul.mubr.msk.f32.gmra.mrb[38].mxu1 %vm4866_vm3, %v7289_v17  ;;  %v18631_v22 = vld [vmem:[#allocation2 + $0x104] sm:$0xff] }
 0x623   : > { %v7100_v16 = vpop.f32.mrb[14].mxu0  ;;  %13633 = vmatprep.mubr.msk.f32.mxu1 %vm14273_vm1, %v20674_v63 }
 0x624   : > { %v13465_v60 = vpop.f32.mrb[15].mxu0  ;;  %13762 = vmatmul.mubr.msk.f32.gmra.mrb[120].mxu0 %vm4866_vm3, %v18619_v40  ;;  %v18629_v3 = vadd.f32 %v7100_v16, %v6756_v11 }
 0x625   : > { %13764 = vmatprep.mubr.msk.f32.mxu0 %vm14273_vm1, %v20674_v63  ;;  %v6625_v23 = vpop.f32.mrb[190].mxu1  ;;  %v7291_v60 = vld [vmem:[#allocation2 + $0x10b] sm:$0xff] }
 0x626   : > { %20694 = vst [vmem:[#allocation62_spill] sm:$0xff] %v18629_v3  ;;  %v6757_v30 = vadd.f32 %v6625_v23, %v18174_v43  ;;  %v13337_v25 = vpop.f32.mrb[191].mxu1  ;;  %13634 = vmatmul.mubr.msk.f32.gmra.mrb[40].mxu1 %vm4866_vm3, %v7290_v18  ;;  %v18643_v3 = vld [vmem:[#allocation2 + $0x10c] sm:$0xff] }
 0x627   : > { %v7105_v15 = vpop.f32.mrb[16].mxu0  ;;  %13636 = vmatprep.mubr.msk.f32.mxu1 %vm14273_vm1, %v20674_v63 }
 0x628   : > { %v13468_v17 = vpop.f32.mrb[17].mxu0  ;;  %13765 = vmatmul.mubr.msk.f32.gmra.mrb[122].mxu0 %vm4866_vm3, %v18631_v22  ;;  %v18641_v16 = vadd.f32 %v7105_v15, %v6757_v30 }
 0x629   : > { %13767 = vmatprep.mubr.msk.f32.mxu0 %vm14273_vm1, %v20674_v63  ;;  %v6630_v11 = vpop.f32.mrb[192].mxu1  ;;  %v7292_v17 = vld [vmem:[#allocation2 + $0x113] sm:$0xff] }
 0x62a   : > { %20695 = vst [vmem:[#allocation63_spill] sm:$0xff] %v18641_v16  ;;  %v6758_v43 = vadd.f32 %v6630_v11, %v18182_v28  ;;  %v13340_v23 = vpop.f32.mrb[193].mxu1  ;;  %13637 = vmatmul.mubr.msk.f32.gmra.mrb[42].mxu1 %vm4866_vm3, %v7291_v60  ;;  %v18655_v16 = vld [vmem:[#allocation2 + $0x114] sm:$0xff] }
 0x62b   : > { %v7110_v50 = vpop.f32.mrb[18].mxu0  ;;  %13639 = vmatprep.mubr.msk.f32.mxu1 %vm14273_vm1, %v20674_v63 }
 0x62c   : > { %v13471_v18 = vpop.f32.mrb[19].mxu0  ;;  %13768 = vmatmul.mubr.msk.f32.gmra.mrb[124].mxu0 %vm4866_vm3, %v18643_v3  ;;  %v18653_v15 = vadd.f32 %v7110_v50, %v6758_v43 }
 0x62d   : > { %13770 = vmatprep.mubr.msk.f32.mxu0 %vm14273_vm1, %v20674_v63  ;;  %v6635_v30 = vpop.f32.mrb[194].mxu1  ;;  %v7293_v18 = vld [vmem:[#allocation2 + $0x11b] sm:$0xff] }
 0x62e   : > { %20696 = vst [vmem:[#allocation64_spill] sm:$0xff] %v18653_v15  ;;  %v6759_v28 = vadd.f32 %v6635_v30, %v18190_v7  ;;  %v13343_v11 = vpop.f32.mrb[195].mxu1  ;;  %13640 = vmatmul.mubr.msk.f32.gmra.mrb[44].mxu1 %vm4866_vm3, %v7292_v17  ;;  %v18667_v15 = vld [vmem:[#allocation2 + $0x11c] sm:$0xff] }
 0x62f   : > { %v7115_v25 = vpop.f32.mrb[20].mxu0  ;;  %13642 = vmatprep.mubr.msk.f32.mxu1 %vm14273_vm1, %v20674_v63 }
 0x630   : > { %v13474_v60 = vpop.f32.mrb[21].mxu0  ;;  %13771 = vmatmul.mubr.msk.f32.gmra.mrb[126].mxu0 %vm4866_vm3, %v18655_v16  ;;  %v18665_v50 = vadd.f32 %v7115_v25, %v6759_v28 }
 0x631   : > { %13773 = vmatprep.mubr.msk.f32.mxu0 %vm14273_vm1, %v20674_v63  ;;  %v6640_v43 = vpop.f32.mrb[196].mxu1  ;;  %v7294_v60 = vld [vmem:[#allocation2 + $0x123] sm:$0xff] }
 0x632   : > { %20697 = vst [vmem:[#allocation65_spill] sm:$0xff] %v18665_v50  ;;  %v6760_v7 = vadd.f32 %v6640_v43, %v18198_v9  ;;  %v13346_v30 = vpop.f32.mrb[197].mxu1  ;;  %13643 = vmatmul.mubr.msk.f32.gmra.mrb[46].mxu1 %vm4866_vm3, %v7293_v18  ;;  %v18679_v50 = vld [vmem:[#allocation2 + $0x124] sm:$0xff] }
 0x633   : > { %v7120_v23 = vpop.f32.mrb[22].mxu0  ;;  %13645 = vmatprep.mubr.msk.f32.mxu1 %vm14273_vm1, %v20674_v63 }
 0x634   : > { %v13477_v17 = vpop.f32.mrb[23].mxu0  ;;  %13774 = vmatmul.mubr.msk.f32.gmra.mrb[128].mxu0 %vm4866_vm3, %v18667_v15  ;;  %v18677_v25 = vadd.f32 %v7120_v23, %v6760_v7 }
 0x635   : > { %13776 = vmatprep.mubr.msk.f32.mxu0 %vm14273_vm1, %v20674_v63  ;;  %v6645_v28 = vpop.f32.mrb[198].mxu1  ;;  %v7295_v17 = vld [vmem:[#allocation2 + $0x12b] sm:$0xff] }
 0x636   : > { %20698 = vst [vmem:[#allocation66_spill] sm:$0xff] %v18677_v25  ;;  %v6761_v9 = vadd.f32 %v6645_v28, %v18206_v5  ;;  %v13349_v43 = vpop.f32.mrb[199].mxu1  ;;  %13646 = vmatmul.mubr.msk.f32.gmra.mrb[48].mxu1 %vm4866_vm3, %v7294_v60  ;;  %v18691_v25 = vld [vmem:[#allocation2 + $0x12c] sm:$0xff] }
 0x637   : > { %v7125_v11 = vpop.f32.mrb[24].mxu0  ;;  %13648 = vmatprep.mubr.msk.f32.mxu1 %vm14273_vm1, %v20674_v63 }
 0x638   : > { %v13480_v18 = vpop.f32.mrb[25].mxu0  ;;  %13777 = vmatmul.mubr.msk.f32.gmra.mrb[130].mxu0 %vm4866_vm3, %v18679_v50  ;;  %v18689_v23 = vadd.f32 %v7125_v11, %v6761_v9 }
 0x639   : > { %13779 = vmatprep.mubr.msk.f32.mxu0 %vm14273_vm1, %v20674_v63  ;;  %v6650_v7 = vpop.f32.mrb[200].mxu1  ;;  %v7296_v18 = vld [vmem:[#allocation2 + $0x133] sm:$0xff] }
 0x63a   : > { %20699 = vst [vmem:[#allocation67_spill] sm:$0xff] %v18689_v23  ;;  %v6762_v5 = vadd.f32 %v6650_v7, %v18214_v20  ;;  %v13352_v28 = vpop.f32.mrb[201].mxu1  ;;  %13649 = vmatmul.mubr.msk.f32.gmra.mrb[50].mxu1 %vm4866_vm3, %v7295_v17  ;;  %v18703_v23 = vld [vmem:[#allocation2 + $0x134] sm:$0xff] }
 0x63b   : > { %v7130_v30 = vpop.f32.mrb[26].mxu0  ;;  %13651 = vmatprep.mubr.msk.f32.mxu1 %vm14273_vm1, %v20674_v63 }
 0x63c   : > { %v13483_v60 = vpop.f32.mrb[27].mxu0  ;;  %13780 = vmatmul.mubr.msk.f32.gmra.mrb[132].mxu0 %vm4866_vm3, %v18691_v25  ;;  %v18701_v11 = vadd.f32 %v7130_v30, %v6762_v5 }
 0x63d   : > { %13782 = vmatprep.mubr.msk.f32.mxu0 %vm14273_vm1, %v20674_v63  ;;  %v6655_v9 = vpop.f32.mrb[202].mxu1  ;;  %v7297_v60 = vld [vmem:[#allocation2 + $0x13b] sm:$0xff] }
 0x63e   : > { %20700 = vst [vmem:[#allocation68_spill] sm:$0xff] %v18701_v11  ;;  %v6763_v20 = vadd.f32 %v6655_v9, %v18222_v59  ;;  %v13355_v7 = vpop.f32.mrb[203].mxu1  ;;  %13652 = vmatmul.mubr.msk.f32.gmra.mrb[52].mxu1 %vm4866_vm3, %v7296_v18  ;;  %v18715_v11 = vld [vmem:[#allocation2 + $0x13c] sm:$0xff] }
 0x63f   : > { %v7135_v43 = vpop.f32.mrb[28].mxu0  ;;  %13654 = vmatprep.mubr.msk.f32.mxu1 %vm14273_vm1, %v20674_v63 }
 0x640   : > { %v13486_v17 = vpop.f32.mrb[29].mxu0  ;;  %13783 = vmatmul.mubr.msk.f32.gmra.mrb[134].mxu0 %vm4866_vm3, %v18703_v23  ;;  %v18713_v30 = vadd.f32 %v7135_v43, %v6763_v20 }
 0x641   : > { %13785 = vmatprep.mubr.msk.f32.mxu0 %vm14273_vm1, %v20674_v63  ;;  %v6660_v5 = vpop.f32.mrb[204].mxu1  ;;  %v7298_v17 = vld [vmem:[#allocation2 + $0x143] sm:$0xff] }
 0x642   : > { %20701 = vst [vmem:[#allocation69_spill] sm:$0xff] %v18713_v30  ;;  %v6764_v59 = vadd.f32 %v6660_v5, %v18230_v49  ;;  %v13358_v9 = vpop.f32.mrb[205].mxu1  ;;  %13655 = vmatmul.mubr.msk.f32.gmra.mrb[54].mxu1 %vm4866_vm3, %v7297_v60  ;;  %v18727_v30 = vld [vmem:[#allocation2 + $0x144] sm:$0xff] }
 0x643   : > { %v7140_v28 = vpop.f32.mrb[30].mxu0  ;;  %13657 = vmatprep.mubr.msk.f32.mxu1 %vm14273_vm1, %v20674_v63  ;;  %20703 = vst [vmem:[#allocation71_spill] sm:$0xff] %v18727_v30 }
 0x644   : > { %v13489_v18 = vpop.f32.mrb[31].mxu0  ;;  %13786 = vmatmul.mubr.msk.f32.gmra.mrb[136].mxu0 %vm4866_vm3, %v18715_v11  ;;  %v18725_v43 = vadd.f32 %v7140_v28, %v6764_v59 }
 0x645   : > { %13788 = vmatprep.mubr.msk.f32.mxu0 %vm14273_vm1, %v20674_v63  ;;  %v6665_v20 = vpop.f32.mrb[206].mxu1  ;;  %v7299_v18 = vld [vmem:[#allocation2 + $0x14b] sm:$0xff] }
 0x646   : > { %20702 = vst [vmem:[#allocation70_spill] sm:$0xff] %v18725_v43  ;;  %v6765_v49 = vadd.f32 %v6665_v20, %v18238_v39  ;;  %v13361_v5 = vpop.f32.mrb[207].mxu1  ;;  %13658 = vmatmul.mubr.msk.f32.gmra.mrb[56].mxu1 %vm4866_vm3, %v7298_v17  ;;  %v18739_v43 = vld [vmem:[#allocation2 + $0x14c] sm:$0xff] }
 0x647   : > { %v7145_v7 = vpop.f32.mrb[32].mxu0  ;;  %13660 = vmatprep.mubr.msk.f32.mxu1 %vm14273_vm1, %v20674_v63  ;;  %20705 = vst [vmem:[#allocation73_spill] sm:$0xff] %v18739_v43 }
 0x648   : > { %v13492_v60 = vpop.f32.mrb[33].mxu0  ;;  %13789 = vmatmul.mubr.msk.f32.gmra.mrb[138].mxu0 %vm4866_vm3, %v18727_v30  ;;  %v18737_v28 = vadd.f32 %v7145_v7, %v6765_v49  ;;  %v11055_v49 = vld [vmem:[%s20358_s4 + $0x100] sm:$0xff] }
 0x649   : > { %13791 = vmatprep.mubr.msk.f32.mxu0 %vm14273_vm1, %v20674_v63  ;;  %v6670_v59 = vpop.f32.mrb[208].mxu1  ;;  %v8700_v30 = vld [vmem:[#allocation2 + $0x25] sm:$0xff] }
 0x64a   : > { %20704 = vst [vmem:[#allocation72_spill] sm:$0xff] %v18737_v28  ;;  %v6766_v39 = vadd.f32 %v6670_v59, %v18246_v45  ;;  %v13364_v20 = vpop.f32.mrb[209].mxu1  ;;  %13661 = vmatmul.mubr.msk.f32.gmra.mrb[58].mxu1 %vm4866_vm3, %v7299_v18  ;;  %v11056_v45 = vld [vmem:[%s20358_s4 + $0x108] sm:$0xff]  ;;  %v7300_v59 = vld [vmem:[#allocation2 + $0x153] sm:$0xf] }
 0x64b   : > { %v7150_v9 = vpop.f32.mrb[34].mxu0  ;;  %13663 = vmatprep.mubr.msk.f32.mxu1 %vm14273_vm1, %v20674_v63  ;;  %v7780_v18 = vld [vmem:[#allocation2 + $0x154] sm:$0xf] }
 0x64c   : > { %v13495_v17 = vpop.f32.mrb[35].mxu0  ;;  %13792 = vmatmul.mubr.msk.f32.gmra.mrb[140].mxu0 %vm4866_vm3, %v18739_v43  ;;  %v18749_v7 = vadd.f32 %v7150_v9, %v6766_v39  ;;  %v14239_v9 = vpack.c.bf16 %v11056_v45, %v11055_v49 }
 0x64d   : > { %13794 = vmatprep.mubr.msk.f32.mxu0 %vm14273_vm1, %v20674_v63  ;;  %v6675_v5 = vpop.f32.mrb[210].mxu1 }
 0x64e   : > { %20706 = vst [vmem:[#allocation74_spill] sm:$0xff] %v18749_v7  ;;  %v6767_v20 = vadd.f32 %v6675_v5, %v18260_v31  ;;  %v13367_v17 = vpop.f32.mrb[211].mxu1  ;;  %13664 = vmatmul.mubr.msk.f32.gmra.mrb[60].mxu1 %vm4866_vm3, %v7300_v59  ;;  %v11057_v31 = vld [vmem:[%s20358_s4 + $0x110] sm:$0xff] }
 0x64f   : > { %v7155_v60 = vpop.f32.mrb[36].mxu0  ;;  %13805 = vmatprep.mubr.msk.f32.mxu1 %vm14273_vm1, %v20674_v63 }
 0x650   : > { %v13498_v28 = vpop.f32.mrb[37].mxu0  ;;  %13795 = vmatmul.mubr.msk.f32.gmra.mrb[142].mxu0 %vm4866_vm3, %v7780_v18  ;;  %v18764_v39 = vadd.f32 %v7155_v60, %v6767_v20  ;;  %v8701_v60 = vld [vmem:[#allocation2 + $0x2d] sm:$0xff] }
 0x651   : > { %13936 = vmatprep.mubr.msk.f32.mxu0 %vm14273_vm1, %v20674_v63  ;;  %v6680_v7 = vpop.f32.mrb[212].mxu1  ;;  %v11058_v28 = vld [vmem:[%s20358_s4 + $0x118] sm:$0xff] }
 0x652   : > { %v6768_v5 = vadd.f32 %v6680_v7, %v18274_v8  ;;  %v13370_v59 = vpop.f32.mrb[213].mxu1  ;;  %13806 = vmatmul.mubr.msk.f32.vlgmr.msra.gmra.mrb[62].mxu1 %vm4866_vm3, %v18291_v10  ;;  %v14242_v45 = vpack.c.bf16 %v11058_v28, %v11057_v31 }
 0x653   : > { %v7160_v43 = vpop.f32.mrb[38].mxu0  ;;  %14240 = vmatpush3.bf16.msra.mxu1 %v14239_v9  ;;  %13808 = vmatprep.mubr.msk.f32.mxu1 %vm14273_vm1, %v20674_v63  ;;  %v8702_v9 = vld [vmem:[#allocation2 + $0x35] sm:$0xff] }
 0x654   : > { %v13501_v18 = vpop.f32.mrb[39].mxu0  ;;  %13937 = vmatmul.mubr.msk.f32.vlgmr.msra.gmra.mrb[144].mxu0 %vm4866_vm3, %v8700_v30  ;;  %v18778_v49 = vadd.f32 %v7160_v43, %v6768_v5  ;;  %14241 = vmatprep.subr.bf16.mxu1 %v20675_v57 }
 0x655   : > { %13939 = vmatprep.mubr.msk.f32.mxu0 %vm14273_vm1, %v20674_v63  ;;  %v6685_v8 = vpop.f32.mrb[214].mxu1  ;;  %v8703_v18 = vld [vmem:[#allocation2 + $0x3d] sm:$0xff] }
 0x656   : > { %v6769_v20 = vadd.f32 %v6685_v8, %v18283_v56  ;;  %v13373_v10 = vpop.f32.mrb[215].mxu1  ;;  %13809 = vmatmul.mubr.msk.f32.gmra.mrb[64].mxu1 %vm4866_vm3, %v18303_v14 }
 0x657   : > { %v7165_v7 = vpop.f32.mrb[40].mxu0  ;;  %13811 = vmatprep.mubr.msk.f32.mxu1 %vm14273_vm1, %v20674_v63  ;;  %14243 = vmatpush3.bf16.msra.mxu1 %v14242_v45 }
 0x658   : > { %v13504_v17 = vpop.f32.mrb[41].mxu0  ;;  %13940 = vmatmul.mubr.msk.f32.gmra.mrb[146].mxu0 %vm4866_vm3, %v8701_v60  ;;  %v18791_v57 = vadd.f32 %v7165_v7, %v6769_v20  ;;  %v8704_v20 = vld [vmem:[#allocation2 + $0x45] sm:$0xff] }
 0x659   : > { %13942 = vmatprep.mubr.msk.f32.mxu0 %vm14273_vm1, %v20674_v63  ;;  %v6690_v30 = vpop.f32.mrb[216].mxu1 }
 0x65a   : > { %v6770_v56 = vadd.f32 %v6690_v30, %v18294_v26  ;;  %v13376_v31 = vpop.f32.mrb[217].mxu1  ;;  %13812 = vmatmul.mubr.msk.f32.gmra.mrb[66].mxu1 %vm4866_vm3, %v18314_v21 }
 0x65b   : > { %v7170_v43 = vpop.f32.mrb[42].mxu0  ;;  %13814 = vmatprep.mubr.msk.f32.mxu1 %vm14273_vm1, %v20674_v63 }
 0x65c   : > { %v13507_v28 = vpop.f32.mrb[43].mxu0  ;;  %13943 = vmatmul.mubr.msk.f32.gmra.mrb[148].mxu0 %vm4866_vm3, %v8702_v9  ;;  %v18801_v14 = vadd.f32 %v7170_v43, %v6770_v56  ;;  %v8705_v9 = vld [vmem:[#allocation2 + $0x4d] sm:$0xff] }
 0x65d   : > { %13945 = vmatprep.mubr.msk.f32.mxu0 %vm14273_vm1, %v20674_v63  ;;  %v6695_v5 = vpop.f32.mrb[218].mxu1 }
 0x65e   : > { %v6771_v26 = vadd.f32 %v6695_v5, %v18305_v34  ;;  %v13379_v45 = vpop.f32.mrb[219].mxu1  ;;  %13815 = vmatmul.mubr.msk.f32.gmra.mrb[68].mxu1 %vm4866_vm3, %v18325_v55 }
 0x65f   : > { %v7175_v59 = vpop.f32.mrb[44].mxu0  ;;  %13817 = vmatprep.mubr.msk.f32.mxu1 %vm14273_vm1, %v20674_v63 }
 0x660   : > { %v13510_v8 = vpop.f32.mrb[45].mxu0  ;;  %13946 = vmatmul.mubr.msk.f32.gmra.mrb[150].mxu0 %vm4866_vm3, %v8703_v18  ;;  %v18811_v21 = vadd.f32 %v7175_v59, %v6771_v26  ;;  %v8706_v59 = vld [vmem:[#allocation2 + $0x55] sm:$0xff] }
 0x661   : > { %13948 = vmatprep.mubr.msk.f32.mxu0 %vm14273_vm1, %v20674_v63  ;;  %v6700_v7 = vpop.f32.mrb[220].mxu1 }
 0x662   : > { %v6772_v34 = vadd.f32 %v6700_v7, %v18316_v48  ;;  %v13382_v10 = vpop.f32.mrb[221].mxu1  ;;  %13818 = vmatmul.mubr.msk.f32.gmra.mrb[70].mxu1 %vm4866_vm3, %v18336_v27  ;;  %v8707_v7 = vld [vmem:[#allocation2 + $0x5d] sm:$0xff] }
 0x663   : > { %v7180_v60 = vpop.f32.mrb[46].mxu0  ;;  %13820 = vmatprep.mubr.msk.f32.mxu1 %vm14273_vm1, %v20674_v63 }
 0x664   : > { %v13513_v17 = vpop.f32.mrb[47].mxu0  ;;  %13949 = vmatmul.mubr.msk.f32.gmra.mrb[152].mxu0 %vm4866_vm3, %v8704_v20  ;;  %v18821_v55 = vadd.f32 %v7180_v60, %v6772_v34 }
 0x665   : > { %13951 = vmatprep.mubr.msk.f32.mxu0 %vm14273_vm1, %v20674_v63  ;;  %v6705_v30 = vpop.f32.mrb[222].mxu1  ;;  %v8708_v17 = vld [vmem:[#allocation2 + $0x65] sm:$0xff] }
 0x666   : > { %v6773_v48 = vadd.f32 %v6705_v30, %v18327_v33  ;;  %v13385_v56 = vpop.f32.mrb[223].mxu1  ;;  %13821 = vmatmul.mubr.msk.f32.gmra.mrb[72].mxu1 %vm4866_vm3, %v18347_v13 }
 0x667   : > { %v7185_v43 = vpop.f32.mrb[48].mxu0  ;;  %13823 = vmatprep.mubr.msk.f32.mxu1 %vm14273_vm1, %v20674_v63  ;;  %v8709_v56 = vld [vmem:[#allocation2 + $0x6d] sm:$0xff] }
 0x668   : > { %v13516_v31 = vpop.f32.mrb[49].mxu0  ;;  %13952 = vmatmul.mubr.msk.f32.gmra.mrb[154].mxu0 %vm4866_vm3, %v8705_v9  ;;  %v18831_v27 = vadd.f32 %v7185_v43, %v6773_v48 }
 0x669   : > { %13954 = vmatprep.mubr.msk.f32.mxu0 %vm14273_vm1, %v20674_v63  ;;  %v6710_v28 = vpop.f32.mrb[224].mxu1 }
 0x66a   : > { %v6774_v33 = vadd.f32 %v6710_v28, %v18338_v58  ;;  %v13388_v18 = vpop.f32.mrb[225].mxu1  ;;  %13824 = vmatmul.mubr.msk.f32.gmra.mrb[74].mxu1 %vm4866_vm3, %v18364_v24 }
 0x66b   : > { %v7190_v5 = vpop.f32.mrb[50].mxu0  ;;  %13826 = vmatprep.mubr.msk.f32.mxu1 %vm14273_vm1, %v20674_v63 }
 0x66c   : > { %v13519_v26 = vpop.f32.mrb[51].mxu0  ;;  %13955 = vmatmul.mubr.msk.f32.gmra.mrb[156].mxu0 %vm4866_vm3, %v8706_v59  ;;  %v18841_v13 = vadd.f32 %v7190_v5, %v6774_v33  ;;  %v8710_v33 = vld [vmem:[#allocation2 + $0x75] sm:$0xff] }
 0x66d   : > { %13957 = vmatprep.mubr.msk.f32.mxu0 %vm14273_vm1, %v20674_v63  ;;  %v6715_v45 = vpop.f32.mrb[226].mxu1 }
 0x66e   : > { %v6775_v58 = vadd.f32 %v6715_v45, %v18349_v42  ;;  %v13391_v60 = vpop.f32.mrb[227].mxu1  ;;  %13827 = vmatmul.mubr.msk.f32.gmra.mrb[76].mxu1 %vm4866_vm3, %v18381_v37 }
 0x66f   : > { %v7195_v8 = vpop.f32.mrb[52].mxu0  ;;  %13829 = vmatprep.mubr.msk.f32.mxu1 %vm14273_vm1, %v20674_v63 }
 0x670   : > { %v13522_v20 = vpop.f32.mrb[53].mxu0  ;;  %13958 = vmatmul.mubr.msk.f32.gmra.mrb[158].mxu0 %vm4866_vm3, %v8707_v7  ;;  %v18851_v24 = vadd.f32 %v7195_v8, %v6775_v58  ;;  %v8711_v7 = vld [vmem:[#allocation2 + $0x7d] sm:$0xff] }
 0x671   : > { %13960 = vmatprep.mubr.msk.f32.mxu0 %vm14273_vm1, %v20674_v63  ;;  %v6720_v34 = vpop.f32.mrb[228].mxu1  ;;  %v20707_v58 = vld [vmem:[#allocation16_spill] sm:$0xff] }
 0x672   : > { %v6776_v42 = vadd.f32 %v6720_v34, %v18366_v38  ;;  %v13394_v30 = vpop.f32.mrb[229].mxu1  ;;  %13830 = vmatmul.mubr.msk.f32.gmra.mrb[78].mxu1 %vm4866_vm3, %v18393_v0 }
 0x673   : > { %v7200_v10 = vpop.f32.mrb[54].mxu0  ;;  %13832 = vmatprep.mubr.msk.f32.mxu1 %vm14273_vm1, %v20674_v63 }
 0x674   : > { %v13525_v43 = vpop.f32.mrb[55].mxu0  ;;  %13961 = vmatmul.mubr.msk.f32.gmra.mrb[160].mxu0 %vm4866_vm3, %v8708_v17  ;;  %v18861_v37 = vadd.f32 %v7200_v10, %v6776_v42  ;;  %v8712_v17 = vld [vmem:[#allocation2 + $0x85] sm:$0xff] }
 0x675   : > { %13963 = vmatprep.mubr.msk.f32.mxu0 %vm14273_vm1, %v20674_v63  ;;  %v6725_v9 = vpop.f32.mrb[230].mxu1  ;;  %v20708_v42 = vld [vmem:[#allocation18_spill] sm:$0xff] }
 0x676   : > { %v6777_v38 = vadd.f32 %v6725_v9, %v18384_v61  ;;  %v13397_v31 = vpop.f32.mrb[231].mxu1  ;;  %13833 = vmatmul.mubr.msk.f32.gmra.mrb[80].mxu1 %vm4866_vm3, %v18404_v46 }
 0x677   : > { %v7205_v48 = vpop.f32.mrb[56].mxu0  ;;  %13835 = vmatprep.mubr.msk.f32.mxu1 %vm14273_vm1, %v20674_v63  ;;  %v20709_v31 = vld [vmem:[#allocation20_spill] sm:$0xff] }
 0x678   : > { %v13528_v0 = vpop.f32.mrb[57].mxu0  ;;  %13964 = vmatmul.mubr.msk.f32.gmra.mrb[162].mxu0 %vm4866_vm3, %v8709_v56  ;;  %v18872_v28 = vadd.f32 %v7205_v48, %v6777_v38  ;;  %v8713_v38 = vld [vmem:[#allocation2 + $0x8d] sm:$0xff] }
 0x679   : > { %13966 = vmatprep.mubr.msk.f32.mxu0 %vm14273_vm1, %v20674_v63  ;;  %v6730_v5 = vpop.f32.mrb[232].mxu1 }
 0x67a   : > { %v6778_v61 = vadd.f32 %v6730_v5, %v18395_v62  ;;  %v13400_v18 = vpop.f32.mrb[233].mxu1  ;;  %13836 = vmatmul.mubr.msk.f32.gmra.mrb[82].mxu1 %vm4866_vm3, %v18415_v2 }
 0x67b   : > { %v7210_v59 = vpop.f32.mrb[58].mxu0  ;;  %13838 = vmatprep.mubr.msk.f32.mxu1 %vm14273_vm1, %v20674_v63  ;;  %v8714_v18 = vld [vmem:[#allocation2 + $0x95] sm:$0xff] }
 0x67c   : > { %v13531_v26 = vpop.f32.mrb[59].mxu0  ;;  %13967 = vmatmul.mubr.msk.f32.gmra.mrb[164].mxu0 %vm4866_vm3, %v8710_v33  ;;  %v18882_v46 = vadd.f32 %v7210_v59, %v6778_v61 }
 0x67d   : > { %13969 = vmatprep.mubr.msk.f32.mxu0 %vm14273_vm1, %v20674_v63  ;;  %v6735_v45 = vpop.f32.mrb[234].mxu1  ;;  %v20710_v26 = vld [vmem:[#allocation14_spill] sm:$0xff] }
 0x67e   : > { %v6779_v62 = vadd.f32 %v6735_v45, %v20707_v58  ;;  %v13403_v60 = vpop.f32.mrb[235].mxu1  ;;  %13839 = vmatmul.mubr.msk.f32.gmra.mrb[84].mxu1 %vm4866_vm3, %v18427_v36 }
 0x67f   : > { %v7215_v8 = vpop.f32.mrb[60].mxu0  ;;  %13841 = vmatprep.mubr.msk.f32.mxu1 %vm14273_vm1, %v20674_v63  ;;  %v8715_v60 = vld [vmem:[#allocation2 + $0x9d] sm:$0xff] }
 0x680   : > { %v13534_v20 = vpop.f32.mrb[61].mxu0  ;;  %13970 = vmatmul.mubr.msk.f32.gmra.mrb[166].mxu0 %vm4866_vm3, %v8711_v7  ;;  %v18892_v2 = vadd.f32 %v7215_v8, %v6779_v62 }
 0x681   : > { %13972 = vmatprep.mubr.msk.f32.mxu0 %vm14273_vm1, %v20674_v63  ;;  %v7495_v34 = vpop.f32.mrb[236].mxu1  ;;  %v20711_v20 = vld [vmem:[#allocation13_spill] sm:$0xff] }
 0x682   : > { %v7699_v30 = vadd.f32 %v7495_v34, %v20708_v42  ;;  %v13545_v43 = vpop.f32.mrb[237].mxu1  ;;  %13842 = vmatmul.mubr.msk.f32.gmra.mrb[86].mxu1 %vm4866_vm3, %v18439_v29 }
 0x683   : > { %v7975_v10 = vpop.f32.mrb[62].mxu0  ;;  %13844 = vmatprep.mubr.msk.f32.mxu1 %vm14273_vm1, %v20674_v63  ;;  %v8716_v43 = vld [vmem:[#allocation2 + $0xa5] sm:$0xff] }
 0x684   : > { %v13676_v9 = vpop.f32.mrb[63].mxu0  ;;  %13973 = vmatmul.mubr.msk.f32.gmra.mrb[168].mxu0 %vm4866_vm3, %v8712_v17  ;;  %v18902_v36 = vadd.f32 %v7975_v10, %v7699_v30 }
 0x685   : > { %13975 = vmatprep.mubr.msk.f32.mxu0 %vm14273_vm1, %v20674_v63  ;;  %v7500_v48 = vpop.f32.mrb[238].mxu1  ;;  %v20712_v9 = vld [vmem:[#allocation49_spill] sm:$0xff] }
 0x686   : > { %v7700_v0 = vadd.f32 %v7500_v48, %v20709_v31  ;;  %v13548_v5 = vpop.f32.mrb[239].mxu1  ;;  %13845 = vmatmul.mubr.msk.f32.gmra.mrb[88].mxu1 %vm4866_vm3, %v18451_v12 }
 0x687   : > { %v7980_v56 = vpop.f32.mrb[64].mxu0  ;;  %13847 = vmatprep.mubr.msk.f32.mxu1 %vm14273_vm1, %v20674_v63  ;;  %v8717_v5 = vld [vmem:[#allocation2 + $0xad] sm:$0xff] }
 0x688   : > { %v13679_v59 = vpop.f32.mrb[65].mxu0  ;;  %13976 = vmatmul.mubr.msk.f32.gmra.mrb[170].mxu0 %vm4866_vm3, %v8713_v38  ;;  %v18912_v29 = vadd.f32 %v7980_v56, %v7700_v0 }
 0x689   : > { %13978 = vmatprep.mubr.msk.f32.mxu0 %vm14273_vm1, %v20674_v63  ;;  %v7505_v33 = vpop.f32.mrb[240].mxu1  ;;  %v20713_v59 = vld [vmem:[#allocation50_spill] sm:$0xff] }
 0x68a   : > { %v7701_v45 = vadd.f32 %v7505_v33, %v20710_v26  ;;  %v13551_v8 = vpop.f32.mrb[241].mxu1  ;;  %13848 = vmatmul.mubr.msk.f32.gmra.mrb[90].mxu1 %vm4866_vm3, %v18463_v4 }
 0x68b   : > { %v7985_v61 = vpop.f32.mrb[66].mxu0  ;;  %13850 = vmatprep.mubr.msk.f32.mxu1 %vm14273_vm1, %v20674_v63  ;;  %v8718_v8 = vld [vmem:[#allocation2 + $0xb5] sm:$0xff] }
 0x68c   : > { %v13682_v7 = vpop.f32.mrb[67].mxu0  ;;  %13979 = vmatmul.mubr.msk.f32.gmra.mrb[172].mxu0 %vm4866_vm3, %v8714_v18  ;;  %v18922_v12 = vadd.f32 %v7985_v61, %v7701_v45 }
 0x68d   : > { %13981 = vmatprep.mubr.msk.f32.mxu0 %vm14273_vm1, %v20674_v63  ;;  %v7510_v58 = vpop.f32.mrb[242].mxu1  ;;  %v20714_v7 = vld [vmem:[#allocation51_spill] sm:$0xff] }
 0x68e   : > { %v7702_v34 = vadd.f32 %v7510_v58, %v20711_v20  ;;  %v13554_v10 = vpop.f32.mrb[243].mxu1  ;;  %13851 = vmatmul.mubr.msk.f32.gmra.mrb[92].mxu1 %vm4866_vm3, %v18475_v6 }
 0x68f   : > { %v7990_v62 = vpop.f32.mrb[68].mxu0  ;;  %13853 = vmatprep.mubr.msk.f32.mxu1 %vm14273_vm1, %v20674_v63  ;;  %v8719_v10 = vld [vmem:[#allocation2 + $0xbd] sm:$0xff] }
 0x690   : > { %v13685_v17 = vpop.f32.mrb[69].mxu0  ;;  %13982 = vmatmul.mubr.msk.f32.gmra.mrb[174].mxu0 %vm4866_vm3, %v8715_v60  ;;  %v18932_v4 = vadd.f32 %v7990_v62, %v7702_v34 }
 0x691   : > { %13984 = vmatprep.mubr.msk.f32.mxu0 %vm14273_vm1, %v20674_v63  ;;  %v7515_v42 = vpop.f32.mrb[244].mxu1  ;;  %v20715_v17 = vld [vmem:[#allocation52_spill] sm:$0xff] }
 0x692   : > { %v7703_v48 = vadd.f32 %v7515_v42, %v20712_v9  ;;  %v13557_v56 = vpop.f32.mrb[245].mxu1  ;;  %13854 = vmatmul.mubr.msk.f32.gmra.mrb[94].mxu1 %vm4866_vm3, %v18487_v44 }
 0x693   : > { %v7995_v30 = vpop.f32.mrb[70].mxu0  ;;  %13856 = vmatprep.mubr.msk.f32.mxu1 %vm14273_vm1, %v20674_v63  ;;  %v8720_v56 = vld [vmem:[#allocation2 + $0xc5] sm:$0xff] }
 0x694   : > { %v13688_v38 = vpop.f32.mrb[71].mxu0  ;;  %13985 = vmatmul.mubr.msk.f32.gmra.mrb[176].mxu0 %vm4866_vm3, %v8716_v43  ;;  %v18942_v6 = vadd.f32 %v7995_v30, %v7703_v48 }
 0x695   : > { %13987 = vmatprep.mubr.msk.f32.mxu0 %vm14273_vm1, %v20674_v63  ;;  %v7520_v31 = vpop.f32.mrb[246].mxu1  ;;  %v20716_v38 = vld [vmem:[#allocation53_spill] sm:$0xff] }
 0x696   : > { %v7704_v33 = vadd.f32 %v7520_v31, %v20713_v59  ;;  %v13560_v61 = vpop.f32.mrb[247].mxu1  ;;  %13857 = vmatmul.mubr.msk.f32.gmra.mrb[96].mxu1 %vm4866_vm3, %v18499_v32 }
 0x697   : > { %v8000_v0 = vpop.f32.mrb[72].mxu0  ;;  %13859 = vmatprep.mubr.msk.f32.mxu1 %vm14273_vm1, %v20674_v63  ;;  %v8721_v61 = vld [vmem:[#allocation2 + $0xcd] sm:$0xff] }
 0x698   : > { %v13691_v18 = vpop.f32.mrb[73].mxu0  ;;  %13988 = vmatmul.mubr.msk.f32.gmra.mrb[178].mxu0 %vm4866_vm3, %v8717_v5  ;;  %v18952_v44 = vadd.f32 %v8000_v0, %v7704_v33 }
 0x699   : > { %13990 = vmatprep.mubr.msk.f32.mxu0 %vm14273_vm1, %v20674_v63  ;;  %v7525_v26 = vpop.f32.mrb[248].mxu1  ;;  %v20717_v18 = vld [vmem:[#allocation54_spill] sm:$0xff] }
 0x69a   : > { %v7705_v58 = vadd.f32 %v7525_v26, %v20714_v7  ;;  %v13563_v62 = vpop.f32.mrb[249].mxu1  ;;  %13860 = vmatmul.mubr.msk.f32.gmra.mrb[98].mxu1 %vm4866_vm3, %v18511_v54 }
 0x69b   : > { %v8005_v45 = vpop.f32.mrb[74].mxu0  ;;  %13862 = vmatprep.mubr.msk.f32.mxu1 %vm14273_vm1, %v20674_v63  ;;  %v8722_v62 = vld [vmem:[#allocation2 + $0xd5] sm:$0xff] }
 0x69c   : > { %v13694_v60 = vpop.f32.mrb[75].mxu0  ;;  %13991 = vmatmul.mubr.msk.f32.gmra.mrb[180].mxu0 %vm4866_vm3, %v8718_v8  ;;  %v18962_v32 = vadd.f32 %v8005_v45, %v7705_v58 }
 0x69d   : > { %13993 = vmatprep.mubr.msk.f32.mxu0 %vm14273_vm1, %v20674_v63  ;;  %v7530_v20 = vpop.f32.mrb[250].mxu1  ;;  %v20718_v60 = vld [vmem:[#allocation55_spill] sm:$0xff] }
 0x69e   : > { %v7706_v42 = vadd.f32 %v7530_v20, %v20715_v17  ;;  %v13566_v30 = vpop.f32.mrb[251].mxu1  ;;  %13863 = vmatmul.mubr.msk.f32.gmra.mrb[100].mxu1 %vm4866_vm3, %v18523_v41 }
 0x69f   : > { %v8010_v34 = vpop.f32.mrb[76].mxu0  ;;  %13865 = vmatprep.mubr.msk.f32.mxu1 %vm14273_vm1, %v20674_v63  ;;  %v8723_v30 = vld [vmem:[#allocation2 + $0xdd] sm:$0xff] }
 0x6a0   : > { %v13697_v43 = vpop.f32.mrb[77].mxu0  ;;  %13994 = vmatmul.mubr.msk.f32.gmra.mrb[182].mxu0 %vm4866_vm3, %v8719_v10  ;;  %v18972_v54 = vadd.f32 %v8010_v34, %v7706_v42 }
 0x6a1   : > { %13996 = vmatprep.mubr.msk.f32.mxu0 %vm14273_vm1, %v20674_v63  ;;  %v7535_v9 = vpop.f32.mrb[252].mxu1  ;;  %v20719_v43 = vld [vmem:[#allocation56_spill] sm:$0xff] }
 0x6a2   : > { %v7707_v31 = vadd.f32 %v7535_v9, %v20716_v38  ;;  %v13569_v0 = vpop.f32.mrb[253].mxu1  ;;  %13866 = vmatmul.mubr.msk.f32.gmra.mrb[102].mxu1 %vm4866_vm3, %v18535_v47 }
 0x6a3   : > { %v8015_v48 = vpop.f32.mrb[78].mxu0  ;;  %13868 = vmatprep.mubr.msk.f32.mxu1 %vm14273_vm1, %v20674_v63  ;;  %v8724_v0 = vld [vmem:[#allocation2 + $0xe5] sm:$0xff] }
 0x6a4   : > { %v13700_v5 = vpop.f32.mrb[79].mxu0  ;;  %13997 = vmatmul.mubr.msk.f32.gmra.mrb[184].mxu0 %vm4866_vm3, %v8720_v56  ;;  %v18982_v41 = vadd.f32 %v8015_v48, %v7707_v31 }
 0x6a5   : > { %13999 = vmatprep.mubr.msk.f32.mxu0 %vm14273_vm1, %v20674_v63  ;;  %v7540_v59 = vpop.f32.mrb[254].mxu1  ;;  %v20720_v5 = vld [vmem:[#allocation57_spill] sm:$0xff] }
 0x6a6   : > { %v7708_v26 = vadd.f32 %v7540_v59, %v20717_v18  ;;  %v13572_v45 = vpop.f32.mrb[255].mxu1  ;;  %13869 = vmatmul.mubr.msk.f32.gmra.mrb[104].mxu1 %vm4866_vm3, %v18547_v35 }
 0x6a7   : > { %v8020_v33 = vpop.f32.mrb[80].mxu0  ;;  %13871 = vmatprep.mubr.msk.f32.mxu1 %vm14273_vm1, %v20674_v63  ;;  %v8725_v45 = vld [vmem:[#allocation2 + $0xed] sm:$0xff] }
 0x6a8   : > { %v13703_v8 = vpop.f32.mrb[81].mxu0  ;;  %14000 = vmatmul.mubr.msk.f32.gmra.mrb[186].mxu0 %vm4866_vm3, %v8721_v61  ;;  %v18992_v47 = vadd.f32 %v8020_v33, %v7708_v26 }
 0x6a9   : > { %14002 = vmatprep.mubr.msk.f32.mxu0 %vm14273_vm1, %v20674_v63  ;;  %v7545_v7 = vpop.f32.mrb[0].mxu1  ;;  %v20721_v8 = vld [vmem:[#allocation58_spill] sm:$0xff] }
 0x6aa   : > { %v7709_v20 = vadd.f32 %v7545_v7, %v20718_v60  ;;  %v13575_v34 = vpop.f32.mrb[1].mxu1  ;;  %13872 = vmatmul.mubr.msk.f32.gmra.mrb[106].mxu1 %vm4866_vm3, %v18559_v1 }
 0x6ab   : > { %v8025_v58 = vpop.f32.mrb[82].mxu0  ;;  %13874 = vmatprep.mubr.msk.f32.mxu1 %vm14273_vm1, %v20674_v63  ;;  %v8726_v34 = vld [vmem:[#allocation2 + $0xf5] sm:$0xff] }
 0x6ac   : > { %v13706_v10 = vpop.f32.mrb[83].mxu0  ;;  %14003 = vmatmul.mubr.msk.f32.gmra.mrb[188].mxu0 %vm4866_vm3, %v8722_v62  ;;  %v19002_v35 = vadd.f32 %v8025_v58, %v7709_v20 }
 0x6ad   : > { %14005 = vmatprep.mubr.msk.f32.mxu0 %vm14273_vm1, %v20674_v63  ;;  %v7550_v17 = vpop.f32.mrb[2].mxu1  ;;  %v20722_v10 = vld [vmem:[#allocation59_spill] sm:$0xff] }
 0x6ae   : > { %v7710_v9 = vadd.f32 %v7550_v17, %v20719_v43  ;;  %v13578_v48 = vpop.f32.mrb[3].mxu1  ;;  %13875 = vmatmul.mubr.msk.f32.gmra.mrb[108].mxu1 %vm4866_vm3, %v18571_v53 }
 0x6af   : > { %v8030_v42 = vpop.f32.mrb[84].mxu0  ;;  %13877 = vmatprep.mubr.msk.f32.mxu1 %vm14273_vm1, %v20674_v63  ;;  %v8727_v48 = vld [vmem:[#allocation2 + $0xfd] sm:$0xff] }
 0x6b0   : > { %v13709_v56 = vpop.f32.mrb[85].mxu0  ;;  %14006 = vmatmul.mubr.msk.f32.gmra.mrb[190].mxu0 %vm4866_vm3, %v8723_v30  ;;  %v19012_v1 = vadd.f32 %v8030_v42, %v7710_v9 }
 0x6b1   : > { %14008 = vmatprep.mubr.msk.f32.mxu0 %vm14273_vm1, %v20674_v63  ;;  %v7555_v38 = vpop.f32.mrb[4].mxu1  ;;  %v20723_v56 = vld [vmem:[#allocation60_spill] sm:$0xff] }
 0x6b2   : > { %v7711_v59 = vadd.f32 %v7555_v38, %v20720_v5  ;;  %v13581_v33 = vpop.f32.mrb[5].mxu1  ;;  %13878 = vmatmul.mubr.msk.f32.gmra.mrb[110].mxu1 %vm4866_vm3, %v18583_v52 }
 0x6b3   : > { %v8035_v31 = vpop.f32.mrb[86].mxu0  ;;  %13880 = vmatprep.mubr.msk.f32.mxu1 %vm14273_vm1, %v20674_v63  ;;  %v8728_v33 = vld [vmem:[#allocation2 + $0x105] sm:$0xff] }
 0x6b4   : > { %v13712_v61 = vpop.f32.mrb[87].mxu0  ;;  %14009 = vmatmul.mubr.msk.f32.gmra.mrb[192].mxu0 %vm4866_vm3, %v8724_v0  ;;  %v19022_v53 = vadd.f32 %v8035_v31, %v7711_v59 }
 0x6b5   : > { %14011 = vmatprep.mubr.msk.f32.mxu0 %vm14273_vm1, %v20674_v63  ;;  %v7560_v18 = vpop.f32.mrb[6].mxu1  ;;  %v20724_v61 = vld [vmem:[#allocation61_spill] sm:$0xff] }
 0x6b6   : > { %v7712_v7 = vadd.f32 %v7560_v18, %v20721_v8  ;;  %v13584_v58 = vpop.f32.mrb[7].mxu1  ;;  %13881 = vmatmul.mubr.msk.f32.gmra.mrb[112].mxu1 %vm4866_vm3, %v18595_v19 }
 0x6b7   : > { %v8040_v26 = vpop.f32.mrb[88].mxu0  ;;  %13883 = vmatprep.mubr.msk.f32.mxu1 %vm14273_vm1, %v20674_v63  ;;  %v8729_v58 = vld [vmem:[#allocation2 + $0x10d] sm:$0xff] }
 0x6b8   : > { %v13715_v62 = vpop.f32.mrb[89].mxu0  ;;  %14012 = vmatmul.mubr.msk.f32.gmra.mrb[194].mxu0 %vm4866_vm3, %v8725_v45  ;;  %v19032_v52 = vadd.f32 %v8040_v26, %v7712_v7 }
 0x6b9   : > { %14014 = vmatprep.mubr.msk.f32.mxu0 %vm14273_vm1, %v20674_v63  ;;  %v7565_v60 = vpop.f32.mrb[8].mxu1  ;;  %v20725_v62 = vld [vmem:[#allocation62_spill] sm:$0xff] }
 0x6ba   : > { %v7713_v17 = vadd.f32 %v7565_v60, %v20722_v10  ;;  %v13587_v42 = vpop.f32.mrb[9].mxu1  ;;  %13884 = vmatmul.mubr.msk.f32.gmra.mrb[114].mxu1 %vm4866_vm3, %v18607_v51 }
 0x6bb   : > { %v8045_v20 = vpop.f32.mrb[90].mxu0  ;;  %13886 = vmatprep.mubr.msk.f32.mxu1 %vm14273_vm1, %v20674_v63  ;;  %v8730_v42 = vld [vmem:[#allocation2 + $0x115] sm:$0xff] }
 0x6bc   : > { %v13718_v30 = vpop.f32.mrb[91].mxu0  ;;  %14015 = vmatmul.mubr.msk.f32.gmra.mrb[196].mxu0 %vm4866_vm3, %v8726_v34  ;;  %v19042_v19 = vadd.f32 %v8045_v20, %v7713_v17 }
 0x6bd   : > { %14017 = vmatprep.mubr.msk.f32.mxu0 %vm14273_vm1, %v20674_v63  ;;  %v7570_v43 = vpop.f32.mrb[10].mxu1  ;;  %v20726_v30 = vld [vmem:[#allocation63_spill] sm:$0xff] }
 0x6be   : > { %v7714_v38 = vadd.f32 %v7570_v43, %v20723_v56  ;;  %v13590_v31 = vpop.f32.mrb[11].mxu1  ;;  %13887 = vmatmul.mubr.msk.f32.gmra.mrb[116].mxu1 %vm4866_vm3, %v18619_v40 }
 0x6bf   : > { %v8050_v9 = vpop.f32.mrb[92].mxu0  ;;  %13889 = vmatprep.mubr.msk.f32.mxu1 %vm14273_vm1, %v20674_v63  ;;  %v8731_v31 = vld [vmem:[#allocation2 + $0x11d] sm:$0xff] }
 0x6c0   : > { %v13721_v0 = vpop.f32.mrb[93].mxu0  ;;  %14018 = vmatmul.mubr.msk.f32.gmra.mrb[198].mxu0 %vm4866_vm3, %v8727_v48  ;;  %v19052_v51 = vadd.f32 %v8050_v9, %v7714_v38 }
 0x6c1   : > { %14020 = vmatprep.mubr.msk.f32.mxu0 %vm14273_vm1, %v20674_v63  ;;  %v7575_v5 = vpop.f32.mrb[12].mxu1  ;;  %v20727_v0 = vld [vmem:[#allocation64_spill] sm:$0xff] }
 0x6c2   : > { %v7715_v18 = vadd.f32 %v7575_v5, %v20724_v61  ;;  %v13593_v26 = vpop.f32.mrb[13].mxu1  ;;  %13890 = vmatmul.mubr.msk.f32.gmra.mrb[118].mxu1 %vm4866_vm3, %v18631_v22 }
 0x6c3   : > { %v8055_v59 = vpop.f32.mrb[94].mxu0  ;;  %13892 = vmatprep.mubr.msk.f32.mxu1 %vm14273_vm1, %v20674_v63  ;;  %v8732_v26 = vld [vmem:[#allocation2 + $0x125] sm:$0xff] }
 0x6c4   : > { %v13724_v45 = vpop.f32.mrb[95].mxu0  ;;  %14021 = vmatmul.mubr.msk.f32.gmra.mrb[200].mxu0 %vm4866_vm3, %v8728_v33  ;;  %v19062_v40 = vadd.f32 %v8055_v59, %v7715_v18 }
 0x6c5   : > { %14023 = vmatprep.mubr.msk.f32.mxu0 %vm14273_vm1, %v20674_v63  ;;  %v7580_v8 = vpop.f32.mrb[14].mxu1  ;;  %v20728_v45 = vld [vmem:[#allocation65_spill] sm:$0xff] }
 0x6c6   : > { %v7716_v60 = vadd.f32 %v7580_v8, %v20725_v62  ;;  %v13596_v20 = vpop.f32.mrb[15].mxu1  ;;  %13893 = vmatmul.mubr.msk.f32.gmra.mrb[120].mxu1 %vm4866_vm3, %v18643_v3 }
 0x6c7   : > { %v8060_v7 = vpop.f32.mrb[96].mxu0  ;;  %13895 = vmatprep.mubr.msk.f32.mxu1 %vm14273_vm1, %v20674_v63  ;;  %v8733_v20 = vld [vmem:[#allocation2 + $0x12d] sm:$0xff] }
 0x6c8   : > { %v13727_v34 = vpop.f32.mrb[97].mxu0  ;;  %14024 = vmatmul.mubr.msk.f32.gmra.mrb[202].mxu0 %vm4866_vm3, %v8729_v58  ;;  %v19072_v22 = vadd.f32 %v8060_v7, %v7716_v60 }
 0x6c9   : > { %14026 = vmatprep.mubr.msk.f32.mxu0 %vm14273_vm1, %v20674_v63  ;;  %v7585_v10 = vpop.f32.mrb[16].mxu1  ;;  %v20729_v34 = vld [vmem:[#allocation66_spill] sm:$0xff] }
 0x6ca   : > { %v7717_v43 = vadd.f32 %v7585_v10, %v20726_v30  ;;  %v13599_v9 = vpop.f32.mrb[17].mxu1  ;;  %13896 = vmatmul.mubr.msk.f32.gmra.mrb[122].mxu1 %vm4866_vm3, %v18655_v16 }
 0x6cb   : > { %v8065_v17 = vpop.f32.mrb[98].mxu0  ;;  %13898 = vmatprep.mubr.msk.f32.mxu1 %vm14273_vm1, %v20674_v63  ;;  %v8734_v9 = vld [vmem:[#allocation2 + $0x135] sm:$0xff] }
 0x6cc   : > { %v13730_v48 = vpop.f32.mrb[99].mxu0  ;;  %14027 = vmatmul.mubr.msk.f32.gmra.mrb[204].mxu0 %vm4866_vm3, %v8730_v42  ;;  %v19082_v3 = vadd.f32 %v8065_v17, %v7717_v43 }
 0x6cd   : > { %14029 = vmatprep.mubr.msk.f32.mxu0 %vm14273_vm1, %v20674_v63  ;;  %v7590_v56 = vpop.f32.mrb[18].mxu1  ;;  %v20730_v48 = vld [vmem:[#allocation67_spill] sm:$0xff] }
 0x6ce   : > { %v7718_v5 = vadd.f32 %v7590_v56, %v20727_v0  ;;  %v13602_v59 = vpop.f32.mrb[19].mxu1  ;;  %13899 = vmatmul.mubr.msk.f32.gmra.mrb[124].mxu1 %vm4866_vm3, %v18667_v15 }
 0x6cf   : > { %v8070_v38 = vpop.f32.mrb[100].mxu0  ;;  %13901 = vmatprep.mubr.msk.f32.mxu1 %vm14273_vm1, %v20674_v63  ;;  %v8735_v59 = vld [vmem:[#allocation2 + $0x13d] sm:$0xff] }
 0x6d0   : > { %v13733_v33 = vpop.f32.mrb[101].mxu0  ;;  %14030 = vmatmul.mubr.msk.f32.gmra.mrb[206].mxu0 %vm4866_vm3, %v8731_v31  ;;  %v19092_v16 = vadd.f32 %v8070_v38, %v7718_v5 }
 0x6d1   : > { %14032 = vmatprep.mubr.msk.f32.mxu0 %vm14273_vm1, %v20674_v63  ;;  %v7595_v61 = vpop.f32.mrb[20].mxu1  ;;  %v20731_v33 = vld [vmem:[#allocation68_spill] sm:$0xff] }
 0x6d2   : > { %v7719_v8 = vadd.f32 %v7595_v61, %v20728_v45  ;;  %v13605_v7 = vpop.f32.mrb[21].mxu1  ;;  %13902 = vmatmul.mubr.msk.f32.gmra.mrb[126].mxu1 %vm4866_vm3, %v18679_v50 }
 0x6d3   : > { %v8075_v18 = vpop.f32.mrb[102].mxu0  ;;  %13904 = vmatprep.mubr.msk.f32.mxu1 %vm14273_vm1, %v20674_v63  ;;  %v8736_v7 = vld [vmem:[#allocation2 + $0x145] sm:$0xff] }
 0x6d4   : > { %v13736_v58 = vpop.f32.mrb[103].mxu0  ;;  %14033 = vmatmul.mubr.msk.f32.gmra.mrb[208].mxu0 %vm4866_vm3, %v8732_v26  ;;  %v19102_v15 = vadd.f32 %v8075_v18, %v7719_v8 }
 0x6d5   : > { %14035 = vmatprep.mubr.msk.f32.mxu0 %vm14273_vm1, %v20674_v63  ;;  %v7600_v62 = vpop.f32.mrb[22].mxu1  ;;  %v20732_v58 = vld [vmem:[#allocation69_spill] sm:$0xff] }
 0x6d6   : > { %v7720_v10 = vadd.f32 %v7600_v62, %v20729_v34  ;;  %v13608_v17 = vpop.f32.mrb[23].mxu1  ;;  %13905 = vmatmul.mubr.msk.f32.gmra.mrb[128].mxu1 %vm4866_vm3, %v18691_v25  ;;  %v20733_v34 = vld [vmem:[#allocation71_spill] sm:$0xff] }
 0x6d7   : > { %v8080_v60 = vpop.f32.mrb[104].mxu0  ;;  %13907 = vmatprep.mubr.msk.f32.mxu1 %vm14273_vm1, %v20674_v63 }
 0x6d8   : > { %v13739_v42 = vpop.f32.mrb[105].mxu0  ;;  %14036 = vmatmul.mubr.msk.f32.gmra.mrb[210].mxu0 %vm4866_vm3, %v8733_v20  ;;  %v19112_v50 = vadd.f32 %v8080_v60, %v7720_v10 }
 0x6d9   : > { %14038 = vmatprep.mubr.msk.f32.mxu0 %vm14273_vm1, %v20674_v63  ;;  %v7605_v30 = vpop.f32.mrb[24].mxu1  ;;  %v8737_v42 = vld [vmem:[#allocation2 + $0x14d] sm:$0xff] }
 0x6da   : > { %v7721_v56 = vadd.f32 %v7605_v30, %v20730_v48  ;;  %v13611_v38 = vpop.f32.mrb[25].mxu1  ;;  %13908 = vmatmul.mubr.msk.f32.gmra.mrb[130].mxu1 %vm4866_vm3, %v18703_v23  ;;  %v20734_v30 = vld [vmem:[#allocation70_spill] sm:$0xff] }
 0x6db   : > { %v8085_v43 = vpop.f32.mrb[106].mxu0  ;;  %13910 = vmatprep.mubr.msk.f32.mxu1 %vm14273_vm1, %v20674_v63 }
 0x6dc   : > { %v13742_v31 = vpop.f32.mrb[107].mxu0  ;;  %14039 = vmatmul.mubr.msk.f32.gmra.mrb[212].mxu0 %vm4866_vm3, %v8734_v9  ;;  %v19122_v25 = vadd.f32 %v8085_v43, %v7721_v56  ;;  %v20735_v56 = vld [vmem:[#allocation73_spill] sm:$0xff] }
 0x6dd   : > { %14041 = vmatprep.mubr.msk.f32.mxu0 %vm14273_vm1, %v20674_v63  ;;  %v7610_v0 = vpop.f32.mrb[26].mxu1 }
 0x6de   : > { %v7722_v61 = vadd.f32 %v7610_v0, %v20731_v33  ;;  %v13614_v18 = vpop.f32.mrb[27].mxu1  ;;  %13911 = vmatmul.mubr.msk.f32.gmra.mrb[132].mxu1 %vm4866_vm3, %v18715_v11  ;;  %v20736_v33 = vld [vmem:[#allocation72_spill] sm:$0xff] }
 0x6df   : > { %v8090_v5 = vpop.f32.mrb[108].mxu0  ;;  %13913 = vmatprep.mubr.msk.f32.mxu1 %vm14273_vm1, %v20674_v63 }
 0x6e0   : > { %v13745_v26 = vpop.f32.mrb[109].mxu0  ;;  %14042 = vmatmul.mubr.msk.f32.gmra.mrb[214].mxu0 %vm4866_vm3, %v8735_v59  ;;  %v19132_v23 = vadd.f32 %v8090_v5, %v7722_v61  ;;  %v8258_v5 = vld [vmem:[#allocation2 + $0x154] sm:$0xff] }
 0x6e1   : > { %14044 = vmatprep.mubr.msk.f32.mxu0 %vm14273_vm1, %v20674_v63  ;;  %v7615_v45 = vpop.f32.mrb[28].mxu1  ;;  %v8738_v59 = vld [vmem:[#allocation2 + $0x155] sm:$0xff] }
 0x6e2   : > { %v7723_v62 = vadd.f32 %v7615_v45, %v20732_v58  ;;  %v13617_v60 = vpop.f32.mrb[29].mxu1  ;;  %13914 = vmatmul.mubr.msk.f32.gmra.mrb[134].mxu1 %vm4866_vm3, %v20733_v34  ;;  %v8259_v45 = vld [vmem:[#allocation2 + $0x15c] sm:$0xff] }
 0x6e3   : > { %v8095_v8 = vpop.f32.mrb[110].mxu0  ;;  %13916 = vmatprep.mubr.msk.f32.mxu1 %vm14273_vm1, %v20674_v63  ;;  %v20737_v60 = vld [vmem:[#allocation74_spill] sm:$0xff] }
 0x6e4   : > { %v13748_v20 = vpop.f32.mrb[111].mxu0  ;;  %14045 = vmatmul.mubr.msk.f32.gmra.mrb[216].mxu0 %vm4866_vm3, %v8736_v7  ;;  %v19142_v11 = vadd.f32 %v8095_v8, %v7723_v62  ;;  %v8739_v8 = vld [vmem:[#allocation2 + $0x15d] sm:$0xff] }
 0x6e5   : > { %14047 = vmatprep.mubr.msk.f32.mxu0 %vm14273_vm1, %v20674_v63  ;;  %v7620_v10 = vpop.f32.mrb[30].mxu1 }
 0x6e6   : > { %v7724_v43 = vadd.f32 %v7620_v10, %v20734_v30  ;;  %v13620_v9 = vpop.f32.mrb[31].mxu1  ;;  %13917 = vmatmul.mubr.msk.f32.gmra.mrb[136].mxu1 %vm4866_vm3, %v20735_v56 }
 0x6e7   : > { %v8100_v17 = vpop.f32.mrb[112].mxu0  ;;  %13919 = vmatprep.mubr.msk.f32.mxu1 %vm14273_vm1, %v20674_v63 }
 0x6e8   : > { %v13751_v48 = vpop.f32.mrb[113].mxu0  ;;  %14048 = vmatmul.mubr.msk.f32.gmra.mrb[218].mxu0 %vm4866_vm3, %v8737_v42  ;;  %v19152_v38 = vadd.f32 %v8100_v17, %v7724_v43  ;;  %v8260_v17 = vld [vmem:[#allocation2 + $0x164] sm:$0xf] }
 0x6e9   : > { %14050 = vmatprep.mubr.msk.f32.mxu0 %vm14273_vm1, %v20674_v63  ;;  %v7625_v31 = vpop.f32.mrb[32].mxu1  ;;  %v8740_v42 = vld [vmem:[#allocation2 + $0x165] sm:$0xf] }
 0x6ea   : > { %v7725_v61 = vadd.f32 %v7625_v31, %v20736_v33  ;;  %v13623_v18 = vpop.f32.mrb[33].mxu1  ;;  %13920 = vmatmul.mubr.msk.f32.gmra.mrb[138].mxu1 %vm4866_vm3, %v8258_v5  ;;  %v9180_v33 = vld [vmem:[#allocation2 + $0x26] sm:$0xff] }
 0x6eb   : > { %v8105_v0 = vpop.f32.mrb[114].mxu0  ;;  %13922 = vmatprep.mubr.msk.f32.mxu1 %vm14273_vm1, %v20674_v63 }
 0x6ec   : > { %v13754_v26 = vpop.f32.mrb[115].mxu0  ;;  %14051 = vmatmul.mubr.msk.f32.gmra.mrb[220].mxu0 %vm4866_vm3, %v8738_v59  ;;  %v19161_v7 = vadd.f32 %v8105_v0, %v7725_v61 }
 0x6ed   : > { %14053 = vmatprep.mubr.msk.f32.mxu0 %vm14273_vm1, %v20674_v63  ;;  %v7630_v58 = vpop.f32.mrb[34].mxu1 }
 0x6ee   : > { %v7726_v20 = vadd.f32 %v7630_v58, %v20737_v60  ;;  %v13626_v34 = vpop.f32.mrb[35].mxu1  ;;  %13923 = vmatmul.mubr.msk.f32.gmra.mrb[140].mxu1 %vm4866_vm3, %v8259_v45  ;;  %v9181_v58 = vld [vmem:[#allocation2 + $0x2e] sm:$0xff] }
 0x6ef   : > { %v8110_v62 = vpop.f32.mrb[116].mxu0  ;;  %13925 = vmatprep.mubr.msk.f32.mxu1 %vm14273_vm1, %v20674_v63 }
 0x6f0   : > { %v13757_v10 = vpop.f32.mrb[117].mxu0  ;;  %14054 = vmatmul.mubr.msk.f32.gmra.mrb[222].mxu0 %vm4866_vm3, %v8739_v8  ;;  %v19170_v30 = vadd.f32 %v8110_v62, %v7726_v20 }
 0x6f1   : > { %14056 = vmatprep.mubr.msk.f32.mxu0 %vm14273_vm1, %v20674_v63  ;;  %v7635_v43 = vpop.f32.mrb[36].mxu1 }
 0x6f2   : > { %v7727_v48 = vadd.f32 %v7635_v43, %v18764_v39  ;;  %v13629_v56 = vpop.f32.mrb[37].mxu1  ;;  %13926 = vmatmul.mubr.msk.f32.gmra.mrb[142].mxu1 %vm4866_vm3, %v8260_v17  ;;  %v9182_v17 = vld [vmem:[#allocation2 + $0x36] sm:$0xff] }
 0x6f3   : > { %v8115_v9 = vpop.f32.mrb[118].mxu0  ;;  %14067 = vmatprep.mubr.msk.f32.mxu1 %vm14273_vm1, %v20674_v63 }
 0x6f4   : > { %v13760_v31 = vpop.f32.mrb[119].mxu0  ;;  %14057 = vmatmul.mubr.msk.f32.gmra.mrb[224].mxu0 %vm4866_vm3, %v8740_v42  ;;  %v19177_v0 = vadd.f32 %v8115_v9, %v7727_v48 }
 0x6f5   : > { %v7640_v5 = vpop.f32.mrb[38].mxu1  ;;  %v9183_v31 = vld [vmem:[#allocation2 + $0x3e] sm:$0xff] }
 0x6f6   : > { %v7728_v61 = vadd.f32 %v7640_v5, %v18778_v49  ;;  %v13632_v18 = vpop.f32.mrb[39].mxu1  ;;  %14068 = vmatmul.mubr.msk.f32.vlgmr.msra.gmra.mrb[144].mxu1 %vm4866_vm3, %v9180_v33 }
 0x6f7   : > { %v8120_v59 = vpop.f32.mrb[120].mxu0  ;;  %14070 = vmatprep.mubr.msk.f32.mxu1 %vm14273_vm1, %v20674_v63 }
 0x6f8   : > { %v13763_v26 = vpop.f32.mrb[121].mxu0  ;;  %v19183_v39 = vadd.f32 %v8120_v59, %v7728_v61 }
 0x6f9   : > { %v7645_v45 = vpop.f32.mrb[40].mxu1  ;;  %v9184_v26 = vld [vmem:[#allocation2 + $0x46] sm:$0xff] }
 0x6fa   : > { %v7729_v62 = vadd.f32 %v7645_v45, %v18791_v57  ;;  %v13635_v60 = vpop.f32.mrb[41].mxu1  ;;  %14071 = vmatmul.mubr.msk.f32.gmra.mrb[146].mxu1 %vm4866_vm3, %v9181_v58 }
 0x6fb   : > { %v8125_v8 = vpop.f32.mrb[122].mxu0  ;;  %14073 = vmatprep.mubr.msk.f32.mxu1 %vm14273_vm1, %v20674_v63 }
 0x6fc   : > { %v13766_v20 = vpop.f32.mrb[123].mxu0  ;;  %v19189_v49 = vadd.f32 %v8125_v8, %v7729_v62 }
 0x6fd   : > { %v7650_v34 = vpop.f32.mrb[42].mxu1  ;;  %v9185_v20 = vld [vmem:[#allocation2 + $0x4e] sm:$0xff] }
 0x6fe   : > { %v7730_v42 = vadd.f32 %v7650_v34, %v18801_v14  ;;  %v13638_v43 = vpop.f32.mrb[43].mxu1  ;;  %14074 = vmatmul.mubr.msk.f32.gmra.mrb[148].mxu1 %vm4866_vm3, %v9182_v17 }
 0x6ff   : > { %v8130_v10 = vpop.f32.mrb[124].mxu0  ;;  %14076 = vmatprep.mubr.msk.f32.mxu1 %vm14273_vm1, %v20674_v63 }
 0x700   : > { %v13769_v9 = vpop.f32.mrb[125].mxu0  ;;  %v19195_v57 = vadd.f32 %v8130_v10, %v7730_v42 }
 0x701   : > { %v7655_v48 = vpop.f32.mrb[44].mxu1  ;;  %v9186_v9 = vld [vmem:[#allocation2 + $0x56] sm:$0xff] }
 0x702   : > { %v7731_v5 = vadd.f32 %v7655_v48, %v18811_v21  ;;  %v13641_v59 = vpop.f32.mrb[45].mxu1  ;;  %14077 = vmatmul.mubr.msk.f32.gmra.mrb[150].mxu1 %vm4866_vm3, %v9183_v31 }
 0x703   : > { %v8135_v56 = vpop.f32.mrb[126].mxu0  ;;  %14079 = vmatprep.mubr.msk.f32.mxu1 %vm14273_vm1, %v20674_v63 }
 0x704   : > { %v13772_v33 = vpop.f32.mrb[127].mxu0  ;;  %v19201_v14 = vadd.f32 %v8135_v56, %v7731_v5 }
 0x705   : > { %v7660_v61 = vpop.f32.mrb[46].mxu1  ;;  %v9187_v33 = vld [vmem:[#allocation2 + $0x5e] sm:$0xff] }
 0x706   : > { %v7732_v45 = vadd.f32 %v7660_v61, %v18821_v55  ;;  %v13644_v8 = vpop.f32.mrb[47].mxu1  ;;  %14080 = vmatmul.mubr.msk.f32.gmra.mrb[152].mxu1 %vm4866_vm3, %v9184_v26 }
 0x707   : > { %v8140_v18 = vpop.f32.mrb[128].mxu0  ;;  %14082 = vmatprep.mubr.msk.f32.mxu1 %vm14273_vm1, %v20674_v63 }
 0x708   : > { %v13775_v58 = vpop.f32.mrb[129].mxu0  ;;  %v19207_v21 = vadd.f32 %v8140_v18, %v7732_v45 }
 0x709   : > { %v7665_v62 = vpop.f32.mrb[48].mxu1  ;;  %v9188_v58 = vld [vmem:[#allocation2 + $0x66] sm:$0xff] }
 0x70a   : > { %v7733_v34 = vadd.f32 %v7665_v62, %v18831_v27  ;;  %v13647_v10 = vpop.f32.mrb[49].mxu1  ;;  %14083 = vmatmul.mubr.msk.f32.gmra.mrb[154].mxu1 %vm4866_vm3, %v9185_v20 }
 0x70b   : > { %v8145_v60 = vpop.f32.mrb[130].mxu0  ;;  %14085 = vmatprep.mubr.msk.f32.mxu1 %vm14273_vm1, %v20674_v63 }
 0x70c   : > { %v13778_v17 = vpop.f32.mrb[131].mxu0  ;;  %v19213_v55 = vadd.f32 %v8145_v60, %v7733_v34 }
 0x70d   : > { %v7670_v42 = vpop.f32.mrb[50].mxu1  ;;  %v9189_v17 = vld [vmem:[#allocation2 + $0x6e] sm:$0xff] }
 0x70e   : > { %v7734_v48 = vadd.f32 %v7670_v42, %v18841_v13  ;;  %v13650_v56 = vpop.f32.mrb[51].mxu1  ;;  %14086 = vmatmul.mubr.msk.f32.gmra.mrb[156].mxu1 %vm4866_vm3, %v9186_v9 }
 0x70f   : > { %v8150_v43 = vpop.f32.mrb[132].mxu0  ;;  %14088 = vmatprep.mubr.msk.f32.mxu1 %vm14273_vm1, %v20674_v63 }
 0x710   : > { %v13781_v31 = vpop.f32.mrb[133].mxu0  ;;  %v19219_v27 = vadd.f32 %v8150_v43, %v7734_v48 }
 0x711   : > { %v7675_v5 = vpop.f32.mrb[52].mxu1  ;;  %v9190_v31 = vld [vmem:[#allocation2 + $0x76] sm:$0xff] }
 0x712   : > { %v7735_v61 = vadd.f32 %v7675_v5, %v18851_v24  ;;  %v13653_v18 = vpop.f32.mrb[53].mxu1  ;;  %14089 = vmatmul.mubr.msk.f32.gmra.mrb[158].mxu1 %vm4866_vm3, %v9187_v33 }
 0x713   : > { %v8155_v59 = vpop.f32.mrb[134].mxu0  ;;  %14091 = vmatprep.mubr.msk.f32.mxu1 %vm14273_vm1, %v20674_v63 }
 0x714   : > { %v13784_v26 = vpop.f32.mrb[135].mxu0  ;;  %v19225_v13 = vadd.f32 %v8155_v59, %v7735_v61 }
 0x715   : > { %v7680_v45 = vpop.f32.mrb[54].mxu1  ;;  %v9191_v26 = vld [vmem:[#allocation2 + $0x7e] sm:$0xff] }
 0x716   : > { %v7736_v62 = vadd.f32 %v7680_v45, %v18861_v37  ;;  %v13656_v60 = vpop.f32.mrb[55].mxu1  ;;  %14092 = vmatmul.mubr.msk.f32.gmra.mrb[160].mxu1 %vm4866_vm3, %v9188_v58 }
 0x717   : > { %v8160_v8 = vpop.f32.mrb[136].mxu0  ;;  %14094 = vmatprep.mubr.msk.f32.mxu1 %vm14273_vm1, %v20674_v63 }
 0x718   : > { %v13787_v20 = vpop.f32.mrb[137].mxu0  ;;  %v19231_v24 = vadd.f32 %v8160_v8, %v7736_v62 }
 0x719   : > { %v7685_v34 = vpop.f32.mrb[56].mxu1  ;;  %v9192_v20 = vld [vmem:[#allocation2 + $0x86] sm:$0xff] }
 0x71a   : > { %v7737_v42 = vadd.f32 %v7685_v34, %v18872_v28  ;;  %v13659_v43 = vpop.f32.mrb[57].mxu1  ;;  %14095 = vmatmul.mubr.msk.f32.gmra.mrb[162].mxu1 %vm4866_vm3, %v9189_v17 }
 0x71b   : > { %v8165_v10 = vpop.f32.mrb[138].mxu0  ;;  %14097 = vmatprep.mubr.msk.f32.mxu1 %vm14273_vm1, %v20674_v63 }
 0x71c   : > { %v13790_v9 = vpop.f32.mrb[139].mxu0  ;;  %v19237_v37 = vadd.f32 %v8165_v10, %v7737_v42 }
 0x71d   : > { %v7690_v48 = vpop.f32.mrb[58].mxu1  ;;  %v9193_v9 = vld [vmem:[#allocation2 + $0x8e] sm:$0xff] }
 0x71e   : > { %v7738_v5 = vadd.f32 %v7690_v48, %v18882_v46  ;;  %v13662_v59 = vpop.f32.mrb[59].mxu1  ;;  %14098 = vmatmul.mubr.msk.f32.gmra.mrb[164].mxu1 %vm4866_vm3, %v9190_v31 }
 0x71f   : > { %v8170_v56 = vpop.f32.mrb[140].mxu0  ;;  %14100 = vmatprep.mubr.msk.f32.mxu1 %vm14273_vm1, %v20674_v63 }
 0x720   : > { %v13793_v33 = vpop.f32.mrb[141].mxu0  ;;  %v19243_v28 = vadd.f32 %v8170_v56, %v7738_v5 }
 0x721   : > { %v7695_v61 = vpop.f32.mrb[60].mxu1  ;;  %v9194_v33 = vld [vmem:[#allocation2 + $0x96] sm:$0xff] }
 0x722   : > { %v7739_v45 = vadd.f32 %v7695_v61, %v18892_v2  ;;  %v13665_v8 = vpop.f32.mrb[61].mxu1  ;;  %14101 = vmatmul.mubr.msk.f32.gmra.mrb[166].mxu1 %vm4866_vm3, %v9191_v26 }
 0x723   : > { %v8175_v18 = vpop.f32.mrb[142].mxu0  ;;  %14103 = vmatprep.mubr.msk.f32.mxu1 %vm14273_vm1, %v20674_v63 }
 0x724   : > { %v13796_v58 = vpop.f32.mrb[143].mxu0  ;;  %v19249_v46 = vadd.f32 %v8175_v18, %v7739_v45 }
 0x725   : > { %v8455_v62 = vpop.f32.mrb[62].mxu1  ;;  %v9195_v58 = vld [vmem:[#allocation2 + $0x9e] sm:$0xff] }
 0x726   : > { %v8659_v34 = vadd.f32 %v8455_v62, %v18902_v36  ;;  %v13807_v10 = vpop.f32.mrb[63].mxu1  ;;  %14104 = vmatmul.mubr.msk.f32.gmra.mrb[168].mxu1 %vm4866_vm3, %v9192_v20 }
 0x727   : > { %v8935_v60 = vpop.f32.mrb[144].mxu0  ;;  %14106 = vmatprep.mubr.msk.f32.mxu1 %vm14273_vm1, %v20674_v63 }
 0x728   : > { %v13938_v17 = vpop.f32.mrb[145].mxu0  ;;  %v19255_v2 = vadd.f32 %v8935_v60, %v8659_v34 }
 0x729   : > { %v8460_v42 = vpop.f32.mrb[64].mxu1  ;;  %v9196_v17 = vld [vmem:[#allocation2 + $0xa6] sm:$0xff] }
 0x72a   : > { %v8660_v48 = vadd.f32 %v8460_v42, %v18912_v29  ;;  %v13810_v56 = vpop.f32.mrb[65].mxu1  ;;  %14107 = vmatmul.mubr.msk.f32.gmra.mrb[170].mxu1 %vm4866_vm3, %v9193_v9 }
 0x72b   : > { %v8940_v43 = vpop.f32.mrb[146].mxu0  ;;  %14109 = vmatprep.mubr.msk.f32.mxu1 %vm14273_vm1, %v20674_v63 }
 0x72c   : > { %v13941_v31 = vpop.f32.mrb[147].mxu0  ;;  %v19261_v36 = vadd.f32 %v8940_v43, %v8660_v48 }
 0x72d   : > { %v8465_v5 = vpop.f32.mrb[66].mxu1  ;;  %v9197_v31 = vld [vmem:[#allocation2 + $0xae] sm:$0xff] }
 0x72e   : > { %v8661_v61 = vadd.f32 %v8465_v5, %v18922_v12  ;;  %v13813_v18 = vpop.f32.mrb[67].mxu1  ;;  %14110 = vmatmul.mubr.msk.f32.gmra.mrb[172].mxu1 %vm4866_vm3, %v9194_v33 }
 0x72f   : > { %v8945_v59 = vpop.f32.mrb[148].mxu0  ;;  %14112 = vmatprep.mubr.msk.f32.mxu1 %vm14273_vm1, %v20674_v63 }
 0x730   : > { %v13944_v26 = vpop.f32.mrb[149].mxu0  ;;  %v19267_v29 = vadd.f32 %v8945_v59, %v8661_v61 }
 0x731   : > { %v8470_v45 = vpop.f32.mrb[68].mxu1  ;;  %v9198_v26 = vld [vmem:[#allocation2 + $0xb6] sm:$0xff] }
 0x732   : > { %v8662_v62 = vadd.f32 %v8470_v45, %v18932_v4  ;;  %v13816_v60 = vpop.f32.mrb[69].mxu1  ;;  %14113 = vmatmul.mubr.msk.f32.gmra.mrb[174].mxu1 %vm4866_vm3, %v9195_v58 }
 0x733   : > { %v8950_v8 = vpop.f32.mrb[150].mxu0  ;;  %14115 = vmatprep.mubr.msk.f32.mxu1 %vm14273_vm1, %v20674_v63 }
 0x734   : > { %v13947_v20 = vpop.f32.mrb[151].mxu0  ;;  %v19273_v12 = vadd.f32 %v8950_v8, %v8662_v62 }
 0x735   : > { %v8475_v34 = vpop.f32.mrb[70].mxu1  ;;  %v9199_v20 = vld [vmem:[#allocation2 + $0xbe] sm:$0xff] }
 0x736   : > { %v8663_v42 = vadd.f32 %v8475_v34, %v18942_v6  ;;  %v13819_v43 = vpop.f32.mrb[71].mxu1  ;;  %14116 = vmatmul.mubr.msk.f32.gmra.mrb[176].mxu1 %vm4866_vm3, %v9196_v17 }
 0x737   : > { %v8955_v10 = vpop.f32.mrb[152].mxu0  ;;  %14118 = vmatprep.mubr.msk.f32.mxu1 %vm14273_vm1, %v20674_v63 }
 0x738   : > { %v13950_v9 = vpop.f32.mrb[153].mxu0  ;;  %v19279_v4 = vadd.f32 %v8955_v10, %v8663_v42 }
 0x739   : > { %v8480_v48 = vpop.f32.mrb[72].mxu1  ;;  %v9200_v9 = vld [vmem:[#allocation2 + $0xc6] sm:$0xff] }
 0x73a   : > { %v8664_v5 = vadd.f32 %v8480_v48, %v18952_v44  ;;  %v13822_v59 = vpop.f32.mrb[73].mxu1  ;;  %14119 = vmatmul.mubr.msk.f32.gmra.mrb[178].mxu1 %vm4866_vm3, %v9197_v31 }
 0x73b   : > { %v8960_v56 = vpop.f32.mrb[154].mxu0  ;;  %14121 = vmatprep.mubr.msk.f32.mxu1 %vm14273_vm1, %v20674_v63 }
 0x73c   : > { %v13953_v33 = vpop.f32.mrb[155].mxu0  ;;  %v19285_v6 = vadd.f32 %v8960_v56, %v8664_v5 }
 0x73d   : > { %v8485_v61 = vpop.f32.mrb[74].mxu1  ;;  %v9201_v33 = vld [vmem:[#allocation2 + $0xce] sm:$0xff] }
 0x73e   : > { %v8665_v45 = vadd.f32 %v8485_v61, %v18962_v32  ;;  %v13825_v8 = vpop.f32.mrb[75].mxu1  ;;  %14122 = vmatmul.mubr.msk.f32.gmra.mrb[180].mxu1 %vm4866_vm3, %v9198_v26 }
 0x73f   : > { %v8965_v18 = vpop.f32.mrb[156].mxu0  ;;  %14124 = vmatprep.mubr.msk.f32.mxu1 %vm14273_vm1, %v20674_v63 }
 0x740   : > { %v13956_v58 = vpop.f32.mrb[157].mxu0  ;;  %v19291_v44 = vadd.f32 %v8965_v18, %v8665_v45 }
 0x741   : > { %v8490_v62 = vpop.f32.mrb[76].mxu1  ;;  %v9202_v58 = vld [vmem:[#allocation2 + $0xd6] sm:$0xff] }
 0x742   : > { %v8666_v34 = vadd.f32 %v8490_v62, %v18972_v54  ;;  %v13828_v10 = vpop.f32.mrb[77].mxu1  ;;  %14125 = vmatmul.mubr.msk.f32.gmra.mrb[182].mxu1 %vm4866_vm3, %v9199_v20 }
 0x743   : > { %v8970_v60 = vpop.f32.mrb[158].mxu0  ;;  %14127 = vmatprep.mubr.msk.f32.mxu1 %vm14273_vm1, %v20674_v63 }
 0x744   : > { %v13959_v17 = vpop.f32.mrb[159].mxu0  ;;  %v19297_v32 = vadd.f32 %v8970_v60, %v8666_v34 }
 0x745   : > { %v8495_v42 = vpop.f32.mrb[78].mxu1  ;;  %v9203_v17 = vld [vmem:[#allocation2 + $0xde] sm:$0xff] }
 0x746   : > { %v8667_v48 = vadd.f32 %v8495_v42, %v18982_v41  ;;  %v13831_v56 = vpop.f32.mrb[79].mxu1  ;;  %14128 = vmatmul.mubr.msk.f32.gmra.mrb[184].mxu1 %vm4866_vm3, %v9200_v9 }
 0x747   : > { %v8975_v43 = vpop.f32.mrb[160].mxu0  ;;  %14130 = vmatprep.mubr.msk.f32.mxu1 %vm14273_vm1, %v20674_v63 }
 0x748   : > { %v13962_v31 = vpop.f32.mrb[161].mxu0  ;;  %v19303_v54 = vadd.f32 %v8975_v43, %v8667_v48 }
 0x749   : > { %v8500_v5 = vpop.f32.mrb[80].mxu1  ;;  %v9204_v31 = vld [vmem:[#allocation2 + $0xe6] sm:$0xff] }
 0x74a   : > { %v8668_v61 = vadd.f32 %v8500_v5, %v18992_v47  ;;  %v13834_v18 = vpop.f32.mrb[81].mxu1  ;;  %14131 = vmatmul.mubr.msk.f32.gmra.mrb[186].mxu1 %vm4866_vm3, %v9201_v33 }
 0x74b   : > { %v8980_v59 = vpop.f32.mrb[162].mxu0  ;;  %14133 = vmatprep.mubr.msk.f32.mxu1 %vm14273_vm1, %v20674_v63 }
 0x74c   : > { %v13965_v26 = vpop.f32.mrb[163].mxu0  ;;  %v19309_v41 = vadd.f32 %v8980_v59, %v8668_v61 }
 0x74d   : > { %v8505_v45 = vpop.f32.mrb[82].mxu1  ;;  %v9205_v26 = vld [vmem:[#allocation2 + $0xee] sm:$0xff] }
 0x74e   : > { %v8669_v62 = vadd.f32 %v8505_v45, %v19002_v35  ;;  %v13837_v60 = vpop.f32.mrb[83].mxu1  ;;  %14134 = vmatmul.mubr.msk.f32.gmra.mrb[188].mxu1 %vm4866_vm3, %v9202_v58 }
 0x74f   : > { %v8985_v8 = vpop.f32.mrb[164].mxu0  ;;  %14136 = vmatprep.mubr.msk.f32.mxu1 %vm14273_vm1, %v20674_v63 }
 0x750   : > { %v13968_v20 = vpop.f32.mrb[165].mxu0  ;;  %v19315_v47 = vadd.f32 %v8985_v8, %v8669_v62 }
 0x751   : > { %v8510_v34 = vpop.f32.mrb[84].mxu1  ;;  %v9206_v20 = vld [vmem:[#allocation2 + $0xf6] sm:$0xff] }
 0x752   : > { %v8670_v42 = vadd.f32 %v8510_v34, %v19012_v1  ;;  %v13840_v43 = vpop.f32.mrb[85].mxu1  ;;  %14137 = vmatmul.mubr.msk.f32.gmra.mrb[190].mxu1 %vm4866_vm3, %v9203_v17 }
 0x753   : > { %v8990_v10 = vpop.f32.mrb[166].mxu0  ;;  %14139 = vmatprep.mubr.msk.f32.mxu1 %vm14273_vm1, %v20674_v63 }
 0x754   : > { %v13971_v9 = vpop.f32.mrb[167].mxu0  ;;  %v19321_v35 = vadd.f32 %v8990_v10, %v8670_v42 }
 0x755   : > { %v8515_v48 = vpop.f32.mrb[86].mxu1  ;;  %v9207_v9 = vld [vmem:[#allocation2 + $0xfe] sm:$0xff] }
 0x756   : > { %v8671_v5 = vadd.f32 %v8515_v48, %v19022_v53  ;;  %v13843_v59 = vpop.f32.mrb[87].mxu1  ;;  %14140 = vmatmul.mubr.msk.f32.gmra.mrb[192].mxu1 %vm4866_vm3, %v9204_v31 }
 0x757   : > { %v8995_v56 = vpop.f32.mrb[168].mxu0  ;;  %14142 = vmatprep.mubr.msk.f32.mxu1 %vm14273_vm1, %v20674_v63 }
 0x758   : > { %v13974_v33 = vpop.f32.mrb[169].mxu0  ;;  %v19327_v1 = vadd.f32 %v8995_v56, %v8671_v5 }
 0x759   : > { %v8520_v61 = vpop.f32.mrb[88].mxu1  ;;  %v9208_v33 = vld [vmem:[#allocation2 + $0x106] sm:$0xff] }
 0x75a   : > { %v8672_v45 = vadd.f32 %v8520_v61, %v19032_v52  ;;  %v13846_v8 = vpop.f32.mrb[89].mxu1  ;;  %14143 = vmatmul.mubr.msk.f32.gmra.mrb[194].mxu1 %vm4866_vm3, %v9205_v26 }
 0x75b   : > { %v9000_v18 = vpop.f32.mrb[170].mxu0  ;;  %14145 = vmatprep.mubr.msk.f32.mxu1 %vm14273_vm1, %v20674_v63 }
 0x75c   : > { %v13977_v58 = vpop.f32.mrb[171].mxu0  ;;  %v19333_v53 = vadd.f32 %v9000_v18, %v8672_v45 }
 0x75d   : > { %v8525_v62 = vpop.f32.mrb[90].mxu1  ;;  %v9209_v58 = vld [vmem:[#allocation2 + $0x10e] sm:$0xff] }
 0x75e   : > { %v8673_v34 = vadd.f32 %v8525_v62, %v19042_v19  ;;  %v13849_v10 = vpop.f32.mrb[91].mxu1  ;;  %14146 = vmatmul.mubr.msk.f32.gmra.mrb[196].mxu1 %vm4866_vm3, %v9206_v20 }
 0x75f   : > { %v9005_v60 = vpop.f32.mrb[172].mxu0  ;;  %14148 = vmatprep.mubr.msk.f32.mxu1 %vm14273_vm1, %v20674_v63 }
 0x760   : > { %v13980_v17 = vpop.f32.mrb[173].mxu0  ;;  %v19339_v52 = vadd.f32 %v9005_v60, %v8673_v34 }
 0x761   : > { %v8530_v42 = vpop.f32.mrb[92].mxu1  ;;  %v9210_v17 = vld [vmem:[#allocation2 + $0x116] sm:$0xff] }
 0x762   : > { %v8674_v48 = vadd.f32 %v8530_v42, %v19052_v51  ;;  %v13852_v56 = vpop.f32.mrb[93].mxu1  ;;  %14149 = vmatmul.mubr.msk.f32.gmra.mrb[198].mxu1 %vm4866_vm3, %v9207_v9 }
 0x763   : > { %v9010_v43 = vpop.f32.mrb[174].mxu0  ;;  %14151 = vmatprep.mubr.msk.f32.mxu1 %vm14273_vm1, %v20674_v63 }
 0x764   : > { %v13983_v31 = vpop.f32.mrb[175].mxu0  ;;  %v19345_v19 = vadd.f32 %v9010_v43, %v8674_v48 }
 0x765   : > { %v8535_v5 = vpop.f32.mrb[94].mxu1  ;;  %v9211_v31 = vld [vmem:[#allocation2 + $0x11e] sm:$0xff] }
 0x766   : > { %v8675_v61 = vadd.f32 %v8535_v5, %v19062_v40  ;;  %v13855_v18 = vpop.f32.mrb[95].mxu1  ;;  %14152 = vmatmul.mubr.msk.f32.gmra.mrb[200].mxu1 %vm4866_vm3, %v9208_v33 }
 0x767   : > { %v9015_v59 = vpop.f32.mrb[176].mxu0  ;;  %14154 = vmatprep.mubr.msk.f32.mxu1 %vm14273_vm1, %v20674_v63 }
 0x768   : > { %v13986_v26 = vpop.f32.mrb[177].mxu0  ;;  %v19351_v51 = vadd.f32 %v9015_v59, %v8675_v61 }
 0x769   : > { %v8540_v45 = vpop.f32.mrb[96].mxu1  ;;  %v9212_v26 = vld [vmem:[#allocation2 + $0x126] sm:$0xff] }
 0x76a   : > { %v8676_v62 = vadd.f32 %v8540_v45, %v19072_v22  ;;  %v13858_v60 = vpop.f32.mrb[97].mxu1  ;;  %14155 = vmatmul.mubr.msk.f32.gmra.mrb[202].mxu1 %vm4866_vm3, %v9209_v58 }
 0x76b   : > { %v9020_v8 = vpop.f32.mrb[178].mxu0  ;;  %14157 = vmatprep.mubr.msk.f32.mxu1 %vm14273_vm1, %v20674_v63 }
 0x76c   : > { %v13989_v20 = vpop.f32.mrb[179].mxu0  ;;  %v19357_v40 = vadd.f32 %v9020_v8, %v8676_v62 }
 0x76d   : > { %v8545_v34 = vpop.f32.mrb[98].mxu1  ;;  %v9213_v20 = vld [vmem:[#allocation2 + $0x12e] sm:$0xff] }
 0x76e   : > { %v8677_v42 = vadd.f32 %v8545_v34, %v19082_v3  ;;  %v13861_v43 = vpop.f32.mrb[99].mxu1  ;;  %14158 = vmatmul.mubr.msk.f32.gmra.mrb[204].mxu1 %vm4866_vm3, %v9210_v17 }
 0x76f   : > { %v9025_v10 = vpop.f32.mrb[180].mxu0  ;;  %14160 = vmatprep.mubr.msk.f32.mxu1 %vm14273_vm1, %v20674_v63 }
 0x770   : > { %v13992_v9 = vpop.f32.mrb[181].mxu0  ;;  %v19363_v22 = vadd.f32 %v9025_v10, %v8677_v42 }
 0x771   : > { %v8550_v48 = vpop.f32.mrb[100].mxu1  ;;  %v9214_v9 = vld [vmem:[#allocation2 + $0x136] sm:$0xff] }
 0x772   : > { %v8678_v5 = vadd.f32 %v8550_v48, %v19092_v16  ;;  %v13864_v59 = vpop.f32.mrb[101].mxu1  ;;  %14161 = vmatmul.mubr.msk.f32.gmra.mrb[206].mxu1 %vm4866_vm3, %v9211_v31 }
 0x773   : > { %v9030_v56 = vpop.f32.mrb[182].mxu0  ;;  %14163 = vmatprep.mubr.msk.f32.mxu1 %vm14273_vm1, %v20674_v63 }
 0x774   : > { %v13995_v33 = vpop.f32.mrb[183].mxu0  ;;  %v19369_v3 = vadd.f32 %v9030_v56, %v8678_v5 }
 0x775   : > { %v8555_v61 = vpop.f32.mrb[102].mxu1  ;;  %v9215_v33 = vld [vmem:[#allocation2 + $0x13e] sm:$0xff] }
 0x776   : > { %v8679_v45 = vadd.f32 %v8555_v61, %v19102_v15  ;;  %v13867_v8 = vpop.f32.mrb[103].mxu1  ;;  %14164 = vmatmul.mubr.msk.f32.gmra.mrb[208].mxu1 %vm4866_vm3, %v9212_v26 }
 0x777   : > { %v9035_v18 = vpop.f32.mrb[184].mxu0  ;;  %14166 = vmatprep.mubr.msk.f32.mxu1 %vm14273_vm1, %v20674_v63 }
 0x778   : > { %v13998_v58 = vpop.f32.mrb[185].mxu0  ;;  %v19375_v16 = vadd.f32 %v9035_v18, %v8679_v45 }
 0x779   : > { %v8560_v62 = vpop.f32.mrb[104].mxu1  ;;  %v9216_v58 = vld [vmem:[#allocation2 + $0x146] sm:$0xff] }
 0x77a   : > { %v8680_v34 = vadd.f32 %v8560_v62, %v19112_v50  ;;  %v13870_v10 = vpop.f32.mrb[105].mxu1  ;;  %14167 = vmatmul.mubr.msk.f32.gmra.mrb[210].mxu1 %vm4866_vm3, %v9213_v20 }
 0x77b   : > { %v9040_v60 = vpop.f32.mrb[186].mxu0  ;;  %14169 = vmatprep.mubr.msk.f32.mxu1 %vm14273_vm1, %v20674_v63 }
 0x77c   : > { %v14001_v17 = vpop.f32.mrb[187].mxu0  ;;  %v19381_v15 = vadd.f32 %v9040_v60, %v8680_v34 }
 0x77d   : > { %v8565_v42 = vpop.f32.mrb[106].mxu1  ;;  %v9217_v17 = vld [vmem:[#allocation2 + $0x14e] sm:$0xff] }
 0x77e   : > { %v8681_v48 = vadd.f32 %v8565_v42, %v19122_v25  ;;  %v13873_v56 = vpop.f32.mrb[107].mxu1  ;;  %14170 = vmatmul.mubr.msk.f32.gmra.mrb[212].mxu1 %vm4866_vm3, %v9214_v9 }
 0x77f   : > { %v9045_v43 = vpop.f32.mrb[188].mxu0  ;;  %14172 = vmatprep.mubr.msk.f32.mxu1 %vm14273_vm1, %v20674_v63 }
 0x780   : > { %v14004_v31 = vpop.f32.mrb[189].mxu0  ;;  %v19387_v50 = vadd.f32 %v9045_v43, %v8681_v48 }
 0x781   : > { %v8570_v5 = vpop.f32.mrb[108].mxu1  ;;  %v9218_v31 = vld [vmem:[#allocation2 + $0x156] sm:$0xff] }
 0x782   : > { %v8682_v61 = vadd.f32 %v8570_v5, %v19132_v23  ;;  %v13876_v18 = vpop.f32.mrb[109].mxu1  ;;  %14173 = vmatmul.mubr.msk.f32.gmra.mrb[214].mxu1 %vm4866_vm3, %v9215_v33 }
 0x783   : > { %v9050_v59 = vpop.f32.mrb[190].mxu0  ;;  %14175 = vmatprep.mubr.msk.f32.mxu1 %vm14273_vm1, %v20674_v63 }
 0x784   : > { %v14007_v26 = vpop.f32.mrb[191].mxu0  ;;  %v19393_v25 = vadd.f32 %v9050_v59, %v8682_v61 }
 0x785   : > { %v8575_v45 = vpop.f32.mrb[110].mxu1 }
 0x786   : > { %v8683_v62 = vadd.f32 %v8575_v45, %v19142_v11  ;;  %v13879_v60 = vpop.f32.mrb[111].mxu1  ;;  %14176 = vmatmul.mubr.msk.f32.gmra.mrb[216].mxu1 %vm4866_vm3, %v9216_v58 }
 0x787   : > { %v9055_v8 = vpop.f32.mrb[192].mxu0  ;;  %14178 = vmatprep.mubr.msk.f32.mxu1 %vm14273_vm1, %v20674_v63 }
 0x788   : > { %v14010_v20 = vpop.f32.mrb[193].mxu0  ;;  %v19399_v23 = vadd.f32 %v9055_v8, %v8683_v62 }
 0x789   : > { %v8580_v34 = vpop.f32.mrb[112].mxu1 }
 0x78a   : > { %v8684_v42 = vadd.f32 %v8580_v34, %v19152_v38  ;;  %v13882_v43 = vpop.f32.mrb[113].mxu1  ;;  %14179 = vmatmul.mubr.msk.f32.gmra.mrb[218].mxu1 %vm4866_vm3, %v9217_v17  ;;  %v9219_v38 = vld [vmem:[#allocation2 + $0x15e] sm:$0xff] }
 0x78b   : > { %v9060_v10 = vpop.f32.mrb[194].mxu0  ;;  %14181 = vmatprep.mubr.msk.f32.mxu1 %vm14273_vm1, %v20674_v63 }
 0x78c   : > { %v14013_v9 = vpop.f32.mrb[195].mxu0  ;;  %v19405_v11 = vadd.f32 %v9060_v10, %v8684_v42 }
 0x78d   : > { %v8585_v48 = vpop.f32.mrb[114].mxu1 }
 0x78e   : > { %v8685_v5 = vadd.f32 %v8585_v48, %v19161_v7  ;;  %v13885_v59 = vpop.f32.mrb[115].mxu1  ;;  %14182 = vmatmul.mubr.msk.f32.gmra.mrb[220].mxu1 %vm4866_vm3, %v9218_v31  ;;  %v9220_v7 = vld [vmem:[#allocation2 + $0x166] sm:$0xf] }
 0x78f   : > { %v9065_v56 = vpop.f32.mrb[196].mxu0  ;;  %14184 = vmatprep.mubr.msk.f32.mxu1 %vm14273_vm1, %v20674_v63 }
 0x790   : > { %v14016_v33 = vpop.f32.mrb[197].mxu0  ;;  %v19411_v61 = vadd.f32 %v9065_v56, %v8685_v5 }
 0x791   : > { %v8590_v18 = vpop.f32.mrb[116].mxu1 }
 0x792   : > { %v8686_v45 = vadd.f32 %v8590_v18, %v19170_v30  ;;  %v13888_v8 = vpop.f32.mrb[117].mxu1  ;;  %14185 = vmatmul.mubr.msk.f32.gmra.mrb[222].mxu1 %vm4866_vm3, %v9219_v38 }
 0x793   : > { %v9070_v26 = vpop.f32.mrb[198].mxu0  ;;  %14187 = vmatprep.mubr.msk.f32.mxu1 %vm14273_vm1, %v20674_v63 }
 0x794   : > { %v14019_v58 = vpop.f32.mrb[199].mxu0  ;;  %v19417_v62 = vadd.f32 %v9070_v26, %v8686_v45 }
 0x795   : > { %v8595_v60 = vpop.f32.mrb[118].mxu1 }
 0x796   : > { %v8687_v34 = vadd.f32 %v8595_v60, %v19177_v0  ;;  %v13891_v10 = vpop.f32.mrb[119].mxu1  ;;  %14188 = vmatmul.mubr.msk.f32.gmra.mrb[224].mxu1 %vm4866_vm3, %v9220_v7 }
 0x797   : > { %v9075_v20 = vpop.f32.mrb[200].mxu0 }
 0x798   : > { %v14022_v17 = vpop.f32.mrb[201].mxu0  ;;  %v19421_v42 = vadd.f32 %v9075_v20, %v8687_v34 }
 0x799   : > { %v8600_v30 = vpop.f32.mrb[120].mxu1 }
 0x79a   : > { %v8688_v9 = vadd.f32 %v8600_v30, %v19183_v39  ;;  %v13894_v48 = vpop.f32.mrb[121].mxu1 }
 0x79b   : > { %v9080_v43 = vpop.f32.mrb[202].mxu0 }
 0x79c   : > { %v14025_v56 = vpop.f32.mrb[203].mxu0  ;;  %v19424_v63 = vadd.f32 %v9080_v43, %v8688_v9 }
 0x79d   : > { %v8605_v31 = vpop.f32.mrb[122].mxu1 }
 0x79e   : > { %v8689_v59 = vadd.f32 %v8605_v31, %v19189_v49  ;;  %v13897_v33 = vpop.f32.mrb[123].mxu1 }
 0x79f   : > { %v9085_v5 = vpop.f32.mrb[204].mxu0 }
 0x7a0   : > { %v14028_v0 = vpop.f32.mrb[205].mxu0  ;;  %v19427_v38 = vadd.f32 %v9085_v5, %v8689_v59 }
 0x7a1   : > { %v8610_v18 = vpop.f32.mrb[124].mxu1 }
 0x7a2   : > { %v8690_v45 = vadd.f32 %v8610_v18, %v19195_v57  ;;  %v13900_v8 = vpop.f32.mrb[125].mxu1 }
 0x7a3   : > { %v9090_v26 = vpop.f32.mrb[206].mxu0 }
 0x7a4   : > { %v14031_v58 = vpop.f32.mrb[207].mxu0  ;;  %v19430_v7 = vadd.f32 %v9090_v26, %v8690_v45 }
 0x7a5   : > { %v8615_v39 = vpop.f32.mrb[126].mxu1 }
 0x7a6   : > { %v8691_v20 = vadd.f32 %v8615_v39, %v19201_v14  ;;  %v13903_v34 = vpop.f32.mrb[127].mxu1 }
 0x7a7   : > { %v9095_v60 = vpop.f32.mrb[208].mxu0 }
 0x7a8   : > { %v14034_v10 = vpop.f32.mrb[209].mxu0  ;;  %v19433_v17 = vadd.f32 %v9095_v60, %v8691_v20 }
 0x7a9   : > { %v8620_v49 = vpop.f32.mrb[128].mxu1 }
 0x7aa   : > { %v8692_v43 = vadd.f32 %v8620_v49, %v19207_v21  ;;  %v13906_v9 = vpop.f32.mrb[129].mxu1 }
 0x7ab   : > { %v9100_v30 = vpop.f32.mrb[210].mxu0 }
 0x7ac   : > { %v14037_v48 = vpop.f32.mrb[211].mxu0  ;;  %v19436_v56 = vadd.f32 %v9100_v30, %v8692_v43 }
 0x7ad   : > { %v8625_v57 = vpop.f32.mrb[130].mxu1 }
 0x7ae   : > { %v8693_v5 = vadd.f32 %v8625_v57, %v19213_v55  ;;  %v13909_v59 = vpop.f32.mrb[131].mxu1 }
 0x7af   : > { %v9105_v31 = vpop.f32.mrb[212].mxu0 }
 0x7b0   : > { %v14040_v33 = vpop.f32.mrb[213].mxu0  ;;  %v19439_v0 = vadd.f32 %v9105_v31, %v8693_v5 }
 0x7b1   : > { %v8630_v14 = vpop.f32.mrb[132].mxu1 }
 0x7b2   : > { %v8694_v26 = vadd.f32 %v8630_v14, %v19219_v27  ;;  %v13912_v45 = vpop.f32.mrb[133].mxu1 }
 0x7b3   : > { %v9110_v18 = vpop.f32.mrb[214].mxu0 }
 0x7b4   : > { %v14043_v8 = vpop.f32.mrb[215].mxu0  ;;  %v19442_v58 = vadd.f32 %v9110_v18, %v8694_v26 }
 0x7b5   : > { %v8635_v21 = vpop.f32.mrb[134].mxu1 }
 0x7b6   : > { %v8695_v60 = vadd.f32 %v8635_v21, %v19225_v13  ;;  %v13915_v20 = vpop.f32.mrb[135].mxu1 }
 0x7b7   : > { %v9115_v39 = vpop.f32.mrb[216].mxu0 }
 0x7b8   : > { %v14046_v34 = vpop.f32.mrb[217].mxu0  ;;  %v19445_v10 = vadd.f32 %v9115_v39, %v8695_v60 }
 0x7b9   : > { %v8640_v55 = vpop.f32.mrb[136].mxu1 }
 0x7ba   : > { %v8696_v30 = vadd.f32 %v8640_v55, %v19231_v24  ;;  %v13918_v43 = vpop.f32.mrb[137].mxu1 }
 0x7bb   : > { %v9120_v49 = vpop.f32.mrb[218].mxu0 }
 0x7bc   : > { %v14049_v9 = vpop.f32.mrb[219].mxu0  ;;  %v19448_v48 = vadd.f32 %v9120_v49, %v8696_v30 }
 0x7bd   : > { %v8645_v27 = vpop.f32.mrb[138].mxu1 }
 0x7be   : > { %v8697_v31 = vadd.f32 %v8645_v27, %v19237_v37  ;;  %v13921_v5 = vpop.f32.mrb[139].mxu1 }
 0x7bf   : > { %v9125_v57 = vpop.f32.mrb[220].mxu0 }
 0x7c0   : > { %v14052_v59 = vpop.f32.mrb[221].mxu0  ;;  %v19451_v33 = vadd.f32 %v9125_v57, %v8697_v31 }
 0x7c1   : > { %v8650_v13 = vpop.f32.mrb[140].mxu1 }
 0x7c2   : > { %v8698_v18 = vadd.f32 %v8650_v13, %v19243_v28  ;;  %v13924_v26 = vpop.f32.mrb[141].mxu1 }
 0x7c3   : > { %v9130_v14 = vpop.f32.mrb[222].mxu0 }
 0x7c4   : > { %v14055_v45 = vpop.f32.mrb[223].mxu0  ;;  %v19454_v8 = vadd.f32 %v9130_v14, %v8698_v18 }
 0x7c5   : > { %v8655_v24 = vpop.f32.mrb[142].mxu1 }
 0x7c6   : > { %v8699_v39 = vadd.f32 %v8655_v24, %v19249_v46  ;;  %v13927_v60 = vpop.f32.mrb[143].mxu1 }
 0x7c7   : > { %v9135_v21 = vpop.f32.mrb[224].mxu0 }
 0x7c8   : > { %v14058_v20 = vpop.f32.mrb[225].mxu0  ;;  %v19457_v34 = vadd.f32 %v9135_v21, %v8699_v39 }
 0x7c9   : > { %v9415_v37 = vpop.f32.mrb[144].mxu1 }
 0x7ca   : > { %v9619_v55 = vadd.f32 %v9415_v37, %v19255_v2  ;;  %v14069_v49 = vpop.f32.mrb[145].mxu1 }
 0x7cd   : > { %v9420_v30 = vpop.f32.mrb[146].mxu1 }
 0x7ce   : > { %v9620_v43 = vadd.f32 %v9420_v30, %v19261_v36  ;;  %v14072_v28 = vpop.f32.mrb[147].mxu1 }
 0x7d1   : > { %v9425_v9 = vpop.f32.mrb[148].mxu1 }
 0x7d2   : > { %v9621_v27 = vadd.f32 %v9425_v9, %v19267_v29  ;;  %v14075_v57 = vpop.f32.mrb[149].mxu1 }
 0x7d5   : > { %v9430_v31 = vpop.f32.mrb[150].mxu1 }
 0x7d6   : > { %v9622_v5 = vadd.f32 %v9430_v31, %v19273_v12  ;;  %v14078_v46 = vpop.f32.mrb[151].mxu1 }
 0x7d9   : > { %v9435_v59 = vpop.f32.mrb[152].mxu1 }
 0x7da   : > { %v9623_v13 = vadd.f32 %v9435_v59, %v19279_v4  ;;  %v14081_v14 = vpop.f32.mrb[153].mxu1 }
 0x7dd   : > { %v9440_v18 = vpop.f32.mrb[154].mxu1 }
 0x7de   : > { %v9624_v2 = vadd.f32 %v9440_v18, %v19285_v6  ;;  %v14084_v26 = vpop.f32.mrb[155].mxu1 }
 0x7e1   : > { %v9445_v45 = vpop.f32.mrb[156].mxu1 }
 0x7e2   : > { %v9625_v36 = vadd.f32 %v9445_v45, %v19291_v44  ;;  %v14087_v24 = vpop.f32.mrb[157].mxu1 }
 0x7e5   : > { %v9450_v21 = vpop.f32.mrb[158].mxu1 }
 0x7e6   : > { %v9626_v29 = vadd.f32 %v9450_v21, %v19297_v32  ;;  %v14090_v39 = vpop.f32.mrb[159].mxu1 }
 0x7e9   : > { %v9455_v60 = vpop.f32.mrb[160].mxu1 }
 0x7ea   : > { %v19468_v12 = vadd.f32 %v9455_v60, %v19303_v54  ;;  %v14093_v20 = vpop.f32.mrb[161].mxu1 }
 0x7eb   : > { %v20740_v20 = vld [vmem:[#allocation6_spill] sm:$0xff] }
 0x7ed   : > { %v9460_v37 = vpop.f32.mrb[162].mxu1 }
 0x7ee   : > { %v19471_v4 = vadd.f32 %v9460_v37, %v19309_v41  ;;  %v14096_v49 = vpop.f32.mrb[163].mxu1  ;;  %v19485_v41 = vld [vmem:[%s20359_s5] ss:$0 sm:$0xff] }
 0x7ef   : > { %v19494_v14 = vadd.f32 %v19485_v41, %v9619_v55  ;;  %v19514_v39 = vadd.f32 %v19485_v41, %v9623_v13 }
 0x7f1   : > { %v9465_v6 = vpop.f32.mrb[164].mxu1  ;;  %20739 = vst [vmem:[#allocation16_spill] sm:$0xff] %v19514_v39 }
 0x7f2   : > { %v19474_v30 = vadd.f32 %v9465_v6, %v19315_v47  ;;  %v14099_v44 = vpop.f32.mrb[165].mxu1  ;;  %v19488_v47 = vadd.f32 %v19485_v41, %v9620_v43  ;;  %v9837_v43 = vmul.f32 %v19494_v14, %v19494_v14 }
 0x7f4   : > { %v9838_v26 = vmul.f32 %v19488_v47, %v19488_v47  ;;  %v9878_v44 = vmul.f32 %v9837_v43, %v20740_v20 }
 0x7f5   : > { %v9470_v28 = vpop.f32.mrb[166].mxu1 }
 0x7f6   : > { %v19477_v9 = vadd.f32 %v9470_v28, %v19321_v35  ;;  %v14102_v32 = vpop.f32.mrb[167].mxu1  ;;  %v19524_v28 = vadd.f32 %v19485_v41, %v9624_v2 }
 0x7f7   : > { %v20742_v32 = vld [vmem:[#allocation7_spill] sm:$0xff] }
 0x7f8   : > { %20741 = vst [vmem:[#allocation18_spill] sm:$0xff] %v19524_v28 }
 0x7f9   : > { %v9475_v57 = vpop.f32.mrb[168].mxu1 }
 0x7fa   : > { %v19480_v54 = vadd.f32 %v9475_v57, %v19327_v1  ;;  %v14105_v31 = vpop.f32.mrb[169].mxu1  ;;  %v19497_v1 = vadd.f32 %v19485_v41, %v9621_v27  ;;  %v19511_v27 = vadd.f32 %v19485_v41, %v9622_v5 }
 0x7fc   : > { %v9839_v55 = vmul.f32 %v19497_v1, %v19497_v1  ;;  %v9710_v13 = vmul.f32 %v19497_v1, %v20742_v32  ;;  %v9840_v31 = vmul.f32 %v19511_v27, %v19511_v27 }
 0x7fd   : > { %v9480_v46 = vpop.f32.mrb[170].mxu1 }
 0x7fe   : > { %v19491_v59 = vadd.f32 %v9480_v46, %v19333_v53  ;;  %v14108_v35 = vpop.f32.mrb[171].mxu1  ;;  %v20738_v53 = vld [vmem:[#allocation8_spill] sm:$0xff]  ;;  %v9880_v57 = vmul.f32 %v9839_v55, %v20742_v32  ;;  %v19535_v46 = vadd.f32 %v19485_v41, %v9625_v36  ;;  %v9919_v55 = vsel %vm4866_vm3, %v9878_v44, 0.0  ;;  %v20746_v44 = vld [vmem:[#allocation11_spill] sm:$0xff] }
 0x7ff   : > { %v9709_v21 = vmul.f32 %v19488_v47, %v20738_v53  ;;  %v9879_v37 = vmul.f32 %v9838_v26, %v20738_v53  ;;  %v20743_v26 = vld [vmem:[#allocation9_spill] sm:$0xff]  ;;  %v19548_v36 = vadd.f32 %v19485_v41, %v9626_v29  ;;  %v20745_v53 = vld [vmem:[#allocation10_spill] sm:$0xff] }
 0x800   : > { %v9881_v32 = vmul.f32 %v9840_v31, %v20743_v26 }
 0x801   : > { %v9485_v18 = vpop.f32.mrb[172].mxu1  ;;  %v9750_v5 = vsel %vm4866_vm3, %v9709_v21, 0.0  ;;  %20744 = vst [vmem:[#allocation20_spill] sm:$0xff] %v19548_v36 }
 0x802   : > { %v19502_v45 = vadd.f32 %v9485_v18, %v19339_v52  ;;  %v14111_v24 = vpop.f32.mrb[173].mxu1  ;;  %v9708_v52 = vmul.f32 %v19494_v14, %v20740_v20  ;;  %v9920_v18 = vsel %vm4866_vm3, %v9879_v37, 0.0  ;;  %v9922_v37 = vsel %vm4866_vm3, %v9880_v57, 0.0 }
 0x803   : > { %v9711_v24 = vmul.f32 %v19511_v27, %v20743_v26  ;;  %v9924_v26 = vsel %vm4866_vm3, %v9881_v32, 0.0 }
 0x804   : > { %v9749_v2 = vsel %vm4866_vm3, %v9708_v52, 0.0  ;;  %v9752_v52 = vsel %vm4866_vm3, %v9710_v13, 0.0  ;;  %v19563_v13 = vadd.f32 %v19485_v41, %v19468_v12  ;;  %v19577_v12 = vadd.f32 %v19485_v41, %v19471_v4 }
 0x805   : > { %v9490_v60 = vpop.f32.mrb[174].mxu1  ;;  %v9754_v20 = vsel %vm4866_vm3, %v9711_v24, 0.0  ;;  %v20747_v24 = vld [vmem:[#allocation12_spill] sm:$0xff] }
 0x806   : > { %v19520_v49 = vadd.f32 %v9490_v60, %v19345_v19  ;;  %v14114_v6 = vpop.f32.mrb[175].mxu1  ;;  %v9841_v19 = vmul.f32 %v19514_v39, %v19514_v39  ;;  %v9751_v60 = vadd.f32 %v9750_v5, %v9749_v2  ;;  %v9713_v5 = vmul.f32 %v19524_v28, %v20746_v44 }
 0x807   : > { %v9842_v6 = vmul.f32 %v19524_v28, %v19524_v28  ;;  %v9843_v2 = vmul.f32 %v19535_v46, %v19535_v46 }
 0x809   : > { %v9495_v35 = vpop.f32.mrb[176].mxu1 }
 0x80a   : > { %v19542_v43 = vadd.f32 %v9495_v35, %v19351_v51  ;;  %v14117_v21 = vpop.f32.mrb[177].mxu1  ;;  %v9712_v51 = vmul.f32 %v19514_v39, %v20745_v53  ;;  %v9921_v35 = vadd.f32 %v9920_v18, %v9919_v55  ;;  %v9753_v18 = vadd.f32 %v9752_v52, %v9751_v60 }
 0x80b   : > { %v9882_v21 = vmul.f32 %v9841_v19, %v20745_v53  ;;  %v9883_v19 = vmul.f32 %v9842_v6, %v20746_v44  ;;  %v9844_v53 = vmul.f32 %v19548_v36, %v19548_v36  ;;  %v9714_v39 = vmul.f32 %v19535_v46, %v20747_v24 }
 0x80c   : > { %v9923_v55 = vadd.f32 %v9922_v37, %v9921_v35  ;;  %v9756_v28 = vsel %vm4866_vm3, %v9712_v51, 0.0  ;;  %v9758_v52 = vsel %vm4866_vm3, %v9713_v5, 0.0  ;;  %v9884_v6 = vmul.f32 %v9843_v2, %v20747_v24  ;;  %v20748_v35 = vld [vmem:[#allocation15_spill] sm:$0xff]  ;;  %v20749_v24 = vld [vmem:[#allocation17_spill] sm:$0xff] }
 0x80d   : > { %v9500_v29 = vpop.f32.mrb[178].mxu1  ;;  %v9926_v60 = vsel %vm4866_vm3, %v9882_v21, 0.0  ;;  %v9715_v32 = vmul.f32 %v19548_v36, %v20748_v35  ;;  %v9845_v51 = vmul.f32 %v19563_v13, %v19563_v13  ;;  %v9928_v5 = vsel %vm4866_vm3, %v9883_v19, 0.0 }
 0x80e   : > { %v19566_v57 = vadd.f32 %v9500_v29, %v19357_v40  ;;  %v14120_v31 = vpop.f32.mrb[179].mxu1  ;;  %v9755_v40 = vadd.f32 %v9754_v20, %v9753_v18  ;;  %v19588_v29 = vadd.f32 %v19485_v41, %v19474_v30  ;;  %v9925_v21 = vadd.f32 %v9924_v26, %v9923_v55 }
 0x80f   : > { %v9885_v2 = vmul.f32 %v9844_v53, %v20748_v35  ;;  %v9760_v18 = vsel %vm4866_vm3, %v9714_v39, 0.0  ;;  %v9716_v44 = vmul.f32 %v19563_v13, %v20749_v24  ;;  %v9846_v36 = vmul.f32 %v19577_v12, %v19577_v12 }
 0x810   : > { %v9757_v31 = vadd.f32 %v9756_v28, %v9755_v40  ;;  %v19602_v30 = vadd.f32 %v19485_v41, %v19477_v9  ;;  %v9930_v28 = vsel %vm4866_vm3, %v9884_v6, 0.0  ;;  %v19607_v26 = vadd.f32 %v19485_v41, %v19480_v54 }
 0x811   : > { %v9505_v37 = vpop.f32.mrb[180].mxu1  ;;  %v9762_v39 = vsel %vm4866_vm3, %v9715_v32, 0.0  ;;  %v9886_v55 = vmul.f32 %v9845_v51, %v20749_v24  ;;  %v9847_v19 = vmul.f32 %v19588_v29, %v19588_v29  ;;  %v9932_v6 = vsel %vm4866_vm3, %v9885_v2, 0.0 }
 0x812   : > { %v19591_v4 = vadd.f32 %v9505_v37, %v19363_v22  ;;  %v14123_v20 = vpop.f32.mrb[181].mxu1  ;;  %v9927_v22 = vadd.f32 %v9926_v60, %v9925_v21  ;;  %v9759_v37 = vadd.f32 %v9758_v52, %v9757_v31  ;;  %v9764_v21 = vsel %vm4866_vm3, %v9716_v44, 0.0 }
 0x813   : > { %v20750_v20 = vld [vmem:[#allocation19_spill] sm:$0xff]  ;;  %v9848_v51 = vmul.f32 %v19602_v30, %v19602_v30  ;;  %v19625_v31 = vadd.f32 %v19485_v41, %v19491_v59  ;;  %v9849_v2 = vmul.f32 %v19607_v26, %v19607_v26  ;;  %v9934_v44 = vsel %vm4866_vm3, %v9886_v55, 0.0 }
 0x814   : > { %v9929_v60 = vadd.f32 %v9928_v5, %v9927_v22  ;;  %v9761_v52 = vadd.f32 %v9760_v18, %v9759_v37  ;;  %v9717_v54 = vmul.f32 %v19577_v12, %v20750_v20  ;;  %v9887_v32 = vmul.f32 %v9846_v36, %v20750_v20  ;;  %v20751_v5 = vld [vmem:[#allocation21_spill] sm:$0xff] }
 0x815   : > { %v9510_v53 = vpop.f32.mrb[182].mxu1  ;;  %v9718_v18 = vmul.f32 %v19588_v29, %v20751_v5  ;;  %v9888_v36 = vmul.f32 %v9847_v19, %v20751_v5  ;;  %v19635_v37 = vadd.f32 %v19485_v41, %v19502_v45  ;;  %v9850_v19 = vmul.f32 %v19625_v31, %v19625_v31 }
 0x816   : > { %v19614_v40 = vadd.f32 %v9510_v53, %v19369_v3  ;;  %v14126_v9 = vpop.f32.mrb[183].mxu1  ;;  %v9931_v3 = vadd.f32 %v9930_v28, %v9929_v60  ;;  %v9763_v53 = vadd.f32 %v9762_v39, %v9761_v52  ;;  %v9766_v60 = vsel %vm4866_vm3, %v9717_v54, 0.0  ;;  %v20752_v52 = vld [vmem:[#allocation22_spill] sm:$0xff] }
 0x817   : > { %v9719_v20 = vmul.f32 %v19602_v30, %v20752_v52  ;;  %v9936_v24 = vsel %vm4866_vm3, %v9887_v32, 0.0  ;;  %v9889_v55 = vmul.f32 %v9848_v51, %v20752_v52  ;;  %v19649_v45 = vadd.f32 %v19485_v41, %v19520_v49  ;;  %v20754_v52 = vld [vmem:[#allocation24_spill] sm:$0xff] }
 0x818   : > { %v9933_v39 = vadd.f32 %v9932_v6, %v9931_v3  ;;  %v9765_v9 = vadd.f32 %v9764_v21, %v9763_v53  ;;  %v9768_v6 = vsel %vm4866_vm3, %v9718_v18, 0.0  ;;  %v20753_v21 = vld [vmem:[#allocation23_spill] sm:$0xff]  ;;  %v9938_v32 = vsel %vm4866_vm3, %v9888_v36, 0.0 }
 0x819   : > { %v9515_v22 = vpop.f32.mrb[184].mxu1  ;;  %v9720_v54 = vmul.f32 %v19607_v26, %v20753_v21  ;;  %v9890_v3 = vmul.f32 %v9849_v2, %v20753_v21  ;;  %v9851_v51 = vmul.f32 %v19635_v37, %v19635_v37  ;;  %v9721_v2 = vmul.f32 %v19625_v31, %v20754_v52 }
 0x81a   : > { %v19638_v59 = vadd.f32 %v9515_v22, %v19375_v16  ;;  %v14129_v28 = vpop.f32.mrb[185].mxu1  ;;  %v9935_v16 = vadd.f32 %v9934_v44, %v9933_v39  ;;  %v19660_v22 = vadd.f32 %v19485_v41, %v19542_v43  ;;  %v9770_v39 = vsel %vm4866_vm3, %v9719_v20, 0.0 }
 0x81b   : > { %v9767_v28 = vadd.f32 %v9766_v60, %v9765_v9  ;;  %v9940_v21 = vsel %vm4866_vm3, %v9889_v55, 0.0  ;;  %v9891_v36 = vmul.f32 %v9850_v19, %v20754_v52  ;;  %v9852_v5 = vmul.f32 %v19649_v45, %v19649_v45  ;;  %v20755_v60 = vld [vmem:[#allocation25_spill] sm:$0xff] }
 0x81c   : > { %v9937_v18 = vadd.f32 %v9936_v24, %v9935_v16  ;;  %v19672_v43 = vadd.f32 %v19485_v41, %v19566_v57  ;;  %v9772_v24 = vsel %vm4866_vm3, %v9720_v54, 0.0  ;;  %v9942_v20 = vsel %vm4866_vm3, %v9890_v3, 0.0 }
 0x81d   : > { %v9520_v53 = vpop.f32.mrb[186].mxu1  ;;  %v9722_v16 = vmul.f32 %v19635_v37, %v20755_v60  ;;  %v9892_v55 = vmul.f32 %v9851_v51, %v20755_v60  ;;  %v9853_v19 = vmul.f32 %v19660_v22, %v19660_v22  ;;  %v9944_v3 = vsel %vm4866_vm3, %v9891_v36, 0.0 }
 0x81e   : > { %v9640_v49 = vadd.f32 %v9520_v53, %v19381_v15  ;;  %v14132_v44 = vpop.f32.mrb[187].mxu1  ;;  %v9769_v15 = vadd.f32 %v9768_v6, %v9767_v28  ;;  %v9939_v53 = vadd.f32 %v9938_v32, %v9937_v18  ;;  %v9774_v6 = vsel %vm4866_vm3, %v9721_v2, 0.0  ;;  %v20756_v32 = vld [vmem:[#allocation26_spill] sm:$0xff] }
 0x81f   : > { %v9723_v54 = vmul.f32 %v19649_v45, %v20756_v32  ;;  %v9893_v28 = vmul.f32 %v9852_v5, %v20756_v32  ;;  %v9854_v51 = vmul.f32 %v19672_v43, %v19672_v43  ;;  %v19691_v18 = vadd.f32 %v19485_v41, %v19591_v4 }
 0x820   : > { %v9771_v57 = vadd.f32 %v9770_v39, %v9769_v15  ;;  %v9941_v35 = vadd.f32 %v9940_v21, %v9939_v53  ;;  %v20757_v39 = vld [vmem:[#allocation27_spill] sm:$0xff]  ;;  %v19697_v2 = vadd.f32 %v19485_v41, %v19614_v40  ;;  %v9776_v36 = vsel %vm4866_vm3, %v9722_v16, 0.0 }
 0x821   : > { %v9525_v9 = vpop.f32.mrb[188].mxu1  ;;  %v9724_v21 = vmul.f32 %v19660_v22, %v20757_v39  ;;  %v9946_v5 = vsel %vm4866_vm3, %v9892_v55, 0.0  ;;  %v9894_v53 = vmul.f32 %v9853_v19, %v20757_v39  ;;  %v9948_v40 = vsel %vm4866_vm3, %v9893_v28, 0.0  ;;  %v20759_v28 = vld [vmem:[#allocation29_spill] sm:$0xff] }
 0x822   : > { %v9641_v44 = vadd.f32 %v9525_v9, %v19387_v50  ;;  %v14135_v52 = vpop.f32.mrb[189].mxu1  ;;  %v9773_v50 = vadd.f32 %v9772_v24, %v9771_v57  ;;  %v9855_v16 = vmul.f32 %v19691_v18, %v19691_v18  ;;  %v19712_v55 = vadd.f32 %v19485_v41, %v19638_v59 }
 0x823   : > { %v9943_v52 = vadd.f32 %v9942_v20, %v9941_v35  ;;  %v9778_v35 = vsel %vm4866_vm3, %v9723_v54, 0.0  ;;  %v20758_v20 = vld [vmem:[#allocation28_spill] sm:$0xff]  ;;  %v9856_v54 = vmul.f32 %v19697_v2, %v19697_v2 }
 0x824   : > { %v9775_v32 = vadd.f32 %v9774_v6, %v9773_v50  ;;  %v9725_v57 = vmul.f32 %v19672_v43, %v20758_v20  ;;  %v9895_v60 = vmul.f32 %v9854_v51, %v20758_v20  ;;  %v9780_v6 = vsel %vm4866_vm3, %v9724_v21, 0.0 }
 0x825   : > { %v9530_v15 = vpop.f32.mrb[190].mxu1  ;;  %v9945_v24 = vadd.f32 %v9944_v3, %v9943_v52  ;;  %v9950_v50 = vsel %vm4866_vm3, %v9894_v53, 0.0  ;;  %v9726_v51 = vmul.f32 %v19691_v18, %v20759_v28  ;;  %v19721_v52 = vadd.f32 %v19485_v41, %v9640_v49 }
 0x826   : > { %v9642_v9 = vadd.f32 %v9530_v15, %v19393_v25  ;;  %v14138_v4 = vpop.f32.mrb[191].mxu1  ;;  %v9777_v25 = vadd.f32 %v9776_v36, %v9775_v32  ;;  %v9782_v36 = vsel %vm4866_vm3, %v9725_v57, 0.0  ;;  %v19726_v21 = vadd.f32 %v19485_v41, %v9641_v44 }
 0x827   : > { %v9947_v19 = vadd.f32 %v9946_v5, %v9945_v24  ;;  %v9952_v5 = vsel %vm4866_vm3, %v9895_v60, 0.0  ;;  %v9896_v53 = vmul.f32 %v9855_v16, %v20759_v28  ;;  %v20761_v24 = vld [vmem:[#allocation30_spill] sm:$0xff]  ;;  %v9857_v49 = vmul.f32 %v19712_v55, %v19712_v55 }
 0x828   : > { %v9779_v4 = vadd.f32 %v9778_v35, %v9777_v25  ;;  %20760 = vst [vmem:[#allocation14_spill] sm:$0xff] %v19726_v21  ;;  %v9727_v20 = vmul.f32 %v19697_v2, %v20761_v24  ;;  %v9897_v35 = vmul.f32 %v9856_v54, %v20761_v24  ;;  %v9784_v44 = vsel %vm4866_vm3, %v9726_v51, 0.0  ;;  %v20762_v25 = vld [vmem:[#allocation31_spill] sm:$0xff] }
 0x829   : > { %v9535_v3 = vpop.f32.mrb[192].mxu1  ;;  %v9949_v32 = vadd.f32 %v9948_v40, %v9947_v19  ;;  %v19736_v40 = vadd.f32 %v19485_v41, %v9642_v9  ;;  %v9728_v60 = vmul.f32 %v19712_v55, %v20762_v25  ;;  %v9858_v16 = vmul.f32 %v19721_v52, %v19721_v52 }
 0x82a   : > { %v9643_v15 = vadd.f32 %v9535_v3, %v19399_v23  ;;  %v14141_v59 = vpop.f32.mrb[193].mxu1  ;;  %v9781_v39 = vadd.f32 %v9780_v6, %v9779_v4  ;;  %v9859_v54 = vmul.f32 %v19726_v21, %v19726_v21  ;;  %v9786_v51 = vsel %vm4866_vm3, %v9727_v20, 0.0  ;;  %v20764_v20 = vld [vmem:[#allocation33_spill] sm:$0xff] }
 0x82b   : > { %v9951_v23 = vadd.f32 %v9950_v50, %v9949_v32  ;;  %v9954_v50 = vsel %vm4866_vm3, %v9896_v53, 0.0  ;;  %v9898_v4 = vmul.f32 %v9857_v49, %v20762_v25  ;;  %v20763_v32 = vld [vmem:[#allocation32_spill] sm:$0xff]  ;;  %v9730_v49 = vmul.f32 %v19726_v21, %v20764_v20 }
 0x82c   : > { %v9783_v59 = vadd.f32 %v9782_v36, %v9781_v39  ;;  %v19747_v9 = vadd.f32 %v19485_v41, %v9643_v15  ;;  %v9729_v24 = vmul.f32 %v19721_v52, %v20763_v32  ;;  %v9860_v39 = vmul.f32 %v19736_v40, %v19736_v40 }
 0x82d   : > { %v9540_v57 = vpop.f32.mrb[194].mxu1  ;;  %v9953_v6 = vadd.f32 %v9952_v5, %v9951_v23  ;;  %v9788_v5 = vsel %vm4866_vm3, %v9728_v60, 0.0  ;;  %v9899_v53 = vmul.f32 %v9858_v16, %v20763_v32  ;;  %v20765_v60 = vld [vmem:[#allocation34_spill] sm:$0xff] }
 0x82e   : > { %v9644_v19 = vadd.f32 %v9540_v57, %v19405_v11  ;;  %v14144_v3 = vpop.f32.mrb[195].mxu1  ;;  %v9785_v28 = vadd.f32 %v9784_v44, %v9783_v59  ;;  %v9956_v11 = vsel %vm4866_vm3, %v9897_v35, 0.0  ;;  %v9900_v35 = vmul.f32 %v9859_v54, %v20764_v20 }
 0x82f   : > { %v9955_v44 = vadd.f32 %v9954_v50, %v9953_v6  ;;  %v9861_v59 = vmul.f32 %v19747_v9, %v19747_v9  ;;  %v9790_v25 = vsel %vm4866_vm3, %v9729_v24, 0.0  ;;  %v9731_v16 = vmul.f32 %v19736_v40, %v20765_v60 }
 0x830   : > { %v19758_v36 = vadd.f32 %v19485_v41, %v9644_v19  ;;  %v9787_v3 = vadd.f32 %v9786_v51, %v9785_v28  ;;  %v9958_v19 = vsel %vm4866_vm3, %v9898_v4, 0.0  ;;  %v9901_v6 = vmul.f32 %v9860_v39, %v20765_v60  ;;  %v20767_v4 = vld [vmem:[#allocation35_spill] sm:$0xff] }
 0x831   : > { %v9545_v15 = vpop.f32.mrb[196].mxu1  ;;  %v9957_v21 = vadd.f32 %v9956_v11, %v9955_v44  ;;  %v9960_v50 = vsel %vm4866_vm3, %v9899_v53, 0.0  ;;  %v9792_v51 = vsel %vm4866_vm3, %v9730_v49, 0.0  ;;  %v9732_v24 = vmul.f32 %v19747_v9, %v20767_v4  ;;  %v20768_v44 = vld [vmem:[#allocation36_spill] sm:$0xff] }
 0x832   : > { %v9645_v23 = vadd.f32 %v9545_v15, %v19411_v61  ;;  %v14147_v57 = vpop.f32.mrb[197].mxu1  ;;  %v9789_v61 = vadd.f32 %v9788_v5, %v9787_v3  ;;  %v9862_v28 = vmul.f32 %v19758_v36, %v19758_v36  ;;  %v9962_v11 = vsel %vm4866_vm3, %v9900_v35, 0.0 }
 0x833   : > { %v9902_v39 = vmul.f32 %v9861_v59, %v20767_v4  ;;  %v9794_v5 = vsel %vm4866_vm3, %v9731_v16, 0.0  ;;  %v9733_v3 = vmul.f32 %v19758_v36, %v20768_v44  ;;  %v9796_v59 = vsel %vm4866_vm3, %v9732_v24, 0.0 }
 0x834   : > { %v19773_v32 = vadd.f32 %v19485_v41, %v9645_v23  ;;  %v9959_v23 = vadd.f32 %v9958_v19, %v9957_v21  ;;  %v9791_v20 = vadd.f32 %v9790_v25, %v9789_v61  ;;  %v9964_v21 = vsel %vm4866_vm3, %v9901_v6, 0.0  ;;  %v20769_v19 = vld [vmem:[#allocation37_spill] sm:$0xff] }
 0x835   : > { %v9550_v54 = vpop.f32.mrb[198].mxu1  ;;  %v9903_v25 = vmul.f32 %v9862_v28, %v20768_v44  ;;  %v9798_v6 = vsel %vm4866_vm3, %v9733_v3, 0.0 }
 0x836   : > { %20766 = vst [vmem:[#allocation13_spill] sm:$0xff] %v19773_v32  ;;  %v9646_v15 = vadd.f32 %v9550_v54, %v19417_v62  ;;  %v14150_v57 = vpop.f32.mrb[199].mxu1  ;;  %v9863_v53 = vmul.f32 %v19773_v32, %v19773_v32  ;;  %v9961_v60 = vadd.f32 %v9960_v50, %v9959_v23  ;;  %v9793_v62 = vadd.f32 %v9792_v51, %v9791_v20  ;;  %v20770_v50 = vld [vmem:[#allocation38_spill] sm:$0xff] }
 0x837   : > { %v9734_v16 = vmul.f32 %v19773_v32, %v20769_v19  ;;  %v9966_v20 = vsel %vm4866_vm3, %v9902_v39, 0.0  ;;  %v9968_v32 = vsel %vm4866_vm3, %v9903_v25, 0.0  ;;  %v20771_v39 = vld [vmem:[#allocation39_spill] sm:$0xff] }
 0x838   : > { %v19791_v49 = vadd.f32 %v19485_v41, %v9646_v15  ;;  %v9963_v15 = vadd.f32 %v9962_v11, %v9961_v60  ;;  %v9795_v4 = vadd.f32 %v9794_v5, %v9793_v62  ;;  %v9904_v28 = vmul.f32 %v9863_v53, %v20769_v19 }
 0x839   : > { %v9555_v35 = vpop.f32.mrb[200].mxu1  ;;  %v9800_v11 = vsel %vm4866_vm3, %v9734_v16, 0.0 }
 0x83a   : > { %v9864_v61 = vmul.f32 %v19791_v49, %v19791_v49  ;;  %v9647_v54 = vadd.f32 %v9555_v35, %v19421_v42  ;;  %v14153_v57 = vpop.f32.mrb[201].mxu1  ;;  %v9735_v51 = vmul.f32 %v19791_v49, %v20770_v50  ;;  %v9965_v23 = vadd.f32 %v9964_v21, %v9963_v15 }
 0x83b   : > { %v9797_v44 = vadd.f32 %v9796_v59, %v9795_v4  ;;  %v9970_v4 = vsel %vm4866_vm3, %v9904_v28, 0.0 }
 0x83c   : > { %v19807_v24 = vadd.f32 %v19485_v41, %v9647_v54  ;;  %v9905_v42 = vmul.f32 %v9864_v61, %v20770_v50  ;;  %v9967_v35 = vadd.f32 %v9966_v20, %v9965_v23  ;;  %v9802_v21 = vsel %vm4866_vm3, %v9735_v51, 0.0 }
 0x83d   : > { %v9560_v60 = vpop.f32.mrb[202].mxu1  ;;  %v9799_v54 = vadd.f32 %v9798_v6, %v9797_v44 }
 0x83e   : > { %v9736_v5 = vmul.f32 %v19807_v24, %v20771_v39  ;;  %v9865_v3 = vmul.f32 %v19807_v24, %v19807_v24  ;;  %v9648_v53 = vadd.f32 %v9560_v60, %v19424_v63  ;;  %v14156_v62 = vpop.f32.mrb[203].mxu1  ;;  %v9969_v16 = vadd.f32 %v9968_v32, %v9967_v35  ;;  %v20772_v63 = vld [vmem:[#allocation40_spill] sm:$0xff]  ;;  %v20773_v35 = vld [vmem:[#allocation41_spill] sm:$0xff] }
 0x83f   : > { %v9801_v61 = vadd.f32 %v9800_v11, %v9799_v54  ;;  %v9972_v57 = vsel %vm4866_vm3, %v9905_v42, 0.0 }
 0x840   : > { %v9906_v25 = vmul.f32 %v9865_v3, %v20771_v39  ;;  %v19821_v59 = vadd.f32 %v19485_v41, %v9648_v53  ;;  %v9804_v50 = vsel %vm4866_vm3, %v9736_v5, 0.0  ;;  %v9971_v51 = vadd.f32 %v9970_v4, %v9969_v16 }
 0x841   : > { %v9565_v15 = vpop.f32.mrb[204].mxu1  ;;  %v9803_v23 = vadd.f32 %v9802_v21, %v9801_v61 }
 0x842   : > { %v9737_v20 = vmul.f32 %v19821_v59, %v20772_v63  ;;  %v9866_v44 = vmul.f32 %v19821_v59, %v19821_v59  ;;  %v9649_v6 = vadd.f32 %v9565_v15, %v19427_v38  ;;  %v14159_v28 = vpop.f32.mrb[205].mxu1  ;;  %v9974_v60 = vsel %vm4866_vm3, %v9906_v25, 0.0 }
 0x843   : > { %v9973_v5 = vadd.f32 %v9972_v57, %v9971_v51  ;;  %v9805_v3 = vadd.f32 %v9804_v50, %v9803_v23  ;;  %v20774_v28 = vld [vmem:[#allocation42_spill] sm:$0xff] }
 0x844   : > { %v9806_v32 = vsel %vm4866_vm3, %v9737_v20, 0.0  ;;  %v9907_v42 = vmul.f32 %v9866_v44, %v20772_v63  ;;  %v19834_v11 = vadd.f32 %v19485_v41, %v9649_v6 }
 0x845   : > { %v9570_v53 = vpop.f32.mrb[206].mxu1  ;;  %v9975_v25 = vadd.f32 %v9974_v60, %v9973_v5  ;;  %v9807_v16 = vadd.f32 %v9806_v32, %v9805_v3 }
 0x846   : > { %v9976_v62 = vsel %vm4866_vm3, %v9907_v42, 0.0  ;;  %v9738_v38 = vmul.f32 %v19834_v11, %v20773_v35  ;;  %v9867_v54 = vmul.f32 %v19834_v11, %v19834_v11  ;;  %v9650_v4 = vadd.f32 %v9570_v53, %v19430_v7  ;;  %v14162_v21 = vpop.f32.mrb[207].mxu1 }
 0x847   : > { %v9977_v57 = vadd.f32 %v9976_v62, %v9975_v25 }
 0x848   : > { %v9808_v61 = vsel %vm4866_vm3, %v9738_v38, 0.0  ;;  %v9908_v15 = vmul.f32 %v9867_v54, %v20773_v35  ;;  %v19845_v50 = vadd.f32 %v19485_v41, %v9650_v4  ;;  %v20775_v54 = vld [vmem:[#allocation43_spill] sm:$0xff] }
 0x849   : > { %v9809_v20 = vadd.f32 %v9808_v61, %v9807_v16  ;;  %v9575_v44 = vpop.f32.mrb[208].mxu1 }
 0x84a   : > { %v9978_v6 = vsel %vm4866_vm3, %v9908_v15, 0.0  ;;  %v9739_v51 = vmul.f32 %v19845_v50, %v20774_v28  ;;  %v9868_v7 = vmul.f32 %v19845_v50, %v19845_v50  ;;  %v9651_v23 = vadd.f32 %v9575_v44, %v19433_v17  ;;  %v14165_v60 = vpop.f32.mrb[209].mxu1 }
 0x84b   : > { %v9979_v32 = vadd.f32 %v9978_v6, %v9977_v57 }
 0x84c   : > { %v9810_v42 = vsel %vm4866_vm3, %v9739_v51, 0.0  ;;  %v9909_v5 = vmul.f32 %v9868_v7, %v20774_v28  ;;  %v19856_v3 = vadd.f32 %v19485_v41, %v9651_v23  ;;  %v20776_v51 = vld [vmem:[#allocation44_spill] sm:$0xff] }
 0x84d   : > { %v9811_v53 = vadd.f32 %v9810_v42, %v9809_v20  ;;  %v9580_v62 = vpop.f32.mrb[210].mxu1 }
 0x84e   : > { %v9980_v38 = vsel %vm4866_vm3, %v9909_v5, 0.0  ;;  %v9740_v4 = vmul.f32 %v19856_v3, %v20775_v54  ;;  %v9869_v21 = vmul.f32 %v19856_v3, %v19856_v3  ;;  %v9652_v17 = vadd.f32 %v9580_v62, %v19436_v56  ;;  %v14168_v25 = vpop.f32.mrb[211].mxu1 }
 0x84f   : > { %v9981_v16 = vadd.f32 %v9980_v38, %v9979_v32 }
 0x850   : > { %v9812_v61 = vsel %vm4866_vm3, %v9740_v4, 0.0  ;;  %v9910_v15 = vmul.f32 %v9869_v21, %v20775_v54  ;;  %v19867_v57 = vadd.f32 %v19485_v41, %v9652_v17  ;;  %v20777_v21 = vld [vmem:[#allocation45_spill] sm:$0xff] }
 0x851   : > { %v9813_v20 = vadd.f32 %v9812_v61, %v9811_v53  ;;  %v9585_v44 = vpop.f32.mrb[212].mxu1 }
 0x852   : > { %v9982_v6 = vsel %vm4866_vm3, %v9910_v15, 0.0  ;;  %v9741_v7 = vmul.f32 %v19867_v57, %v20776_v51  ;;  %v9870_v23 = vmul.f32 %v19867_v57, %v19867_v57  ;;  %v9653_v56 = vadd.f32 %v9585_v44, %v19439_v0  ;;  %v14171_v60 = vpop.f32.mrb[213].mxu1 }
 0x853   : > { %v9983_v32 = vadd.f32 %v9982_v6, %v9981_v16 }
 0x854   : > { %v9814_v42 = vsel %vm4866_vm3, %v9741_v7, 0.0  ;;  %v9911_v5 = vmul.f32 %v9870_v23, %v20776_v51  ;;  %v19878_v62 = vadd.f32 %v19485_v41, %v9653_v56  ;;  %v20778_v56 = vld [vmem:[#allocation46_spill] sm:$0xff] }
 0x855   : > { %v9815_v53 = vadd.f32 %v9814_v42, %v9813_v20  ;;  %v9590_v38 = vpop.f32.mrb[214].mxu1 }
 0x856   : > { %v9984_v4 = vsel %vm4866_vm3, %v9911_v5, 0.0  ;;  %v9742_v17 = vmul.f32 %v19878_v62, %v20777_v21  ;;  %v9871_v25 = vmul.f32 %v19878_v62, %v19878_v62  ;;  %v9654_v0 = vadd.f32 %v9590_v38, %v19442_v58  ;;  %v14174_v16 = vpop.f32.mrb[215].mxu1 }
 0x857   : > { %v9985_v61 = vadd.f32 %v9984_v4, %v9983_v32  ;;  %v20779_v16 = vld [vmem:[#allocation47_spill] sm:$0xff] }
 0x858   : > { %v9816_v15 = vsel %vm4866_vm3, %v9742_v17, 0.0  ;;  %v9912_v44 = vmul.f32 %v9871_v25, %v20777_v21  ;;  %v19889_v6 = vadd.f32 %v19485_v41, %v9654_v0 }
 0x859   : > { %v9817_v20 = vadd.f32 %v9816_v15, %v9815_v53  ;;  %v9595_v7 = vpop.f32.mrb[216].mxu1 }
 0x85a   : > { %v9986_v23 = vsel %vm4866_vm3, %v9912_v44, 0.0  ;;  %v9743_v60 = vmul.f32 %v19889_v6, %v20778_v56  ;;  %v9872_v42 = vmul.f32 %v19889_v6, %v19889_v6  ;;  %v9655_v58 = vadd.f32 %v9595_v7, %v19445_v10  ;;  %v14177_v32 = vpop.f32.mrb[217].mxu1 }
 0x85b   : > { %v9987_v5 = vadd.f32 %v9986_v23, %v9985_v61 }
 0x85c   : > { %v9818_v38 = vsel %vm4866_vm3, %v9743_v60, 0.0  ;;  %v9913_v4 = vmul.f32 %v9872_v42, %v20778_v56  ;;  %v19900_v17 = vadd.f32 %v19485_v41, %v9655_v58 }
 0x85d   : > { %v9819_v53 = vadd.f32 %v9818_v38, %v9817_v20  ;;  %v9600_v25 = vpop.f32.mrb[218].mxu1  ;;  %v20780_v38 = vld [vmem:[#allocation48_spill] sm:$0xff] }
 0x85e   : > { %v9988_v0 = vsel %vm4866_vm3, %v9913_v4, 0.0  ;;  %v9744_v15 = vmul.f32 %v19900_v17, %v20779_v16  ;;  %v9873_v44 = vmul.f32 %v19900_v17, %v19900_v17  ;;  %v9656_v10 = vadd.f32 %v9600_v25, %v19448_v48  ;;  %v14180_v61 = vpop.f32.mrb[219].mxu1 }
 0x85f   : > { %v9989_v7 = vadd.f32 %v9988_v0, %v9987_v5 }
 0x860   : > { %v9820_v23 = vsel %vm4866_vm3, %v9744_v15, 0.0  ;;  %v9914_v60 = vmul.f32 %v9873_v44, %v20779_v16  ;;  %v19911_v42 = vadd.f32 %v19485_v41, %v9656_v10 }
 0x861   : > { %v9821_v20 = vadd.f32 %v9820_v23, %v9819_v53  ;;  %v9605_v58 = vpop.f32.mrb[220].mxu1  ;;  %v20781_v23 = vld [vmem:[#allocation3_spill] sm:$0xff] }
 0x862   : > { %v9990_v32 = vsel %vm4866_vm3, %v9914_v60, 0.0  ;;  %v9745_v4 = vmul.f32 %v19911_v42, %v20780_v38  ;;  %v9874_v56 = vmul.f32 %v19911_v42, %v19911_v42  ;;  %v9657_v48 = vadd.f32 %v9605_v58, %v19451_v33  ;;  %v14183_v5 = vpop.f32.mrb[221].mxu1 }
 0x863   : > { %v9991_v25 = vadd.f32 %v9990_v32, %v9989_v7 }
 0x864   : > { %v9822_v0 = vsel %vm4866_vm3, %v9745_v4, 0.0  ;;  %v9915_v15 = vmul.f32 %v9874_v56, %v20780_v38  ;;  %v19922_v44 = vadd.f32 %v19485_v41, %v9657_v48 }
 0x865   : > { %v9823_v53 = vadd.f32 %v9822_v0, %v9821_v20  ;;  %v9610_v10 = vpop.f32.mrb[222].mxu1  ;;  %v20782_v0 = vld [vmem:[#allocation4_spill] sm:$0xff] }
 0x866   : > { %v9992_v61 = vsel %vm4866_vm3, %v9915_v15, 0.0  ;;  %v9746_v60 = vmul.f32 %v19922_v44, %v20781_v23  ;;  %v9875_v16 = vmul.f32 %v19922_v44, %v19922_v44  ;;  %v9658_v33 = vadd.f32 %v9610_v10, %v19454_v8  ;;  %v14186_v7 = vpop.f32.mrb[223].mxu1 }
 0x867   : > { %v9993_v58 = vadd.f32 %v9992_v61, %v9991_v25  ;;  %v20783_v7 = vld [vmem:[#allocation5_spill] sm:$0xff] }
 0x868   : > { %v9824_v32 = vsel %vm4866_vm3, %v9746_v60, 0.0  ;;  %v9916_v56 = vmul.f32 %v9875_v16, %v20781_v23  ;;  %v19933_v4 = vadd.f32 %v19485_v41, %v9658_v33 }
 0x869   : > { %v9825_v20 = vadd.f32 %v9824_v32, %v9823_v53  ;;  %v9615_v48 = vpop.f32.mrb[224].mxu1 }
 0x86a   : > { %v9994_v5 = vsel %vm4866_vm3, %v9916_v56, 0.0  ;;  %v9747_v15 = vmul.f32 %v19933_v4, %v20782_v0  ;;  %v9876_v38 = vmul.f32 %v19933_v4, %v19933_v4  ;;  %v9659_v8 = vadd.f32 %v9615_v48, %v19457_v34  ;;  %v14189_v25 = vpop.f32.mrb[225].mxu1 }
 0x86b   : > { %v9995_v10 = vadd.f32 %v9994_v5, %v9993_v58 }
 0x86c   : > { %v9826_v61 = vsel %vm4866_vm3, %v9747_v15, 0.0  ;;  %v9917_v16 = vmul.f32 %v9876_v38, %v20782_v0  ;;  %v19944_v60 = vadd.f32 %v19485_v41, %v9659_v8 }
 0x86d   : > { %v9827_v53 = vadd.f32 %v9826_v61, %v9825_v20 }
 0x86e   : > { %v9996_v33 = vsel %vm4866_vm3, %v9917_v16, 0.0  ;;  %v9748_v32 = vmul.f32 %v19944_v60, %v20783_v7  ;;  %v9877_v56 = vmul.f32 %v19944_v60, %v19944_v60 }
 0x86f   : > { %v9997_v23 = vadd.f32 %v9996_v33, %v9995_v10 }
 0x870   : > { %v9828_v34 = vsel %vm4946_vm4, %v9748_v32, 0.0  ;;  %v9918_v58 = vmul.f32 %v9877_v56, %v20783_v7 }
 0x871   : > { %v9829_v48 = vadd.f32 %v9828_v34, %v9827_v53 }
 0x872   : > { %v9998_v38 = vsel %vm4946_vm4, %v9918_v58, 0.0 }
 0x873   : > { %v9830_v5 = vrot.slane %v9829_v48, 4  ;;  %v9999_v41 = vadd.f32 %v9998_v38, %v9997_v23  ;;  %v20785_v38 = vld [vmem:[#allocation18_spill] sm:$0xff] }
 0x875   : > { %v9831_v15 = vadd.f32 %v9830_v5, %v9829_v48  ;;  %v10000_v20 = vrot.slane %v9999_v41, 4 }
 0x877   : > { %v9832_v8 = vrot.slane %v9831_v15, 2  ;;  %v10001_v25 = vadd.f32 %v10000_v20, %v9999_v41 }
 0x879   : > { %v9833_v61 = vadd.f32 %v9832_v8, %v9831_v15  ;;  %v10002_v16 = vrot.slane %v10001_v25, 2 }
 0x87b   : > { %v9834_v0 = vrot.slane %v9833_v61, 1  ;;  %v10003_v21 = vadd.f32 %v10002_v16, %v10001_v25 }
 0x87d   : > { %v9835_v51 = vadd.f32 %v9834_v0, %v9833_v61  ;;  %v10004_v54 = vrot.slane %v10003_v21, 1 }
 0x87f   : > { %v19954_v10 = vmul.f32 0.00390625, %v9835_v51  ;;  %v10005_v33 = vadd.f32 %v10004_v54, %v10003_v21 }
 0x881   : > { %v10006_v32 = vmul.f32 0.00390625, %v10005_v33  ;;  %v10036_v53 = vsub.f32 %v19821_v59, %v19954_v10  ;;  %v10037_v23 = vsub.f32 %v19834_v11, %v19954_v10  ;;  %v10038_v56 = vsub.f32 %v19845_v50, %v19954_v10  ;;  %v20784_v33 = vld [vmem:[#allocation16_spill] sm:$0xff] }
 0x882   : > { %v10039_v34 = vsub.f32 %v19856_v3, %v19954_v10  ;;  %v10048_v41 = vmul.f32 %v19954_v10, %v19954_v10  ;;  %v10007_v8 = vsub.f32 %v19494_v14, %v19954_v10  ;;  %v10008_v25 = vsub.f32 %v19488_v47, %v19954_v10  ;;  %v20786_v14 = vld [vmem:[#allocation20_spill] sm:$0xff] }
 0x883   : > { %v10009_v61 = vsub.f32 %v19497_v1, %v19954_v10  ;;  %v10010_v16 = vsub.f32 %v19511_v27, %v19954_v10  ;;  %v10011_v5 = vsub.f32 %v20784_v33, %v19954_v10  ;;  %v10015_v47 = vsub.f32 %v19563_v13, %v19954_v10 }
 0x884   : > { %v10049_v15 = vsub.f32 %v10006_v32, %v10048_v41  ;;  %v10012_v32 = vsub.f32 %v20785_v38, %v19954_v10  ;;  %v10013_v41 = vsub.f32 %v19535_v46, %v19954_v10  ;;  %v10016_v1 = vsub.f32 %v19577_v12, %v19954_v10 }
 0x885   : > { %v10017_v27 = vsub.f32 %v19588_v29, %v19954_v10  ;;  %v10019_v38 = vsub.f32 %v19607_v26, %v19954_v10  ;;  %v10020_v46 = vsub.f32 %v19625_v31, %v19954_v10  ;;  %v10021_v33 = vsub.f32 %v19635_v37, %v19954_v10 }
 0x886   : > { %v10050_v20 = vadd.f32 1e-05, %v10049_v15  ;;  %v10014_v15 = vsub.f32 %v20786_v14, %v19954_v10  ;;  %v10022_v13 = vsub.f32 %v19649_v45, %v19954_v10  ;;  %v10023_v12 = vsub.f32 %v19660_v22, %v19954_v10  ;;  %v20787_v45 = vld [vmem:[#allocation14_spill] sm:$0xff] }
 0x887   : > { %v10024_v29 = vsub.f32 %v19672_v43, %v19954_v10  ;;  %v10026_v26 = vsub.f32 %v19697_v2, %v19954_v10  ;;  %v10027_v31 = vsub.f32 %v19712_v55, %v19954_v10  ;;  %v10028_v37 = vsub.f32 %v19721_v52, %v19954_v10  ;;  %v20788_v2 = vld [vmem:[#allocation13_spill] sm:$0xff] }
 0x888   : > { %14262 = vrsqrt.f32 %v10050_v20  ;;  %v10018_v20 = vsub.f32 %v19602_v30, %v19954_v10  ;;  %v10025_v30 = vsub.f32 %v19691_v18, %v19954_v10  ;;  %v10029_v14 = vsub.f32 %v20787_v45, %v19954_v10 }
 0x889   : > { %v10030_v22 = vsub.f32 %v19736_v40, %v19954_v10  ;;  %v10031_v43 = vsub.f32 %v19747_v9, %v19954_v10  ;;  %v10032_v18 = vsub.f32 %v19758_v36, %v19954_v10  ;;  %v10033_v58 = vsub.f32 %v20788_v2, %v19954_v10 }
 0x88a   : > { %v10034_v55 = vsub.f32 %v19791_v49, %v19954_v10  ;;  %v10035_v52 = vsub.f32 %v19807_v24, %v19954_v10  ;;  %v20789_v59 = vsub.f32 %v19867_v57, %v19954_v10  ;;  %v20790_v11 = vsub.f32 %v19878_v62, %v19954_v10 }
 0x88b   : > { %v20791_v50 = vsub.f32 %v19889_v6, %v19954_v10  ;;  %v20792_v3 = vsub.f32 %v19900_v17, %v19954_v10  ;;  %v20793_v57 = vsub.f32 %v19911_v42, %v19954_v10  ;;  %v20794_v62 = vsub.f32 %v19922_v44, %v19954_v10 }
 0x88c   : > { %v20795_v6 = vsub.f32 %v19933_v4, %v19954_v10  ;;  %v20796_v17 = vsub.f32 %v19944_v60, %v19954_v10 }
 0x892   : > { %v14263_v48 = vpop.eup %14262 }
 0x893   : > { %v20040_v45 = vmul.f32 %v14263_v48, %v10007_v8  ;;  %v20042_v21 = vmul.f32 %v14263_v48, %v10008_v25  ;;  %v20044_v40 = vmul.f32 %v14263_v48, %v10009_v61  ;;  %v20046_v9 = vmul.f32 %v14263_v48, %v10010_v16 }
 0x894   : > { %v20048_v54 = vmul.f32 %v14263_v48, %v10011_v5  ;;  %v20050_v36 = vmul.f32 %v14263_v48, %v10012_v32  ;;  %v20052_v51 = vmul.f32 %v14263_v48, %v10013_v41  ;;  %v20054_v2 = vmul.f32 %v14263_v48, %v10014_v15 }
 0x895   : > { %v20056_v49 = vmul.f32 %v14263_v48, %v10015_v47  ;;  %v20058_v0 = vmul.f32 %v14263_v48, %v10016_v1  ;;  %v20060_v24 = vmul.f32 %v14263_v48, %v10017_v27  ;;  %v20062_v8 = vmul.f32 %v14263_v48, %v10018_v20 }
 0x896   : > { %v20064_v25 = vmul.f32 %v14263_v48, %v10019_v38  ;;  %v20066_v61 = vmul.f32 %v14263_v48, %v10020_v46  ;;  %v20068_v5 = vmul.f32 %v14263_v48, %v10021_v33  ;;  %v20070_v16 = vmul.f32 %v14263_v48, %v10022_v13 }
 0x897   : > { %v20072_v32 = vmul.f32 %v14263_v48, %v10023_v12  ;;  %v20074_v41 = vmul.f32 %v14263_v48, %v10024_v29  ;;  %v20076_v15 = vmul.f32 %v14263_v48, %v10025_v30  ;;  %v20078_v47 = vmul.f32 %v14263_v48, %v10026_v26 }
 0x898   : > { %v20080_v1 = vmul.f32 %v14263_v48, %v10027_v31  ;;  %v20082_v27 = vmul.f32 %v14263_v48, %v10028_v37  ;;  %v20084_v20 = vmul.f32 %v14263_v48, %v10029_v14  ;;  %v20086_v38 = vmul.f32 %v14263_v48, %v10030_v22 }
 0x899   : > { %v20088_v46 = vmul.f32 %v14263_v48, %v10031_v43  ;;  %v20090_v33 = vmul.f32 %v14263_v48, %v10032_v18  ;;  %v20092_v13 = vmul.f32 %v14263_v48, %v10033_v58  ;;  %v20094_v12 = vmul.f32 %v14263_v48, %v10034_v55 }
 0x89a   : > { %v20096_v29 = vmul.f32 %v14263_v48, %v10035_v52  ;;  %v20101_v30 = vmul.f32 %v14263_v48, %v10036_v53  ;;  %v20106_v26 = vmul.f32 %v14263_v48, %v10037_v23  ;;  %v20111_v31 = vmul.f32 %v14263_v48, %v10038_v56 }
 0x89b   : > { %v20116_v58 = vmul.f32 %v14263_v48, %v10039_v34  ;;  %v20121_v53 = vmul.f32 %v14263_v48, %v20789_v59  ;;  %v20126_v23 = vmul.f32 %v14263_v48, %v20790_v11  ;;  %v20131_v56 = vmul.f32 %v14263_v48, %v20791_v50  ;;  %v20797_v50 = vld [vmem:[#allocation6_spill] sm:$0xff] }
 0x89c   : > { %v20136_v34 = vmul.f32 %v14263_v48, %v20792_v3  ;;  %v20141_v37 = vmul.f32 %v14263_v48, %v20793_v57  ;;  %v20146_v14 = vmul.f32 %v14263_v48, %v20794_v62  ;;  %v20151_v22 = vmul.f32 %v14263_v48, %v20795_v6  ;;  %v20798_v57 = vld [vmem:[#allocation8_spill] sm:$0xff]  ;;  %v20799_v6 = vld [vmem:[#allocation7_spill] sm:$0xff] }
 0x89d   : > { %v20156_v43 = vmul.f32 %v14263_v48, %v20796_v17  ;;  %v10093_v18 = vmax.f32 %v20040_v45, 0.0  ;;  %v10094_v42 = vmax.f32 %v20042_v21, 0.0  ;;  %v10095_v55 = vmax.f32 %v20044_v40, 0.0 }
 0x89e   : > { %v10096_v44 = vmax.f32 %v20046_v9, 0.0  ;;  %v10097_v52 = vmax.f32 %v20048_v54, 0.0  ;;  %v10098_v59 = vmax.f32 %v20050_v36, 0.0  ;;  %v10099_v4 = vmax.f32 %v20052_v51, 0.0 }
 0x89f   : > { %v10100_v11 = vmax.f32 %v20054_v2, 0.0  ;;  %v10101_v60 = vmax.f32 %v20056_v49, 0.0  ;;  %v10102_v10 = vmax.f32 %v20058_v0, 0.0  ;;  %v10103_v48 = vmax.f32 %v20060_v24, 0.0 }
 0x8a0   : > { %v10104_v21 = vmax.f32 %v20062_v8, 0.0  ;;  %v10105_v45 = vmax.f32 %v20064_v25, 0.0  ;;  %v10106_v40 = vmax.f32 %v20066_v61, 0.0  ;;  %v10107_v54 = vmax.f32 %v20068_v5, 0.0 }
 0x8a1   : > { %v10108_v9 = vmax.f32 %v20070_v16, 0.0  ;;  %v10109_v51 = vmax.f32 %v20072_v32, 0.0  ;;  %v10110_v36 = vmax.f32 %v20074_v41, 0.0  ;;  %v10111_v2 = vmax.f32 %v20076_v15, 0.0 }
 0x8a2   : > { %v10112_v0 = vmax.f32 %v20078_v47, 0.0  ;;  %v10113_v49 = vmax.f32 %v20080_v1, 0.0  ;;  %v10114_v24 = vmax.f32 %v20082_v27, 0.0  ;;  %v10115_v8 = vmax.f32 %v20084_v20, 0.0  ;;  %v20802_v20 = vld [vmem:[#allocation11_spill] sm:$0xff]  ;;  %v20803_v27 = vld [vmem:[#allocation12_spill] sm:$0xff] }
 0x8a3   : > { %v10116_v25 = vmax.f32 %v20086_v38, 0.0  ;;  %v10117_v61 = vmax.f32 %v20088_v46, 0.0  ;;  %v10118_v5 = vmax.f32 %v20090_v33, 0.0  ;;  %v10119_v16 = vmax.f32 %v20092_v13, 0.0  ;;  %v20800_v46 = vld [vmem:[#allocation9_spill] sm:$0xff]  ;;  %v20801_v38 = vld [vmem:[#allocation10_spill] sm:$0xff] }
 0x8a4   : > { %v10120_v32 = vmax.f32 %v20094_v12, 0.0  ;;  %v10121_v41 = vmax.f32 %v20096_v29, 0.0  ;;  %v10122_v15 = vmax.f32 %v20101_v30, 0.0  ;;  %v10134_v3 = vmul.f32 %v10093_v18, %v20797_v50  ;;  %v20804_v1 = vld [vmem:[#allocation15_spill] sm:$0xff]  ;;  %v20805_v47 = vld [vmem:[#allocation17_spill] sm:$0xff] }
 0x8a5   : > { %v10135_v62 = vmul.f32 %v10094_v42, %v20798_v57  ;;  %v10136_v17 = vmul.f32 %v10095_v55, %v20799_v6  ;;  %v10137_v33 = vmul.f32 %v10096_v44, %v20800_v46  ;;  %v10138_v13 = vmul.f32 %v10097_v52, %v20801_v38  ;;  %v20806_v50 = vld [vmem:[#allocation19_spill] sm:$0xff]  ;;  %v20807_v55 = vld [vmem:[#allocation21_spill] sm:$0xff]  ;;  %v20808_v52 = vld [vmem:[#allocation22_spill] sm:$0xff] }
 0x8a6   : > { %v10139_v12 = vmul.f32 %v10098_v59, %v20802_v20  ;;  %v10140_v29 = vmul.f32 %v10099_v4, %v20803_v27  ;;  %v10141_v30 = vmul.f32 %v10100_v11, %v20804_v1  ;;  %v10142_v18 = vmul.f32 %v10101_v60, %v20805_v47  ;;  %10175 = vst.msk [vmem:[%s20198_s29] sm:$0xff] %vm4866_vm3, %v10134_v3  ;;  %v20809_v20 = vld [vmem:[#allocation23_spill] sm:$0xff]  ;;  %v20810_v27 = vld [vmem:[#allocation24_spill] sm:$0xff]  ;;  %v20811_v60 = vld [vmem:[#allocation25_spill] sm:$0xff] }
 0x8a7   : > { %v10143_v42 = vmul.f32 %v10102_v10, %v20806_v50  ;;  %10176 = vst.msk [vmem:[%s20198_s29 + $0x8] sm:$0xff] %vm4866_vm3, %v10135_v62  ;;  %v10144_v44 = vmul.f32 %v10103_v48, %v20807_v55  ;;  %v10145_v59 = vmul.f32 %v10104_v21, %v20808_v52  ;;  %v10146_v4 = vmul.f32 %v10105_v45, %v20809_v20  ;;  %v20812_v48 = vld [vmem:[#allocation26_spill] sm:$0xff]  ;;  %v20813_v47 = vld [vmem:[#allocation27_spill] sm:$0xff]  ;;  %v20814_v1 = vld [vmem:[#allocation28_spill] sm:$0xff] }
 0x8a8   : > { %v10147_v11 = vmul.f32 %v10106_v40, %v20810_v27  ;;  %10177 = vst.msk [vmem:[%s20198_s29 + $0x10] sm:$0xff] %vm4866_vm3, %v10136_v17  ;;  %10178 = vst.msk [vmem:[%s20198_s29 + $0x18] sm:$0xff] %vm4866_vm3, %v10137_v33  ;;  %v10148_v10 = vmul.f32 %v10107_v54, %v20811_v60  ;;  %v10149_v21 = vmul.f32 %v10108_v9, %v20812_v48  ;;  %v20815_v38 = vld [vmem:[#allocation29_spill] sm:$0xff]  ;;  %v20816_v46 = vld [vmem:[#allocation30_spill] sm:$0xff]  ;;  %v20829_v6 = vmax.f32 %v20121_v53, 0.0 }
 0x8a9   : > { %10179 = vst.msk [vmem:[%s20198_s29 + $0x20] sm:$0xff] %vm4866_vm3, %v10138_v13  ;;  %10180 = vst.msk [vmem:[%s20198_s29 + $0x28] sm:$0xff] %vm4866_vm3, %v10139_v12  ;;  %v10150_v45 = vmul.f32 %v10109_v51, %v20813_v47  ;;  %v10151_v40 = vmul.f32 %v10110_v36, %v20814_v1  ;;  %v10152_v54 = vmul.f32 %v10111_v2, %v20815_v38  ;;  %v20817_v33 = vld [vmem:[#allocation31_spill] sm:$0xff]  ;;  %v20818_v13 = vld [vmem:[#allocation32_spill] sm:$0xff]  ;;  %v20835_v50 = vmax.f32 %v20136_v34, 0.0 }
 0x8aa   : > { %10181 = vst.msk [vmem:[%s20198_s29 + $0x30] sm:$0xff] %vm4866_vm3, %v10140_v29  ;;  %10182 = vst.msk [vmem:[%s20198_s29 + $0x38] sm:$0xff] %vm4866_vm3, %v10141_v30  ;;  %v10153_v9 = vmul.f32 %v10112_v0, %v20816_v46  ;;  %v10154_v51 = vmul.f32 %v10113_v49, %v20817_v33  ;;  %v10155_v36 = vmul.f32 %v10114_v24, %v20818_v13  ;;  %v20819_v12 = vld [vmem:[#allocation33_spill] sm:$0xff]  ;;  %v20820_v29 = vld [vmem:[#allocation34_spill] sm:$0xff] }
 0x8ab   : > { %10183 = vst.msk [vmem:[%s20198_s29 + $0x40] sm:$0xff] %vm4866_vm3, %v10142_v18  ;;  %10184 = vst.msk [vmem:[%s20198_s29 + $0x48] sm:$0xff] %vm4866_vm3, %v10143_v42  ;;  %v10156_v2 = vmul.f32 %v10115_v8, %v20819_v12  ;;  %v10157_v0 = vmul.f32 %v10116_v25, %v20820_v29  ;;  %v20821_v30 = vld [vmem:[#allocation35_spill] sm:$0xff]  ;;  %v20822_v3 = vld [vmem:[#allocation36_spill] sm:$0xff]  ;;  %v10160_v8 = vmul.f32 %v10119_v16, %v20769_v19  ;;  %v20824_v19 = vmax.f32 %v20106_v26, 0.0 }
 0x8ac   : > { %10185 = vst.msk [vmem:[%s20198_s29 + $0x50] sm:$0xff] %vm4866_vm3, %v10144_v44  ;;  %10186 = vst.msk [vmem:[%s20198_s29 + $0x58] sm:$0xff] %vm4866_vm3, %v10145_v59  ;;  %v10158_v49 = vmul.f32 %v10117_v61, %v20821_v30  ;;  %v10159_v24 = vmul.f32 %v10118_v5, %v20822_v3  ;;  %v20823_v57 = vld [vmem:[#allocation38_spill] sm:$0xff]  ;;  %v10162_v61 = vmul.f32 %v10121_v41, %v20771_v39  ;;  %v20825_v39 = vmax.f32 %v20111_v31, 0.0  ;;  %v20828_v62 = vld [vmem:[#allocation44_spill] sm:$0xff] }
 0x8ad   : > { %10187 = vst.msk [vmem:[%s20198_s29 + $0x60] sm:$0xff] %vm4866_vm3, %v10146_v4  ;;  %10188 = vst.msk [vmem:[%s20198_s29 + $0x68] sm:$0xff] %vm4866_vm3, %v10147_v11  ;;  %v10161_v25 = vmul.f32 %v10120_v32, %v20823_v57  ;;  %v10163_v5 = vmul.f32 %v10122_v15, %v20772_v63  ;;  %v10164_v16 = vmul.f32 %v20824_v19, %v20773_v35  ;;  %v20826_v32 = vld [vmem:[#allocation43_spill] sm:$0xff]  ;;  %v20827_v41 = vmax.f32 %v20116_v58, 0.0  ;;  %v20830_v35 = vld [vmem:[#allocation45_spill] sm:$0xff] }
 0x8ae   : > { %10189 = vst.msk [vmem:[%s20198_s29 + $0x70] sm:$0xff] %vm4866_vm3, %v10148_v10  ;;  %10190 = vst.msk [vmem:[%s20198_s29 + $0x78] sm:$0xff] %vm4866_vm3, %v10149_v21  ;;  %v10165_v63 = vmul.f32 %v20825_v39, %v20774_v28  ;;  %v10167_v17 = vmul.f32 %v20829_v6, %v20828_v62  ;;  %v20831_v28 = vmax.f32 %v20126_v23, 0.0  ;;  %v20832_v31 = vld [vmem:[#allocation46_spill] sm:$0xff]  ;;  %v20833_v58 = vmax.f32 %v20131_v56, 0.0  ;;  %v20834_v18 = vld [vmem:[#allocation47_spill] sm:$0xff] }
 0x8af   : > { %10191 = vst.msk [vmem:[%s20198_s29 + $0x80] sm:$0xff] %vm4866_vm3, %v10150_v45  ;;  %10192 = vst.msk [vmem:[%s20198_s29 + $0x88] sm:$0xff] %vm4866_vm3, %v10151_v40  ;;  %v10166_v15 = vmul.f32 %v20827_v41, %v20826_v32  ;;  %v10170_v42 = vmul.f32 %v20835_v50, %v20834_v18  ;;  %v20836_v55 = vld [vmem:[#allocation48_spill] sm:$0xff]  ;;  %v20837_v44 = vmax.f32 %v20141_v37, 0.0  ;;  %v20838_v23 = vld [vmem:[#allocation3_spill] sm:$0xff]  ;;  %v20839_v56 = vmax.f32 %v20146_v14, 0.0 }
 0x8b0   : > { %10193 = vst.msk [vmem:[%s20198_s29 + $0x90] sm:$0xff] %vm4866_vm3, %v10152_v54  ;;  %10194 = vst.msk [vmem:[%s20198_s29 + $0x98] sm:$0xff] %vm4866_vm3, %v10153_v9  ;;  %v10168_v26 = vmul.f32 %v20831_v28, %v20830_v35  ;;  %v10169_v53 = vmul.f32 %v20833_v58, %v20832_v31  ;;  %v20840_v59 = vld [vmem:[#allocation4_spill] sm:$0xff]  ;;  %v20841_v37 = vmax.f32 %v20151_v22, 0.0  ;;  %v20842_v4 = vmax.f32 %v20156_v43, 0.0 }
 0x8b1   : > { %10195 = vst.msk [vmem:[%s20198_s29 + $0xa0] sm:$0xff] %vm4866_vm3, %v10154_v51  ;;  %10196 = vst.msk [vmem:[%s20198_s29 + $0xa8] sm:$0xff] %vm4866_vm3, %v10155_v36  ;;  %v10171_v52 = vmul.f32 %v20837_v44, %v20836_v55  ;;  %v10172_v34 = vmul.f32 %v20839_v56, %v20838_v23 }
 0x8b2   : > { %10197 = vst.msk [vmem:[%s20198_s29 + $0xb0] sm:$0xff] %vm4866_vm3, %v10156_v2  ;;  %10198 = vst.msk [vmem:[%s20198_s29 + $0xb8] sm:$0xff] %vm4866_vm3, %v10157_v0  ;;  %v10173_v20 = vmul.f32 %v20841_v37, %v20840_v59  ;;  %v10174_v27 = vmul.f32 %v20842_v4, %v20783_v7 }
 0x8b3   : > { %10199 = vst.msk [vmem:[%s20198_s29 + $0xc0] sm:$0xff] %vm4866_vm3, %v10158_v49  ;;  %10200 = vst.msk [vmem:[%s20198_s29 + $0xc8] sm:$0xff] %vm4866_vm3, %v10159_v24 }
 0x8b4   : > { %10201 = vst.msk [vmem:[%s20198_s29 + $0xd0] sm:$0xff] %vm4866_vm3, %v10160_v8  ;;  %10202 = vst.msk [vmem:[%s20198_s29 + $0xd8] sm:$0xff] %vm4866_vm3, %v10161_v25 }
 0x8b5   : > { %10203 = vst.msk [vmem:[%s20198_s29 + $0xe0] sm:$0xff] %vm4866_vm3, %v10162_v61  ;;  %10204 = vst.msk [vmem:[%s20198_s29 + $0xe8] sm:$0xff] %vm4866_vm3, %v10163_v5 }
 0x8b6   : > { %10205 = vst.msk [vmem:[%s20198_s29 + $0xf0] sm:$0xff] %vm4866_vm3, %v10164_v16  ;;  %10206 = vst.msk [vmem:[%s20198_s29 + $0xf8] sm:$0xff] %vm4866_vm3, %v10165_v63 }
 0x8b7   : > { %10207 = vst.msk [vmem:[%s20198_s29 + $0x100] sm:$0xff] %vm4866_vm3, %v10166_v15  ;;  %10208 = vst.msk [vmem:[%s20198_s29 + $0x108] sm:$0xff] %vm4866_vm3, %v10167_v17 }
 0x8b8   : > { %10209 = vst.msk [vmem:[%s20198_s29 + $0x110] sm:$0xff] %vm4866_vm3, %v10168_v26  ;;  %10210 = vst.msk [vmem:[%s20198_s29 + $0x118] sm:$0xff] %vm4866_vm3, %v10169_v53 }
 0x8b9   : > { %10211 = vst.msk [vmem:[%s20198_s29 + $0x120] sm:$0xff] %vm4866_vm3, %v10170_v42  ;;  %10212 = vst.msk [vmem:[%s20198_s29 + $0x128] sm:$0xff] %vm4866_vm3, %v10171_v52 }
 0x8ba   : > { %10213 = vst.msk [vmem:[%s20198_s29 + $0x130] sm:$0xff] %vm4866_vm3, %v10172_v34  ;;  %10214 = vst.msk [vmem:[%s20198_s29 + $0x138] sm:$0xff] %vm4866_vm3, %v10173_v20 }
 0x8bb   : > { %10215 = vst.msk [vmem:[%s20198_s29 + $0x140] sm:$0xf] %vm4946_vm4, %v10174_v27 }
 0x8bc PF: > { %s18_s24 = sadd.s32 1, %s14270_s24  }
 0x8bd   : > { %p15_p4 = scmp.ge.s32.totalorder %s18_s24, 4  }
 0x8bf   :  { %17 = sbr.rel (!%p15_p4) target bundleno = 1 (0x1), region = 102 }

</bundles_post_ra>
